<compile_context>
chip_gen: v7x
topology: tpu7x:2x2x1
jax: 0.10.0
libtpu: 0.0.40
codegen_flags: <defaults>
</compile_context>

<pallas_src>
import jax
import jax.numpy as jnp
from jax.experimental import pallas as pl
from jax.experimental.pallas import tpu as pltpu

EPS = 1e-5  # nn.BatchNorm2d default


def _round_up(x, m):
    return (x + m - 1) // m * m


def basic_conv2d(x_nchw, w_oihw, bias, gamma, beta, *, matmul_dtype=jnp.bfloat16):
    """Forward pass of BasicConv2d (stride 1, VALID padding = Conv2d defaults).

    x_nchw: (N, Cin, H, W), w_oihw: (Cout, Cin, KH, KW). Returns (N, Cout, OH, OW) f32.
    The conv bias is accepted for API faithfulness but not used: BN's training-mode
    batch-mean subtraction cancels it exactly in the forward output.
    """
    del bias  # mathematically dead in the forward output (cancelled by BN mean)

    N, Cin, H, W = x_nchw.shape
    Cout, _, KH, KW = w_oihw.shape
    OH, OW = H - KH + 1, W - KW + 1
    R = N * OH * OW                 # rows of the im2col / output matrix
    Kdim = KH * KW * Cin            # folded contraction dimension
    inv_r = 1.0 / R                 # python float -> weak-typed constant in-kernel

    # --- lane-dense channel tiling: pad Cout up to a multiple of 128 --------
    C_TILE = 128
    Cout_pad = _round_up(Cout, C_TILE)
    n_ctiles = Cout_pad // C_TILE

    # --- wrapper-side layout plumbing (channels-last, MXU-natural weights) --
    x_nhwc = jnp.transpose(x_nchw, (0, 2, 3, 1)).astype(matmul_dtype)   # (N,H,W,Cin)
    # (Cout,Cin,KH,KW) -> (KH,KW,Cin,Cout) -> (KH*KW*Cin, Cout): RHS in (K, N)
    # layout, row index = (kh*KW + kw)*Cin + c, matching the patch column order.
    w_flat = jnp.transpose(w_oihw, (2, 3, 1, 0)).reshape(Kdim, Cout).astype(matmul_dtype)
    w_flat = jnp.pad(w_flat, ((0, 0), (0, Cout_pad - Cout)))            # zero-pad N dim
    g2 = jnp.pad(gamma.astype(jnp.float32), (0, Cout_pad - Cout)).reshape(1, Cout_pad)
    bt2 = jnp.pad(beta.astype(jnp.float32), (0, Cout_pad - Cout)).reshape(1, Cout_pad)

    def kernel(x_ref, w_ref, g_ref, bt_ref, o_ref, patch_ref):
        # x_ref     : (N, H, W, Cin) bf16   whole activation (constant index map)
        # w_ref     : (Kdim, 128)    bf16   weight tile, K-major
        # g_ref, bt_ref : (1, 128)   f32    per-channel BN params (lane-major)
        # o_ref     : (R, 128)       f32    lane-dense output tile
        # patch_ref : (R, Kdim)      bf16   persistent im2col scratch
        j = pl.program_id(0)

        # im2col built ONCE (first grid step) directly in bf16 -- no f32
        # round-trip -- and cached in VMEM scratch for all channel tiles.
        # Columns ordered (kh, kw, cin) to match w_flat's row order.
        @pl.when(j == 0)
        def _():
            x = x_ref[...]                                            # bf16
            cols = []
            for kh in range(KH):
                for kw in range(KW):
                    cols.append(x[:, kh:kh + OH, kw:kw + OW, :].reshape(R, Cin))
            patch_ref[...] = jnp.concatenate(cols, axis=-1)           # (R, Kdim)

        # ---- convolution: one MXU matmul with folded K = KH*KW*Cin ---------
        acc = jnp.dot(patch_ref[...], w_ref[...],
                      preferred_element_type=jnp.float32)             # (R, 128) f32

        # ---- BatchNorm2d, training mode, single-traversal batch stats ------
        mean = jnp.sum(acc, axis=0, keepdims=True) * inv_r            # (1, 128)
        ex2 = jnp.sum(acc * acc, axis=0, keepdims=True) * inv_r       # (1, 128)
        var = jnp.maximum(ex2 - mean * mean, 0.0)                     # biased var
        y = (acc - mean) * jax.lax.rsqrt(var + EPS)
        y = y * g_ref[...] + bt_ref[...]

        # ---- ReLU + lane-dense (unmasked) store -----------------------------
        o_ref[...] = jnp.maximum(y, 0.0)

    # Chip-aware scoped-VMEM limit (v5e/v6e: 128 MiB physical; v7x: 64 MiB).
    try:
        cap = pltpu.get_tpu_info().vmem_capacity_bytes
        vmem_limit = int(min(96 * 1024 * 1024, cap * 3 // 4))
    except Exception:
        vmem_limit = 64 * 1024 * 1024

    flops = 2 * R * Kdim * Cout_pad
    bytes_accessed = (x_nhwc.size * x_nhwc.dtype.itemsize
                      + w_flat.size * w_flat.dtype.itemsize
                      + (g2.size + bt2.size) * 4
                      + R * Cout_pad * 4)

    out_flat = pl.pallas_call(
        kernel,
        out_shape=jax.ShapeDtypeStruct((R, Cout_pad), jnp.float32),
        grid=(n_ctiles,),
        in_specs=[
            # whole activation; constant index map -> DMA'd once, revisits skipped.
            # TODO(synk): pipeline_mode=pl.Buffered(1) would drop the never-used
            # second buffer of x once single-buffered constant inputs are safe
            # in the TPU pipeliner.
            pl.BlockSpec((N, H, W, Cin), lambda j: (0, 0, 0, 0)),
            pl.BlockSpec((Kdim, C_TILE), lambda j: (0, j)),
            pl.BlockSpec((1, C_TILE), lambda j: (0, j)),
            pl.BlockSpec((1, C_TILE), lambda j: (0, j)),
        ],
        out_specs=pl.BlockSpec((R, C_TILE), lambda j: (0, j)),
        scratch_shapes=[pltpu.VMEM((R, Kdim), matmul_dtype)],
        compiler_params=pltpu.CompilerParams(
            # "arbitrary": the im2col scratch is filled on step 0 and reused by
            # later channel tiles, so the channel axis must run sequentially.
            dimension_semantics=("arbitrary",),
            vmem_limit_bytes=vmem_limit,
        ),
        cost_estimate=pl.CostEstimate(
            flops=flops, transcendentals=0, bytes_accessed=bytes_accessed),
    )(x_nhwc, w_flat, g2, bt2)

    # Drop channel padding and go back to PyTorch NCHW (layout plumbing).
    out = out_flat[:, :Cout].reshape(N, OH, OW, Cout)
    return jnp.transpose(out, (0, 3, 1, 2))


def reference(x_nchw, w_oihw, bias, gamma, beta, conv_dtype=jnp.float32):
    """Pure-JAX reference matching PyTorch Conv2d + BatchNorm2d(train) + ReLU.

    conv_dtype lets us reproduce the kernel's bf16 MXU operand rounding
    (f32 accumulation either way); BN/ReLU always in f32.
    """
    y = jax.lax.conv_general_dilated(
        x_nchw.astype(conv_dtype), w_oihw.astype(conv_dtype),
        window_strides=(1, 1), padding="VALID",
        dimension_numbers=("NCHW", "OIHW", "NCHW"),
        preferred_element_type=jnp.float32)
    y = y + bias[None, :, None, None]
    mean = jnp.mean(y, axis=(0, 2, 3), keepdims=True)
    var = jnp.mean((y - mean) ** 2, axis=(0, 2, 3), keepdims=True)    # biased var
    y = (y - mean) * jax.lax.rsqrt(var + EPS)
    y = y * gamma[None, :, None, None] + beta[None, :, None, None]
    return jnp.maximum(y, 0.0)


if __name__ == "__main__":
    # Small shapes consistent with the module: BasicConv2d(4, 32, kernel_size=3)
    N, Cin, H, W = 2, 4, 16, 16
    Cout, K = 32, 3

    key = jax.random.PRNGKey(0)
    k1, k2, k3, k4, k5 = jax.random.split(key, 5)

    fan_in = Cin * K * K
    bound = 1.0 / (fan_in ** 0.5)
    w = jax.random.uniform(k1, (Cout, Cin, K, K), jnp.float32, -bound, bound)
    b = jax.random.uniform(k2, (Cout,), jnp.float32, -bound, bound)
    gamma = jax.random.uniform(k3, (Cout,), jnp.float32, 0.5, 1.5)
    beta = 0.1 * jax.random.normal(k4, (Cout,), jnp.float32)
    x = jax.random.normal(k5, (N, Cin, H, W), jnp.float32)

    out = jax.block_until_ready(basic_conv2d(x, w, b, gamma, beta))
    OH = OW = H - K + 1
    assert out.shape == (N, Cout, OH, OW)

    # 1) Structural check: reference with the SAME bf16 operand rounding the
    #    kernel's MXU path uses -> must match tightly (catches layout/index bugs).
    ref_b = reference(x, w, b, gamma, beta, conv_dtype=jnp.bfloat16)
    err_b = float(jnp.max(jnp.abs(out - ref_b)))
    assert jnp.allclose(out, ref_b, rtol=2e-3, atol=2e-3), f"bf16-ref mismatch {err_b}"

    # 2) Semantics check vs the full-f32 PyTorch-style reference; tolerance
    #    covers only bf16 MXU input rounding (BN is f32 in both).
    ref_f = reference(x, w, b, gamma, beta, conv_dtype=jnp.float32)
    err_f = float(jnp.max(jnp.abs(out - ref_f)))
    assert jnp.allclose(out, ref_f, rtol=5e-2, atol=5e-2), f"f32-ref mismatch {err_f}"

    print("KERNEL_OK")
</pallas_src>

<mosaic_0001>
module attributes {stable_mosaic.version = 11 : i64} {
  func.func @kernel(%arg0: i32, %arg1: memref<2x16x16x4xbf16, #tpu.memory_space<vmem>>, %arg2: memref<36x128xbf16, #tpu.memory_space<vmem>>, %arg3: memref<1x128xf32, #tpu.memory_space<vmem>>, %arg4: memref<1x128xf32, #tpu.memory_space<vmem>>, %arg5: memref<392x128xf32, #tpu.memory_space<vmem>>, %arg6: memref<392x36xbf16, #tpu.memory_space<vmem>>) attributes {dimension_semantics = [#tpu.dimension_semantics<arbitrary>], iteration_bounds = array<i64: 1>, scalar_prefetch = 0 : i64, scratch_operands = 1 : i64, tpu.core_type = #tpu.core_type<tc>, window_params = [{pipeline_mode = #tpu.pipeline_mode<synchronous>, transform_indices = @transform_0, window_bounds = array<i64: 2, 16, 16, 4>}, {transform_indices = @transform_1, window_bounds = array<i64: 36, 128>}, {transform_indices = @transform_2, window_bounds = array<i64: 1, 128>}, {transform_indices = @transform_3, window_bounds = array<i64: 1, 128>}, {transform_indices = @transform_4, window_bounds = array<i64: 392, 128>}]} {
    %c0_i32 = arith.constant 0 : i32
    %0 = arith.cmpi eq, %arg0, %c0_i32 : i32
    %1 = arith.extui %0 : i1 to i32
    %c0_i32_0 = arith.constant 0 : i32
    %2 = arith.cmpi ne, %1, %c0_i32_0 : i32
    scf.if %2 {
      %c0_17 = arith.constant 0 : index
      %c0_18 = arith.constant 0 : index
      %c0_19 = arith.constant 0 : index
      %c0_20 = arith.constant 0 : index
      %35 = vector.load %arg1[%c0_17, %c0_18, %c0_19, %c0_20] : memref<2x16x16x4xbf16, #tpu.memory_space<vmem>>, vector<2x16x16x4xbf16>
      %36 = vector.extract_strided_slice %35 {offsets = [0, 0, 0, 0], sizes = [2, 14, 14, 4], strides = [1, 1, 1, 1]} : vector<2x16x16x4xbf16> to vector<2x14x14x4xbf16>
      %37 = vector.shape_cast %36 : vector<2x14x14x4xbf16> to vector<392x4xbf16>
      %38 = vector.extract_strided_slice %35 {offsets = [0, 0, 1, 0], sizes = [2, 14, 14, 4], strides = [1, 1, 1, 1]} : vector<2x16x16x4xbf16> to vector<2x14x14x4xbf16>
      %39 = vector.shape_cast %38 : vector<2x14x14x4xbf16> to vector<392x4xbf16>
      %40 = vector.extract_strided_slice %35 {offsets = [0, 0, 2, 0], sizes = [2, 14, 14, 4], strides = [1, 1, 1, 1]} : vector<2x16x16x4xbf16> to vector<2x14x14x4xbf16>
      %41 = vector.shape_cast %40 : vector<2x14x14x4xbf16> to vector<392x4xbf16>
      %42 = vector.extract_strided_slice %35 {offsets = [0, 1, 0, 0], sizes = [2, 14, 14, 4], strides = [1, 1, 1, 1]} : vector<2x16x16x4xbf16> to vector<2x14x14x4xbf16>
      %43 = vector.shape_cast %42 : vector<2x14x14x4xbf16> to vector<392x4xbf16>
      %44 = vector.extract_strided_slice %35 {offsets = [0, 1, 1, 0], sizes = [2, 14, 14, 4], strides = [1, 1, 1, 1]} : vector<2x16x16x4xbf16> to vector<2x14x14x4xbf16>
      %45 = vector.shape_cast %44 : vector<2x14x14x4xbf16> to vector<392x4xbf16>
      %46 = vector.extract_strided_slice %35 {offsets = [0, 1, 2, 0], sizes = [2, 14, 14, 4], strides = [1, 1, 1, 1]} : vector<2x16x16x4xbf16> to vector<2x14x14x4xbf16>
      %47 = vector.shape_cast %46 : vector<2x14x14x4xbf16> to vector<392x4xbf16>
      %48 = vector.extract_strided_slice %35 {offsets = [0, 2, 0, 0], sizes = [2, 14, 14, 4], strides = [1, 1, 1, 1]} : vector<2x16x16x4xbf16> to vector<2x14x14x4xbf16>
      %49 = vector.shape_cast %48 : vector<2x14x14x4xbf16> to vector<392x4xbf16>
      %50 = vector.extract_strided_slice %35 {offsets = [0, 2, 1, 0], sizes = [2, 14, 14, 4], strides = [1, 1, 1, 1]} : vector<2x16x16x4xbf16> to vector<2x14x14x4xbf16>
      %51 = vector.shape_cast %50 : vector<2x14x14x4xbf16> to vector<392x4xbf16>
      %52 = vector.extract_strided_slice %35 {offsets = [0, 2, 2, 0], sizes = [2, 14, 14, 4], strides = [1, 1, 1, 1]} : vector<2x16x16x4xbf16> to vector<2x14x14x4xbf16>
      %53 = vector.shape_cast %52 : vector<2x14x14x4xbf16> to vector<392x4xbf16>
      %54 = tpu.concatenate %37, %39, %41, %43, %45, %47, %49, %51, %53 in 1 : vector<392x4xbf16>, vector<392x4xbf16>, vector<392x4xbf16>, vector<392x4xbf16>, vector<392x4xbf16>, vector<392x4xbf16>, vector<392x4xbf16>, vector<392x4xbf16>, vector<392x4xbf16> -> vector<392x36xbf16>
      %c0_21 = arith.constant 0 : index
      %c0_22 = arith.constant 0 : index
      %55 = vector.load %arg6[%c0_21, %c0_22] : memref<392x36xbf16, #tpu.memory_space<vmem>>, vector<392x36xbf16>
      tpu.vector_store %arg6[%c0_21, %c0_22], %54 {strides = array<i32>} : memref<392x36xbf16, #tpu.memory_space<vmem>>, vector<392x36xbf16>,
    } else {
    }
    %c0 = arith.constant 0 : index
    %c0_1 = arith.constant 0 : index
    %3 = vector.load %arg6[%c0, %c0_1] : memref<392x36xbf16, #tpu.memory_space<vmem>>, vector<392x36xbf16>
    %c0_2 = arith.constant 0 : index
    %c0_3 = arith.constant 0 : index
    %4 = vector.load %arg2[%c0_2, %c0_3] : memref<36x128xbf16, #tpu.memory_space<vmem>>, vector<36x128xbf16>
    %cst = arith.constant dense<0.000000e+00> : vector<392x128xf32>
    %5 = tpu.matmul %3, %4, %cst {dimension_numbers = #tpu.dot_dimension_numbers<[1], [0], [0], [1], [0, 0, 1, 1], [], []>} : vector<392x36xbf16>, vector<36x128xbf16>, vector<392x128xf32> -> vector<392x128xf32>
    %cst_4 = arith.constant dense<0.000000e+00> : vector<128xf32>
    %6 = vector.multi_reduction <add>, %5, %cst_4 [0] : vector<392x128xf32> to vector<128xf32>
    %7 = vector.shape_cast %6 : vector<128xf32> to vector<1x128xf32>
    %cst_5 = arith.constant 0.00255102036 : f32
    %8 = vector.broadcast %cst_5 : f32 to vector<1x128xf32>
    %9 = arith.mulf %7, %8 : vector<1x128xf32>
    %10 = arith.mulf %5, %5 : vector<392x128xf32>
    %cst_6 = arith.constant dense<0.000000e+00> : vector<128xf32>
    %11 = vector.multi_reduction <add>, %10, %cst_6 [0] : vector<392x128xf32> to vector<128xf32>
    %12 = vector.shape_cast %11 : vector<128xf32> to vector<1x128xf32>
    %cst_7 = arith.constant 0.00255102036 : f32
    %13 = vector.broadcast %cst_7 : f32 to vector<1x128xf32>
    %14 = arith.mulf %12, %13 : vector<1x128xf32>
    %15 = arith.mulf %9, %9 : vector<1x128xf32>
    %16 = arith.subf %14, %15 : vector<1x128xf32>
    %cst_8 = arith.constant 0.000000e+00 : f32
    %17 = vector.broadcast %cst_8 : f32 to vector<1x128xf32>
    %18 = arith.maximumf %16, %17 : vector<1x128xf32>
    %19 = vector.broadcast %9 : vector<1x128xf32> to vector<392x128xf32>
    %20 = arith.subf %5, %19 : vector<392x128xf32>
    %cst_9 = arith.constant 9.99999974E-6 : f32
    %21 = vector.broadcast %cst_9 : f32 to vector<1x128xf32>
    %22 = arith.addf %18, %21 : vector<1x128xf32>
    %23 = math.rsqrt %22 : vector<1x128xf32>
    %24 = vector.broadcast %23 : vector<1x128xf32> to vector<392x128xf32>
    %25 = arith.mulf %20, %24 : vector<392x128xf32>
    %c0_10 = arith.constant 0 : index
    %c0_11 = arith.constant 0 : index
    %26 = vector.load %arg3[%c0_10, %c0_11] : memref<1x128xf32, #tpu.memory_space<vmem>>, vector<1x128xf32>
    %27 = vector.broadcast %26 : vector<1x128xf32> to vector<392x128xf32>
    %28 = arith.mulf %25, %27 : vector<392x128xf32>
    %c0_12 = arith.constant 0 : index
    %c0_13 = arith.constant 0 : index
    %29 = vector.load %arg4[%c0_12, %c0_13] : memref<1x128xf32, #tpu.memory_space<vmem>>, vector<1x128xf32>
    %30 = vector.broadcast %29 : vector<1x128xf32> to vector<392x128xf32>
    %31 = arith.addf %28, %30 : vector<392x128xf32>
    %cst_14 = arith.constant 0.000000e+00 : f32
    %32 = vector.broadcast %cst_14 : f32 to vector<392x128xf32>
    %33 = arith.maximumf %31, %32 : vector<392x128xf32>
    %c0_15 = arith.constant 0 : index
    %c0_16 = arith.constant 0 : index
    %34 = vector.load %arg5[%c0_15, %c0_16] : memref<392x128xf32, #tpu.memory_space<vmem>>, vector<392x128xf32>
    tpu.vector_store %arg5[%c0_15, %c0_16], %33 {strides = array<i32>} : memref<392x128xf32, #tpu.memory_space<vmem>>, vector<392x128xf32>,
    return
  }
  func.func @transform_0(%arg0: i32) -> (i32, i32, i32, i32) {
    %c0_i32 = arith.constant 0 : i32
    %c0_i32_0 = arith.constant 0 : i32
    %c0_i32_1 = arith.constant 0 : i32
    %c0_i32_2 = arith.constant 0 : i32
    %c0_i32_3 = arith.constant 0 : i32
    return %c0_i32, %c0_i32_0, %c0_i32_1, %c0_i32_2 : i32, i32, i32, i32
  }
  func.func @transform_1(%arg0: i32) -> (i32, i32) {
    %c0_i32 = arith.constant 0 : i32
    %c0_i32_0 = arith.constant 0 : i32
    return %c0_i32, %arg0 : i32, i32
  }
  func.func @transform_2(%arg0: i32) -> (i32, i32) {
    %c0_i32 = arith.constant 0 : i32
    %c0_i32_0 = arith.constant 0 : i32
    return %c0_i32, %arg0 : i32, i32
  }
  func.func @transform_3(%arg0: i32) -> (i32, i32) {
    %c0_i32 = arith.constant 0 : i32
    %c0_i32_0 = arith.constant 0 : i32
    return %c0_i32, %arg0 : i32, i32
  }
  func.func @transform_4(%arg0: i32) -> (i32, i32) {
    %c0_i32 = arith.constant 0 : i32
    %c0_i32_0 = arith.constant 0 : i32
    return %c0_i32, %arg0 : i32, i32
  }
}

</mosaic_0001>

<bundles_post_ra>
// kernel: tpu_custom_call.1
= control target key start
LH: loop header
LB: loop body
LE: loop exit
PB: predicated region body
PF: predicated region fallthrough
CT: control target
= control target key end

     0   :  { %9 = vsyncpa [#allocation4], 0  ;;  %s20259_s0 = inlined_call_operand.hbm [shape: bf16[2,16,16,4], index: 0, kind: input, shape index: {}]   ;;  %s20260_s1 = inlined_call_operand.hbm [shape: bf16[36,128], index: 1, kind: input, shape index: {}]   ;;  %s20261_s2 = inlined_call_operand.hbm [shape: f32[1,128], index: 2, kind: input, shape index: {}]   ;;  %s20262_s3 = inlined_call_operand.hbm [shape: f32[1,128], index: 3, kind: input, shape index: {}]   ;;  %s20263_s4 = inlined_call_operand.hbm [shape: f32[392,128], index: 4, kind: output, shape index: {}]  }
   0x1   :  { %10 = vsyncpa [#allocation7], 0 }
   0x2   :  { %11 = vsyncpa [#allocation10], 0 }
   0x3   :  { %12 = vsyncpa [#allocation5], 0  ;;  %s13731_s15 = smov [#allocation6]   ;;  %s13732_s17 = smov [#allocation3]  }
   0x4   :  { %s30_s16 = sshll.u32 %s13731_s15, 4  ;;  %s18_s18 = sshll.u32 %s13732_s17, 4  ;;  %s31_s16 = int_to_ptr.vmem [resolvable:$true] %s30_s16  ;;  %s13774_s18 = int_to_ptr.vmem [resolvable:$true] %s18_s18 }
   0x5   :  { %s13613_s21 = scalar_lea.hbm %s20260_s1, 320 }
   0x6   :  { %p13614_p0 = scmp.ne.s32.totalorder %s20260_s1, %s13613_s21  ;;  %p13617_p1 = scmp.lt.u32.totalorder %s13613_s21, %s20260_s1 }
   0x8   :  { %p13619_p2 = pnand %p13617_p1, %p13614_p0 }
   0xa   :  { %13622 = shalt.err (!%p13619_p2)
}
   0xb   :  { %s13623_s26 = scalar_lea.vmem %s31_s16, 320  ;;  %p13628_p4 = scmp.lt.s32.totalorder %s31_s16, %s31_s16 }
   0xc   :  { %p13624_p3 = scmp.ne.s32.totalorder %s31_s16, %s13623_s26  ;;  %p13629_p5 = scmp.lt.s32.totalorder %s13623_s26, %s13623_s26 }
   0xe   :  { %p13630_p6 = por %p13629_p5, %p13628_p4 }
  0x10   :  { %p13631_p7 = pnand %p13630_p6, %p13624_p3 }
  0x12   :  { %13634 = shalt.err (!%p13631_p7)
}
  0x13   :  { %s13733_s27 = smov 64   ;;  %s13734_s28 = smov 4  }
  0x14   :  { %36 = dma.hbm_to_vmem [thread:$0]  %s20260_s1, 320, %s31_s16, [#allocation7], %s13733_s27, %s13733_s27, %s13734_s28  }
  0x15   :  { %s13635_s7 = scalar_lea.hbm %s20259_s0, 4096 }
  0x16   :  { %p13636_p8 = scmp.ne.s32.totalorder %s20259_s0, %s13635_s7  ;;  %p13639_p9 = scmp.lt.u32.totalorder %s13635_s7, %s20259_s0 }
  0x18   :  { %p13641_p10 = pnand %p13639_p9, %p13636_p8 }
  0x1a   :  { %13644 = shalt.err (!%p13641_p10)
}
  0x1b   :  { %s13645_s12 = scalar_lea.vmem %s13774_s18, 4096  ;;  %p13650_p12 = scmp.lt.s32.totalorder %s13774_s18, %s13774_s18 }
  0x1c   :  { %p13646_p11 = scmp.ne.s32.totalorder %s13774_s18, %s13645_s12  ;;  %p13651_p13 = scmp.lt.s32.totalorder %s13645_s12, %s13645_s12 }
  0x1e   :  { %p13652_p0 = por %p13651_p13, %p13650_p12 }
  0x20   :  { %p13653_p1 = pnand %p13652_p0, %p13646_p11 }
  0x22   :  { %13656 = shalt.err (!%p13653_p1)
}
  0x23   :  { %24 = dma.hbm_to_vmem [thread:$0]  %s20259_s0, 4096, %s13774_s18, [#allocation4], %s13733_s27, %s13733_s27, %s13734_s28  }
  0x24   :  { %s13735_s14 = smov [#allocation8]   ;;  %s13736_s16 = smov [#allocation9]  }
  0x25   :  { %s43_s15 = sshll.u32 %s13735_s14, 4  ;;  %s53_s17 = sshll.u32 %s13736_s16, 4  ;;  %s44_s15 = int_to_ptr.vmem [resolvable:$true] %s43_s15  ;;  %s54_s17 = int_to_ptr.vmem [resolvable:$true] %s53_s17 }
  0x26   :  { %s13657_s21 = scalar_lea.hbm %s20261_s2, 16 }
  0x27   :  { %p13658_p2 = scmp.ne.s32.totalorder %s20261_s2, %s13657_s21  ;;  %p13661_p3 = scmp.lt.u32.totalorder %s13657_s21, %s20261_s2 }
  0x29   :  { %p13663_p4 = pnand %p13661_p3, %p13658_p2 }
  0x2b   :  { %13666 = shalt.err (!%p13663_p4)
}
  0x2c   :  { %s13667_s0 = scalar_lea.vmem %s44_s15, 16  ;;  %s13671_s18 = scalar_lea.vmem %s44_s15, 32 }
  0x2d   :  { %p13668_p5 = scmp.ne.s32.totalorder %s44_s15, %s13667_s0  ;;  %p13672_p6 = scmp.lt.s32.totalorder %s44_s15, %s44_s15 }
  0x2e   :  { %p13673_p7 = scmp.lt.s32.totalorder %s13671_s18, %s13667_s0 }
  0x30   :  { %p13674_p8 = por %p13673_p7, %p13672_p6 }
  0x32   :  { %p13675_p9 = pnand %p13674_p8, %p13668_p5 }
  0x34   :  { %13678 = shalt.err (!%p13675_p9)
}
  0x35   :  { %46 = dma.hbm_to_vmem [thread:$0]  %s20261_s2, 16, %s44_s15, [#allocation7]  }
  0x36   :  { %s13679_s5 = scalar_lea.hbm %s20262_s3, 16 }
  0x37   :  { %p13680_p10 = scmp.ne.s32.totalorder %s20262_s3, %s13679_s5  ;;  %p13683_p11 = scmp.lt.u32.totalorder %s13679_s5, %s20262_s3 }
  0x39   :  { %p13685_p12 = pnand %p13683_p11, %p13680_p10 }
  0x3b   :  { %13688 = shalt.err (!%p13685_p12)
}
  0x3c   :  { %s13689_s10 = scalar_lea.vmem %s54_s17, 16  ;;  %s13693_s11 = scalar_lea.vmem %s54_s17, 32 }
  0x3d   :  { %p13690_p13 = scmp.ne.s32.totalorder %s54_s17, %s13689_s10  ;;  %p13694_p0 = scmp.lt.s32.totalorder %s54_s17, %s54_s17 }
  0x3e   :  { %p13695_p1 = scmp.lt.s32.totalorder %s13693_s11, %s13689_s10 }
  0x40   :  { %p13696_p2 = por %p13695_p1, %p13694_p0 }
  0x42   :  { %p13697_p3 = pnand %p13696_p2, %p13690_p13 }
  0x44   :  { %13700 = shalt.err (!%p13697_p3)
}
  0x45   :  { %56 = dma.hbm_to_vmem [thread:$0]  %s20262_s3, 16, %s54_s17, [#allocation10]  }
  0x46   :  { %13723 = dma.done.wait [#allocation4], 4096  }
  0x47   :  { %13724 = vsyncadd [#allocation4], 4294963200 }
  0x48   :  { %13725 = dma.done.wait [#allocation7], 336  }
  0x49   :  { %13726 = vsyncadd [#allocation7], 4294966960 }
  0x4a   :  { %13727 = dma.done.wait [#allocation10], 16  }
  0x4b   :  { %13728 = vsyncadd [#allocation10], 4294967280  ;;  %v205_v0 = vlaneseq  ;;  %v13737_v1 = vmov 1966171168   ;;  %vm1538_vm0 = vsmask.f32 256 }
  0x4c   :  { %v203_v2 = vunpack.c.l.s4 %v13737_v1  ;;  %v12975_v6 = vld.sshfl [vmem:[#allocation3 + $0x10] sm:$0x33 pattern:$0x75316420]  ;;  %vm1539_vm1 = vsmask.f32 1284 }
  0x4d   :  { %v206_v3 = vshrl.u32 %v205_v0, 7  ;;  %v12976_v7 = vld.sshfl [vmem:[#allocation3 + $0x14] sm:$0x33 pattern:$0x75316420]  ;;  %v295_v8 = vcombine.high %v12975_v6, %v12975_v6  ;;  %vm13944_vm5 = vmor %vm1538_vm0, %vm1539_vm1  ;;  %s13738_s3 = smov 20  }
  0x4e   :  { %v204_v4 = vunpack.c.0.s8 %v203_v2  ;;  %v12977_v10 = vld.sshfl [vmem:[#allocation3 + $0x18] sm:$0x33 pattern:$0x75316420]  ;;  %v319_v11 = vcombine.high %v12976_v7, %v12976_v7  ;;  %vm1541_vm2 = vsmask.f32 2312 }
  0x4f   :  { %v342_v14 = vcombine.high %v12977_v10, %v12977_v10  ;;  %v12973_v16 = vld.sshfl [vmem:[#allocation3 + $0x8] sm:$0x33 pattern:$0x75316420]  ;;  %vm1543_vm3 = vsmask.f32 3340  ;;  %vm13977_vm7 = vmor %vm13944_vm5, %vm1541_vm2 }
  0x50   :  { %v13831_v5 = vsub.s32 %v204_v4, %v206_v3  ;;  %v12974_v20 = vld.sshfl [vmem:[#allocation3 + $0xc] sm:$0x33 pattern:$0x75316420]  ;;  %v248_v21 = vcombine.high %v12973_v16, %v12973_v16  ;;  %vm1545_vm4 = vsmask.f32 4368  ;;  %vm14009_vm9 = vmor %vm13977_vm7, %vm1543_vm3 }
  0x51   :  { %v272_v26 = vcombine.high %v12974_v20, %v12974_v20  ;;  %v12971_v47 = vld.sshfl [vmem:[#allocation3] sm:$0x33 pattern:$0x75316420]  ;;  %vm1547_vm6 = vsmask.f32 5396  ;;  %vm14031_vm11 = vmor %vm14009_vm9, %vm1545_vm4 }
  0x52   :  { %v13834_v9 = vrot.slane %v12975_v6, %v13831_v5  ;;  %v13837_v12 = vrot.slane %v12976_v7, %v13831_v5  ;;  %v13840_v13 = vrot.slane %v295_v8, %v13831_v5  ;;  %v13843_v15 = vrot.slane %v12977_v10, %v13831_v5  ;;  %v12972_v52 = vld.sshfl [vmem:[#allocation3 + $0x4] sm:$0x33 pattern:$0x75316420]  ;;  %s13739_s1 = smov 12   ;;  %s13740_s13 = smov 24   ;;  %vm14062_vm12 = vmor %vm14031_vm11, %vm1547_vm6 }
  0x53   :  { %v13850_v18 = vrot.slane %v319_v11, %v13831_v5  ;;  %v13857_v22 = vrot.slane %v12973_v16, %v13831_v5  ;;  %v13860_v23 = vrot.slane %v342_v14, %v13831_v5  ;;  %v13875_v30 = vrot.slane %v248_v21, %v13831_v5  ;;  %s13741_s14 = smov 8   ;;  %s13742_s15 = smov 32  }
  0x54   :  { %v13847_v17 = vcombine.high %v13834_v9, %v13834_v9  ;;  %v13854_v19 = vcombine.high %v13837_v12, %v13837_v12  ;;  %v13864_v24 = vcombine.high %v13843_v15, %v13843_v15  ;;  %v13260_v25 = vcombine.high %v13834_v9, %v13840_v13  ;;  %s13743_s16 = smov 16   ;;  %s13744_s17 = smov 28  }
  0x55   :  { %v3676_v27 = vcombine.low %v13837_v12, %v13850_v18  ;;  %v13301_v29 = vcombine.high %v13837_v12, %v13850_v18  ;;  %v13881_v33 = vrot.slane %v12974_v20, %v13831_v5  ;;  %v13884_v34 = vrot.slane %v272_v26, %v13831_v5 }
  0x56   :  { %v3677_v28 = vcombine.low %v13854_v19, %v13843_v15  ;;  %v3678_v31 = vcombine.low %v13860_v23, %v13864_v24  ;;  %v3685_v32 = vrot.slane %v13260_v25, %v13831_v5  ;;  %v13273_v38 = vcombine.high %v13857_v22, %v13875_v30 }
  0x57   :  { %v3692_v35 = vrot.slane %v3676_v27, %v13831_v5  ;;  %v9289_v37 = vrot.slane %v13301_v29, %v13831_v5  ;;  %v13896_v40 = vcombine.high %v13881_v33, %v13881_v33  ;;  %v6077_v41 = vcombine.low %v13881_v33, %v13884_v34 }
  0x58   :  { %v3699_v36 = vrot.slane %v3677_v28, %v13831_v5  ;;  %v13892_v39 = vrot.slane %v3678_v31, %v13831_v5  ;;  %v7277_v42 = vcombine.low %v13857_v22, %v13875_v30  ;;  %v6086_v44 = vrot.slane %v13273_v38, %v13831_v5 }
  0x59   :  { %v3707_v43 = vcombine.low %v3685_v32, %v3692_v35  ;;  %v3629_v45 = vcombine.low %v13834_v9, %v13840_v13  ;;  %v6093_v50 = vrot.slane %v6077_v41, %v13831_v5  ;;  %v7278_v51 = vcombine.low %v13896_v40, %v13834_v9 }
  0x5a   :  { %v9828_v46 = vcombine.low %v3692_v35, %v3699_v36  ;;  %v3708_v48 = vcombine.low %v3699_v36, %v13892_v39  ;;  %v9290_v49 = vcombine.low %v9289_v37, %v13892_v39  ;;  %v7285_v54 = vrot.slane %v7277_v42, %v13831_v5 }
  0x5b   :  { %v13911_v53 = vrot.slane %v3707_v43, %v13831_v5  ;;  %v13915_v55 = vrot.slane %v3629_v45, %v13831_v5  ;;  %v7292_v59 = vrot.slane %v7278_v51, %v13831_v5  ;;  %v201_v60 = vcombine.high %v12971_v47, %v12971_v47 }
  0x5c   :  { %v9842_v56 = vrot.slane %v9828_v46, %v13831_v5  ;;  %v13919_v57 = vrot.slane %v3708_v48, %v13831_v5  ;;  %v9297_v58 = vrot.slane %v9290_v49, %v13831_v5  ;;  %v7293_v61 = vcombine.low %v7285_v54, %v6086_v44 }
  0x5d   :  { %20451 = vst [vmem:[#allocation16_spill] sm:$0xff] %v13911_v53  ;;  %v9827_v62 = vcombine.low %v13915_v55, %v3685_v32  ;;  %v13925_v63 = vrot.slane %v12971_v47, %v13831_v5  ;;  %v225_v0 = vcombine.high %v12972_v52, %v12972_v52  ;;  %v7294_v3 = vcombine.low %v6093_v50, %v7292_v59 }
  0x5e   :  { %20452 = vst [vmem:[#allocation17_spill] sm:$0xff] %v13919_v57  ;;  %v9298_v1 = vcombine.low %v13911_v53, %v9297_v58  ;;  %v13931_v4 = vrot.slane %v201_v60, %v13831_v5  ;;  %v7301_v6 = vrot.slane %v7293_v61, %v13831_v5  ;;  %v13940_v10 = vrot.slane %v12972_v52, %v13831_v5 }
  0x5f   :  { %v9835_v7 = vrot.slane %v9827_v62, %v13831_v5  ;;  %v13937_v8 = vcombine.high %v13925_v63, %v13925_v63  ;;  %v7308_v14 = vrot.slane %v7294_v3, %v13831_v5  ;;  %v13955_v20 = vrot.slane %v225_v0, %v13831_v5 }
  0x60   :  { %9779 = vrot.lane.b32.xlu0 %v9298_v1, %s13738_s3  ;;  %v13952_v16 = vcombine.high %v13931_v4, %v13931_v4  ;;  %v13274_v21 = vcombine.high %v13881_v33, %v13884_v34  ;;  %v13961_v26 = vcombine.high %v13940_v10, %v13940_v10  ;;  %v6079_v28 = vcombine.low %v13840_v13, %v13847_v17 }
  0x61   :  { %v9843_v25 = vcombine.low %v9835_v7, %v9842_v56  ;;  %v6027_v27 = vcombine.low %v13931_v4, %v13937_v8  ;;  %v7309_v29 = vcombine.low %v7301_v6, %v7308_v14  ;;  %v13969_v31 = vcombine.high %v13955_v20, %v13955_v20 }
  0x62   :  { %v6028_v32 = vcombine.low %v13952_v16, %v13940_v10  ;;  %v6100_v35 = vrot.slane %v13274_v21, %v13831_v5  ;;  %v6029_v37 = vcombine.low %v13955_v20, %v13961_v26  ;;  %v13985_v41 = vrot.slane %v6079_v28, %v13831_v5 }
  0x63   :  { %v6037_v38 = vrot.slane %v6027_v27, %v13831_v5  ;;  %v6108_v42 = vcombine.low %v6086_v44, %v6093_v50  ;;  %vm1549_vm8 = vsmask.f32 6424  ;;  %7965 = vrot.lane.b32.xlu1 %v7309_v29, %s13739_s1  ;;  %v6030_v43 = vcombine.low %v13969_v31, %v13875_v30 }
  0x64   :  { %v6044_v45 = vrot.slane %v6028_v32, %v13831_v5  ;;  %v13993_v46 = vcombine.high %v13857_v22, %v13857_v22  ;;  %v13997_v47 = vcombine.high %v13875_v30, %v13875_v30  ;;  %v6051_v48 = vrot.slane %v6029_v37, %v13831_v5  ;;  %vm1550_vm13 = vmor %vm14062_vm12, %vm1549_vm8 }
  0x65   :  { %v6109_v44 = vcombine.low %v6100_v35, %v13985_v41  ;;  %v6116_v49 = vrot.slane %v6108_v42, %v13831_v5  ;;  %v14004_v50 = vcombine.high %v13884_v34, %v13884_v34  ;;  %v6058_v52 = vrot.slane %v6030_v43, %v13831_v5  ;;  %v12978_v35 = vld.sshfl [vmem:[#allocation3 + $0x1c] sm:$0x33 pattern:$0x75316420] }
  0x66   :  { %v6059_v54 = vcombine.low %v6037_v38, %v6044_v45  ;;  %v3626_v56 = vcombine.low %v13875_v30, %v13993_v46  ;;  %v3627_v58 = vcombine.low %v13997_v47, %v13881_v33  ;;  %vm1551_vm10 = vsmask.f32 7452  ;;  %v12979_v42 = vld.sshfl [vmem:[#allocation3 + $0x20] sm:$0x33 pattern:$0x75316420] }
  0x67   :  { %v6123_v59 = vrot.slane %v6109_v44, %v13831_v5  ;;  %v3628_v61 = vcombine.low %v13884_v34, %v13896_v40  ;;  %v9265_v62 = vcombine.low %v14004_v50, %v13840_v13  ;;  %10323 = vrot.lane.b32.xlu1 %v9843_v25, %s13740_s13  ;;  %v6060_v0 = vcombine.low %v6051_v48, %v6058_v52  ;;  %vm14115_vm14 = vmor %vm1550_vm13, %vm1551_vm10 }
  0x68   :  { %v6067_v1 = vrot.slane %v6059_v54, %v13831_v5  ;;  %v3636_v3 = vrot.slane %v3626_v56, %v13831_v5  ;;  %v3643_v6 = vrot.slane %v3627_v58, %v13831_v5  ;;  %v14041_v25 = vcombine.high %v13840_v13, %v13840_v13 }
  0x69   :  { %v6124_v11 = vcombine.low %v6116_v49, %v6123_v59  ;;  %v14036_v14 = vrot.slane %v3628_v61, %v13831_v5  ;;  %v9272_v21 = vrot.slane %v9265_v62, %v13831_v5  ;;  %v6074_v27 = vrot.slane %v6060_v0, %v13831_v5 }
  0x6a   :  { %v3658_v28 = vcombine.low %v3636_v3, %v3643_v6  ;;  %v14046_v29 = vcombine.high %v13850_v18, %v13850_v18  ;;  %v6126_v32 = vcombine.low %v13850_v18, %v13854_v19  ;;  %v6125_v37 = vcombine.low %v14041_v25, %v13837_v12 }
  0x6b   :  { %v9273_v36 = vcombine.low %v14036_v14, %v9272_v21  ;;  %v7310_v38 = vcombine.low %v13843_v15, %v13860_v23  ;;  %v14057_v43 = vcombine.high %v13860_v23, %v13860_v23  ;;  %v6075_v48 = vcombine.low %v6067_v1, %v6074_v27  ;;  %7229 = vrot.lane.b32.xlu1 %v6124_v11, %s13741_s14 }
  0x6c   :  { %v14068_v44 = vrot.slane %v3658_v28, %v13831_v5  ;;  %v6127_v51 = vcombine.low %v14046_v29, %v13860_v23  ;;  %v14075_v54 = vrot.slane %v6125_v37, %v13831_v5  ;;  %v14078_v56 = vrot.slane %v6126_v32, %v13831_v5 }
  0x6d   :  { %v9280_v52 = vrot.slane %v9273_v36, %v13831_v5  ;;  %v7317_v58 = vrot.slane %v7310_v38, %v13831_v5  ;;  %7227 = vrot.lane.b32.xlu0 %v6075_v48, %s13741_s14  ;;  %v366_v61 = vcombine.high %v12978_v35, %v12978_v35  ;;  %v14086_v62 = vrot.slane %v12978_v35, %v13831_v5 }
  0x6e   :  { %v14083_v59 = vrot.slane %v6127_v51, %v13831_v5  ;;  %v389_v0 = vcombine.high %v12979_v42, %v12979_v42  ;;  %v7318_v3 = vcombine.low %v13985_v41, %v14075_v54  ;;  %v14096_v7 = vrot.slane %v12979_v42, %v13831_v5 }
  0x6f   :  { %v9281_v1 = vcombine.low %v14068_v44, %v9280_v52  ;;  %v7319_v6 = vcombine.low %v14078_v56, %v7317_v58  ;;  %v14101_v21 = vrot.slane %v366_v61, %v13831_v5  ;;  %v14105_v27 = vcombine.high %v14086_v62, %v14086_v62 }
  0x70   :  { %v10951_v11 = vcombine.low %v14078_v56, %v14083_v59  ;;  %v14108_v28 = vrot.slane %v389_v0, %v13831_v5  ;;  %v7326_v41 = vrot.slane %v7318_v3, %v13831_v5  ;;  %v3724_v35 = vcombine.low %v14057_v43, %v14086_v62 }
  0x71   :  { %v7333_v32 = vrot.slane %v7319_v6, %v13831_v5  ;;  %v1554_v37 = vshrl.u32 %v13925_v63, 16  ;;  %9777 = vrot.lane.b32.xlu0 %v9281_v1, %s13738_s3  ;;  %v3725_v42 = vcombine.low %v14101_v21, %v14105_v27  ;;  %v1559_v48 = vshll.u32 %v13931_v4, 16 }
  0x72   :  { %v10958_v38 = vrot.slane %v10951_v11, %v13831_v5  ;;  %v3726_v45 = vcombine.low %v14096_v7, %v14108_v28  ;;  %v14128_v52 = vrot.slane %v3724_v35, %v13831_v5  ;;  %v1562_v58 = vshrl.u32 %v13931_v4, 16 }
  0x73   :  { %v7334_v51 = vcombine.low %v7326_v41, %v7333_v32  ;;  %v1567_v61 = vshll.u32 %v13937_v8, 16  ;;  %v14133_v1 = vrot.slane %v3725_v42, %v13831_v5  ;;  %v1561_v6 = vsel %vm14115_vm14, %v1554_v37, %v1559_v48 }
  0x74   :  { %v10959_v0 = vcombine.low %v7326_v41, %v10958_v38  ;;  %v14136_v3 = vrot.slane %v3726_v45, %v13831_v5  ;;  %v9844_v11 = vcombine.low %v13892_v39, %v14128_v52  ;;  %v1570_v35 = vshrl.u32 %v13937_v8, 16 }
  0x75   :  { %v1569_v32 = vsel %vm14115_vm14, %v1562_v58, %v1567_v61  ;;  %v1575_v2 = vshll.u32 %v13952_v16, 16  ;;  %7967 = vrot.lane.b32.xlu0 %v7334_v51, %s13739_s1  ;;  %v1578_v37 = vshrl.u32 %v13952_v16, 16  ;;  %v1583_v38 = vshll.u32 %v13940_v10, 16 }
  0x76   :  { %20465 = vst [vmem:[#allocation18_spill] sm:$0xff] %v14136_v3  ;;  %11271 = vrot.lane.b32.xlu1 %v10959_v0, %s13742_s15  ;;  %v9845_v41 = vcombine.low %v14133_v1, %v14136_v3  ;;  %v1586_v39 = vshrl.u32 %v13940_v10, 16  ;;  %v9852_v42 = vrot.slane %v9844_v11, %v13831_v5  ;;  %v1591_v45 = vshll.u32 %v13955_v20, 16 }
  0x77   :  { %v1577_v8 = vsel %vm14115_vm14, %v1570_v35, %v1575_v2  ;;  %v1594_v48 = vshrl.u32 %v13955_v20, 16  ;;  %v1585_v58 = vsel %vm14115_vm14, %v1578_v37, %v1583_v38  ;;  %v1599_v16 = vshll.u32 %v13961_v26, 16 }
  0x78   :  { %v9859_v51 = vrot.slane %v9845_v41, %v13831_v5  ;;  %v1602_v61 = vshrl.u32 %v13961_v26, 16  ;;  %v1593_v0 = vsel %vm14115_vm14, %v1586_v39, %v1591_v45  ;;  %v1607_v11 = vshll.u32 %v13969_v31, 16 }
  0x79   :  { %v1611_v2 = vshrl.u32 %v13857_v22, 16  ;;  %v1616_v35 = vshll.u32 %v13875_v30, 16  ;;  %v1601_v41 = vsel %vm14115_vm14, %v1594_v48, %v1599_v16  ;;  %v1619_v60 = vshrl.u32 %v13875_v30, 16 }
  0x7a   :  { %v9860_v49 = vcombine.low %v9852_v42, %v9859_v51  ;;  %v1624_v37 = vshll.u32 %v13993_v46, 16  ;;  %v1609_v38 = vsel %vm14115_vm14, %v1602_v61, %v1607_v11  ;;  %v4777_v45 = vcombine.low %v1561_v6, %v1569_v32 }
  0x7b   :  { %v1618_v39 = vsel %vm14115_vm14, %v1611_v2, %v1616_v35  ;;  %v4778_v31 = vcombine.low %v1577_v8, %v1585_v58  ;;  %v4779_v51 = vcombine.low %v1593_v0, %v1601_v41  ;;  %v1627_v30 = vshrl.u32 %v13993_v46, 16 }
  0x7c   :  { %10325 = vrot.lane.b32.xlu1 %v9860_v49, %s13740_s13  ;;  %v14179_v42 = vsel %vm14115_vm14, %v1619_v60, %v1624_v37  ;;  %v4780_v48 = vcombine.low %v1609_v38, %v1618_v39  ;;  %v4787_v16 = vrot.slane %v4777_v45, %v13831_v5  ;;  %v1632_v11 = vshll.u32 %v13997_v47, 16 }
  0x7d   :  { %v4794_v3 = vrot.slane %v4778_v31, %v13831_v5  ;;  %v8015_v61 = vcombine.low %v1618_v39, %v14179_v42  ;;  %v4801_v6 = vrot.slane %v4779_v51, %v13831_v5  ;;  %v1635_v32 = vshrl.u32 %v13997_v47, 16 }
  0x7e   :  { %v4808_v49 = vrot.slane %v4780_v48, %v13831_v5  ;;  %v1640_v60 = vshll.u32 %v13881_v33, 16  ;;  %v14192_v46 = vsel %vm14115_vm14, %v1627_v30, %v1632_v11  ;;  %v1643_v58 = vshrl.u32 %v13881_v33, 16 }
  0x7f   :  { %v4809_v8 = vcombine.low %v4787_v16, %v4794_v3  ;;  %v1648_v0 = vshll.u32 %v13884_v34, 16  ;;  %v1651_v41 = vshrl.u32 %v13884_v34, 16  ;;  %v1656_v47 = vshll.u32 %v13896_v40, 16 }
  0x80   :  { %v4810_v2 = vcombine.low %v4801_v6, %v4808_v49  ;;  %v14198_v35 = vsel %vm14115_vm14, %v1635_v32, %v1640_v60  ;;  %v1659_v38 = vshrl.u32 %v13896_v40, 16  ;;  %v1668_v33 = vshrl.u32 %v13834_v9, 16 }
  0x81   :  { %v4817_v37 = vrot.slane %v4809_v8, %v13831_v5  ;;  %v14205_v3 = vsel %vm14115_vm14, %v1643_v58, %v1648_v0  ;;  %v14212_v45 = vsel %vm14115_vm14, %v1651_v41, %v1656_v47  ;;  %v1673_v34 = vshll.u32 %v13840_v13, 16 }
  0x82   :  { %v4824_v39 = vrot.slane %v4810_v2, %v13831_v5  ;;  %v8016_v31 = vcombine.low %v14192_v46, %v14198_v35  ;;  %v20466_v51 = vshll.u32 %v14004_v50, 16  ;;  %v8017_v9 = vcombine.low %v14205_v3, %v14212_v45 }
  0x83   :  { %v8025_v40 = vrot.slane %v8015_v61, %v13831_v5  ;;  %v1676_v30 = vshrl.u32 %v13840_v13, 16  ;;  %v1675_v11 = vsel %vm14115_vm14, %v1668_v33, %v1673_v34  ;;  %v1681_v49 = vshll.u32 %v13847_v17, 16 }
  0x84   :  { %v14221_v48 = vsel %vm14115_vm14, %v1659_v38, %v20466_v51  ;;  %v4825_v16 = vcombine.low %v4817_v37, %v4824_v39  ;;  %v8032_v6 = vrot.slane %v8016_v31, %v13831_v5  ;;  %v8039_v32 = vrot.slane %v8017_v9, %v13831_v5 }
  0x85   :  { %v8018_v50 = vcombine.low %v14221_v48, %v1675_v11  ;;  %v1684_v60 = vshrl.u32 %v13847_v17, 16  ;;  %v1689_v8 = vshll.u32 %v14041_v25, 16  ;;  %v1683_v13 = vsel %vm14115_vm14, %v1676_v30, %v1681_v49 }
  0x86   :  { %5977 = vrot.lane.b32.xlu0 %v4825_v16, %s13734_s28  ;;  %v8047_v61 = vcombine.low %v8025_v40, %v8032_v6  ;;  %v1692_v58 = vshrl.u32 %v14041_v25, 16  ;;  %v1697_v0 = vshll.u32 %v13837_v12, 16  ;;  %v1700_v47 = vshrl.u32 %v13837_v12, 16 }
  0x87   :  { %v8046_v2 = vrot.slane %v8018_v50, %v13831_v5  ;;  %v1691_v41 = vsel %vm14115_vm14, %v1684_v60, %v1689_v8  ;;  %v1705_v17 = vshll.u32 %v13850_v18, 16  ;;  %v1708_v33 = vshrl.u32 %v13850_v18, 16 }
  0x88   :  { %v8055_v37 = vrot.slane %v8047_v61, %v13831_v5  ;;  %v1699_v38 = vsel %vm14115_vm14, %v1692_v58, %v1697_v0  ;;  %v1713_v25 = vshll.u32 %v13854_v19, 16  ;;  %v1716_v31 = vshrl.u32 %v13854_v19, 16 }
  0x89   :  { %v8048_v39 = vcombine.low %v8039_v32, %v8046_v2  ;;  %v1707_v34 = vsel %vm14115_vm14, %v1700_v47, %v1705_v17  ;;  %v1725_v51 = vshrl.u32 %v13843_v15, 16  ;;  %v1730_v9 = vshll.u32 %v13860_v23, 16 }
  0x8a   :  { %v1715_v12 = vsel %vm14115_vm14, %v1708_v33, %v1713_v25  ;;  %v4829_v40 = vcombine.low %v1675_v11, %v1683_v13  ;;  %v4875_v30 = vcombine.low %v1691_v41, %v1699_v38  ;;  %v20467_v18 = vshll.u32 %v14046_v29, 16 }
  0x8b   :  { %v8062_v16 = vrot.slane %v8048_v39, %v13831_v5  ;;  %v4876_v49 = vcombine.low %v1707_v34, %v1715_v12  ;;  %v1733_v50 = vshrl.u32 %v13860_v23, 16  ;;  %v1732_v19 = vsel %vm14115_vm14, %v1725_v51, %v1730_v9 }
  0x8c   :  { %v1723_v6 = vsel %vm14115_vm14, %v1716_v31, %v20467_v18  ;;  %v4857_v32 = vrot.slane %v4829_v40, %v13831_v5  ;;  %v14267_v60 = vrot.slane %v4875_v30, %v13831_v5  ;;  %v1738_v11 = vshll.u32 %v13864_v24, 16 }
  0x8d   :  { %v8063_v8 = vcombine.low %v8055_v37, %v8062_v16  ;;  %v4877_v61 = vcombine.low %v1723_v6, %v1732_v19  ;;  %v14271_v29 = vrot.slane %v4876_v49, %v13831_v5  ;;  %v8064_v58 = vcombine.low %v1683_v13, %v1691_v41 }
  0x8e   :  { %v10373_v0 = vcombine.low %v4857_v32, %v14267_v60  ;;  %v14276_v2 = vsel %vm14115_vm14, %v1733_v50, %v1738_v11  ;;  %v8065_v47 = vcombine.low %v1699_v38, %v1707_v34  ;;  %v8066_v17 = vcombine.low %v1715_v12, %v1723_v6 }
  0x8f   :  { %9215 = vrot.lane.b32.xlu1 %v8063_v8, %s13743_s16  ;;  %v14280_v33 = vrot.slane %v4877_v61, %v13831_v5  ;;  %v8067_v37 = vcombine.low %v1732_v19, %v14276_v2  ;;  %v8074_v25 = vrot.slane %v8064_v58, %v13831_v5  ;;  %v4826_v13 = vcombine.low %v14179_v42, %v14192_v46 }
  0x90   :  { %v10381_v41 = vrot.slane %v10373_v0, %v13831_v5  ;;  %v8081_v39 = vrot.slane %v8065_v47, %v13831_v5  ;;  %v8088_v38 = vrot.slane %v8066_v17, %v13831_v5  ;;  %v4827_v34 = vcombine.low %v14198_v35, %v14205_v3 }
  0x91   :  { %v10374_v31 = vcombine.low %v14271_v29, %v14280_v33  ;;  %v8095_v51 = vrot.slane %v8067_v37, %v13831_v5  ;;  %v4828_v12 = vcombine.low %v14212_v45, %v14221_v48  ;;  %v4836_v9 = vrot.slane %v4826_v13, %v13831_v5 }
  0x92   :  { %v8096_v42 = vcombine.low %v8074_v25, %v8081_v39  ;;  %v4843_v46 = vrot.slane %v4827_v34, %v13831_v5  ;;  %v14300_v40 = vcombine.high %v14096_v7, %v14096_v7  ;;  %v13275_v35 = vcombine.high %v13843_v15, %v13860_v23 }
  0x93   :  { %v10388_v3 = vrot.slane %v10374_v31, %v13831_v5  ;;  %v8097_v30 = vcombine.low %v8088_v38, %v8095_v51  ;;  %v4850_v16 = vrot.slane %v4828_v12, %v13831_v5  ;;  %v6174_v45 = vcombine.low %v14086_v62, %v14101_v21 }
  0x94   :  { %v8104_v48 = vrot.slane %v8096_v42, %v13831_v5  ;;  %v4858_v18 = vcombine.low %v4836_v9, %v4843_v46  ;;  %v6156_v6 = vrot.slane %v13275_v35, %v13831_v5  ;;  %v13276_v49 = vcombine.high %v14086_v62, %v14101_v21 }
  0x95   :  { %v10389_v50 = vcombine.low %v10381_v41, %v10388_v3  ;;  %v8111_v19 = vrot.slane %v8097_v30, %v13831_v5  ;;  %v4859_v15 = vcombine.low %v4850_v16, %v4857_v32  ;;  %v6176_v23 = vcombine.low %v14108_v28, %v14300_v40 }
  0x96   :  { %v4866_v11 = vrot.slane %v4858_v18, %v13831_v5  ;;  %v14317_v8 = vrot.slane %v6174_v45, %v13831_v5  ;;  %v14320_v61 = vrot.slane %v13276_v49, %v13831_v5  ;;  %v14324_v58 = vcombine.high %v14101_v21, %v14101_v21 }
  0x97   :  { %10901 = vrot.lane.b32.xlu0 %v10389_v50, %s13744_s17  ;;  %v8112_v0 = vcombine.low %v8104_v48, %v8111_v19  ;;  %v4873_v32 = vrot.slane %v4859_v15, %v13831_v5  ;;  %v14329_v47 = vrot.slane %v6176_v23, %v13831_v5  ;;  %v1741_v17 = vshrl.u32 %v13864_v24, 16 }
  0x98   :  { %v7343_v37 = vcombine.low %v6156_v6, %v14317_v8  ;;  %v1746_v25 = vshll.u32 %v14057_v43, 16  ;;  %v1749_v13 = vshrl.u32 %v14057_v43, 16  ;;  %v1754_v41 = vshll.u32 %v14086_v62, 16 }
  0x99   :  { %9217 = vrot.lane.b32.xlu1 %v8112_v0, %s13743_s16  ;;  %v4874_v39 = vcombine.low %v4866_v11, %v4873_v32  ;;  %v10960_v38 = vcombine.low %v14320_v61, %v14329_v47  ;;  %v1757_v34 = vshrl.u32 %v14086_v62, 16  ;;  %v1762_v31 = vshll.u32 %v14101_v21, 16 }
  0x9a   :  { %v14342_v24 = vrot.slane %v7343_v37, %v13831_v5  ;;  %v1748_v51 = vsel %vm14115_vm14, %v1741_v17, %v1746_v25  ;;  %v1756_v43 = vsel %vm14115_vm14, %v1749_v13, %v1754_v41  ;;  %v1765_v12 = vshrl.u32 %v14101_v21, 16 }
  0x9b   :  { %5979 = vrot.lane.b32.xlu0 %v4874_v39, %s13734_s28  ;;  %v10967_v9 = vrot.slane %v10960_v38, %v13831_v5  ;;  %v1764_v62 = vsel %vm14115_vm14, %v1757_v34, %v1762_v31  ;;  %v1770_v42 = vshll.u32 %v14105_v27, 16  ;;  %v1773_v46 = vshrl.u32 %v14105_v27, 16 }
  0x9c   :  { %v1778_v35 = vshll.u32 %v14324_v58, 16  ;;  %v1782_v3 = vshrl.u32 %v14096_v7, 16  ;;  %v1787_v30 = vshll.u32 %v14108_v28, 16  ;;  %v1790_v16 = vshrl.u32 %v14108_v28, 16 }
  0x9d   :  { %v10968_v21 = vcombine.low %v14342_v24, %v10967_v9  ;;  %v1772_v45 = vsel %vm14115_vm14, %v1765_v12, %v1770_v42  ;;  %v1795_v48 = vshll.u32 %v14300_v40, 16  ;;  %v4878_v18 = vcombine.low %v14276_v2, %v1748_v51 }
  0x9e   :  { %v1780_v49 = vsel %vm14115_vm14, %v1773_v46, %v1778_v35  ;;  %v1789_v50 = vsel %vm14115_vm14, %v1782_v3, %v1787_v30  ;;  %v4924_v19 = vcombine.low %v1756_v43, %v1764_v62  ;;  %v6157_v15 = vcombine.low %v14075_v54, %v14078_v56  ;;  %v12981_v35 = vld.sshfl [vmem:[#allocation3 + $0x28] sm:$0x33 pattern:$0x75316420] }
  0x9f   :  { %11273 = vrot.lane.b32.xlu1 %v10968_v21, %s13742_s15  ;;  %v1797_v23 = vsel %vm14115_vm14, %v1790_v16, %v1795_v48  ;;  %v4906_v11 = vrot.slane %v4878_v18, %v13831_v5  ;;  %v4925_v0 = vcombine.low %v1772_v45, %v1780_v49  ;;  %v6158_v2 = vcombine.low %v14083_v59, %v6156_v6 }
  0xa0   :  { %v4926_v32 = vcombine.low %v1789_v50, %v1797_v23  ;;  %v14376_v17 = vrot.slane %v4924_v19, %v13831_v5  ;;  %v6165_v37 = vrot.slane %v6157_v15, %v13831_v5  ;;  %v4907_v25 = vcombine.low %v14267_v60, %v14271_v29 }
  0xa1   :  { %v14382_v54 = vrot.slane %v4925_v0, %v13831_v5  ;;  %v6172_v56 = vrot.slane %v6158_v2, %v13831_v5  ;;  %v4908_v13 = vcombine.low %v14280_v33, %v4906_v11  ;;  %v14388_v41 = vcombine.high %v14108_v28, %v14108_v28  ;;  %v12980_v33 = vld.sshfl [vmem:[#allocation3 + $0x24] sm:$0x33 pattern:$0x75316420] }
  0xa2   :  { %v14391_v59 = vrot.slane %v4926_v32, %v13831_v5  ;;  %v10390_v6 = vcombine.low %v4906_v11, %v14376_v17  ;;  %v4915_v39 = vrot.slane %v4907_v25, %v13831_v5  ;;  %v1798_v60 = vshrl.u32 %v14300_v40, 16 }
  0xa3   :  { %v6173_v29 = vcombine.low %v6165_v37, %v6172_v56  ;;  %v4922_v38 = vrot.slane %v4908_v13, %v13831_v5  ;;  %v1803_v34 = vshll.u32 %v14388_v41, 16  ;;  %v8113_v31 = vcombine.low %v1748_v51, %v1756_v43 }
  0xa4   :  { %v10391_v12 = vcombine.low %v14382_v54, %v14391_v59  ;;  %v10398_v9 = vrot.slane %v10390_v6, %v13831_v5  ;;  %v8114_v42 = vcombine.low %v1764_v62, %v1772_v45  ;;  %v8115_v46 = vcombine.low %v1780_v49, %v1789_v50 }
  0xa5   :  { %7231 = vrot.lane.b32.xlu1 %v6173_v29, %s13741_s14  ;;  %v4923_v3 = vcombine.low %v4915_v39, %v4922_v38  ;;  %v14404_v40 = vsel %vm14115_vm14, %v1798_v60, %v1803_v34  ;;  %v8123_v30 = vrot.slane %v8113_v31, %v13831_v5  ;;  %v7335_v51 = vcombine.low %v14105_v27, %v14096_v7 }
  0xa6   :  { %v10405_v43 = vrot.slane %v10391_v12, %v13831_v5  ;;  %v8116_v16 = vcombine.low %v1797_v23, %v14404_v40  ;;  %v8130_v62 = vrot.slane %v8114_v42, %v13831_v5  ;;  %v8137_v21 = vrot.slane %v8115_v46, %v13831_v5 }
  0xa7   :  { %v7342_v45 = vrot.slane %v7335_v51, %v13831_v5  ;;  %v413_v48 = vcombine.high %v12980_v33, %v12980_v33  ;;  %v14415_v18 = vrot.slane %v12980_v33, %v13831_v5  ;;  %v436_v49 = vcombine.high %v12981_v35, %v12981_v35 }
  0xa8   :  { %v10406_v50 = vcombine.low %v10398_v9, %v10405_v43  ;;  %v8144_v19 = vrot.slane %v8116_v16, %v13831_v5  ;;  %v8145_v15 = vcombine.low %v8123_v30, %v8130_v62  ;;  %v14419_v27 = vrot.slane %v12981_v35, %v13831_v5 }
  0xa9   :  { %v7344_v23 = vcombine.low %v7342_v45, %v14329_v47  ;;  %v14423_v11 = vrot.slane %v413_v48, %v13831_v5  ;;  %v14427_v0 = vcombine.high %v14415_v18, %v14415_v18  ;;  %v14430_v2 = vrot.slane %v436_v49, %v13831_v5 }
  0xaa   :  { %10903 = vrot.lane.b32.xlu0 %v10406_v50, %s13744_s17  ;;  %v8146_v32 = vcombine.low %v8137_v21, %v8144_v19  ;;  %v8153_v37 = vrot.slane %v8145_v15, %v13831_v5  ;;  %v14436_v25 = vcombine.high %v14419_v27, %v14419_v27  ;;  %v13261_v56 = vcombine.high %v14096_v7, %v14108_v28 }
  0xab   :  { %v7358_v13 = vrot.slane %v7344_v23, %v13831_v5  ;;  %v3773_v6 = vcombine.low %v14415_v18, %v14423_v11  ;;  %v3774_v39 = vcombine.low %v14427_v0, %v14419_v27  ;;  %v3756_v60 = vcombine.low %v14128_v52, %v14133_v1 }
  0xac   :  { %v8160_v29 = vrot.slane %v8146_v32, %v13831_v5  ;;  %v14449_v38 = vrot.slane %v13261_v56, %v13831_v5  ;;  %v3775_v34 = vcombine.low %v14430_v2, %v14436_v25  ;;  %v9299_v7 = vcombine.low %v14324_v58, %v14108_v28 }
  0xad   :  { %v7359_v31 = vcombine.low %v14342_v24, %v7358_v13  ;;  %v14457_v33 = vrot.slane %v3773_v6, %v13831_v5  ;;  %v14460_v12 = vrot.slane %v3774_v39, %v13831_v5  ;;  %v14463_v52 = vrot.slane %v3756_v60, %v13831_v5 }
  0xae   :  { %20468 = vst [vmem:[#allocation19_spill] sm:$0xff] %v14449_v38  ;;  %5981 = vrot.lane.b32.xlu0 %v4923_v3, %s13734_s28  ;;  %v8161_v1 = vcombine.low %v8153_v37, %v8160_v29  ;;  %v14467_v9 = vrot.slane %v3775_v34, %v13831_v5  ;;  %v9306_v42 = vrot.slane %v9299_v7, %v13831_v5  ;;  %v1806_v23 = vshrl.u32 %v14388_v41, 16 }
  0xaf   :  { %20469 = vst [vmem:[#allocation20_spill] sm:$0xff] %v14457_v33  ;;  %20470 = vst [vmem:[#allocation21_spill] sm:$0xff] %v14460_v12  ;;  %v1514_v28 = vcombine.high %v14423_v11, %v14423_v11  ;;  %v9861_v58 = vcombine.low %v14449_v38, %v14457_v33  ;;  %v6177_v24 = vcombine.low %v14388_v41, %v14415_v18  ;;  %v1811_v32 = vshll.u32 %v14415_v18, 16 }
  0xb0   :  { %20471 = vst [vmem:[#allocation22_spill] sm:$0xff] %v14463_v52  ;;  %v6223_v46 = vcombine.low %v14423_v11, %v14427_v0  ;;  %v13277_v35 = vcombine.high %v14419_v27, %v14430_v2  ;;  %9219 = vrot.lane.b32.xlu1 %v8161_v1, %s13743_s16  ;;  %v9862_v3 = vcombine.low %v14460_v12, %v14467_v9  ;;  %v1814_v37 = vshrl.u32 %v14415_v18, 16 }
  0xb1   :  { %v9307_v30 = vcombine.low %v9306_v42, %v14449_v38  ;;  %v1835_v51 = vshll.u32 %v1514_v28, 16  ;;  %v6224_v43 = vcombine.low %v1514_v28, %v14430_v2  ;;  %v9869_v16 = vrot.slane %v9861_v58, %v13831_v5 }
  0xb2   :  { %v6205_v62 = vrot.slane %v6177_v24, %v13831_v5  ;;  %v14488_v21 = vrot.slane %v6223_v46, %v13831_v5  ;;  %v14491_v45 = vrot.slane %v13277_v35, %v13831_v5  ;;  %7969 = vrot.lane.b32.xlu0 %v7359_v31, %s13739_s1  ;;  %v9876_v48 = vrot.slane %v9862_v3, %v13831_v5 }
  0xb3   :  { %v9314_v49 = vrot.slane %v9307_v30, %v13831_v5  ;;  %v14497_v50 = vrot.slane %v6224_v43, %v13831_v5  ;;  %v14501_v19 = vcombine.high %v14430_v2, %v14430_v2  ;;  %v1819_v39 = vshll.u32 %v14423_v11, 16 }
  0xb4   :  { %v7368_v15 = vcombine.low %v6205_v62, %v14488_v21  ;;  %v9877_v56 = vcombine.low %v9869_v16, %v9876_v48  ;;  %v1813_v29 = vsel %vm14115_vm14, %v1806_v23, %v1811_v32  ;;  %v1822_v41 = vshrl.u32 %v14423_v11, 16 }
  0xb5   :  { %v9315_v13 = vcombine.low %v14463_v52, %v9314_v49  ;;  %v10969_v6 = vcombine.low %v14497_v50, %v14491_v45  ;;  %v1827_v34 = vshll.u32 %v14427_v0, 16  ;;  %v1821_v31 = vsel %vm14115_vm14, %v1814_v37, %v1819_v39 }
  0xb6   :  { %v14512_v60 = vrot.slane %v7368_v15, %v13831_v5  ;;  %10327 = vrot.lane.b32.xlu1 %v9877_v56, %s13740_s13  ;;  %v1830_v1 = vshrl.u32 %v14427_v0, 16  ;;  %v1839_v42 = vshrl.u32 %v14419_v27, 16  ;;  %v1844_v58 = vshll.u32 %v14430_v2, 16 }
  0xb7   :  { %9781 = vrot.lane.b32.xlu0 %v9315_v13, %s13738_s3  ;;  %v10976_v7 = vrot.slane %v10969_v6, %v13831_v5  ;;  %v1829_v28 = vsel %vm14115_vm14, %v1822_v41, %v1827_v34  ;;  %v1847_v24 = vshrl.u32 %v14430_v2, 16  ;;  %v1852_v46 = vshll.u32 %v14436_v25, 16  ;;  %v12982_v15 = vld.sshfl [vmem:[#allocation3 + $0x2c] sm:$0x33 pattern:$0x75316420] }
  0xb8   :  { %v1837_v3 = vsel %vm14115_vm14, %v1830_v1, %v1835_v51  ;;  %v1855_v30 = vshrl.u32 %v14436_v25, 16  ;;  %v1860_v0 = vshll.u32 %v14501_v19, 16  ;;  %v1846_v43 = vsel %vm14115_vm14, %v1839_v42, %v1844_v58 }
  0xb9   :  { %v10977_v35 = vcombine.low %v14512_v60, %v10976_v7  ;;  %v1854_v16 = vsel %vm14115_vm14, %v1847_v24, %v1852_v46  ;;  %v4927_v48 = vcombine.low %v14404_v40, %v1813_v29  ;;  %v4973_v49 = vcombine.low %v1821_v31, %v1829_v28 }
  0xba   :  { %v1862_v23 = vsel %vm14115_vm14, %v1855_v30, %v1860_v0  ;;  %v4974_v51 = vcombine.low %v1837_v3, %v1846_v43  ;;  %v6206_v25 = vcombine.low %v14317_v8, %v14320_v61  ;;  %v6207_v32 = vcombine.low %v14329_v47, %v6205_v62 }
  0xbb   :  { %11275 = vrot.lane.b32.xlu1 %v10977_v35, %s13742_s15  ;;  %v4955_v37 = vrot.slane %v4927_v48, %v13831_v5  ;;  %v4975_v56 = vcombine.low %v1854_v16, %v1862_v23  ;;  %v14548_v13 = vrot.slane %v4973_v49, %v13831_v5  ;;  %v4956_v40 = vcombine.low %v14376_v17, %v14382_v54 }
  0xbc   :  { %v14553_v6 = vrot.slane %v4974_v51, %v13831_v5  ;;  %v6214_v39 = vrot.slane %v6206_v25, %v13831_v5  ;;  %v6221_v41 = vrot.slane %v6207_v32, %v13831_v5  ;;  %v14558_v8 = vrot.slane %v12982_v15, %v13831_v5 }
  0xbd   :  { %v14561_v61 = vrot.slane %v4975_v56, %v13831_v5  ;;  %v10407_v47 = vcombine.low %v4955_v37, %v14548_v13  ;;  %v4957_v62 = vcombine.low %v14391_v59, %v4955_v37  ;;  %v4964_v34 = vrot.slane %v4956_v40, %v13831_v5 }
  0xbe   :  { %v6222_v17 = vcombine.low %v6214_v39, %v6221_v41  ;;  %v1863_v54 = vshrl.u32 %v14501_v19, 16  ;;  %v1868_v7 = vshll.u32 %v14558_v8, 16  ;;  %v8162_v1 = vcombine.low %v1813_v29, %v1821_v31  ;;  %v12983_v31 = vld.sshfl [vmem:[#allocation3 + $0x30] sm:$0x33 pattern:$0x75316420] }
  0xbf   :  { %v10408_v42 = vcombine.low %v14553_v6, %v14561_v61  ;;  %v10415_v58 = vrot.slane %v10407_v47, %v13831_v5  ;;  %v4971_v24 = vrot.slane %v4957_v62, %v13831_v5  ;;  %v8163_v46 = vcombine.low %v1829_v28, %v1837_v3 }
  0xc0   :  { %7233 = vrot.lane.b32.xlu1 %v6222_v17, %s13741_s14  ;;  %v14575_v59 = vsel %vm14115_vm14, %v1863_v54, %v1868_v7  ;;  %v8164_v35 = vcombine.low %v1846_v43, %v1854_v16  ;;  %v8172_v30 = vrot.slane %v8162_v1, %v13831_v5  ;;  %v7360_v29 = vcombine.low %v14419_v27, %v14430_v2 }
  0xc1   :  { %v10422_v0 = vrot.slane %v10408_v42, %v13831_v5  ;;  %v4972_v48 = vcombine.low %v4964_v34, %v4971_v24  ;;  %v8165_v49 = vcombine.low %v1862_v23, %v14575_v59  ;;  %v8179_v28 = vrot.slane %v8163_v46, %v13831_v5 }
  0xc2   :  { %v8186_v3 = vrot.slane %v8164_v35, %v13831_v5  ;;  %v7367_v51 = vrot.slane %v7360_v29, %v13831_v5  ;;  %v460_v25 = vcombine.high %v12982_v15, %v12982_v15  ;;  %v14587_v43 = vcombine.high %v14558_v8, %v14558_v8 }
  0xc3   :  { %v10423_v16 = vcombine.low %v10415_v58, %v10422_v0  ;;  %v8193_v27 = vrot.slane %v8165_v49, %v13831_v5  ;;  %v8194_v2 = vcombine.low %v8172_v30, %v8179_v28  ;;  %v483_v32 = vcombine.high %v12983_v31, %v12983_v31 }
  0xc4   :  { %v7369_v37 = vcombine.low %v7367_v51, %v14491_v45  ;;  %v14592_v23 = vrot.slane %v460_v25, %v13831_v5  ;;  %v14595_v56 = vrot.slane %v12983_v31, %v13831_v5  ;;  %v3776_v15 = vcombine.low %v14501_v19, %v14558_v8 }
  0xc5   :  { %10905 = vrot.lane.b32.xlu0 %v10423_v16, %s13744_s17  ;;  %v8195_v40 = vcombine.low %v8186_v3, %v8193_v27  ;;  %v8202_v39 = vrot.slane %v8194_v2, %v13831_v5  ;;  %v14602_v41 = vrot.slane %v483_v32, %v13831_v5  ;;  %v13302_v47 = vcombine.high %v14415_v18, %v14423_v11  ;;  %v12984_v11 = vld.sshfl [vmem:[#allocation3 + $0x34] sm:$0x33 pattern:$0x75316420] }
  0xc6   :  { %v7383_v62 = vrot.slane %v7369_v37, %v13831_v5  ;;  %v3804_v34 = vrot.slane %v3776_v15, %v13831_v5  ;;  %v3822_v17 = vcombine.low %v14592_v23, %v14587_v43  ;;  %v14612_v19 = vcombine.high %v14595_v56, %v14595_v56 }
  0xc7   :  { %v8209_v54 = vrot.slane %v8195_v40, %v13831_v5  ;;  %v3823_v7 = vcombine.low %v14595_v56, %v14602_v41  ;;  %v13262_v1 = vcombine.high %v14595_v56, %v14602_v41  ;;  %v9323_v18 = vrot.slane %v13302_v47, %v13831_v5 }
  0xc8   :  { %v7384_v42 = vcombine.low %v14512_v60, %v7383_v62  ;;  %v14622_v58 = vrot.slane %v3822_v17, %v13831_v5  ;;  %v3806_v24 = vcombine.low %v14467_v9, %v3804_v34  ;;  %v499_v46 = vcombine.high %v14602_v41, %v14602_v41 }
  0xc9   :  { %5983 = vrot.lane.b32.xlu0 %v4972_v48, %s13734_s28  ;;  %v8210_v35 = vcombine.low %v8202_v39, %v8209_v54  ;;  %v14629_v30 = vrot.slane %v3823_v7, %v13831_v5  ;;  %v14632_v29 = vrot.slane %v13262_v1, %v13831_v5  ;;  %v9324_v31 = vcombine.low %v14457_v33, %v9323_v18 }
  0xca   :  { %20472 = vst [vmem:[#allocation23_spill] sm:$0xff] %v14622_v58  ;;  %v9878_v60 = vcombine.low %v3804_v34, %v14622_v58  ;;  %v14637_v0 = vrot.slane %v3806_v24, %v13831_v5  ;;  %v507_v9 = vcombine.high %v12984_v11, %v12984_v11  ;;  %v14640_v49 = vrot.slane %v12984_v11, %v13831_v5 }
  0xcb   :  { %20473 = vst [vmem:[#allocation24_spill] sm:$0xff] %v14629_v30  ;;  %9221 = vrot.lane.b32.xlu1 %v8210_v35, %s13743_s16  ;;  %v9879_v48 = vcombine.low %v14629_v30, %v14632_v29  ;;  %v9331_v28 = vrot.slane %v9324_v31, %v13831_v5  ;;  %v6226_v3 = vcombine.low %v14558_v8, %v14592_v23  ;;  %v1871_v34 = vshrl.u32 %v14558_v8, 16 }
  0xcc   :  { %20474 = vst [vmem:[#allocation25_spill] sm:$0xff] %v14637_v0  ;;  %v13278_v51 = vcombine.high %v14558_v8, %v14592_v23  ;;  %v9886_v25 = vrot.slane %v9878_v60, %v13831_v5  ;;  %v14652_v16 = vrot.slane %v507_v9, %v13831_v5  ;;  %v6273_v27 = vcombine.low %v14602_v41, %v14612_v19 }
  0xcd   :  { %v6274_v2 = vcombine.low %v499_v46, %v14640_v49  ;;  %7971 = vrot.lane.b32.xlu0 %v7384_v42, %s13739_s1  ;;  %v9893_v32 = vrot.slane %v9879_v48, %v13831_v5  ;;  %v9332_v37 = vcombine.low %v9331_v28, %v14637_v0  ;;  %v14661_v15 = vrot.slane %v6226_v3, %v13831_v5 }
  0xce   :  { %v14664_v40 = vrot.slane %v13278_v51, %v13831_v5  ;;  %v14667_v39 = vrot.slane %v6273_v27, %v13831_v5  ;;  %v14674_v62 = vcombine.high %v14592_v23, %v14592_v23  ;;  %v1876_v7 = vshll.u32 %v14592_v23, 16 }
  0xcf   :  { %v14670_v47 = vrot.slane %v6274_v2, %v13831_v5  ;;  %v9894_v17 = vcombine.low %v9886_v25, %v9893_v32  ;;  %v1879_v1 = vshrl.u32 %v14592_v23, 16  ;;  %v1884_v11 = vshll.u32 %v14587_v43, 16 }
  0xd0   :  { %v10978_v54 = vcombine.low %v14661_v15, %v14664_v40  ;;  %v1887_v42 = vshrl.u32 %v14587_v43, 16  ;;  %v1892_v24 = vshll.u32 %v14674_v62, 16  ;;  %v1878_v35 = vsel %vm14115_vm14, %v1871_v34, %v1876_v7 }
  0xd1   :  { %v7394_v18 = vcombine.low %v14667_v39, %v14670_v47  ;;  %10329 = vrot.lane.b32.xlu1 %v9894_v17, %s13740_s13  ;;  %9783 = vrot.lane.b32.xlu0 %v9332_v37, %s13738_s3  ;;  %v1896_v23 = vshrl.u32 %v14595_v56, 16  ;;  %v1901_v31 = vshll.u32 %v14602_v41, 16  ;;  %v1886_v9 = vsel %vm14115_vm14, %v1879_v1, %v1884_v11 }
  0xd2   :  { %v10985_v8 = vrot.slane %v10978_v54, %v13831_v5  ;;  %v1894_v48 = vsel %vm14115_vm14, %v1887_v42, %v1892_v24  ;;  %v1904_v28 = vshrl.u32 %v14602_v41, 16  ;;  %v1909_v51 = vshll.u32 %v14612_v19, 16 }
  0xd3   :  { %v14694_v60 = vrot.slane %v7394_v18, %v13831_v5  ;;  %v1903_v3 = vsel %vm14115_vm14, %v1896_v23, %v1901_v31  ;;  %v1912_v25 = vshrl.u32 %v14612_v19, 16  ;;  %v1917_v27 = vshll.u32 %v499_v46, 16 }
  0xd4   :  { %v1920_v32 = vshrl.u32 %v499_v46, 16  ;;  %v1925_v37 = vshll.u32 %v14640_v49, 16  ;;  %v4976_v34 = vcombine.low %v14575_v59, %v1878_v35  ;;  %v1911_v17 = vsel %vm14115_vm14, %v1904_v28, %v1909_v51 }
  0xd5   :  { %v10986_v2 = vcombine.low %v10985_v8, %v14694_v60  ;;  %v1919_v54 = vsel %vm14115_vm14, %v1912_v25, %v1917_v27  ;;  %v5022_v7 = vcombine.low %v1886_v9, %v1894_v48  ;;  %v6255_v1 = vcombine.low %v14488_v21, %v14497_v50 }
  0xd6   :  { %v1927_v19 = vsel %vm14115_vm14, %v1920_v32, %v1925_v37  ;;  %v5004_v46 = vrot.slane %v4976_v34, %v13831_v5  ;;  %v5023_v18 = vcombine.low %v1903_v3, %v1911_v17  ;;  %v6256_v59 = vcombine.low %v14491_v45, %v14661_v15 }
  0xd7   :  { %11277 = vrot.lane.b32.xlu1 %v10986_v2, %s13742_s15  ;;  %v5024_v11 = vcombine.low %v1919_v54, %v1927_v19  ;;  %v14721_v42 = vrot.slane %v5022_v7, %v13831_v5  ;;  %v6263_v24 = vrot.slane %v6255_v1, %v13831_v5  ;;  %v5005_v21 = vcombine.low %v14548_v13, %v14553_v6  ;;  %v12985_v7 = vld.sshfl [vmem:[#allocation3 + $0x38] sm:$0x33 pattern:$0x75316420] }
  0xd8   :  { %v14727_v50 = vrot.slane %v5023_v18, %v13831_v5  ;;  %v6270_v8 = vrot.slane %v6256_v59, %v13831_v5  ;;  %v5006_v23 = vcombine.low %v14561_v61, %v5004_v46  ;;  %v1928_v31 = vshrl.u32 %v14640_v49, 16 }
  0xd9   :  { %v14733_v45 = vrot.slane %v5024_v11, %v13831_v5  ;;  %v10424_v28 = vcombine.low %v5004_v46, %v14721_v42  ;;  %v5013_v51 = vrot.slane %v5005_v21, %v13831_v5  ;;  %v1933_v25 = vshll.u32 %v14652_v16, 16 }
  0xda   :  { %v6271_v27 = vcombine.low %v6263_v24, %v6270_v8  ;;  %v5020_v13 = vrot.slane %v5006_v23, %v13831_v5  ;;  %v8211_v6 = vcombine.low %v1878_v35, %v1886_v9  ;;  %v8212_v2 = vcombine.low %v1894_v48, %v1903_v3  ;;  %v12986_v9 = vld.sshfl [vmem:[#allocation3 + $0x3c] sm:$0x33 pattern:$0x75316420] }
  0xdb   :  { %v10425_v32 = vcombine.low %v14727_v50, %v14733_v45  ;;  %v10432_v61 = vrot.slane %v10424_v28, %v13831_v5  ;;  %v14744_v37 = vsel %vm14115_vm14, %v1928_v31, %v1933_v25  ;;  %v8213_v34 = vcombine.low %v1911_v17, %v1919_v54 }
  0xdc   :  { %7235 = vrot.lane.b32.xlu1 %v6271_v27, %s13741_s14  ;;  %v5021_v1 = vcombine.low %v5013_v51, %v5020_v13  ;;  %v8214_v46 = vcombine.low %v1927_v19, %v14744_v37  ;;  %v8221_v18 = vrot.slane %v8211_v6, %v13831_v5  ;;  %v8228_v35 = vrot.slane %v8212_v2, %v13831_v5 }
  0xdd   :  { %v10439_v48 = vrot.slane %v10425_v32, %v13831_v5  ;;  %v8235_v3 = vrot.slane %v8213_v34, %v13831_v5  ;;  %v7385_v59 = vcombine.low %v14587_v43, %v14595_v56  ;;  %v14756_v17 = vcombine.high %v14640_v49, %v14640_v49 }
  0xde   :  { %v8242_v54 = vrot.slane %v8214_v46, %v13831_v5  ;;  %v8243_v11 = vcombine.low %v8221_v18, %v8228_v35  ;;  %v530_v19 = vcombine.high %v12985_v7, %v12985_v7  ;;  %v14760_v24 = vrot.slane %v12985_v7, %v13831_v5 }
  0xdf   :  { %v10440_v21 = vcombine.low %v10432_v61, %v10439_v48  ;;  %v7392_v8 = vrot.slane %v7385_v59, %v13831_v5  ;;  %v14764_v23 = vrot.slane %v12986_v9, %v13831_v5  ;;  %v3825_v43 = vcombine.low %v14640_v49, %v14652_v16 }
  0xe0   :  { %v8244_v56 = vcombine.low %v8235_v3, %v8242_v54  ;;  %v8251_v31 = vrot.slane %v8243_v11, %v13831_v5  ;;  %v14770_v28 = vrot.slane %v530_v19, %v13831_v5  ;;  %v14774_v51 = vcombine.high %v14760_v24, %v14760_v24 }
  0xe1   :  { %10907 = vrot.lane.b32.xlu0 %v10440_v21, %s13744_s17  ;;  %v7393_v25 = vcombine.low %v14661_v15, %v7392_v8  ;;  %v3853_v27 = vrot.slane %v3825_v43, %v13831_v5  ;;  %v3871_v13 = vcombine.low %v14756_v17, %v14760_v24  ;;  %v9333_v6 = vcombine.low %v14674_v62, %v14602_v41 }
  0xe2   :  { %v8258_v2 = vrot.slane %v8244_v56, %v13831_v5  ;;  %v14786_v32 = vcombine.high %v14770_v28, %v14770_v28  ;;  %v3872_v61 = vcombine.low %v14770_v28, %v14774_v51  ;;  %v554_v34 = vcombine.high %v12986_v9, %v12986_v9 }
  0xe3   :  { %v7401_v15 = vrot.slane %v7393_v25, %v13831_v5  ;;  %v14792_v7 = vrot.slane %v3871_v13, %v13831_v5  ;;  %v3855_v46 = vcombine.low %v14632_v29, %v3853_v27  ;;  %v9340_v18 = vrot.slane %v9333_v6, %v13831_v5 }
  0xe4   :  { %v8259_v41 = vcombine.low %v8251_v31, %v8258_v2  ;;  %v3873_v62 = vcombine.low %v14786_v32, %v14764_v23  ;;  %v14799_v35 = vrot.slane %v3872_v61, %v13831_v5  ;;  %v14802_v48 = vrot.slane %v554_v34, %v13831_v5 }
  0xe5   :  { %20475 = vst [vmem:[#allocation26_spill] sm:$0xff] %v14792_v7  ;;  %5985 = vrot.lane.b32.xlu0 %v5021_v1, %s13734_s28  ;;  %v7409_v9 = vcombine.low %v7401_v15, %v14694_v60  ;;  %v9895_v3 = vcombine.low %v3853_v27, %v14792_v7  ;;  %v14808_v29 = vrot.slane %v3855_v46, %v13831_v5  ;;  %v1936_v43 = vshrl.u32 %v14652_v16, 16 }
  0xe6   :  { %20476 = vst [vmem:[#allocation27_spill] sm:$0xff] %v14799_v35  ;;  %v9341_v59 = vcombine.low %v14622_v58, %v9340_v18  ;;  %9223 = vrot.lane.b32.xlu1 %v8259_v41, %s13743_s16  ;;  %v14813_v54 = vrot.slane %v3873_v62, %v13831_v5  ;;  %v1516_v11 = vcombine.high %v14652_v16, %v14652_v16  ;;  %v1941_v61 = vshll.u32 %v14756_v17, 16 }
  0xe7   :  { %20477 = vst [vmem:[#allocation28_spill] sm:$0xff] %v14808_v29  ;;  %v6275_v1 = vcombine.low %v14652_v16, %v14756_v17  ;;  %v13279_v60 = vcombine.high %v14760_v24, %v14770_v28  ;;  %v9903_v19 = vrot.slane %v9895_v3, %v13831_v5  ;;  %v6323_v8 = vcombine.low %v14764_v23, %v14802_v48 }
  0xe8   :  { %v9348_v21 = vrot.slane %v9341_v59, %v13831_v5  ;;  %v9896_v56 = vcombine.low %v14799_v35, %v14813_v54  ;;  %v1949_v31 = vshll.u32 %v1516_v11, 16  ;;  %v6321_v27 = vcombine.low %v1516_v11, %v14770_v28 }
  0xe9   :  { %v14829_v25 = vrot.slane %v6275_v1, %v13831_v5  ;;  %7973 = vrot.lane.b32.xlu0 %v7409_v9, %s13739_s1  ;;  %v14835_v6 = vrot.slane %v13279_v60, %v13831_v5  ;;  %v14838_v2 = vrot.slane %v6323_v8, %v13831_v5  ;;  %v1944_v46 = vshrl.u32 %v14756_v17, 16 }
  0xea   :  { %v9349_v13 = vcombine.low %v9348_v21, %v14808_v29  ;;  %v9910_v34 = vrot.slane %v9896_v56, %v13831_v5  ;;  %v14843_v15 = vrot.slane %v6321_v27, %v13831_v5  ;;  %v1953_v18 = vshrl.u32 %v14760_v24, 16 }
  0xeb   :  { %v7419_v41 = vcombine.low %v14835_v6, %v14838_v2  ;;  %v1943_v62 = vsel %vm14115_vm14, %v1936_v43, %v1941_v61  ;;  %v1958_v9 = vshll.u32 %v14770_v28, 16  ;;  %v1961_v3 = vshrl.u32 %v14770_v28, 16 }
  0xec   :  { %v9911_v59 = vcombine.low %v9903_v19, %v9910_v34  ;;  %v10987_v11 = vcombine.low %v14829_v25, %v14843_v15  ;;  %v1951_v1 = vsel %vm14115_vm14, %v1944_v46, %v1949_v31  ;;  %v1966_v17 = vshll.u32 %v14774_v51, 16 }
  0xed   :  { %9785 = vrot.lane.b32.xlu0 %v9349_v13, %s13738_s3  ;;  %v14860_v60 = vrot.slane %v7419_v41, %v13831_v5  ;;  %v1960_v21 = vsel %vm14115_vm14, %v1953_v18, %v1958_v9  ;;  %v1969_v8 = vshrl.u32 %v14774_v51, 16  ;;  %v1974_v19 = vshll.u32 %v14786_v32, 16 }
  0xee   :  { %10331 = vrot.lane.b32.xlu1 %v9911_v59, %s13740_s13  ;;  %v10994_v43 = vrot.slane %v10987_v11, %v13831_v5  ;;  %v1968_v56 = vsel %vm14115_vm14, %v1961_v3, %v1966_v17  ;;  %v1977_v31 = vshrl.u32 %v14786_v32, 16  ;;  %v1982_v27 = vshll.u32 %v14764_v23, 16 }
  0xef   :  { %v1976_v13 = vsel %vm14115_vm14, %v1969_v8, %v1974_v19  ;;  %v1985_v61 = vshrl.u32 %v14764_v23, 16  ;;  %v1990_v51 = vshll.u32 %v14802_v48, 16  ;;  %v5025_v34 = vcombine.low %v14744_v37, %v1943_v62 }
  0xf0   :  { %v10995_v46 = vcombine.low %v10994_v43, %v14860_v60  ;;  %v1984_v18 = vsel %vm14115_vm14, %v1977_v31, %v1982_v27  ;;  %v5071_v41 = vcombine.low %v1951_v1, %v1960_v21  ;;  %v5072_v9 = vcombine.low %v1968_v56, %v1976_v13 }
  0xf1   :  { %v1992_v32 = vsel %vm14115_vm14, %v1985_v61, %v1990_v51  ;;  %v5053_v3 = vrot.slane %v5025_v34, %v13831_v5  ;;  %v6304_v59 = vcombine.low %v14664_v40, %v14667_v39  ;;  %v6305_v11 = vcombine.low %v14670_v47, %v14829_v25 }
  0xf2   :  { %11279 = vrot.lane.b32.xlu1 %v10995_v46, %s13742_s15  ;;  %v5073_v37 = vcombine.low %v1984_v18, %v1992_v32  ;;  %v14889_v17 = vrot.slane %v5071_v41, %v13831_v5  ;;  %v14892_v8 = vrot.slane %v5072_v9, %v13831_v5  ;;  %v5054_v19 = vcombine.low %v14721_v42, %v14727_v50 }
  0xf3   :  { %v6312_v43 = vrot.slane %v6304_v59, %v13831_v5  ;;  %v6319_v31 = vrot.slane %v6305_v11, %v13831_v5  ;;  %v5055_v40 = vcombine.low %v14733_v45, %v5053_v3  ;;  %v14901_v39 = vcombine.high %v14764_v23, %v14764_v23  ;;  %v12987_v45 = vld.sshfl [vmem:[#allocation3 + $0x40] sm:$0x33 pattern:$0x75316420] }
  0xf4   :  { %v14904_v47 = vrot.slane %v5073_v37, %v13831_v5  ;;  %v10441_v27 = vcombine.low %v5053_v3, %v14889_v17  ;;  %v5062_v61 = vrot.slane %v5054_v19, %v13831_v5  ;;  %v1993_v51 = vshrl.u32 %v14802_v48, 16  ;;  %v12988_v37 = vld.sshfl [vmem:[#allocation3 + $0x44] sm:$0x33 pattern:$0x75316420] }
  0xf5   :  { %v6320_v42 = vcombine.low %v6312_v43, %v6319_v31  ;;  %v5069_v50 = vrot.slane %v5055_v40, %v13831_v5  ;;  %v1998_v34 = vshll.u32 %v14901_v39, 16  ;;  %v8260_v46 = vcombine.low %v1943_v62, %v1951_v1 }
  0xf6   :  { %v10442_v41 = vcombine.low %v14892_v8, %v14904_v47  ;;  %v10449_v9 = vrot.slane %v10441_v27, %v13831_v5  ;;  %v8261_v59 = vcombine.low %v1960_v21, %v1968_v56  ;;  %v8262_v11 = vcombine.low %v1976_v13, %v1984_v18 }
  0xf7   :  { %7237 = vrot.lane.b32.xlu1 %v6320_v42, %s13741_s14  ;;  %v5070_v3 = vcombine.low %v5062_v61, %v5069_v50  ;;  %v14917_v19 = vsel %vm14115_vm14, %v1993_v51, %v1998_v34  ;;  %v8270_v43 = vrot.slane %v8260_v46, %v13831_v5  ;;  %v7410_v62 = vcombine.low %v14760_v24, %v14770_v28 }
  0xf8   :  { %v10456_v1 = vrot.slane %v10442_v41, %v13831_v5  ;;  %v8263_v31 = vcombine.low %v1992_v32, %v14917_v19  ;;  %v8277_v21 = vrot.slane %v8261_v59, %v13831_v5  ;;  %v8284_v56 = vrot.slane %v8262_v11, %v13831_v5 }
  0xf9   :  { %v7417_v13 = vrot.slane %v7410_v62, %v13831_v5  ;;  %v577_v18 = vcombine.high %v12987_v45, %v12987_v45  ;;  %v14928_v40 = vrot.slane %v12987_v45, %v13831_v5  ;;  %v601_v27 = vcombine.high %v12988_v37, %v12988_v37 }
  0xfa   :  { %v10457_v61 = vcombine.low %v10449_v9, %v10456_v1  ;;  %v8291_v51 = vrot.slane %v8263_v31, %v13831_v5  ;;  %v8292_v42 = vcombine.low %v8270_v43, %v8277_v21  ;;  %v14932_v24 = vrot.slane %v12988_v37, %v13831_v5 }
  0xfb   :  { %v7418_v28 = vcombine.low %v14829_v25, %v7417_v13  ;;  %v14936_v32 = vrot.slane %v577_v18, %v13831_v5  ;;  %v14939_v50 = vrot.slane %v601_v27, %v13831_v5  ;;  %v3874_v34 = vcombine.low %v14802_v48, %v14901_v39 }
  0xfc   :  { %10909 = vrot.lane.b32.xlu0 %v10457_v61, %s13744_s17  ;;  %v8293_v46 = vcombine.low %v8284_v56, %v8291_v51  ;;  %v8300_v45 = vrot.slane %v8292_v42, %v13831_v5  ;;  %v13303_v41 = vcombine.high %v14640_v49, %v14652_v16  ;;  %v592_v25 = vcombine.high %v14928_v40, %v14928_v40 }
  0xfd   :  { %v7426_v9 = vrot.slane %v7418_v28, %v13831_v5  ;;  %v3902_v59 = vrot.slane %v3874_v34, %v13831_v5  ;;  %v3920_v11 = vcombine.low %v14928_v40, %v14936_v32  ;;  %v13263_v37 = vcombine.high %v14928_v40, %v14936_v32 }
  0xfe   :  { %v8307_v43 = vrot.slane %v8293_v46, %v13831_v5  ;;  %v3922_v62 = vcombine.low %v14932_v24, %v14939_v50  ;;  %v9357_v49 = vrot.slane %v13303_v41, %v13831_v5  ;;  %v593_v16 = vcombine.high %v14936_v32, %v14936_v32 }
  0xff   :  { %v7434_v1 = vcombine.low %v7426_v9, %v14860_v60  ;;  %v14963_v31 = vrot.slane %v3920_v11, %v13831_v5  ;;  %v14966_v21 = vrot.slane %v13263_v37, %v13831_v5  ;;  %v3904_v56 = vcombine.low %v14813_v54, %v3902_v59 }
 0x100   :  { %5987 = vrot.lane.b32.xlu0 %v5070_v3, %s13734_s28  ;;  %v8308_v13 = vcombine.low %v8300_v45, %v8307_v43  ;;  %v14971_v18 = vrot.slane %v3922_v62, %v13831_v5  ;;  %v9358_v27 = vcombine.low %v9357_v49, %v14799_v35  ;;  %v14976_v61 = vcombine.high %v14932_v24, %v14932_v24 }
 0x101   :  { %20478 = vst [vmem:[#allocation29_spill] sm:$0xff] %v14963_v31  ;;  %20479 = vst [vmem:[#allocation30_spill] sm:$0xff] %v14966_v21  ;;  %v9912_v60 = vcombine.low %v3902_v59, %v14963_v31  ;;  %v14980_v51 = vrot.slane %v3904_v56, %v13831_v5  ;;  %v13280_v54 = vcombine.high %v14764_v23, %v14802_v48  ;;  %v2001_v49 = vshrl.u32 %v14901_v39, 16 }
 0x102   :  { %20480 = vst [vmem:[#allocation31_spill] sm:$0xff] %v14971_v18  ;;  %v6370_v3 = vcombine.low %v14936_v32, %v592_v25  ;;  %9225 = vrot.lane.b32.xlu1 %v8308_v13, %s13743_s16  ;;  %v9913_v42 = vcombine.low %v14966_v21, %v14971_v18  ;;  %v9365_v28 = vrot.slane %v9358_v27, %v13831_v5  ;;  %v2015_v27 = vshll.u32 %v14936_v32, 16 }
 0x103   :  { %20481 = vst [vmem:[#allocation32_spill] sm:$0xff] %v14980_v51  ;;  %v6371_v34 = vcombine.low %v593_v16, %v14932_v24  ;;  %v6372_v46 = vcombine.low %v14939_v50, %v14976_v61  ;;  %v9920_v45 = vrot.slane %v9912_v60, %v13831_v5  ;;  %v6352_v41 = vrot.slane %v13280_v54, %v13831_v5 }
 0x104   :  { %v14995_v23 = vrot.slane %v6370_v3, %v13831_v5  ;;  %v14999_v9 = vcombine.high %v14802_v48, %v14802_v48  ;;  %7975 = vrot.lane.b32.xlu0 %v7434_v1, %s13739_s1  ;;  %v9927_v59 = vrot.slane %v9913_v42, %v13831_v5  ;;  %v9366_v11 = vcombine.low %v9365_v28, %v14980_v51 }
 0x105   :  { %v15005_v37 = vrot.slane %v6371_v34, %v13831_v5  ;;  %v15008_v43 = vrot.slane %v6372_v46, %v13831_v5  ;;  %v2010_v48 = vshrl.u32 %v14928_v40, 16  ;;  %v2018_v60 = vshrl.u32 %v14936_v32, 16 }
 0x106   :  { %v10996_v62 = vcombine.low %v6352_v41, %v14995_v23  ;;  %v2006_v56 = vshll.u32 %v14999_v9, 16  ;;  %v9928_v13 = vcombine.low %v9920_v45, %v9927_v59  ;;  %v2023_v42 = vshll.u32 %v592_v25, 16 }
 0x107   :  { %v7444_v1 = vcombine.low %v15005_v37, %v15008_v43  ;;  %v2026_v28 = vshrl.u32 %v592_v25, 16  ;;  %v2017_v46 = vsel %vm14115_vm14, %v2010_v48, %v2015_v27  ;;  %v2031_v45 = vshll.u32 %v593_v16, 16 }
 0x108   :  { %v11003_v54 = vrot.slane %v10996_v62, %v13831_v5  ;;  %v2008_v3 = vsel %vm14115_vm14, %v2001_v49, %v2006_v56  ;;  %10333 = vrot.lane.b32.xlu1 %v9928_v13, %s13740_s13  ;;  %9787 = vrot.lane.b32.xlu0 %v9366_v11, %s13738_s3  ;;  %v2034_v59 = vshrl.u32 %v593_v16, 16  ;;  %v2025_v62 = vsel %vm14115_vm14, %v2018_v60, %v2023_v42 }
 0x109   :  { %v15024_v34 = vrot.slane %v7444_v1, %v13831_v5  ;;  %v2039_v31 = vshll.u32 %v14932_v24, 16  ;;  %v2042_v49 = vshrl.u32 %v14932_v24, 16  ;;  %v2047_v25 = vshll.u32 %v14939_v50, 16 }
 0x10a   :  { %v2033_v11 = vsel %vm14115_vm14, %v2026_v28, %v2031_v45  ;;  %v2050_v13 = vshrl.u32 %v14939_v50, 16  ;;  %v2055_v48 = vshll.u32 %v14976_v61, 16  ;;  %v5074_v27 = vcombine.low %v14917_v19, %v2008_v3 }
 0x10b   :  { %v11004_v56 = vcombine.low %v11003_v54, %v15024_v34  ;;  %v2041_v16 = vsel %vm14115_vm14, %v2034_v59, %v2039_v31  ;;  %v2049_v1 = vsel %vm14115_vm14, %v2042_v49, %v2047_v25  ;;  %v5120_v60 = vcombine.low %v2017_v46, %v2025_v62 }
 0x10c   :  { %v2057_v54 = vsel %vm14115_vm14, %v2050_v13, %v2055_v48  ;;  %v5121_v42 = vcombine.low %v2033_v11, %v2041_v16  ;;  %v6353_v28 = vcombine.low %v14843_v15, %v14835_v6  ;;  %v6354_v45 = vcombine.low %v14838_v2, %v6352_v41 }
 0x10d   :  { %11281 = vrot.lane.b32.xlu1 %v11004_v56, %s13742_s15  ;;  %v5102_v51 = vrot.slane %v5074_v27, %v13831_v5  ;;  %v5122_v31 = vcombine.low %v2049_v1, %v2057_v54  ;;  %v15051_v59 = vrot.slane %v5120_v60, %v13831_v5  ;;  %v5103_v19 = vcombine.low %v14889_v17, %v14892_v8 }
 0x10e   :  { %v15056_v49 = vrot.slane %v5121_v42, %v13831_v5  ;;  %v6361_v25 = vrot.slane %v6353_v28, %v13831_v5  ;;  %v6368_v56 = vrot.slane %v6354_v45, %v13831_v5  ;;  %v15062_v6 = vcombine.high %v14939_v50, %v14939_v50 }
 0x10f   :  { %v15065_v2 = vrot.slane %v5122_v31, %v13831_v5  ;;  %v10458_v15 = vcombine.low %v5102_v51, %v15051_v59  ;;  %v5104_v41 = vcombine.low %v14904_v47, %v5102_v51  ;;  %v5111_v17 = vrot.slane %v5103_v19, %v13831_v5  ;;  %v12989_v31 = vld.sshfl [vmem:[#allocation3 + $0x48] sm:$0x33 pattern:$0x75316420] }
 0x110   :  { %v6369_v8 = vcombine.low %v6361_v25, %v6368_v56  ;;  %v2058_v13 = vshrl.u32 %v14976_v61, 16  ;;  %v2063_v48 = vshll.u32 %v15062_v6, 16  ;;  %v8309_v27 = vcombine.low %v2008_v3, %v2017_v46  ;;  %v12990_v46 = vld.sshfl [vmem:[#allocation3 + $0x4c] sm:$0x33 pattern:$0x75316420] }
 0x111   :  { %v10459_v60 = vcombine.low %v15056_v49, %v15065_v2  ;;  %v10466_v42 = vrot.slane %v10458_v15, %v13831_v5  ;;  %v5118_v28 = vrot.slane %v5104_v41, %v13831_v5  ;;  %v8310_v45 = vcombine.low %v2025_v62, %v2033_v11 }
 0x112   :  { %7239 = vrot.lane.b32.xlu1 %v6369_v8, %s13741_s14  ;;  %v15079_v47 = vsel %vm14115_vm14, %v2058_v13, %v2063_v48  ;;  %v8311_v51 = vcombine.low %v2041_v16, %v2049_v1  ;;  %v8319_v19 = vrot.slane %v8309_v27, %v13831_v5  ;;  %v7435_v3 = vcombine.low %v14901_v39, %v14928_v40 }
 0x113   :  { %v10473_v25 = vrot.slane %v10459_v60, %v13831_v5  ;;  %v5119_v56 = vcombine.low %v5111_v17, %v5118_v28  ;;  %v8312_v15 = vcombine.low %v2057_v54, %v15079_v47  ;;  %v8326_v62 = vrot.slane %v8310_v45, %v13831_v5 }
 0x114   :  { %v8333_v11 = vrot.slane %v8311_v51, %v13831_v5  ;;  %v7442_v41 = vrot.slane %v7435_v3, %v13831_v5  ;;  %v624_v8 = vcombine.high %v12989_v31, %v12989_v31  ;;  %v15090_v16 = vrot.slane %v12989_v31, %v13831_v5 }
 0x115   :  { %v10474_v1 = vcombine.low %v10466_v42, %v10473_v25  ;;  %v8340_v13 = vrot.slane %v8312_v15, %v13831_v5  ;;  %v8341_v39 = vcombine.low %v8319_v19, %v8326_v62  ;;  %v648_v40 = vcombine.high %v12990_v46, %v12990_v46 }
 0x116   :  { %v7443_v48 = vcombine.low %v7442_v41, %v14995_v23  ;;  %v15095_v17 = vrot.slane %v624_v8, %v13831_v5  ;;  %v15099_v54 = vcombine.high %v15090_v16, %v15090_v16  ;;  %v15102_v27 = vrot.slane %v12990_v46, %v13831_v5 }
 0x117   :  { %10911 = vrot.lane.b32.xlu0 %v10474_v1, %s13744_s17  ;;  %v8342_v60 = vcombine.low %v8333_v11, %v8340_v13  ;;  %v8349_v42 = vrot.slane %v8341_v39, %v13831_v5  ;;  %v15107_v28 = vrot.slane %v648_v40, %v13831_v5  ;;  %v3923_v45 = vcombine.low %v14976_v61, %v15090_v16 }
 0x118   :  { %v7451_v31 = vrot.slane %v7443_v48, %v13831_v5  ;;  %v15114_v51 = vcombine.high %v15095_v17, %v15095_v17  ;;  %v15118_v19 = vcombine.high %v15102_v27, %v15102_v27  ;;  %v3969_v3 = vcombine.low %v15095_v17, %v15099_v54 }
 0x119   :  { %v8356_v46 = vrot.slane %v8342_v60, %v13831_v5  ;;  %v15124_v25 = vrot.slane %v3923_v45, %v13831_v5  ;;  %v9367_v61 = vcombine.low %v14999_v9, %v14936_v32  ;;  %v13304_v15 = vcombine.high %v14932_v24, %v14939_v50 }
 0x11a   :  { %v7459_v62 = vcombine.low %v7451_v31, %v15024_v34  ;;  %v3970_v11 = vcombine.low %v15114_v51, %v15102_v27  ;;  %v3971_v41 = vcombine.low %v15107_v28, %v15118_v19  ;;  %v15136_v8 = vrot.slane %v3969_v3, %v13831_v5 }
 0x11b   :  { %20482 = vst [vmem:[#allocation33_spill] sm:$0xff] %v15124_v25  ;;  %5989 = vrot.lane.b32.xlu0 %v5119_v56, %s13734_s28  ;;  %v8357_v1 = vcombine.low %v8349_v42, %v8356_v46  ;;  %v9375_v13 = vrot.slane %v9367_v61, %v13831_v5  ;;  %v9382_v32 = vrot.slane %v13304_v15, %v13831_v5  ;;  %vm11321_vm15 = vcmask 31744  }
 0x11c   :  { %v6373_v24 = vcombine.low %v15062_v6, %v15095_v17  ;;  %v15144_v50 = vrot.slane %v3970_v11, %v13831_v5  ;;  %v15147_v9 = vrot.slane %v3971_v41, %v13831_v5  ;;  %v9929_v34 = vcombine.low %v15124_v25, %v15136_v8 }
 0x11d   :  { %v13281_v56 = vcombine.high %v15090_v16, %v15095_v17  ;;  %9227 = vrot.lane.b32.xlu1 %v8357_v1, %s13743_s16  ;;  %v9383_v39 = vcombine.low %v9375_v13, %v14966_v21  ;;  %v9384_v40 = vcombine.low %v14971_v18, %v9382_v32  ;;  %v6420_v48 = vcombine.low %v15102_v27, %v15107_v28 }
 0x11e   :  { %20483 = vst [vmem:[#allocation34_spill] sm:$0xff] %v15147_v9  ;;  %v15157_v6 = vrot.slane %v6373_v24, %v13831_v5  ;;  %v9930_v60 = vcombine.low %v15144_v50, %v15147_v9  ;;  %v9937_v42 = vrot.slane %v9929_v34, %v13831_v5  ;;  %v13282_v45 = vcombine.high %v15102_v27, %v15107_v28 }
 0x11f   :  { %v15167_v31 = vrot.slane %v13281_v56, %v13831_v5  ;;  %7977 = vrot.lane.b32.xlu0 %v7459_v62, %s13739_s1  ;;  %v9391_v3 = vrot.slane %v9383_v39, %v13831_v5  ;;  %v9398_v46 = vrot.slane %v9384_v40, %v13831_v5  ;;  %v15173_v61 = vrot.slane %v6420_v48, %v13831_v5 }
 0x120   :  { %v15177_v15 = vcombine.high %v15107_v28, %v15107_v28  ;;  %v9944_v11 = vrot.slane %v9930_v60, %v13831_v5  ;;  %v15181_v41 = vrot.slane %v13282_v45, %v13831_v5  ;;  %v2067_v62 = vshrl.u32 %v15090_v16, 16 }
 0x121   :  { %v11005_v1 = vcombine.low %v15157_v6, %v15167_v31  ;;  %v9399_v13 = vcombine.low %v9391_v3, %v9398_v46  ;;  %v2072_v32 = vshll.u32 %v15095_v17, 16  ;;  %v2075_v24 = vshrl.u32 %v15095_v17, 16  ;;  %v13000_v46 = vld.sshfl [vmem:[#allocation3 + $0x84] sm:$0x33 pattern:$0x75316420] }
 0x122   :  { %20484 = vst [vmem:[#allocation35_spill] sm:$0xff] %v15181_v41  ;;  %v2080_v34 = vshll.u32 %v15099_v54, 16  ;;  %v9945_v56 = vcombine.low %v9937_v42, %v9944_v11  ;;  %v11006_v39 = vcombine.low %v15173_v61, %v15181_v41  ;;  %v2083_v48 = vshrl.u32 %v15099_v54, 16 }
 0x123   :  { %v11013_v40 = vrot.slane %v11005_v1, %v13831_v5  ;;  %9789 = vrot.lane.b32.xlu0 %v9399_v13, %s13738_s3  ;;  %v15196_v60 = vsel %vm14115_vm14, %v2067_v62, %v2072_v32  ;;  %v2088_v3 = vshll.u32 %v15114_v51, 16  ;;  %v2091_v42 = vshrl.u32 %v15114_v51, 16  ;;  %v13001_v11 = vld.sshfl [vmem:[#allocation3 + $0x88] sm:$0x33 pattern:$0x75316420] }
 0x124   :  { %v15200_v45 = vsel %vm14115_vm14, %v2075_v24, %v2080_v34  ;;  %10335 = vrot.lane.b32.xlu1 %v9945_v56, %s13740_s13  ;;  %v11020_v54 = vrot.slane %v11006_v39, %v13831_v5  ;;  %v2096_v1 = vshll.u32 %v15102_v27, 16  ;;  %v2099_v13 = vshrl.u32 %v15102_v27, 16 }
 0x125   :  { %v2104_v62 = vshll.u32 %v15107_v28, 16  ;;  %v15211_v32 = vsel %vm14115_vm14, %v2083_v48, %v2088_v3  ;;  %v2107_v24 = vshrl.u32 %v15107_v28, 16  ;;  %v2112_v51 = vshll.u32 %v15118_v19, 16 }
 0x126   :  { %v2115_v34 = vshrl.u32 %v15118_v19, 16  ;;  %v11021_v18 = vcombine.low %v11013_v40, %v11020_v54  ;;  %v15218_v56 = vsel %vm14115_vm14, %v2091_v42, %v2096_v1  ;;  %v2120_v39 = vshll.u32 %v15177_v15, 16  ;;  %v13002_v54 = vld.sshfl [vmem:[#allocation3 + $0x8c] sm:$0x33 pattern:$0x75316420] }
 0x127   :  { %v15222_v27 = vsel %vm14115_vm14, %v2099_v13, %v2104_v62  ;;  %v15227_v48 = vsel %vm14115_vm14, %v2107_v24, %v2112_v51  ;;  %v5123_v28 = vcombine.low %v15079_v47, %v15196_v60  ;;  %v5169_v40 = vcombine.low %v15200_v45, %v15211_v32 }
 0x128   :  { %v5170_v3 = vcombine.low %v15218_v56, %v15222_v27  ;;  %11283 = vrot.lane.b32.xlu1 %v11021_v18, %s13742_s15  ;;  %v15238_v42 = vsel %vm14115_vm14, %v2115_v34, %v2120_v39  ;;  %v883_v1 = vcombine.high %v13000_v46, %v13000_v46  ;;  %v15241_v13 = vrot.slane %v13000_v46, %v13831_v5  ;;  %v13003_v34 = vld.sshfl [vmem:[#allocation3 + $0x90] sm:$0x33 pattern:$0x75316420] }
 0x129   :  { %v906_v62 = vcombine.high %v13001_v11, %v13001_v11  ;;  %v15244_v47 = vrot.slane %v5123_v28, %v13831_v5  ;;  %v5171_v24 = vcombine.low %v15227_v48, %v15238_v42  ;;  %v15249_v51 = vrot.slane %v5169_v40, %v13831_v5 }
 0x12a   :  { %20485 = vst [vmem:[#allocation36_spill] sm:$0xff] %v15241_v13  ;;  %v15252_v18 = vrot.slane %v5170_v3, %v13831_v5  ;;  %v15255_v39 = vrot.slane %v883_v1, %v13831_v5  ;;  %v15259_v46 = vcombine.high %v15241_v13, %v15241_v13  ;;  %v15262_v28 = vrot.slane %v13001_v11, %v13831_v5 }
 0x12b   :  { %20486 = vst [vmem:[#allocation37_spill] sm:$0xff] %v15249_v51  ;;  %v15265_v25 = vrot.slane %v906_v62, %v13831_v5  ;;  %v15268_v40 = vrot.slane %v5171_v24, %v13831_v5  ;;  %v10475_v3 = vcombine.low %v15244_v47, %v15249_v51  ;;  %v930_v21 = vcombine.high %v13002_v54, %v13002_v54 }
 0x12c   :  { %20487 = vst [vmem:[#allocation38_spill] sm:$0xff] %v15255_v39  ;;  %20488 = vst [vmem:[#allocation39_spill] sm:$0xff] %v15259_v46  ;;  %v15273_v1 = vrot.slane %v13002_v54, %v13831_v5  ;;  %v15277_v13 = vcombine.high %v15262_v28, %v15262_v28  ;;  %v953_v62 = vcombine.high %v13003_v34, %v13003_v34  ;;  %v2409_v0 = vshrl.u32 %v15262_v28, 16 }
 0x12d   :  { %20489 = vst [vmem:[#allocation40_spill] sm:$0xff] %v15262_v28  ;;  %20490 = vst [vmem:[#allocation41_spill] sm:$0xff] %v15265_v25  ;;  %v15281_v11 = vcombine.high %v15265_v25, %v15265_v25  ;;  %v15284_v7 = vrot.slane %v13003_v34, %v13831_v5  ;;  %v10476_v24 = vcombine.low %v15252_v18, %v15268_v40  ;;  %v2400_v34 = vshrl.u32 %v15259_v46, 16 }
 0x12e   :  { %20491 = vst [vmem:[#allocation42_spill] sm:$0xff] %v15268_v40  ;;  %20492 = vst [vmem:[#allocation43_spill] sm:$0xff] %v15273_v1  ;;  %v10483_v35 = vrot.slane %v10475_v3, %v13831_v5  ;;  %v15290_v54 = vrot.slane %v930_v21, %v13831_v5  ;;  %v15294_v29 = vcombine.high %v15273_v1, %v15273_v1  ;;  %v2414_v3 = vshll.u32 %v15265_v25, 16 }
 0x12f   :  { %20493 = vst [vmem:[#allocation44_spill] sm:$0xff] %v15277_v13  ;;  %20494 = vst [vmem:[#allocation45_spill] sm:$0xff] %v15281_v11  ;;  %v15297_v58 = vrot.slane %v953_v62, %v13831_v5  ;;  %v1524_v30 = vcombine.high %v15255_v39, %v15255_v39  ;;  %v10490_v33 = vrot.slane %v10476_v24, %v13831_v5  ;;  %v2417_v12 = vshrl.u32 %v15265_v25, 16 }
 0x130   :  { %20495 = vst [vmem:[#allocation46_spill] sm:$0xff] %v15284_v7  ;;  %20496 = vst [vmem:[#allocation47_spill] sm:$0xff] %v15290_v54  ;;  %v15306_v21 = vcombine.high %v15290_v54, %v15290_v54  ;;  %v2422_v62 = vshll.u32 %v15277_v13, 16  ;;  %v2425_v38 = vshrl.u32 %v15277_v13, 16  ;;  %v2430_v39 = vshll.u32 %v15281_v11, 16 }
 0x131   :  { %20497 = vst [vmem:[#allocation48_spill] sm:$0xff] %v15294_v29  ;;  %20498 = vst [vmem:[#allocation49_spill] sm:$0xff] %v15297_v58  ;;  %v2405_v52 = vshll.u32 %v1524_v30, 16  ;;  %v10491_v46 = vcombine.low %v10483_v35, %v10490_v33  ;;  %v15315_v41 = vsel %vm14115_vm14, %v2409_v0, %v2414_v3  ;;  %v2433_v24 = vshrl.u32 %v15281_v11, 16 }
 0x132   :  { %20499 = vst [vmem:[#allocation50_spill] sm:$0xff] %v15315_v41  ;;  %v2438_v57 = vshll.u32 %v15273_v1, 16  ;;  %v15323_v40 = vsel %vm14115_vm14, %v2417_v12, %v2422_v62  ;;  %v15327_v13 = vsel %vm14115_vm14, %v2425_v38, %v2430_v39  ;;  %v2441_v33 = vshrl.u32 %v15273_v1, 16 }
 0x133   :  { %v2407_v53 = vsel %vm14115_vm14, %v2400_v34, %v2405_v52  ;;  %20500 = vst [vmem:[#allocation51_spill] sm:$0xff] %v15323_v40  ;;  %20501 = vst [vmem:[#allocation52_spill] sm:$0xff] %v15327_v13  ;;  %10913 = vrot.lane.b32.xlu0 %v10491_v46, %s13744_s17  ;;  %v2446_v35 = vshll.u32 %v15290_v54, 16  ;;  %v2449_v52 = vshrl.u32 %v15290_v54, 16  ;;  %v2454_v34 = vshll.u32 %v15294_v29, 16 }
 0x134   :  { %v15333_v0 = vsel %vm14115_vm14, %v2433_v24, %v2438_v57  ;;  %v2457_v12 = vshrl.u32 %v15294_v29, 16  ;;  %v2462_v3 = vshll.u32 %v15306_v21, 16  ;;  %v2466_v38 = vshrl.u32 %v15284_v7, 16 }
 0x135   :  { %20502 = vst [vmem:[#allocation53_spill] sm:$0xff] %v15333_v0  ;;  %v2471_v39 = vshll.u32 %v15297_v58, 16  ;;  %v15344_v46 = vsel %vm14115_vm14, %v2441_v33, %v2446_v35  ;;  %v15348_v57 = vsel %vm14115_vm14, %v2449_v52, %v2454_v34  ;;  %v5414_v62 = vcombine.low %v2407_v53, %v15315_v41 }
 0x136   :  { %20503 = vst [vmem:[#allocation54_spill] sm:$0xff] %v15344_v46  ;;  %20504 = vst [vmem:[#allocation55_spill] sm:$0xff] %v15348_v57  ;;  %v5415_v24 = vcombine.low %v15323_v40, %v15327_v13  ;;  %v15355_v11 = vsel %vm14115_vm14, %v2457_v12, %v2462_v3  ;;  %v5416_v33 = vcombine.low %v15333_v0, %v15344_v46  ;;  %vm11397_vm0 = vcmask 64512  }
 0x137   :  { %v15359_v51 = vsel %vm14115_vm14, %v2466_v38, %v2471_v39  ;;  %v5417_v53 = vcombine.low %v15348_v57, %v15355_v11  ;;  %v5424_v52 = vrot.slane %v5414_v62, %v13831_v5  ;;  %v5152_v35 = vcombine.low %v15051_v59, %v15056_v49 }
 0x138   :  { %v5431_v34 = vrot.slane %v5415_v24, %v13831_v5  ;;  %v5438_v3 = vrot.slane %v5416_v33, %v13831_v5  ;;  %v5153_v62 = vcombine.low %v15065_v2, %v15244_v47  ;;  %v6664_v24 = vcombine.low %v1524_v30, %v15265_v25 }
 0x139   :  { %v5445_v40 = vrot.slane %v5417_v53, %v13831_v5  ;;  %v5160_v12 = vrot.slane %v5152_v35, %v13831_v5  ;;  %v13287_v33 = vcombine.high %v15262_v28, %v15265_v25  ;;  %v6666_v38 = vcombine.low %v15273_v1, %v15290_v54 }
 0x13a   :  { %v5446_v41 = vcombine.low %v5424_v52, %v5431_v34  ;;  %v13288_v39 = vcombine.high %v15273_v1, %v15290_v54  ;;  %v5167_v53 = vrot.slane %v5153_v62, %v13831_v5  ;;  %v6674_v2 = vrot.slane %v6664_v24, %v13831_v5  ;;  %v13004_v34 = vld.sshfl [vmem:[#allocation3 + $0x94] sm:$0x33 pattern:$0x75316420] }
 0x13b   :  { %v5447_v59 = vcombine.low %v5438_v3, %v5445_v40  ;;  %v15393_v30 = vrot.slane %v13287_v33, %v13831_v5  ;;  %v15396_v47 = vrot.slane %v6666_v38, %v13831_v5  ;;  %v6402_v52 = vcombine.low %v14995_v23, %v15005_v37 }
 0x13c   :  { %v5454_v49 = vrot.slane %v5446_v41, %v13831_v5  ;;  %v6695_v35 = vrot.slane %v13288_v39, %v13831_v5  ;;  %v5168_v3 = vcombine.low %v5160_v12, %v5167_v53  ;;  %v6403_v41 = vcombine.low %v15008_v43, %v15157_v6  ;;  %v12991_v6 = vld.sshfl [vmem:[#allocation3 + $0x50] sm:$0x33 pattern:$0x75316420] }
 0x13d   :  { %20505 = vst [vmem:[#allocation56_spill] sm:$0xff] %v15393_v30  ;;  %20506 = vst [vmem:[#allocation57_spill] sm:$0xff] %v15396_v47  ;;  %v5461_v40 = vrot.slane %v5447_v59, %v13831_v5  ;;  %v968_v62 = vcombine.high %v15284_v7, %v15284_v7  ;;  %v6696_v24 = vcombine.low %v6674_v2, %v15393_v30  ;;  %vm11448_vm1 = vcmask 97280  }
 0x13e   :  { %v6697_v38 = vcombine.low %v15396_v47, %v6695_v35  ;;  %v6410_v33 = vrot.slane %v6402_v52, %v13831_v5  ;;  %v969_v39 = vcombine.high %v15297_v58, %v15297_v58  ;;  %5991 = vrot.lane.b32.xlu0 %v5168_v3, %s13734_s28  ;;  %v6417_v37 = vrot.slane %v6403_v41, %v13831_v5 }
 0x13f   :  { %v5462_v23 = vcombine.low %v5454_v49, %v5461_v40  ;;  %v977_v12 = vcombine.high %v13004_v34, %v13004_v34  ;;  %v15414_v43 = vrot.slane %v13004_v34, %v13831_v5  ;;  %v6704_v59 = vrot.slane %v6696_v24, %v13831_v5 }
 0x140   :  { %v6711_v53 = vrot.slane %v6697_v38, %v13831_v5  ;;  %v6713_v2 = vcombine.low %v15297_v58, %v968_v62  ;;  %v7642_v35 = vcombine.low %v15294_v29, %v15284_v7  ;;  %v6418_v49 = vcombine.low %v6410_v33, %v6417_v37 }
 0x141   :  { %6003 = vrot.lane.b32.xlu1 %v5462_v23, %s13734_s28  ;;  %v15423_v52 = vrot.slane %v977_v12, %v13831_v5  ;;  %v15427_v34 = vcombine.high %v15414_v43, %v15414_v43  ;;  %v6714_v40 = vcombine.low %v969_v39, %v15414_v43  ;;  %v671_v38 = vcombine.high %v12991_v6, %v12991_v6 }
 0x142   :  { %v6712_v3 = vcombine.low %v6704_v59, %v6711_v53  ;;  %v15431_v41 = vrot.slane %v6713_v2, %v13831_v5  ;;  %v7649_v24 = vrot.slane %v7642_v35, %v13831_v5  ;;  %7241 = vrot.lane.b32.xlu0 %v6418_v49, %s13741_s14  ;;  %v15441_v37 = vrot.slane %v12991_v6, %v13831_v5 }
 0x143   :  { %v6715_v33 = vcombine.low %v15423_v52, %v15427_v34  ;;  %v15438_v23 = vrot.slane %v6714_v40, %v13831_v5  ;;  %v7460_v12 = vcombine.low %v15090_v16, %v15095_v17  ;;  %v15447_v53 = vrot.slane %v671_v38, %v13831_v5  ;;  %v15461_v40 = vpop.permute.xlu0 %9779 }
 0x144   :  { %20507 = vst [vmem:[#allocation58_spill] sm:$0xff] %v15431_v41  ;;  %v7650_v59 = vcombine.low %v7649_v24, %v15431_v41  ;;  %v15451_v2 = vcombine.high %v15423_v52, %v15423_v52  ;;  %v2474_v35 = vshrl.u32 %v15297_v58, 16  ;;  %v7461_v6 = vcombine.low %v15118_v19, %v15441_v37  ;;  %v15463_v24 = vpop.permute.xlu1 %7965 }
 0x145   :  { %7253 = vrot.lane.b32.xlu1 %v6712_v3, %s13741_s14  ;;  %v15456_v49 = vrot.slane %v6715_v33, %v13831_v5  ;;  %v7468_v16 = vrot.slane %v7460_v12, %v13831_v5  ;;  %v2479_v17 = vshll.u32 %v968_v62, 16  ;;  %v2482_v57 = vshrl.u32 %v968_v62, 16 }
 0x146   :  { %v7658_v38 = vrot.slane %v7650_v59, %v13831_v5  ;;  %v2487_v46 = vshll.u32 %v969_v39, 16  ;;  %v2490_v0 = vshrl.u32 %v969_v39, 16  ;;  %v7475_v33 = vrot.slane %v7461_v6, %v13831_v5 }
 0x147   :  { %v7651_v3 = vcombine.low %v15438_v23, %v15456_v49  ;;  %v7476_v13 = vcombine.low %v7468_v16, %v15167_v31  ;;  %v15472_v19 = vsel %vm14115_vm14, %v2474_v35, %v2479_v17  ;;  %v2495_v59 = vshll.u32 %v15414_v43, 16 }
 0x148   :  { %v15476_v12 = vsel %vm14115_vm14, %v2482_v57, %v2487_v46  ;;  %v2498_v62 = vshrl.u32 %v15414_v43, 16  ;;  %v2503_v39 = vshll.u32 %v15423_v52, 16  ;;  %v7477_v6 = vcombine.low %v15173_v61, %v7475_v33  ;;  %v15502_v29 = vpop.permute.xlu1 %10323 }
 0x149   :  { %v15482_v30 = vrot.slane %v7651_v3, %v13831_v5  ;;  %v7484_v16 = vrot.slane %v7476_v13, %v13831_v5  ;;  %v2506_v35 = vshrl.u32 %v15423_v52, 16  ;;  %v15489_v17 = vsel %vm14115_vm14, %v2490_v0, %v2495_v59  ;;  %v15504_v0 = vpop.permute.xlu0 %7227 }
 0x14a   :  { %v15493_v46 = vsel %vm14115_vm14, %v2498_v62, %v2503_v39  ;;  %v2511_v57 = vshll.u32 %v15427_v34, 16  ;;  %v2514_v47 = vshrl.u32 %v15427_v34, 16  ;;  %v7491_v33 = vrot.slane %v7477_v6, %v13831_v5 }
 0x14b   :  { %20508 = vst [vmem:[#allocation59_spill] sm:$0xff] %v15482_v30  ;;  %v7666_v3 = vcombine.low %v7658_v38, %v15482_v30  ;;  %v2519_v13 = vshll.u32 %v15451_v2, 16  ;;  %v8653_v54 = vcombine.low %v15472_v19, %v15476_v12  ;;  %v8654_v62 = vcombine.low %v15489_v17, %v15493_v46 }
 0x14c   :  { %v15508_v59 = vsel %vm14115_vm14, %v2506_v35, %v2511_v57  ;;  %v20509_v38 = vcombine.low %v15355_v11, %v15359_v51  ;;  %v2124_v6 = vshrl.u32 %v15441_v37, 16  ;;  %v7492_v30 = vcombine.low %v7484_v16, %v7491_v33 }
 0x14d   :  { %7991 = vrot.lane.b32.xlu1 %v7666_v3, %s13739_s1  ;;  %v15520_v1 = vsel %vm14115_vm14, %v2514_v47, %v2519_v13  ;;  %v8669_v35 = vrot.slane %v8653_v54, %v13831_v5  ;;  %v2129_v57 = vshll.u32 %v15447_v53, 16  ;;  %v8676_v28 = vrot.slane %v8654_v62, %v13831_v5 }
 0x14e   :  { %v8662_v39 = vrot.slane %v20509_v38, %v13831_v5  ;;  %v8655_v25 = vcombine.low %v15508_v59, %v15520_v1  ;;  %v8358_v11 = vcombine.low %v15196_v60, %v15200_v45  ;;  %v8359_v3 = vcombine.low %v15211_v32, %v15218_v56  ;;  %7979 = vrot.lane.b32.xlu0 %v7492_v30, %s13739_s1 }
 0x14f   :  { %v15534_v47 = vsel %vm14115_vm14, %v2124_v6, %v2129_v57  ;;  %v8360_v54 = vcombine.low %v15222_v27, %v15227_v48  ;;  %v13267_v33 = vcombine.high %v15284_v7, %v15297_v58  ;;  %v4265_v62 = vcombine.low %v15414_v43, %v15423_v52  ;;  %v15552_v48 = vpop.permute.xlu1 %7229 }
 0x150   :  { %v8684_v16 = vcombine.low %v8662_v39, %v8669_v35  ;;  %v8683_v13 = vrot.slane %v8655_v25, %v13831_v5  ;;  %v8361_v60 = vcombine.low %v15238_v42, %v15534_v47  ;;  %v8368_v45 = vrot.slane %v8358_v11, %v13831_v5  ;;  %v15554_v25 = vpop.permute.xlu0 %9777 }
 0x151   :  { %v8375_v32 = vrot.slane %v8359_v3, %v13831_v5  ;;  %v8382_v30 = vrot.slane %v8360_v54, %v13831_v5  ;;  %v15550_v27 = vrot.slane %v13267_v33, %v13831_v5  ;;  %v9526_v6 = vcombine.low %v15306_v21, %v15297_v58 }
 0x152   :  { %v8692_v56 = vrot.slane %v8684_v16, %v13831_v5  ;;  %v8685_v38 = vcombine.low %v8676_v28, %v8683_v13  ;;  %v8389_v42 = vrot.slane %v8361_v60, %v13831_v5  ;;  %v15560_v35 = vrot.slane %v4265_v62, %v13831_v5 }
 0x153   :  { %20510 = vst [vmem:[#allocation60_spill] sm:$0xff] %v15550_v27  ;;  %v8390_v39 = vcombine.low %v8368_v45, %v8375_v32  ;;  %v13309_v57 = vcombine.high %v15414_v43, %v15423_v52  ;;  %v4001_v11 = vcombine.low %v15136_v8, %v15144_v50  ;;  %v9400_v3 = vcombine.low %v15177_v15, %v15447_v53 }
 0x154   :  { %20511 = vst [vmem:[#allocation61_spill] sm:$0xff] %v15560_v35  ;;  %v8699_v28 = vrot.slane %v8685_v38, %v13831_v5  ;;  %v8391_v16 = vcombine.low %v8382_v30, %v8389_v42  ;;  %v9534_v33 = vrot.slane %v9526_v6, %v13831_v5  ;;  %v3577_v8 = vcombine.low %v13925_v63, %v13931_v4  ;;  %v13005_v38 = vld.sshfl [vmem:[#allocation3 + $0x98] sm:$0x33 pattern:$0x75316420]  ;;  %v15589_v42 = vpop.permute.xlu1 %11271 }
 0x155   :  { %v8398_v54 = vrot.slane %v8390_v39, %v13831_v5  ;;  %v9541_v21 = vrot.slane %v13309_v57, %v13831_v5  ;;  %v15573_v13 = vrot.slane %v4001_v11, %v13831_v5  ;;  %v9407_v43 = vrot.slane %v9400_v3, %v13831_v5  ;;  %v15591_v39 = vpop.permute.xlu0 %7967 }
 0x156   :  { %v8700_v50 = vcombine.low %v8692_v56, %v8699_v28  ;;  %v8405_v15 = vrot.slane %v8391_v16, %v13831_v5  ;;  %v9542_v52 = vcombine.low %v9534_v33, %v15550_v27  ;;  %v13259_v60 = vcombine.high %v13925_v63, %v13931_v4  ;;  %v12992_v28 = vld.sshfl [vmem:[#allocation3 + $0x54] sm:$0x33 pattern:$0x75316420] }
 0x157   :  { %20512 = vst [vmem:[#allocation62_spill] sm:$0xff] %v15573_v13  ;;  %v9543_v45 = vcombine.low %v15560_v35, %v9541_v21  ;;  %v9408_v32 = vcombine.low %v15147_v9, %v9407_v43  ;;  %v3579_v30 = vcombine.low %v13940_v10, %v13955_v20  ;;  %v3580_v62 = vcombine.low %v13961_v26, %v13857_v22  ;;  %v13006_v26 = vld.sshfl [vmem:[#allocation3 + $0x9c] sm:$0x33 pattern:$0x75316420] }
 0x158   :  { %9241 = vrot.lane.b32.xlu1 %v8700_v50, %s13743_s16  ;;  %v8406_v56 = vcombine.low %v8398_v54, %v8405_v15  ;;  %v9550_v63 = vrot.slane %v9542_v52, %v13831_v5  ;;  %v3587_v4 = vrot.slane %v3577_v8, %v13831_v5  ;;  %v3594_v6 = vrot.slane %v13259_v60, %v13831_v5 }
 0x159   :  { %v9557_v57 = vrot.slane %v9543_v45, %v13831_v5  ;;  %v9415_v10 = vrot.slane %v9408_v32, %v13831_v5  ;;  %v3601_v22 = vrot.slane %v3579_v30, %v13831_v5  ;;  %v3608_v20 = vrot.slane %v3580_v62, %v13831_v5  ;;  %v12993_v32 = vld.sshfl [vmem:[#allocation3 + $0x58] sm:$0x33 pattern:$0x75316420]  ;;  %v15621_v62 = vpop.permute.xlu1 %10325 }
 0x15a   :  { %9229 = vrot.lane.b32.xlu0 %v8406_v56, %s13743_s16  ;;  %v3609_v11 = vcombine.low %v3587_v4, %v3594_v6  ;;  %v1000_v3 = vcombine.high %v13005_v38, %v13005_v38  ;;  %v15603_v21 = vrot.slane %v13005_v38, %v13831_v5  ;;  %v1024_v50 = vcombine.high %v13006_v26, %v13006_v26  ;;  %v5978_v38 = vpop.permute.xlu0 %5977 }
 0x15b   :  { %v9558_v16 = vcombine.low %v9550_v63, %v9557_v57  ;;  %v9416_v54 = vcombine.low %v15573_v13, %v9415_v10  ;;  %v3610_v33 = vcombine.low %v3601_v22, %v3608_v20  ;;  %v15610_v15 = vrot.slane %v13006_v26, %v13831_v5 }
 0x15c   :  { %v3617_v43 = vrot.slane %v3609_v11, %v13831_v5  ;;  %v15607_v8 = vrot.slane %v1000_v3, %v13831_v5  ;;  %v15616_v60 = vcombine.high %v15603_v21, %v15603_v21  ;;  %v4266_v45 = vcombine.low %v15427_v34, %v15603_v21 }
 0x15d   :  { %9803 = vrot.lane.b32.xlu1 %v9558_v16, %s13738_s3  ;;  %v3624_v52 = vrot.slane %v3610_v33, %v13831_v5  ;;  %v695_v30 = vcombine.high %v12992_v28, %v12992_v28  ;;  %v15628_v63 = vrot.slane %v1024_v50, %v13831_v5  ;;  %v15632_v4 = vcombine.high %v15610_v15, %v15610_v15 }
 0x15e   :  { %9791 = vrot.lane.b32.xlu0 %v9416_v54, %s13738_s3  ;;  %v15625_v56 = vcombine.high %v15607_v8, %v15607_v8  ;;  %v15635_v34 = vrot.slane %v12992_v28, %v13831_v5  ;;  %v15638_v57 = vrot.slane %v4266_v45, %v13831_v5  ;;  %v4312_v10 = vcombine.low %v15607_v8, %v15616_v60 }
 0x15f   :  { %v3625_v6 = vcombine.low %v3617_v43, %v3624_v52  ;;  %v15643_v22 = vrot.slane %v695_v30, %v13831_v5  ;;  %v4314_v26 = vcombine.low %v15628_v63, %v15632_v4  ;;  %v718_v3 = vcombine.high %v12993_v32, %v12993_v32 }
 0x160   :  { %20513 = vst [vmem:[#allocation63_spill] sm:$0xff] %v15638_v57  ;;  %v4313_v20 = vcombine.low %v15625_v56, %v15610_v15  ;;  %v15651_v11 = vcombine.high %v15635_v34, %v15635_v34  ;;  %v15655_v16 = vrot.slane %v4312_v10, %v13831_v5  ;;  %v15658_v54 = vrot.slane %v12993_v32, %v13831_v5 }
 0x161   :  { %v11324_v28 = vsel %vm11321_vm15, %v3625_v6, %v5978_v38  ;;  %v3972_v33 = vcombine.low %v15441_v37, %v15447_v53  ;;  %v15668_v52 = vrot.slane %v4314_v26, %v13831_v5  ;;  %v15671_v45 = vrot.slane %v718_v3, %v13831_v5 }
 0x162   :  { %20514 = vst [vmem:[#allocation64_spill] sm:$0xff] %v15655_v16  ;;  %v11399_v43 = vsel %vm11397_vm0, %v11324_v28, %v15504_v0  ;;  %v15665_v50 = vrot.slane %v4313_v20, %v13831_v5  ;;  %v10088_v30 = vcombine.low %v15638_v57, %v15655_v16  ;;  %v13264_v38 = vcombine.high %v15441_v37, %v15447_v53  ;;  %v9216_v20 = vpop.permute.xlu1 %9215  ;;  %v13583_v16 = vld [vmem:[#allocation6] sm:$0xff]  }
 0x163   :  { %20516 = vst [vmem:[#allocation66_spill] sm:$0xff] %v15668_v52  ;;  %v15676_v32 = vrot.slane %v3972_v33, %v13831_v5  ;;  %v4019_v0 = vcombine.low %v15635_v34, %v15643_v22  ;;  %v4020_v10 = vcombine.low %v15651_v11, %v15658_v54  ;;  %vm11499_vm2 = vcmask 130048  }
 0x164   :  { %20515 = vst [vmem:[#allocation65_spill] sm:$0xff] %v15665_v50  ;;  %v10089_v6 = vcombine.low %v15665_v50, %v15668_v52  ;;  %v10096_v26 = vrot.slane %v10088_v30, %v13831_v5  ;;  %v15688_v3 = vrot.slane %v13264_v38, %v13831_v5  ;;  %vm11550_vm3 = vcmask 162816  }
 0x165   :  { %20517 = vst [vmem:[#allocation67_spill] sm:$0xff] %v15676_v32  ;;  %v15691_v28 = vrot.slane %v4019_v0, %v13831_v5  ;;  %v15695_v13 = vrot.slane %v4020_v10, %v13831_v5  ;;  %v11450_v27 = vsel %vm11448_vm1, %v11399_v43, %v15463_v24  ;;  %vm11601_vm4 = vcmask 195584   ;;  %v10902_v43 = vpop.permute.xlu0 %10901 }
 0x166   :  { %20518 = vst [vmem:[#allocation68_spill] sm:$0xff] %v15688_v3  ;;  %v10103_v33 = vrot.slane %v10089_v6, %v13831_v5  ;;  %v9946_v9 = vcombine.low %v15676_v32, %v15688_v3  ;;  %v11501_v30 = vsel %vm11499_vm2, %v11450_v27, %v9216_v20  ;;  %vm11652_vm5 = vcmask 228352  }
 0x167   :  { %20519 = vst [vmem:[#allocation69_spill] sm:$0xff] %v15691_v28  ;;  %20520 = vst [vmem:[#allocation70_spill] sm:$0xff] %v15695_v13  ;;  %vm11703_vm6 = vcmask 261120   ;;  %v9947_v0 = vcombine.low %v15691_v28, %v15695_v13  ;;  %v11552_v6 = vsel %vm11550_vm3, %v11501_v30, %v15554_v25  ;;  %vm11926_vm7 = vcmask 289792  }
 0x168   :  { %v10104_v38 = vcombine.low %v10096_v26, %v10103_v33  ;;  %v9954_v10 = vrot.slane %v9946_v9, %v13831_v5  ;;  %v11603_v24 = vsel %vm11601_vm4, %v11552_v6, %v15502_v29  ;;  %v15711_v32 = vcombine.high %v15628_v63, %v15628_v63 }
 0x169   :  { %v2523_v27 = vshrl.u32 %v15603_v21, 16  ;;  %v9961_v20 = vrot.slane %v9947_v0, %v13831_v5  ;;  %v11654_v26 = vsel %vm11652_vm5, %v11603_v24, %v10902_v43  ;;  %v2528_v25 = vshll.u32 %v15607_v8, 16 }
 0x16a   :  { %20521 = vst [vmem:[#allocation71_spill] sm:$0xff] %v15711_v32  ;;  %10349 = vrot.lane.b32.xlu1 %v10104_v38, %s13740_s13  ;;  %v2531_v9 = vshrl.u32 %v15607_v8, 16  ;;  %v11705_v29 = vsel %vm11703_vm6, %v11654_v26, %v15589_v42  ;;  %v2536_v33 = vshll.u32 %v15616_v60, 16  ;;  %v2539_v30 = vshrl.u32 %v15616_v60, 16 }
 0x16b   :  { %v2544_v6 = vshll.u32 %v15625_v56, 16  ;;  %v9962_v13 = vcombine.low %v9954_v10, %v9961_v20  ;;  %v13321_v35 = vcombine.low %v11705_v29, %v11705_v29  ;;  %v13322_v38 = vcombine.high %v11705_v29, %v11705_v29 }
 0x16c   :  { %v15726_v0 = vsel %vm14115_vm14, %v2523_v27, %v2528_v25  ;;  %v15730_v24 = vsel %vm14115_vm14, %v2531_v9, %v2536_v33  ;;  %v2547_v43 = vshrl.u32 %v15625_v56, 16  ;;  %v2552_v60 = vshll.u32 %v15610_v15, 16 }
 0x16d   :  { %v15734_v42 = vsel %vm14115_vm14, %v2539_v30, %v2544_v6  ;;  %10337 = vrot.lane.b32.xlu0 %v9962_v13, %s13740_s13  ;;  %11927 = vst.msk [vmem:[#allocation2] sm:$0xf] %vm11926_vm7, %v13321_v35  ;;  %11928 = vst.msk [vmem:[#allocation2 + $0x4] sm:$0xf] %vm11926_vm7, %v13322_v38  ;;  %v2555_v10 = vshrl.u32 %v15610_v15, 16  ;;  %v2560_v27 = vshll.u32 %v15628_v63, 16  ;;  %v5466_v35 = vcombine.low %v15520_v1, %v15726_v0 }
 0x16e   :  { %v2563_v20 = vshrl.u32 %v15628_v63, 16  ;;  %v2568_v26 = vshll.u32 %v15632_v4, 16  ;;  %v15747_v25 = vsel %vm14115_vm14, %v2547_v43, %v2552_v60  ;;  %v2571_v56 = vshrl.u32 %v15632_v4, 16 }
 0x16f   :  { %v2576_v13 = vshll.u32 %v15711_v32, 16  ;;  %v15755_v9 = vsel %vm14115_vm14, %v2555_v10, %v2560_v27  ;;  %v5512_v33 = vcombine.low %v15730_v24, %v15734_v42  ;;  %v15765_v30 = vcombine.high %v15441_v37, %v15441_v37 }
 0x170   :  { %v15759_v29 = vsel %vm14115_vm14, %v2563_v20, %v2568_v26  ;;  %v15772_v1 = vrot.slane %v5466_v35, %v13831_v5  ;;  %v5513_v38 = vcombine.low %v15747_v25, %v15755_v9  ;;  %v15778_v43 = vcombine.high %v15447_v53, %v15447_v53 }
 0x171   :  { %v15769_v6 = vsel %vm14115_vm14, %v2571_v56, %v2576_v13  ;;  %v15783_v37 = vrot.slane %v5512_v33, %v13831_v5  ;;  %v15787_v10 = vcombine.high %v15643_v22, %v15643_v22  ;;  %v2132_v27 = vshrl.u32 %v15447_v53, 16 }
 0x172   :  { %20522 = vst [vmem:[#allocation72_spill] sm:$0xff] %v15769_v6  ;;  %v5514_v60 = vcombine.low %v15759_v29, %v15769_v6  ;;  %v15791_v20 = vrot.slane %v5513_v38, %v13831_v5  ;;  %v2137_v26 = vshll.u32 %v15765_v30, 16  ;;  %v2140_v56 = vshrl.u32 %v15765_v30, 16 }
 0x173   :  { %20523 = vst [vmem:[#allocation73_spill] sm:$0xff] %v15783_v37  ;;  %v2145_v13 = vshll.u32 %v15778_v43, 16  ;;  %v10650_v33 = vcombine.low %v15772_v1, %v15783_v37  ;;  %v2148_v57 = vshrl.u32 %v15778_v43, 16  ;;  %v2153_v7 = vshll.u32 %v15635_v34, 16 }
 0x174   :  { %20524 = vst [vmem:[#allocation74_spill] sm:$0xff] %v15791_v20  ;;  %v15797_v35 = vrot.slane %v5514_v60, %v13831_v5  ;;  %v15805_v38 = vsel %vm14115_vm14, %v2132_v27, %v2137_v26  ;;  %v2156_v3 = vshrl.u32 %v15635_v34, 16  ;;  %v2161_v60 = vshll.u32 %v15643_v22, 16 }
 0x175   :  { %v15809_v58 = vsel %vm14115_vm14, %v2140_v56, %v2145_v13  ;;  %v10658_v37 = vrot.slane %v10650_v33, %v13831_v5  ;;  %v15818_v52 = vsel %vm14115_vm14, %v2148_v57, %v2153_v7  ;;  %v2164_v27 = vshrl.u32 %v15643_v22, 16 }
 0x176   :  { %20525 = vst [vmem:[#allocation75_spill] sm:$0xff] %v15797_v35  ;;  %v10651_v28 = vcombine.low %v15791_v20, %v15797_v35  ;;  %v15823_v26 = vsel %vm14115_vm14, %v2156_v3, %v2161_v60  ;;  %v2169_v56 = vshll.u32 %v15651_v11, 16  ;;  %v2172_v13 = vshrl.u32 %v15651_v11, 16 }
 0x177   :  { %v2177_v32 = vshll.u32 %v15787_v10, 16  ;;  %v2181_v33 = vshrl.u32 %v15658_v54, 16  ;;  %v2186_v20 = vshll.u32 %v15671_v45, 16  ;;  %v5172_v7 = vcombine.low %v15534_v47, %v15805_v38 }
 0x178   :  { %v10665_v35 = vrot.slane %v10651_v28, %v13831_v5  ;;  %v15835_v57 = vsel %vm14115_vm14, %v2164_v27, %v2169_v56  ;;  %v5218_v60 = vcombine.low %v15809_v58, %v15818_v52  ;;  %v3659_v28 = vcombine.low %v14036_v14, %v13915_v55 }
 0x179   :  { %20526 = vst [vmem:[#allocation76_spill] sm:$0xff] %v15835_v57  ;;  %v15839_v3 = vsel %vm14115_vm14, %v2172_v13, %v2177_v32  ;;  %v15847_v6 = vsel %vm14115_vm14, %v2181_v33, %v2186_v20  ;;  %v15850_v47 = vrot.slane %v5172_v7, %v13831_v5  ;;  %v5219_v27 = vcombine.low %v15823_v26, %v15835_v57  ;;  %v5980_v32 = vpop.permute.xlu0 %5979 }
 0x17a   :  { %v10666_v50 = vcombine.low %v10658_v37, %v10665_v35  ;;  %20527 = vst [vmem:[#allocation77_spill] sm:$0xff] %v15847_v6  ;;  %v5220_v56 = vcombine.low %v15839_v3, %v15847_v6  ;;  %v15857_v13 = vrot.slane %v5218_v60, %v13831_v5  ;;  %v3673_v55 = vrot.slane %v3659_v28, %v13831_v5  ;;  %v13584_v28 = vld [vmem:[#allocation6 + $0x8] sm:$0xff]   ;;  %v9218_v6 = vpop.permute.xlu1 %9217 }
 0x17b   :  { %v15862_v14 = vrot.slane %v5219_v27, %v13831_v5  ;;  %v20331_v37 = vmov 0.0   ;;  %v6716_v20 = vcombine.low %v15451_v2, %v15607_v8  ;;  %v13289_v35 = vcombine.high %v15603_v21, %v15607_v8 }
 0x17c   :  { %20528 = vst [vmem:[#allocation78_spill] sm:$0xff] %v15857_v13  ;;  %10927 = vrot.lane.b32.xlu1 %v10666_v50, %s13744_s17  ;;  %13453 = vmatprep.subr.bf16.mxu0 %v20331_v37  ;;  %v15870_v33 = vrot.slane %v5220_v56, %v13831_v5  ;;  %v10492_v7 = vcombine.low %v15850_v47, %v15857_v13  ;;  %v20529_v13 = vmov 0.0   ;;  %vm12244_vm8 = vcmask 1041408  }
 0x17d   :  { %v3674_v50 = vcombine.low %v14068_v44, %v3673_v55  ;;  %v6763_v60 = vcombine.low %v15610_v15, %v15628_v63  ;;  %13454 = vmatpush3.bf16.msra.mxu0 %v13583_v16  ;;  %v15878_v27 = vrot.slane %v6716_v20, %v13831_v5  ;;  %v13290_v2 = vcombine.high %v15610_v15, %v15628_v63 }
 0x17e   :  { %v15883_v37 = vrot.slane %v13289_v35, %v13831_v5  ;;  %v6422_v56 = vcombine.low %v15447_v53, %v15765_v30  ;;  %13455 = vmatprep.subr.bf16.mxu0 %v20529_v13  ;;  %v10493_v44 = vcombine.low %v15862_v14, %v15870_v33  ;;  %v10500_v55 = vrot.slane %v10492_v7, %v13831_v5  ;;  %v10904_v35 = vpop.permute.xlu0 %10903 }
 0x17f   :  { %v11327_v20 = vsel %vm11321_vm15, %v3674_v50, %v5980_v32  ;;  %v15893_v57 = vrot.slane %v6763_v60, %v13831_v5  ;;  %13559 = vmatprep.subr.bf16.mxu1 %v20529_v13  ;;  %v15899_v53 = vrot.slane %v13290_v2, %v13831_v5  ;;  %v6468_v50 = vcombine.low %v15778_v43, %v15635_v34  ;;  %v13242_v60 = vld.sshfl [vmem:[#allocation3 + $0x7c] sm:$0x33 pattern:$0x75316420] }
 0x180   :  { %v11401_v15 = vsel %vm11397_vm0, %v11327_v20, %v15552_v48  ;;  %v11116_v63 = vcombine.low %v15878_v27, %v15883_v37  ;;  %v15904_v30 = vrot.slane %v6422_v56, %v13831_v5  ;;  %13562 = vmatpush3.bf16.msra.mxu1 %v13583_v16  ;;  %v10507_v32 = vrot.slane %v10493_v44, %v13831_v5 }
 0x181   :  { %v11452_v7 = vsel %vm11448_vm1, %v11401_v15, %v15591_v39  ;;  %v6469_v48 = vcombine.low %v15643_v22, %v15651_v11  ;;  %13456 = vmatpush3.bf16.msra.mxu0 %v13584_v28  ;;  %v11117_v2 = vcombine.low %v15893_v57, %v15899_v53  ;;  %v6470_v16 = vcombine.low %v15787_v10, %v15671_v45 }
 0x182   :  { %v11124_v56 = vrot.slane %v11116_v63, %v13831_v5  ;;  %v11503_v44 = vsel %vm11499_vm2, %v11452_v7, %v9218_v6  ;;  %13457 = vmatprep.subr.bf16.mxu0 %v20529_v13  ;;  %v10508_v39 = vcombine.low %v10500_v55, %v10507_v32  ;;  %v15921_v43 = vrot.slane %v6468_v50, %v13831_v5  ;;  %v11274_v32 = vpop.permute.xlu1 %11273 }
 0x183   :  { %v15924_v11 = vrot.slane %v6469_v48, %v13831_v5  ;;  %v11554_v20 = vsel %vm11550_vm3, %v11503_v44, %v15461_v40  ;;  %13560 = vmatprep.subr.bf16.mxu1 %v20529_v13  ;;  %v11131_v15 = vrot.slane %v11117_v2, %v13831_v5  ;;  %v15931_v10 = vrot.slane %v6470_v16, %v13831_v5  ;;  %v5982_v16 = vpop.permute.xlu0 %5981 }
 0x184   :  { %v11605_v6 = vsel %vm11601_vm4, %v11554_v20, %v15621_v62  ;;  %v3398_v55 = vcombine.high %v13242_v60, %v13242_v60  ;;  %13563 = vmatpush3.bf16.msra.mxu1 %v13584_v28  ;;  %10915 = vrot.lane.b32.xlu0 %v10508_v39, %s13744_s17  ;;  %v7501_v63 = vcombine.low %v15904_v30, %v15921_v43  ;;  %vm13746_vm9 = vmmov 0  }
 0x185   :  { %v11656_v40 = vsel %vm11652_vm5, %v11605_v6, %v10904_v35  ;;  %v15940_v7 = vrot.slane %v13242_v60, %v13831_v5  ;;  %v5463_v50 = vcombine.low %v15359_v51, %v15472_v19  ;;  %v11132_v48 = vcombine.low %v11124_v56, %v11131_v15  ;;  %13561 = vmatprep.subr.bf16.mxu1 %v20529_v13 }
 0x186   :  { %v11022_v62 = vcombine.low %v15924_v11, %v15931_v10  ;;  %v11707_v28 = vsel %vm11703_vm6, %v11656_v40, %v11274_v32  ;;  %v15948_v2 = vrot.slane %v3398_v55, %v13831_v5  ;;  %v15952_v35 = vrot.slane %v7501_v63, %v13831_v5  ;;  %13459 = vmatprep.mubr.msk.bf16.mxu0 %vm13746_vm9, %v20529_v13 }
 0x187   :  { %20530 = vst [vmem:[#allocation79_spill] sm:$0xff] %v15940_v7  ;;  %v13323_v60 = vcombine.low %v11707_v28, %v11707_v28  ;;  %v13324_v44 = vcombine.high %v11707_v28, %v11707_v28  ;;  %v15956_v51 = vcombine.high %v15940_v7, %v15940_v7  ;;  %11297 = vrot.lane.b32.xlu1 %v11132_v48, %s13742_s15  ;;  %vm12168_vm10 = vcmask 293888  }
 0x188   :  { %20531 = vst [vmem:[#allocation80_spill] sm:$0xff] %v15948_v2  ;;  %v11029_v19 = vrot.slane %v11022_v62, %v13831_v5  ;;  %v3461_v56 = vcombine.high %v15948_v2, %v15948_v2  ;;  %v3504_v39 = vshrl.u32 %v15948_v2, 16  ;;  %v5464_v20 = vcombine.low %v15476_v12, %v15489_v17  ;;  %v20535_v12 = vld [vmem:[#allocation37_spill] sm:$0xff]  ;;  %13511 = vmatprep.mubr.msk.bf16.mxu1 %vm13746_vm9, %v20529_v13 }
 0x189   :  { %20532 = vst [vmem:[#allocation81_spill] sm:$0xff] %v15956_v51  ;;  %11929 = vst.msk [vmem:[#allocation2 + $0x8] sm:$0xf] %vm11926_vm7, %v13323_v60  ;;  %v3509_v15 = vshll.u32 %v15956_v51, 16  ;;  %v3512_v6 = vshrl.u32 %v15956_v51, 16  ;;  %v5465_v55 = vcombine.low %v15493_v46, %v15508_v59  ;;  %v15972_v63 = vrot.slane %v5463_v50, %v13831_v5  ;;  %v20537_v46 = vld [vmem:[#allocation42_spill] sm:$0xff]  ;;  %v7232_v50 = vpop.permute.xlu1 %7231 }
 0x18a   :  { %11930 = vst.msk [vmem:[#allocation2 + $0xc] sm:$0xf] %vm11926_vm7, %v13324_v44  ;;  %v11030_v32 = vcombine.low %v15952_v35, %v11029_v19  ;;  %v3517_v40 = vshll.u32 %v3461_v56, 16  ;;  %v15976_v48 = vrot.slane %v5464_v20, %v13831_v5  ;;  %v5201_v17 = vcombine.low %v20535_v12, %v15252_v18  ;;  %v20538_v60 = vld [vmem:[#allocation16_spill] sm:$0xff]  ;;  %v20539_v44 = vld [vmem:[#allocation17_spill] sm:$0xff] }
 0x18b   :  { %20533 = vst [vmem:[#allocation82_spill] sm:$0xff] %v15972_v63  ;;  %v3511_v62 = vsel %vm14115_vm14, %v3504_v39, %v3509_v15  ;;  %v15983_v28 = vrot.slane %v5465_v55, %v13831_v5  ;;  %v5202_v59 = vcombine.low %v20537_v46, %v15850_v47  ;;  %v20540_v19 = vcombine.low %v20538_v60, %v20539_v44  ;;  %v13585_v47 = vld [vmem:[#allocation6 + $0x10] ss:$0 sps:$4 sm:$0x33]   ;;  %v7970_v55 = vpop.permute.xlu0 %7969  ;;  %v20542_v44 = vld [vmem:[#allocation35_spill] sm:$0xff] }
 0x18c   :  { %20534 = vst [vmem:[#allocation83_spill] sm:$0xff] %v15976_v48  ;;  %11285 = vrot.lane.b32.xlu0 %v11030_v32, %s13742_s15  ;;  %v3519_v18 = vsel %vm14115_vm14, %v3512_v6, %v3517_v40  ;;  %v5495_v39 = vcombine.low %v15972_v63, %v15976_v48  ;;  %v5209_v20 = vrot.slane %v5201_v17, %v13831_v5 }
 0x18d   :  { %20536 = vst [vmem:[#allocation37_spill] sm:$0xff] %v15983_v28  ;;  %v11330_v56 = vsel %vm11321_vm15, %v20540_v19, %v5982_v16  ;;  %v6745_v15 = vcombine.low %v15431_v41, %v15438_v23  ;;  %v5496_v12 = vcombine.low %v15983_v28, %v15772_v1  ;;  %v10625_v46 = vcombine.low %v3511_v62, %v3519_v18 }
 0x18e   :  { %v5216_v32 = vrot.slane %v5202_v59, %v13831_v5  ;;  %v5503_v6 = vrot.slane %v5495_v39, %v13831_v5  ;;  %v6746_v40 = vcombine.low %v15456_v49, %v15878_v27  ;;  %v6451_v23 = vcombine.low %v15167_v31, %v15173_v61  ;;  %v13007_v59 = vld.sshfl [vmem:[#allocation3 + $0xa0] sm:$0x33 pattern:$0x75316420] }
 0x18f   :  { %v6753_v17 = vrot.slane %v6745_v15, %v13831_v5  ;;  %v5510_v60 = vrot.slane %v5496_v12, %v13831_v5  ;;  %v16012_v1 = vrot.slane %v10625_v46, %v13831_v5  ;;  %v6452_v19 = vcombine.low %v20542_v44, %v15904_v30  ;;  %v13586_v15 = vld [vmem:[#allocation2] sm:$0xff]   ;;  %v9220_v30 = vpop.permute.xlu1 %9219 }
 0x190   :  { %v5217_v62 = vcombine.low %v5209_v20, %v5216_v32  ;;  %v6760_v18 = vrot.slane %v6746_v40, %v13831_v5  ;;  %v6459_v39 = vrot.slane %v6451_v23, %v13831_v5  ;;  %v12246_v49 = vsel %vm12244_vm8, %v13585_v47, 0 }
 0x191   :  { %20541 = vst [vmem:[#allocation42_spill] sm:$0xff] %v16012_v1  ;;  %v11403_v27 = vsel %vm11397_vm0, %v11330_v56, %v7232_v50  ;;  %v5511_v31 = vcombine.low %v5503_v6, %v5510_v60  ;;  %v6466_v20 = vrot.slane %v6452_v19, %v13831_v5  ;;  %13458 = vmatpush3.bf16.msra.mxu0 %v12246_v49  ;;  %v9782_v56 = vpop.permute.xlu0 %9781 }
 0x192   :  { %5993 = vrot.lane.b32.xlu0 %v5217_v62, %s13734_s28  ;;  %v6761_v12 = vcombine.low %v6753_v17, %v6760_v18  ;;  %v11454_v46 = vsel %vm11448_vm1, %v11403_v27, %v7970_v55  ;;  %v1047_v47 = vcombine.high %v13007_v59, %v13007_v59  ;;  %v16028_v50 = vrot.slane %v13007_v59, %v13831_v5 }
 0x193   :  { %6005 = vrot.lane.b32.xlu1 %v5511_v31, %s13734_s28  ;;  %v6467_v32 = vcombine.low %v6459_v39, %v6466_v20  ;;  %v7667_v6 = vcombine.low %v15603_v21, %v15607_v8  ;;  %v7493_v40 = vcombine.low %v15658_v54, %v15671_v45  ;;  %13564 = vmatpush3.bf16.msra.mxu1 %v12246_v49 }
 0x194   :  { %v16036_v55 = vrot.slane %v1047_v47, %v13831_v5  ;;  %v7668_v17 = vcombine.low %v15632_v4, %v16028_v50  ;;  %13460 = vmatmul.mubr.msk.bf16.vlgmr.msra.gmra.mrb[0].mxu0 %vm12168_vm10, %v13586_v15  ;;  %v11505_v23 = vsel %vm11499_vm2, %v11454_v46, %v9220_v30  ;;  %v2580_v60 = vshrl.u32 %v16028_v50, 16  ;;  %v13587_v15 = vld [vmem:[#allocation2 + $0x8] sm:$0xff]  }
 0x195   :  { %v7675_v21 = vrot.slane %v7667_v6, %v13831_v5  ;;  %v7500_v8 = vrot.slane %v7493_v40, %v13831_v5  ;;  %v11556_v62 = vsel %vm11550_vm3, %v11505_v23, %v9782_v56  ;;  %v8701_v4 = vcombine.low %v15726_v0, %v15730_v24  ;;  %13463 = vmatprep.mubr.msk.bf16.mxu0 %vm13746_vm9, %v20529_v13  ;;  %v10328_v0 = vpop.permute.xlu1 %10327  ;;  %v20543_v30 = vld [vmem:[#allocation72_spill] sm:$0xff] }
 0x196   :  { %7243 = vrot.lane.b32.xlu0 %v6467_v32, %s13741_s14  ;;  %v7682_v44 = vrot.slane %v7668_v17, %v13831_v5  ;;  %v2585_v19 = vshll.u32 %v16036_v55, 16  ;;  %v8702_v59 = vcombine.low %v15734_v42, %v15747_v25  ;;  %v8703_v18 = vcombine.low %v15755_v9, %v15759_v29 }
 0x197   :  { %7255 = vrot.lane.b32.xlu1 %v6761_v12, %s13741_s14  ;;  %v7683_v39 = vcombine.low %v7675_v21, %v15883_v37  ;;  %v7502_v49 = vcombine.low %v15924_v11, %v7500_v8  ;;  %v8711_v24 = vrot.slane %v8701_v4, %v13831_v5  ;;  %v16065_v27 = vcombine.high %v15658_v54, %v15658_v54 }
 0x198   :  { %v7684_v42 = vcombine.low %v15893_v57, %v7682_v44  ;;  %v16070_v25 = vsel %vm14115_vm14, %v2580_v60, %v2585_v19  ;;  %v8718_v9 = vrot.slane %v8702_v59, %v13831_v5  ;;  %v8725_v29 = vrot.slane %v8703_v18, %v13831_v5  ;;  %v20544_v60 = vld [vmem:[#allocation76_spill] sm:$0xff] }
 0x199   :  { %v7691_v31 = vrot.slane %v7683_v39, %v13831_v5  ;;  %v7516_v20 = vrot.slane %v7502_v49, %v13831_v5  ;;  %v8704_v12 = vcombine.low %v20543_v30, %v16070_v25  ;;  %v2189_v46 = vshrl.u32 %v15671_v45, 16  ;;  %v11276_v59 = vpop.permute.xlu1 %11275  ;;  %v20546_v39 = vld [vmem:[#allocation65_spill] sm:$0xff]  ;;  %v20547_v49 = vld [vmem:[#allocation64_spill] sm:$0xff] }
 0x19a   :  { %v7698_v47 = vrot.slane %v7684_v42, %v13831_v5  ;;  %v8733_v56 = vcombine.low %v8711_v24, %v8718_v9  ;;  %v2194_v32 = vshll.u32 %v16065_v27, 16  ;;  %v8407_v6 = vcombine.low %v15805_v38, %v15809_v58  ;;  %v10906_v58 = vpop.permute.xlu0 %10905  ;;  %v20548_v42 = vld [vmem:[#allocation71_spill] sm:$0xff] }
 0x19b   :  { %v7517_v40 = vcombine.low %v15952_v35, %v7516_v20  ;;  %v8732_v17 = vrot.slane %v8704_v12, %v13831_v5  ;;  %v8408_v23 = vcombine.low %v15818_v52, %v15823_v26  ;;  %v8409_v21 = vcombine.low %v20544_v60, %v15839_v3  ;;  %v20545_v52 = vld [vmem:[#allocation77_spill] sm:$0xff]  ;;  %v20551_v60 = vld [vmem:[#allocation66_spill] sm:$0xff] }
 0x19c   :  { %v7699_v8 = vcombine.low %v7691_v31, %v7698_v47  ;;  %v8741_v4 = vrot.slane %v8733_v56, %v13831_v5  ;;  %v16092_v44 = vsel %vm14115_vm14, %v2189_v46, %v2194_v32  ;;  %v8417_v19 = vrot.slane %v8407_v6, %v13831_v5  ;;  %13464 = vmatmul.mubr.msk.bf16.gmra.mrb[4].mxu0 %vm12168_vm10, %v13587_v15  ;;  %v13008_v47 = vld.sshfl [vmem:[#allocation3 + $0xa4] sm:$0x33 pattern:$0x75316420] }
 0x19d   :  { %7981 = vrot.lane.b32.xlu0 %v7517_v40, %s13739_s1  ;;  %v8734_v38 = vcombine.low %v8725_v29, %v8732_v17  ;;  %v8410_v26 = vcombine.low %v20545_v52, %v16092_v44  ;;  %v8424_v3 = vrot.slane %v8408_v23, %v13831_v5  ;;  %v8431_v35 = vrot.slane %v8409_v21, %v13831_v5  ;;  %v13009_v17 = vld.sshfl [vmem:[#allocation3 + $0xa8] sm:$0x33 pattern:$0x75316420] }
 0x19e   :  { %7993 = vrot.lane.b32.xlu1 %v7699_v8, %s13739_s1  ;;  %v11607_v18 = vsel %vm11601_vm4, %v11556_v62, %v10328_v0  ;;  %v4344_v24 = vcombine.low %v20547_v49, %v20546_v39  ;;  %v9559_v9 = vcombine.low %v20548_v42, %v16036_v55  ;;  %v4021_v29 = vcombine.low %v15671_v45, %v16065_v27  ;;  %v20552_v8 = vld [vmem:[#allocation69_spill] sm:$0xff] }
 0x19f   :  { %v8748_v15 = vrot.slane %v8734_v38, %v13831_v5  ;;  %v8438_v31 = vrot.slane %v8410_v26, %v13831_v5  ;;  %v8439_v20 = vcombine.low %v8417_v19, %v8424_v3  ;;  %v11658_v30 = vsel %vm11652_vm5, %v11607_v18, %v10906_v58  ;;  %13467 = vmatprep.mubr.msk.bf16.mxu0 %vm13746_vm9, %v20529_v13  ;;  %v20553_v19 = vld [vmem:[#allocation68_spill] sm:$0xff]  ;;  %v20555_v26 = vld [vmem:[#allocation18_spill] sm:$0xff] }
 0x1a0   :  { %v11709_v62 = vsel %vm11703_vm6, %v11658_v30, %v11276_v59  ;;  %v16116_v0 = vrot.slane %v4344_v24, %v13831_v5  ;;  %v9566_v12 = vrot.slane %v9559_v9, %v13831_v5  ;;  %v16120_v46 = vrot.slane %v4021_v29, %v13831_v5 }
 0x1a1   :  { %v8749_v56 = vcombine.low %v8741_v4, %v8748_v15  ;;  %v8440_v32 = vcombine.low %v8431_v35, %v8438_v31  ;;  %v8447_v6 = vrot.slane %v8439_v20, %v13831_v5  ;;  %v13325_v40 = vcombine.low %v11709_v62, %v11709_v62  ;;  %v20554_v4 = vld [vmem:[#allocation19_spill] sm:$0xff]  ;;  %v5984_v35 = vpop.permute.xlu0 %5983 }
 0x1a2   :  { %20549 = vst [vmem:[#allocation16_spill] sm:$0xff] %v16116_v0  ;;  %20550 = vst [vmem:[#allocation17_spill] sm:$0xff] %v16120_v46  ;;  %v13326_v23 = vcombine.high %v11709_v62, %v11709_v62  ;;  %v9567_v21 = vcombine.low %v20551_v60, %v9566_v12  ;;  %v4050_v58 = vcombine.low %v20553_v19, %v20552_v8  ;;  %v12994_v15 = vld.sshfl [vmem:[#allocation3 + $0x5c] sm:$0x33 pattern:$0x75316420] }
 0x1a3   :  { %v13305_v38 = vcombine.high %v15635_v34, %v15643_v22  ;;  %9243 = vrot.lane.b32.xlu1 %v8749_v56, %s13743_s16  ;;  %v8454_v52 = vrot.slane %v8440_v32, %v13831_v5  ;;  %11931 = vst.msk [vmem:[#allocation2 + $0x10] sm:$0xf] %vm11926_vm7, %v13325_v40  ;;  %v3757_v3 = vcombine.low %v20555_v26, %v20554_v4  ;;  %v20557_v12 = vld [vmem:[#allocation22_spill] sm:$0xff] }
 0x1a4   :  { %v1071_v59 = vcombine.high %v13008_v47, %v13008_v47  ;;  %v16134_v18 = vrot.slane %v13008_v47, %v13831_v5  ;;  %11932 = vst.msk [vmem:[#allocation2 + $0x14] sm:$0xf] %vm11926_vm7, %v13326_v23  ;;  %v9574_v39 = vrot.slane %v9567_v21, %v13831_v5  ;;  %v16139_v34 = vrot.slane %v4050_v58, %v13831_v5  ;;  %v12995_v21 = vld.sshfl [vmem:[#allocation3 + $0x60] sm:$0x33 pattern:$0x75316420] }
 0x1a5   :  { %v9424_v22 = vrot.slane %v13305_v38, %v13831_v5  ;;  %v1094_v49 = vcombine.high %v13009_v17, %v13009_v17  ;;  %v8455_v24 = vcombine.low %v8447_v6, %v8454_v52  ;;  %v3771_v42 = vrot.slane %v3757_v3, %v13831_v5  ;;  %v7972_v26 = vpop.permute.xlu0 %7971 }
 0x1a6   :  { %20556 = vst [vmem:[#allocation35_spill] sm:$0xff] %v16139_v34  ;;  %v16144_v9 = vrot.slane %v1071_v59, %v13831_v5  ;;  %v16148_v29 = vcombine.high %v16134_v18, %v16134_v18  ;;  %v9575_v31 = vcombine.low %v16116_v0, %v9574_v39  ;;  %v16153_v30 = vrot.slane %v13009_v17, %v13831_v5  ;;  %v7234_v17 = vpop.permute.xlu1 %7233 }
 0x1a7   :  { %v9425_v20 = vcombine.low %v9424_v22, %v16120_v46  ;;  %v16156_v62 = vrot.slane %v1094_v49, %v13831_v5  ;;  %9231 = vrot.lane.b32.xlu0 %v8455_v24, %s13743_s16  ;;  %v3772_v47 = vcombine.low %v20557_v12, %v3771_v42  ;;  %v4315_v56 = vcombine.low %v16028_v50, %v16036_v55 }
 0x1a8   :  { %v13268_v32 = vcombine.high %v16028_v50, %v16036_v55  ;;  %v4362_v6 = vcombine.low %v16134_v18, %v16144_v9  ;;  %9805 = vrot.lane.b32.xlu1 %v9575_v31, %s13738_s3  ;;  %v4363_v23 = vcombine.low %v16148_v29, %v16153_v30  ;;  %v16172_v8 = vcombine.high %v15671_v45, %v15671_v45 }
 0x1a9   :  { %v9432_v40 = vrot.slane %v9425_v20, %v13831_v5  ;;  %v742_v19 = vcombine.high %v12994_v15, %v12994_v15  ;;  %v11333_v58 = vsel %vm11321_vm15, %v3772_v47, %v5984_v35  ;;  %v16176_v38 = vrot.slane %v4315_v56, %v13831_v5  ;;  %v9784_v0 = vpop.permute.xlu0 %9783 }
 0x1aa   :  { %v16179_v52 = vrot.slane %v13268_v32, %v13831_v5  ;;  %v16182_v4 = vrot.slane %v4362_v6, %v13831_v5  ;;  %v16186_v59 = vrot.slane %v4363_v23, %v13831_v5  ;;  %v16189_v39 = vrot.slane %v12994_v15, %v13831_v5 }
 0x1ab   :  { %20558 = vst [vmem:[#allocation72_spill] sm:$0xff] %v16176_v38  ;;  %v9433_v3 = vcombine.low %v16139_v34, %v9432_v40  ;;  %v16192_v35 = vrot.slane %v742_v19, %v13831_v5  ;;  %v765_v49 = vcombine.high %v12995_v21, %v12995_v21  ;;  %v16197_v24 = vrot.slane %v12995_v21, %v13831_v5  ;;  %v13588_v31 = vld [vmem:[#allocation2 + $0x10] sm:$0xff]  }
 0x1ac   :  { %20559 = vst [vmem:[#allocation76_spill] sm:$0xff] %v16186_v59  ;;  %v10105_v22 = vcombine.low %v16176_v38, %v16179_v52  ;;  %v11405_v42 = vsel %vm11397_vm0, %v11333_v58, %v7234_v17  ;;  %v10106_v20 = vcombine.low %v16182_v4, %v16186_v59  ;;  %v16205_v15 = vcombine.high %v16189_v39, %v16189_v39 }
 0x1ad   :  { %9793 = vrot.lane.b32.xlu0 %v9433_v3, %s13738_s3  ;;  %v4067_v12 = vcombine.low %v16172_v8, %v16189_v39  ;;  %v16210_v47 = vsel %vm11448_vm1, %v11405_v42, %v7972_v26  ;;  %v16214_v32 = vrot.slane %v765_v49, %v13831_v5  ;;  %v16218_v6 = vcombine.high %v16028_v50, %v16028_v50 }
 0x1ae   :  { %v10113_v56 = vrot.slane %v10105_v22, %v13831_v5  ;;  %v16222_v40 = vcombine.high %v16036_v55, %v16036_v55  ;;  %13468 = vmatmul.mubr.msk.bf16.gmra.mrb[8].mxu0 %vm12168_vm10, %v13588_v31  ;;  %v10120_v17 = vrot.slane %v10106_v20, %v13831_v5  ;;  %v4068_v23 = vcombine.low %v16192_v35, %v16205_v15 }
 0x1af   :  { %v16229_v21 = vrot.slane %v4067_v12, %v13831_v5  ;;  %v16233_v19 = vcombine.high %v16144_v9, %v16144_v9  ;;  %13471 = vmatprep.mubr.msk.bf16.mxu0 %vm13746_vm9, %v20529_v13  ;;  %v4069_v50 = vcombine.low %v16197_v24, %v16214_v32  ;;  %v2588_v58 = vshrl.u32 %v16036_v55, 16 }
 0x1b0   :  { %v2593_v26 = vshll.u32 %v16218_v6, 16  ;;  %v2596_v3 = vshrl.u32 %v16218_v6, 16  ;;  %v10121_v22 = vcombine.low %v10113_v56, %v10120_v17  ;;  %v16243_v49 = vrot.slane %v4068_v23, %v13831_v5 }
 0x1b1   :  { %20560 = vst [vmem:[#allocation77_spill] sm:$0xff] %v16229_v21  ;;  %v9963_v42 = vcombine.low %v16120_v46, %v16229_v21  ;;  %v2601_v31 = vshll.u32 %v16222_v40, 16  ;;  %v16249_v20 = vrot.slane %v4069_v50, %v13831_v5  ;;  %v2604_v16 = vshrl.u32 %v16222_v40, 16 }
 0x1b2   :  { %20561 = vst [vmem:[#allocation65_spill] sm:$0xff] %v16243_v49  ;;  %v16253_v12 = vsel %vm14115_vm14, %v2588_v58, %v2593_v26  ;;  %v2609_v61 = vshll.u32 %v16134_v18, 16  ;;  %10351 = vrot.lane.b32.xlu1 %v10121_v22, %s13740_s13  ;;  %v2612_v23 = vshrl.u32 %v16134_v18, 16  ;;  %v2617_v50 = vshll.u32 %v16144_v9, 16 }
 0x1b3   :  { %20562 = vst [vmem:[#allocation64_spill] sm:$0xff] %v16249_v20  ;;  %v9971_v56 = vrot.slane %v9963_v42, %v13831_v5  ;;  %v16261_v17 = vsel %vm14115_vm14, %v2596_v3, %v2601_v31  ;;  %v9964_v58 = vcombine.low %v16243_v49, %v16249_v20  ;;  %v2620_v59 = vshrl.u32 %v16144_v9, 16 }
 0x1b4   :  { %v16269_v26 = vsel %vm14115_vm14, %v2604_v16, %v2609_v61  ;;  %v2625_v22 = vshll.u32 %v16148_v29, 16  ;;  %v16275_v42 = vsel %vm14115_vm14, %v2612_v23, %v2617_v50  ;;  %v2628_v3 = vshrl.u32 %v16148_v29, 16 }
 0x1b5   :  { %v2633_v31 = vshll.u32 %v16233_v19, 16  ;;  %v2637_v41 = vshrl.u32 %v16153_v30, 16  ;;  %v9978_v20 = vrot.slane %v9964_v58, %v13831_v5  ;;  %v2642_v61 = vshll.u32 %v16156_v62, 16 }
 0x1b6   :  { %v16283_v16 = vsel %vm14115_vm14, %v2620_v59, %v2625_v22  ;;  %v5515_v28 = vcombine.low %v16070_v25, %v16253_v12  ;;  %v5561_v50 = vcombine.low %v16261_v17, %v16269_v26  ;;  %v16298_v58 = vcombine.high %v16197_v24, %v16197_v24  ;;  %v9222_v22 = vpop.permute.xlu1 %9221 }
 0x1b7   :  { %v16290_v23 = vsel %vm14115_vm14, %v2628_v3, %v2633_v31  ;;  %v5562_v48 = vcombine.low %v16275_v42, %v16283_v16  ;;  %v9979_v59 = vcombine.low %v9971_v56, %v9978_v20  ;;  %v16302_v63 = vsel %vm14115_vm14, %v2637_v41, %v2642_v61 }
 0x1b8   :  { %v16305_v25 = vrot.slane %v5515_v28, %v13831_v5  ;;  %v16309_v3 = vcombine.high %v16192_v35, %v16192_v35  ;;  %v5563_v31 = vcombine.low %v16290_v23, %v16302_v63  ;;  %v16314_v1 = vrot.slane %v5561_v50, %v13831_v5 }
 0x1b9   :  { %v16317_v20 = vrot.slane %v5562_v48, %v13831_v5  ;;  %v2197_v56 = vshrl.u32 %v16065_v27, 16  ;;  %10339 = vrot.lane.b32.xlu0 %v9979_v59, %s13740_s13  ;;  %v2202_v41 = vshll.u32 %v16172_v8, 16  ;;  %v2205_v28 = vshrl.u32 %v16172_v8, 16 }
 0x1ba   :  { %20563 = vst [vmem:[#allocation71_spill] sm:$0xff] %v16309_v3  ;;  %20564 = vst [vmem:[#allocation69_spill] sm:$0xff] %v16314_v1  ;;  %v2210_v61 = vshll.u32 %v16189_v39, 16  ;;  %v2213_v51 = vshrl.u32 %v16189_v39, 16  ;;  %v16326_v34 = vrot.slane %v5563_v31, %v13831_v5  ;;  %v10667_v50 = vcombine.low %v16305_v25, %v16314_v1  ;;  %v10330_v1 = vpop.permute.xlu1 %10329 }
 0x1bb   :  { %20565 = vst [vmem:[#allocation68_spill] sm:$0xff] %v16317_v20  ;;  %v2218_v48 = vshll.u32 %v16192_v35, 16  ;;  %v2221_v27 = vshrl.u32 %v16192_v35, 16  ;;  %v16334_v59 = vsel %vm14115_vm14, %v2197_v56, %v2202_v41  ;;  %v2226_v46 = vshll.u32 %v16205_v15, 16 }
 0x1bc   :  { %20566 = vst [vmem:[#allocation19_spill] sm:$0xff] %v16326_v34  ;;  %v16338_v8 = vsel %vm14115_vm14, %v2205_v28, %v2210_v61  ;;  %v2229_v31 = vshrl.u32 %v16205_v15, 16  ;;  %v10668_v60 = vcombine.low %v16317_v20, %v16326_v34  ;;  %v10675_v38 = vrot.slane %v10667_v50, %v13831_v5 }
 0x1bd   :  { %v16347_v2 = vsel %vm14115_vm14, %v2213_v51, %v2218_v48  ;;  %v2234_v56 = vshll.u32 %v16309_v3, 16  ;;  %v16352_v41 = vsel %vm14115_vm14, %v2221_v27, %v2226_v46  ;;  %v2238_v28 = vshrl.u32 %v16197_v24, 16 }
 0x1be   :  { %v2243_v61 = vshll.u32 %v16214_v32, 16  ;;  %v2246_v7 = vshrl.u32 %v16214_v32, 16  ;;  %v10682_v34 = vrot.slane %v10668_v60, %v13831_v5  ;;  %v2251_v51 = vshll.u32 %v16298_v58, 16 }
 0x1bf   :  { %v16360_v50 = vsel %vm14115_vm14, %v2229_v31, %v2234_v56  ;;  %v5221_v48 = vcombine.low %v16092_v44, %v16334_v59  ;;  %v5267_v27 = vcombine.low %v16338_v8, %v16347_v2  ;;  %v11507_v60 = vsel %vm11499_vm2, %v16210_v47, %v9222_v22 }
 0x1c0   :  { %v16367_v46 = vsel %vm14115_vm14, %v2238_v28, %v2243_v61  ;;  %v5268_v20 = vcombine.low %v16352_v41, %v16360_v50  ;;  %v10683_v31 = vcombine.low %v10675_v38, %v10682_v34  ;;  %v16377_v56 = vsel %vm14115_vm14, %v2246_v7, %v2251_v51  ;;  %v10908_v61 = vpop.permute.xlu0 %10907 }
 0x1c1   :  { %v16380_v44 = vrot.slane %v5221_v48, %v13831_v5  ;;  %v11558_v28 = vsel %vm11550_vm3, %v11507_v60, %v9784_v0  ;;  %v5269_v3 = vcombine.low %v16367_v46, %v16377_v56  ;;  %v16386_v21 = vrot.slane %v5267_v27, %v13831_v5 }
 0x1c2   :  { %v16389_v49 = vrot.slane %v5268_v20, %v13831_v5  ;;  %v6765_v34 = vcombine.low %v16036_v55, %v16218_v6  ;;  %10929 = vrot.lane.b32.xlu1 %v10683_v31, %s13744_s17  ;;  %v6811_v7 = vcombine.low %v16222_v40, %v16134_v18  ;;  %v6812_v0 = vcombine.low %v16144_v9, %v16148_v29  ;;  %v11278_v20 = vpop.permute.xlu1 %11277 }
 0x1c3   :  { %20567 = vst [vmem:[#allocation18_spill] sm:$0xff] %v16386_v21  ;;  %v6813_v38 = vcombine.low %v16233_v19, %v16156_v62  ;;  %v13283_v47 = vcombine.high %v15658_v54, %v15671_v45  ;;  %v16403_v22 = vrot.slane %v5269_v3, %v13831_v5  ;;  %v10509_v55 = vcombine.low %v16380_v44, %v16386_v21 }
 0x1c4   :  { %v6793_v6 = vrot.slane %v6765_v34, %v13831_v5  ;;  %v6517_v40 = vcombine.low %v16189_v39, %v16192_v35  ;;  %v16411_v29 = vrot.slane %v6811_v7, %v13831_v5  ;;  %v16414_v19 = vrot.slane %v6812_v0, %v13831_v5  ;;  %v5986_v0 = vpop.permute.xlu0 %5985 }
 0x1c5   :  { %20568 = vst [vmem:[#allocation22_spill] sm:$0xff] %v16403_v22  ;;  %v16417_v54 = vrot.slane %v6813_v38, %v13831_v5  ;;  %v6499_v45 = vrot.slane %v13283_v47, %v13831_v5  ;;  %v10510_v3 = vcombine.low %v16389_v49, %v16403_v22  ;;  %v10517_v51 = vrot.slane %v10509_v55, %v13831_v5 }
 0x1c6   :  { %20569 = vst [vmem:[#allocation84_spill] sm:$0xff] %v16411_v29  ;;  %v13284_v48 = vcombine.high %v16189_v39, %v16192_v35  ;;  %v6519_v27 = vcombine.low %v16214_v32, %v16298_v58  ;;  %v7708_v60 = vcombine.low %v6793_v6, %v16411_v29  ;;  %v16431_v34 = vrot.slane %v6517_v40, %v13831_v5  ;;  %v7236_v22 = vpop.permute.xlu1 %7235 }
 0x1c7   :  { %20570 = vst [vmem:[#allocation85_spill] sm:$0xff] %v16417_v54  ;;  %v11133_v31 = vcombine.low %v16414_v19, %v16417_v54  ;;  %v11609_v7 = vsel %vm11601_vm4, %v11558_v28, %v10330_v1  ;;  %v10524_v38 = vrot.slane %v10510_v3, %v13831_v5 }
 0x1c8   :  { %20571 = vst [vmem:[#allocation86_spill] sm:$0xff] %v16431_v34  ;;  %v16436_v47 = vrot.slane %v13284_v48, %v13831_v5  ;;  %v16439_v39 = vrot.slane %v6519_v27, %v13831_v5  ;;  %v11660_v35 = vsel %vm11652_vm5, %v11609_v7, %v10908_v61  ;;  %v16443_v55 = vrot.slane %v7708_v60, %v13831_v5  ;;  %v20572_v60 = vld [vmem:[#allocation74_spill] sm:$0xff]  ;;  %v20573_v7 = vld [vmem:[#allocation73_spill] sm:$0xff] }
 0x1c9   :  { %v11140_v54 = vrot.slane %v11133_v31, %v13831_v5  ;;  %v7526_v40 = vcombine.low %v6499_v45, %v16431_v34  ;;  %v11711_v1 = vsel %vm11703_vm6, %v11660_v35, %v11278_v20  ;;  %v10525_v28 = vcombine.low %v10517_v51, %v10524_v38  ;;  %v20574_v31 = vld [vmem:[#allocation75_spill] sm:$0xff]  ;;  %v20575_v51 = vld [vmem:[#allocation78_spill] sm:$0xff]  ;;  %v20576_v35 = vld [vmem:[#allocation21_spill] sm:$0xff] }
 0x1ca   :  { %v11031_v3 = vcombine.low %v16436_v47, %v16439_v39  ;;  %v13327_v48 = vcombine.low %v11711_v1, %v11711_v1  ;;  %v13328_v29 = vcombine.high %v11711_v1, %v11711_v1  ;;  %v5544_v21 = vcombine.low %v20573_v7, %v20572_v60 }
 0x1cb   :  { %v11141_v27 = vcombine.low %v16443_v55, %v11140_v54  ;;  %v16452_v61 = vrot.slane %v7526_v40, %v13831_v5  ;;  %v5545_v34 = vcombine.low %v20574_v31, %v16305_v25  ;;  %10917 = vrot.lane.b32.xlu0 %v10525_v28, %s13744_s17  ;;  %v5250_v54 = vcombine.low %v20575_v51, %v15862_v14  ;;  %v20577_v40 = vld [vmem:[#allocation20_spill] sm:$0xff]  ;;  %v9224_v31 = vpop.permute.xlu1 %9223 }
 0x1cc   :  { %v11038_v20 = vrot.slane %v11031_v3, %v13831_v5  ;;  %11933 = vst.msk [vmem:[#allocation2 + $0x18] sm:$0xf] %vm11926_vm7, %v13327_v48  ;;  %11934 = vst.msk [vmem:[#allocation2 + $0x1c] sm:$0xf] %vm11926_vm7, %v13328_v29  ;;  %v5251_v38 = vcombine.low %v15870_v33, %v16380_v44  ;;  %v3805_v1 = vcombine.low %v20577_v40, %v20576_v35  ;;  %v7974_v48 = vpop.permute.xlu0 %7973 }
 0x1cd   :  { %11299 = vrot.lane.b32.xlu1 %v11141_v27, %s13742_s15  ;;  %v5552_v25 = vrot.slane %v5544_v21, %v13831_v5  ;;  %v5559_v28 = vrot.slane %v5545_v34, %v13831_v5  ;;  %v6794_v3 = vcombine.low %v15883_v37, %v15893_v57  ;;  %v6795_v29 = vcombine.low %v15899_v53, %v6793_v6  ;;  %v20578_v37 = vld [vmem:[#allocation25_spill] sm:$0xff] }
 0x1ce   :  { %v11039_v14 = vcombine.low %v16452_v61, %v11038_v20  ;;  %v5258_v60 = vrot.slane %v5250_v54, %v13831_v5  ;;  %v5265_v33 = vrot.slane %v5251_v38, %v13831_v5  ;;  %v3813_v44 = vrot.slane %v3805_v1, %v13831_v5 }
 0x1cf   :  { %v5560_v7 = vcombine.low %v5552_v25, %v5559_v28  ;;  %v6802_v27 = vrot.slane %v6794_v3, %v13831_v5  ;;  %v6809_v21 = vrot.slane %v6795_v29, %v13831_v5  ;;  %v6500_v34 = vcombine.low %v15921_v43, %v15924_v11 }
 0x1d0   :  { %11287 = vrot.lane.b32.xlu0 %v11039_v14, %s13742_s15  ;;  %v5266_v57 = vcombine.low %v5258_v60, %v5265_v33  ;;  %v3821_v53 = vcombine.low %v3813_v44, %v20578_v37  ;;  %v6501_v6 = vcombine.low %v15931_v10, %v6499_v45  ;;  %v7700_v20 = vcombine.low %v16153_v30, %v16156_v62  ;;  %v9786_v25 = vpop.permute.xlu0 %9785 }
 0x1d1   :  { %6007 = vrot.lane.b32.xlu1 %v5560_v7, %s13734_s28  ;;  %v6810_v51 = vcombine.low %v6802_v27, %v6809_v21  ;;  %v6508_v54 = vrot.slane %v6500_v34, %v13831_v5  ;;  %v7518_v38 = vcombine.low %v16205_v15, %v16197_v24  ;;  %v16493_v43 = vcombine.high %v16153_v30, %v16153_v30 }
 0x1d2   :  { %v11336_v11 = vsel %vm11321_vm15, %v3821_v53, %v5986_v0  ;;  %v6515_v10 = vrot.slane %v6501_v6, %v13831_v5  ;;  %v7707_v45 = vrot.slane %v7700_v20, %v13831_v5  ;;  %v16500_v35 = vcombine.high %v16156_v62, %v16156_v62  ;;  %v16534_v20 = vld.sshfl [vmem:[#allocation3 + $0x64] sm:$0x33 pattern:$0x75316420] }
 0x1d3   :  { %v11407_v40 = vsel %vm11397_vm0, %v11336_v11, %v7236_v22  ;;  %v7525_v1 = vrot.slane %v7518_v38, %v13831_v5  ;;  %v2645_v15 = vshrl.u32 %v16156_v62, 16  ;;  %v2650_v28 = vshll.u32 %v16493_v43, 16  ;;  %v13589_v60 = vld [vmem:[#allocation2 + $0x18] sm:$0xff]  }
 0x1d4   :  { %5995 = vrot.lane.b32.xlu0 %v5266_v57, %s13734_s28  ;;  %v6516_v0 = vcombine.low %v6508_v54, %v6515_v10  ;;  %v11458_v3 = vsel %vm11448_vm1, %v11407_v40, %v7974_v48  ;;  %v7709_v29 = vcombine.low %v16414_v19, %v7707_v45  ;;  %v2653_v14 = vshrl.u32 %v16493_v43, 16  ;;  %v10332_v48 = vpop.permute.xlu1 %10331  ;;  %13472 = vmatmul.mubr.msk.bf16.gmra.mrb[12].mxu0 %vm12168_vm10, %v13589_v60 }
 0x1d5   :  { %7257 = vrot.lane.b32.xlu1 %v6810_v51, %s13741_s14  ;;  %v7527_v22 = vcombine.low %v7525_v1, %v16439_v39  ;;  %v11509_v33 = vsel %vm11499_vm2, %v11458_v3, %v9224_v31  ;;  %v16515_v44 = vsel %vm14115_vm14, %v2645_v15, %v2650_v28  ;;  %v2658_v7 = vshll.u32 %v16500_v35, 16  ;;  %13475 = vmatprep.mubr.msk.bf16.mxu0 %vm13746_vm9, %v20529_v13  ;;  %v10910_v1 = vpop.permute.xlu0 %10909 }
 0x1d6   :  { %v7723_v27 = vrot.slane %v7709_v29, %v13831_v5  ;;  %v11560_v21 = vsel %vm11550_vm3, %v11509_v33, %v9786_v25  ;;  %v8750_v34 = vcombine.low %v16253_v12, %v16261_v17  ;;  %v8751_v57 = vcombine.low %v16269_v26, %v16275_v42 }
 0x1d7   :  { %v7541_v37 = vrot.slane %v7527_v22, %v13831_v5  ;;  %v16528_v53 = vsel %vm14115_vm14, %v2653_v14, %v2658_v7  ;;  %v8752_v6 = vcombine.low %v16283_v16, %v16290_v23  ;;  %v8753_v31 = vcombine.low %v16302_v63, %v16515_v44 }
 0x1d8   :  { %7245 = vrot.lane.b32.xlu0 %v6516_v0, %s13741_s14  ;;  %v7724_v12 = vcombine.low %v16443_v55, %v7723_v27  ;;  %v5564_v17 = vcombine.low %v16515_v44, %v16528_v53  ;;  %v8760_v26 = vrot.slane %v8750_v34, %v13831_v5  ;;  %v8767_v42 = vrot.slane %v8751_v57, %v13831_v5 }
 0x1d9   :  { %v7542_v16 = vcombine.low %v16452_v61, %v7541_v37  ;;  %v8774_v63 = vrot.slane %v8752_v6, %v13831_v5  ;;  %v8781_v23 = vrot.slane %v8753_v31, %v13831_v5  ;;  %v16549_v51 = vcombine.high %v16214_v32, %v16214_v32  ;;  %v13010_v6 = vld.sshfl [vmem:[#allocation3 + $0xac] sm:$0x33 pattern:$0x75316420] }
 0x1da   :  { %7995 = vrot.lane.b32.xlu1 %v7724_v12, %s13739_s1  ;;  %v8782_v55 = vcombine.low %v8760_v26, %v8767_v42  ;;  %v16554_v54 = vrot.slane %v16534_v20, %v13831_v5  ;;  %v2254_v38 = vshrl.u32 %v16298_v58, 16  ;;  %v8456_v61 = vcombine.low %v16334_v59, %v16338_v8  ;;  %v11280_v8 = vpop.permute.xlu1 %11279  ;;  %v20580_v12 = vld [vmem:[#allocation65_spill] sm:$0xff] }
 0x1db   :  { %v8783_v11 = vcombine.low %v8774_v63, %v8781_v23  ;;  %v2259_v10 = vshll.u32 %v16549_v51, 16  ;;  %v2262_v45 = vshrl.u32 %v16549_v51, 16  ;;  %v8457_v40 = vcombine.low %v16347_v2, %v16352_v41  ;;  %v20581_v26 = vld [vmem:[#allocation77_spill] sm:$0xff]  ;;  %v20585_v63 = vld [vmem:[#allocation24_spill] sm:$0xff]  ;;  %v20586_v23 = vld [vmem:[#allocation23_spill] sm:$0xff] }
 0x1dc   :  { %7983 = vrot.lane.b32.xlu0 %v7542_v16, %s13739_s1  ;;  %v8790_v25 = vrot.slane %v8782_v55, %v13831_v5  ;;  %v2267_v15 = vshll.u32 %v16554_v54, 16  ;;  %v8458_v58 = vcombine.low %v16360_v50, %v16367_v46  ;;  %v8466_v59 = vrot.slane %v8456_v61, %v13831_v5  ;;  %v13011_v16 = vld.sshfl [vmem:[#allocation3 + $0xb0] sm:$0x33 pattern:$0x75316420] }
 0x1dd   :  { %v8797_v28 = vrot.slane %v8783_v11, %v13831_v5  ;;  %v16572_v0 = vsel %vm14115_vm14, %v2254_v38, %v2259_v10  ;;  %v8473_v2 = vrot.slane %v8457_v40, %v13831_v5  ;;  %v11611_v41 = vsel %vm11601_vm4, %v11560_v21, %v10332_v48  ;;  %v5988_v38 = vpop.permute.xlu0 %5987 }
 0x1de   :  { %v16578_v3 = vsel %vm14115_vm14, %v2262_v45, %v2267_v15  ;;  %v8459_v50 = vcombine.low %v16377_v56, %v16572_v0  ;;  %v8480_v46 = vrot.slane %v8458_v58, %v13831_v5  ;;  %v11662_v29 = vsel %vm11652_vm5, %v11611_v41, %v10910_v1 }
 0x1df   :  { %v8798_v14 = vcombine.low %v8790_v25, %v8797_v28  ;;  %v8488_v22 = vcombine.low %v8466_v59, %v8473_v2  ;;  %v11713_v33 = vsel %vm11703_vm6, %v11662_v29, %v11280_v8  ;;  %v4364_v21 = vcombine.low %v16156_v62, %v16493_v43  ;;  %v20588_v2 = vld [vmem:[#allocation28_spill] sm:$0xff]  ;;  %v12997_v29 = vld.sshfl [vmem:[#allocation3 + $0x68] sm:$0x33 pattern:$0x75316420] }
 0x1e0   :  { %v8487_v7 = vrot.slane %v8459_v50, %v13831_v5  ;;  %v13329_v27 = vcombine.low %v11713_v33, %v11713_v33  ;;  %v13330_v48 = vcombine.high %v11713_v33, %v11713_v33  ;;  %v4393_v34 = vcombine.low %v16179_v52, %v16182_v4  ;;  %v20582_v52 = vld [vmem:[#allocation71_spill] sm:$0xff] }
 0x1e1   :  { %9245 = vrot.lane.b32.xlu1 %v8798_v14, %s13743_s16  ;;  %v8496_v56 = vrot.slane %v8488_v22, %v13831_v5  ;;  %v13310_v57 = vcombine.high %v16134_v18, %v16144_v9  ;;  %v13265_v37 = vcombine.high %v16197_v24, %v16214_v32  ;;  %v16601_v43 = vrot.slane %v4364_v21, %v13831_v5  ;;  %v7238_v22 = vpop.permute.xlu1 %7237 }
 0x1e2   :  { %v8489_v31 = vcombine.low %v8480_v46, %v8487_v7  ;;  %11935 = vst.msk [vmem:[#allocation2 + $0x20] sm:$0xf] %vm11926_vm7, %v13329_v27  ;;  %11936 = vst.msk [vmem:[#allocation2 + $0x24] sm:$0xf] %vm11926_vm7, %v13330_v48  ;;  %v4099_v42 = vcombine.low %v20581_v26, %v20580_v12  ;;  %v9434_v4 = vcombine.low %v20582_v52, %v16214_v32 }
 0x1e3   :  { %20579 = vst [vmem:[#allocation74_spill] sm:$0xff] %v16601_v43  ;;  %v16608_v18 = vrot.slane %v4393_v34, %v13831_v5  ;;  %v9583_v9 = vrot.slane %v13310_v57, %v13831_v5  ;;  %v16612_v24 = vrot.slane %v13265_v37, %v13831_v5  ;;  %v3854_v55 = vcombine.low %v20586_v23, %v20585_v63  ;;  %v7976_v57 = vpop.permute.xlu0 %7975 }
 0x1e4   :  { %v8503_v61 = vrot.slane %v8489_v31, %v13831_v5  ;;  %v16618_v11 = vrot.slane %v4099_v42, %v13831_v5  ;;  %v9441_v32 = vrot.slane %v9434_v4, %v13831_v5  ;;  %v1118_v10 = vcombine.high %v13010_v6, %v13010_v6 }
 0x1e5   :  { %20583 = vst [vmem:[#allocation73_spill] sm:$0xff] %v16608_v18  ;;  %20584 = vst [vmem:[#allocation75_spill] sm:$0xff] %v16612_v24  ;;  %v9584_v45 = vcombine.low %v9583_v9, %v16601_v43  ;;  %v3862_v40 = vrot.slane %v3854_v55, %v13831_v5  ;;  %v16624_v1 = vrot.slane %v13010_v6, %v13831_v5 }
 0x1e6   :  { %20587 = vst [vmem:[#allocation78_spill] sm:$0xff] %v16618_v11  ;;  %v1141_v25 = vcombine.high %v13011_v16, %v13011_v16  ;;  %v8504_v15 = vcombine.low %v8496_v56, %v8503_v61  ;;  %v9442_v58 = vcombine.low %v9441_v32, %v16612_v24  ;;  %v16628_v59 = vrot.slane %v1118_v10, %v13831_v5 }
 0x1e7   :  { %v16631_v8 = vrot.slane %v13011_v16, %v13831_v5  ;;  %v9591_v28 = vrot.slane %v9584_v45, %v13831_v5  ;;  %v3870_v41 = vcombine.low %v3862_v40, %v20588_v2  ;;  %v16637_v50 = vcombine.high %v16624_v1, %v16624_v1 }
 0x1e8   :  { %v16640_v46 = vrot.slane %v1141_v25, %v13831_v5  ;;  %9233 = vrot.lane.b32.xlu0 %v8504_v15, %s13743_s16  ;;  %v9449_v14 = vrot.slane %v9442_v58, %v13831_v5  ;;  %v4410_v33 = vcombine.low %v16500_v35, %v16624_v1  ;;  %v789_v7 = vcombine.high %v16534_v20, %v16534_v20 }
 0x1e9   :  { %v16650_v27 = vcombine.high %v16554_v54, %v16554_v54  ;;  %v9592_v48 = vcombine.low %v16608_v18, %v9591_v28  ;;  %v11339_v21 = vsel %vm11321_vm15, %v3870_v41, %v5988_v38  ;;  %v4411_v56 = vcombine.low %v16628_v59, %v16637_v50  ;;  %v13590_v37 = vld [vmem:[#allocation2 + $0x20] sm:$0xff]  }
 0x1ea   :  { %v4412_v34 = vcombine.low %v16631_v8, %v16640_v46  ;;  %v9450_v6 = vcombine.low %v16618_v11, %v9449_v14  ;;  %v16660_v20 = vrot.slane %v4410_v33, %v13831_v5  ;;  %v16663_v31 = vrot.slane %v789_v7, %v13831_v5  ;;  %13476 = vmatmul.mubr.msk.bf16.gmra.mrb[16].mxu0 %vm12168_vm10, %v13590_v37 }
 0x1eb   :  { %v812_v12 = vcombine.high %v12997_v29, %v12997_v29  ;;  %9807 = vrot.lane.b32.xlu1 %v9592_v48, %s13738_s3  ;;  %v16667_v26 = vrot.slane %v4411_v56, %v13831_v5  ;;  %v16673_v52 = vrot.slane %v12997_v29, %v13831_v5  ;;  %v11409_v4 = vsel %vm11397_vm0, %v11339_v21, %v7238_v22  ;;  %v9226_v56 = vpop.permute.xlu1 %9225 }
 0x1ec   :  { %v16670_v42 = vrot.slane %v4412_v34, %v13831_v5  ;;  %9795 = vrot.lane.b32.xlu0 %v9450_v6, %s13738_s3  ;;  %v10122_v16 = vcombine.low %v16601_v43, %v16660_v20  ;;  %v4116_v63 = vcombine.low %v16554_v54, %v16663_v31  ;;  %v16685_v23 = vsel %vm11448_vm1, %v11409_v4, %v7976_v57 }
 0x1ed   :  { %v16680_v9 = vrot.slane %v812_v12, %v13831_v5  ;;  %v16691_v38 = vcombine.high %v16673_v52, %v16673_v52  ;;  %v4117_v61 = vcombine.low %v16650_v27, %v16673_v52  ;;  %v16697_v32 = vcombine.high %v16631_v8, %v16631_v8  ;;  %13479 = vmatprep.mubr.msk.bf16.mxu0 %vm13746_vm9, %v20529_v13 }
 0x1ee   :  { %20589 = vst [vmem:[#allocation21_spill] sm:$0xff] %v16670_v42  ;;  %v10123_v55 = vcombine.low %v16667_v26, %v16670_v42  ;;  %v10130_v10 = vrot.slane %v10122_v16, %v13831_v5  ;;  %v16702_v45 = vrot.slane %v4116_v63, %v13831_v5  ;;  %v16706_v40 = vcombine.high %v16628_v59, %v16628_v59 }
 0x1ef   :  { %v2661_v25 = vshrl.u32 %v16500_v35, 16  ;;  %v4118_v58 = vcombine.low %v16680_v9, %v16691_v38  ;;  %v16715_v28 = vrot.slane %v4117_v61, %v13831_v5  ;;  %v2666_v2 = vshll.u32 %v16624_v1, 16 }
 0x1f0   :  { %20590 = vst [vmem:[#allocation20_spill] sm:$0xff] %v16702_v45  ;;  %v10137_v15 = vrot.slane %v10123_v55, %v13831_v5  ;;  %v9980_v41 = vcombine.low %v16612_v24, %v16702_v45  ;;  %v2669_v29 = vshrl.u32 %v16624_v1, 16  ;;  %v2674_v35 = vshll.u32 %v16628_v59, 16 }
 0x1f1   :  { %20591 = vst [vmem:[#allocation25_spill] sm:$0xff] %v16715_v28  ;;  %v2677_v14 = vshrl.u32 %v16628_v59, 16  ;;  %v16724_v33 = vrot.slane %v4118_v58, %v13831_v5  ;;  %v16728_v7 = vsel %vm14115_vm14, %v2661_v25, %v2666_v2  ;;  %v2682_v48 = vshll.u32 %v16637_v50, 16 }
 0x1f2   :  { %v10138_v22 = vcombine.low %v10130_v10, %v10137_v15  ;;  %v9988_v21 = vrot.slane %v9980_v41, %v13831_v5  ;;  %v16734_v34 = vsel %vm14115_vm14, %v2669_v29, %v2674_v35  ;;  %v2685_v57 = vshrl.u32 %v16637_v50, 16 }
 0x1f3   :  { %v2690_v37 = vshll.u32 %v16706_v40, 16  ;;  %v9981_v6 = vcombine.low %v16715_v28, %v16724_v33  ;;  %v16743_v12 = vsel %vm14115_vm14, %v2677_v14, %v2682_v48  ;;  %v2694_v4 = vshrl.u32 %v16631_v8, 16 }
 0x1f4   :  { %10353 = vrot.lane.b32.xlu1 %v10138_v22, %s13740_s13  ;;  %v2699_v16 = vshll.u32 %v16640_v46, 16  ;;  %v2702_v55 = vshrl.u32 %v16640_v46, 16  ;;  %v2707_v61 = vshll.u32 %v16697_v32, 16  ;;  %v16757_v10 = vrot.slane %v5564_v17, %v13831_v5 }
 0x1f5   :  { %v16749_v63 = vsel %vm14115_vm14, %v2685_v57, %v2690_v37  ;;  %v9995_v25 = vrot.slane %v9981_v6, %v13831_v5  ;;  %v5610_v58 = vcombine.low %v16728_v7, %v16734_v34  ;;  %v16774_v44 = vcombine.high %v16680_v9, %v16680_v9  ;;  %v9788_v57 = vpop.permute.xlu0 %9787 }
 0x1f6   :  { %v16762_v15 = vsel %vm14115_vm14, %v2694_v4, %v2699_v16  ;;  %v5611_v2 = vcombine.low %v16743_v12, %v16749_v63  ;;  %v16770_v41 = vsel %vm14115_vm14, %v2702_v55, %v2707_v61  ;;  %v16778_v17 = vcombine.high %v16663_v31, %v16663_v31  ;;  %v10334_v55 = vpop.permute.xlu1 %10333 }
 0x1f7   :  { %v2270_v29 = vshrl.u32 %v16554_v54, 16  ;;  %v9996_v35 = vcombine.low %v9988_v21, %v9995_v25  ;;  %v5612_v14 = vcombine.low %v16762_v15, %v16770_v41  ;;  %v16784_v22 = vrot.slane %v5610_v58, %v13831_v5 }
 0x1f8   :  { %v16787_v48 = vrot.slane %v5611_v2, %v13831_v5  ;;  %v2275_v37 = vshll.u32 %v16663_v31, 16  ;;  %v2278_v6 = vshrl.u32 %v16663_v31, 16  ;;  %v2283_v4 = vshll.u32 %v16650_v27, 16 }
 0x1f9   :  { %20592 = vst [vmem:[#allocation65_spill] sm:$0xff] %v16784_v22  ;;  %v2286_v16 = vshrl.u32 %v16650_v27, 16  ;;  %10341 = vrot.lane.b32.xlu0 %v9996_v35, %s13740_s13  ;;  %v16795_v21 = vrot.slane %v5612_v14, %v13831_v5  ;;  %v10684_v61 = vcombine.low %v16757_v10, %v16784_v22  ;;  %v2291_v25 = vshll.u32 %v16778_v17, 16 }
 0x1fa   :  { %20593 = vst [vmem:[#allocation77_spill] sm:$0xff] %v16787_v48  ;;  %v2295_v58 = vshrl.u32 %v16673_v52, 16  ;;  %v16803_v2 = vsel %vm14115_vm14, %v2270_v29, %v2275_v37  ;;  %v16807_v60 = vsel %vm14115_vm14, %v2278_v6, %v2283_v4  ;;  %v2300_v35 = vshll.u32 %v16680_v9, 16 }
 0x1fb   :  { %20594 = vst [vmem:[#allocation71_spill] sm:$0xff] %v16795_v21  ;;  %v2303_v14 = vshrl.u32 %v16680_v9, 16  ;;  %v10685_v28 = vcombine.low %v16787_v48, %v16795_v21  ;;  %v10692_v42 = vrot.slane %v10684_v61, %v13831_v5  ;;  %v16816_v11 = vsel %vm14115_vm14, %v2286_v16, %v2291_v25 }
 0x1fc   :  { %v2308_v29 = vshll.u32 %v16691_v38, 16  ;;  %v16821_v37 = vsel %vm14115_vm14, %v2295_v58, %v2300_v35  ;;  %v2311_v6 = vshrl.u32 %v16691_v38, 16  ;;  %v2316_v4 = vshll.u32 %v16774_v44, 16  ;;  %v10912_v58 = vpop.permute.xlu0 %10911 }
 0x1fd   :  { %v20595_v18 = vcombine.low %v16572_v0, %v16578_v3  ;;  %v10699_v61 = vrot.slane %v10685_v28, %v13831_v5  ;;  %v5316_v25 = vcombine.low %v16803_v2, %v16807_v60  ;;  %v5317_v38 = vcombine.low %v16816_v11, %v16821_v37 }
 0x1fe   :  { %v16834_v16 = vsel %vm14115_vm14, %v2303_v14, %v2308_v29  ;;  %v16842_v35 = vsel %vm14115_vm14, %v2311_v6, %v2316_v4  ;;  %v11511_v0 = vsel %vm11499_vm2, %v16685_v23, %v9226_v56  ;;  %v6860_v28 = vcombine.low %v16624_v1, %v16628_v59  ;;  %v11282_v14 = vpop.permute.xlu1 %11281 }
 0x1ff   :  { %v16829_v24 = vrot.slane %v20595_v18, %v13831_v5  ;;  %v13291_v18 = vcombine.high %v16153_v30, %v16156_v62  ;;  %v10700_v29 = vcombine.low %v10692_v42, %v10699_v61  ;;  %v5318_v43 = vcombine.low %v16834_v16, %v16842_v35 }
 0x200   :  { %v16853_v21 = vrot.slane %v5316_v25, %v13831_v5  ;;  %v16856_v6 = vrot.slane %v5317_v38, %v13831_v5  ;;  %v11562_v4 = vsel %vm11550_vm3, %v11511_v0, %v9788_v57  ;;  %v13292_v30 = vcombine.high %v16624_v1, %v16628_v59 }
 0x201   :  { %v6842_v23 = vrot.slane %v13291_v18, %v13831_v5  ;;  %v6862_v62 = vcombine.low %v16640_v46, %v16697_v32  ;;  %10931 = vrot.lane.b32.xlu1 %v10700_v29, %s13744_s17  ;;  %v16866_v42 = vrot.slane %v5318_v43, %v13831_v5  ;;  %v16871_v61 = vrot.slane %v6860_v28, %v13831_v5  ;;  %v5990_v28 = vpop.permute.xlu0 %5989 }
 0x202   :  { %20596 = vst [vmem:[#allocation24_spill] sm:$0xff] %v16853_v21  ;;  %20597 = vst [vmem:[#allocation23_spill] sm:$0xff] %v16856_v6  ;;  %v10526_v56 = vcombine.low %v16829_v24, %v16853_v21  ;;  %v6520_v57 = vcombine.low %v16549_v51, %v16554_v54  ;;  %v16876_v25 = vrot.slane %v13292_v30, %v13831_v5  ;;  %v20603_v21 = vld [vmem:[#allocation69_spill] sm:$0xff] }
 0x203   :  { %20598 = vst [vmem:[#allocation28_spill] sm:$0xff] %v16866_v42  ;;  %20599 = vst [vmem:[#allocation87_spill] sm:$0xff] %v16871_v61  ;;  %v16879_v1 = vrot.slane %v6862_v62, %v13831_v5  ;;  %v6566_v59 = vcombine.low %v16663_v31, %v16650_v27  ;;  %v6567_v43 = vcombine.low %v16778_v17, %v16680_v9  ;;  %v7240_v62 = vpop.permute.xlu1 %7239 }
 0x204   :  { %20600 = vst [vmem:[#allocation88_spill] sm:$0xff] %v16876_v25  ;;  %v10527_v38 = vcombine.low %v16856_v6, %v16866_v42  ;;  %v10534_v0 = vrot.slane %v10526_v56, %v13831_v5  ;;  %v7733_v18 = vcombine.low %v6842_v23, %v16871_v61  ;;  %v6548_v51 = vrot.slane %v6520_v57, %v13831_v5  ;;  %v20602_v42 = vld [vmem:[#allocation68_spill] sm:$0xff] }
 0x205   :  { %v11142_v29 = vcombine.low %v16876_v25, %v16879_v1  ;;  %v13285_v30 = vcombine.high %v16673_v52, %v16680_v9  ;;  %v16895_v27 = vrot.slane %v6566_v59, %v13831_v5  ;;  %v16898_v17 = vrot.slane %v6567_v43, %v13831_v5 }
 0x206   :  { %v10541_v56 = vrot.slane %v10527_v38, %v13831_v5  ;;  %v16902_v61 = vrot.slane %v7733_v18, %v13831_v5  ;;  %v11613_v57 = vsel %vm11601_vm4, %v11562_v4, %v10334_v55  ;;  %v5593_v25 = vcombine.low %v20603_v21, %v20602_v42  ;;  %v20604_v18 = vld [vmem:[#allocation19_spill] sm:$0xff] }
 0x207   :  { %20601 = vst [vmem:[#allocation89_spill] sm:$0xff] %v16895_v27  ;;  %v11149_v6 = vrot.slane %v11142_v29, %v13831_v5  ;;  %v16909_v22 = vrot.slane %v13285_v30, %v13831_v5  ;;  %v7551_v59 = vcombine.low %v6548_v51, %v16895_v27  ;;  %v11664_v43 = vsel %vm11652_vm5, %v11613_v57, %v10912_v58  ;;  %v20607_v57 = vld [vmem:[#allocation27_spill] sm:$0xff]  ;;  %v9228_v27 = vpop.permute.xlu1 %9227 }
 0x208   :  { %v10542_v48 = vcombine.low %v10534_v0, %v10541_v56  ;;  %v11715_v38 = vsel %vm11703_vm6, %v11664_v43, %v11282_v14  ;;  %v5594_v45 = vcombine.low %v20604_v18, %v16757_v10  ;;  %v5601_v55 = vrot.slane %v5593_v25, %v13831_v5  ;;  %v20605_v14 = vld [vmem:[#allocation18_spill] sm:$0xff]  ;;  %v7978_v56 = vpop.permute.xlu0 %7977 }
 0x209   :  { %v11150_v4 = vcombine.low %v16902_v61, %v11149_v6  ;;  %v16919_v21 = vrot.slane %v7551_v59, %v13831_v5  ;;  %v11040_v42 = vcombine.low %v16898_v17, %v16909_v22  ;;  %v13331_v29 = vcombine.low %v11715_v38, %v11715_v38  ;;  %v20606_v10 = vld [vmem:[#allocation22_spill] sm:$0xff] }
 0x20a   :  { %10919 = vrot.lane.b32.xlu0 %v10542_v48, %s13744_s17  ;;  %v13332_v58 = vcombine.high %v11715_v38, %v11715_v38  ;;  %v5608_v0 = vrot.slane %v5594_v45, %v13831_v5  ;;  %v5299_v30 = vcombine.low %v20605_v14, %v16389_v49  ;;  %v5300_v25 = vcombine.low %v20606_v10, %v16829_v24  ;;  %v20608_v59 = vld [vmem:[#allocation26_spill] sm:$0xff]  ;;  %v20609_v48 = vld [vmem:[#allocation84_spill] sm:$0xff]  ;;  %v20610_v45 = vld [vmem:[#allocation85_spill] sm:$0xff] }
 0x20b   :  { %11301 = vrot.lane.b32.xlu1 %v11150_v4, %s13742_s15  ;;  %v11047_v6 = vrot.slane %v11040_v42, %v13831_v5  ;;  %11937 = vst.msk [vmem:[#allocation2 + $0x28] sm:$0xf] %vm11926_vm7, %v13331_v29  ;;  %v3903_v43 = vcombine.low %v20608_v59, %v20607_v57  ;;  %v6843_v38 = vcombine.low %v20609_v48, %v16414_v19  ;;  %v20611_v42 = vld [vmem:[#allocation86_spill] sm:$0xff] }
 0x20c   :  { %v6844_v18 = vcombine.low %v20610_v45, %v6842_v23  ;;  %11938 = vst.msk [vmem:[#allocation2 + $0x2c] sm:$0xf] %vm11926_vm7, %v13332_v58  ;;  %v5609_v49 = vcombine.low %v5601_v55, %v5608_v0  ;;  %v5307_v24 = vrot.slane %v5299_v30, %v13831_v5  ;;  %v5314_v4 = vrot.slane %v5300_v25, %v13831_v5 }
 0x20d   :  { %v6549_v14 = vcombine.low %v20611_v42, %v16436_v47  ;;  %v11048_v29 = vcombine.low %v16919_v21, %v11047_v6  ;;  %v3911_v10 = vrot.slane %v3903_v43, %v13831_v5  ;;  %v6851_v57 = vrot.slane %v6843_v38, %v13831_v5  ;;  %v20612_v47 = vld [vmem:[#allocation32_spill] sm:$0xff] }
 0x20e   :  { %v6858_v19 = vrot.slane %v6844_v18, %v13831_v5  ;;  %v5315_v23 = vcombine.low %v5307_v24, %v5314_v4  ;;  %v6550_v59 = vcombine.low %v16439_v39, %v6548_v51  ;;  %v7725_v58 = vcombine.low %v16637_v50, %v16631_v8  ;;  %v9790_v51 = vpop.permute.xlu0 %9789  ;;  %v10336_v18 = vpop.permute.xlu1 %10335 }
 0x20f   :  { %v6557_v55 = vrot.slane %v6549_v14, %v13831_v5  ;;  %11289 = vrot.lane.b32.xlu0 %v11048_v29, %s13742_s15  ;;  %6009 = vrot.lane.b32.xlu1 %v5609_v49, %s13734_s28  ;;  %v3919_v0 = vcombine.low %v3911_v10, %v20612_v47  ;;  %v7543_v25 = vcombine.low %v16673_v52, %v16680_v9  ;;  %v2710_v6 = vshrl.u32 %v16697_v32, 16  ;;  %v16970_v32 = vld.sshfl [vmem:[#allocation3 + $0x6c] sm:$0x33 pattern:$0x75316420] }
 0x210   :  { %v6859_v30 = vcombine.low %v6851_v57, %v6858_v19  ;;  %v6564_v43 = vrot.slane %v6550_v59, %v13831_v5  ;;  %v7732_v39 = vrot.slane %v7725_v58, %v13831_v5  ;;  %v16960_v50 = vcombine.high %v16640_v46, %v16640_v46 }
 0x211   :  { %v8799_v48 = vcombine.low %v16528_v53, %v16728_v7  ;;  %v11342_v38 = vsel %vm11321_vm15, %v3919_v0, %v5990_v28  ;;  %v7550_v45 = vrot.slane %v7543_v25, %v13831_v5  ;;  %v8800_v52 = vcombine.low %v16734_v34, %v16743_v12 }
 0x212   :  { %v8801_v9 = vcombine.low %v16749_v63, %v16762_v15  ;;  %v6565_v49 = vcombine.low %v6557_v55, %v6564_v43  ;;  %v11411_v24 = vsel %vm11397_vm0, %v11342_v38, %v7240_v62  ;;  %v7734_v4 = vcombine.low %v7732_v39, %v16879_v1  ;;  %v10914_v55 = vpop.permute.xlu0 %10913  ;;  %v11284_v0 = vpop.permute.xlu1 %11283 }
 0x213   :  { %v2715_v53 = vshll.u32 %v16960_v50, 16  ;;  %5997 = vrot.lane.b32.xlu0 %v5315_v23, %s13734_s28  ;;  %7259 = vrot.lane.b32.xlu1 %v6859_v30, %s13741_s14  ;;  %v11462_v7 = vsel %vm11448_vm1, %v11411_v24, %v7978_v56  ;;  %v7552_v34 = vcombine.low %v7550_v45, %v16909_v22  ;;  %v8809_v12 = vrot.slane %v8799_v48, %v13831_v5  ;;  %v13591_v15 = vld [vmem:[#allocation2 + $0x28] sm:$0xff]  }
 0x214   :  { %v2319_v63 = vshrl.u32 %v16774_v44, 16  ;;  %v7748_v28 = vrot.slane %v7734_v4, %v13831_v5  ;;  %v11513_v62 = vsel %vm11499_vm2, %v11462_v7, %v9228_v27  ;;  %v8816_v14 = vrot.slane %v8800_v52, %v13831_v5  ;;  %13480 = vmatmul.mubr.msk.bf16.gmra.mrb[20].mxu0 %vm12168_vm10, %v13591_v15  ;;  %v20616_v7 = vld [vmem:[#allocation39_spill] sm:$0xff] }
 0x215   :  { %v16985_v42 = vsel %vm14115_vm14, %v2710_v6, %v2715_v53  ;;  %v7566_v29 = vrot.slane %v7552_v34, %v13831_v5  ;;  %v11564_v56 = vsel %vm11550_vm3, %v11513_v62, %v9790_v51  ;;  %v8823_v57 = vrot.slane %v8801_v9, %v13831_v5  ;;  %13483 = vmatprep.mubr.msk.bf16.mxu0 %vm13746_vm9, %v20529_v13  ;;  %v20615_v53 = vld [vmem:[#allocation40_spill] sm:$0xff]  ;;  %v20618_v34 = vld [vmem:[#allocation41_spill] sm:$0xff] }
 0x216   :  { %v8802_v10 = vcombine.low %v16770_v41, %v16985_v42  ;;  %v7749_v19 = vcombine.low %v16902_v61, %v7748_v28  ;;  %v8831_v27 = vcombine.low %v8809_v12, %v8816_v14  ;;  %v16997_v23 = vrot.slane %v16970_v32, %v13831_v5  ;;  %v20620_v28 = vld [vmem:[#allocation45_spill] sm:$0xff]  ;;  %v20621_v14 = vld [vmem:[#allocation48_spill] sm:$0xff] }
 0x217   :  { %v8505_v59 = vcombine.low %v16578_v3, %v16803_v2  ;;  %7247 = vrot.lane.b32.xlu0 %v6565_v49, %s13741_s14  ;;  %v7567_v41 = vcombine.low %v16919_v21, %v7566_v29  ;;  %v8506_v61 = vcombine.low %v16807_v60, %v16816_v11  ;;  %v8507_v47 = vcombine.low %v16821_v37, %v16834_v16  ;;  %v20622_v29 = vld [vmem:[#allocation47_spill] sm:$0xff] }
 0x218   :  { %v8830_v58 = vrot.slane %v8802_v10, %v13831_v5  ;;  %7997 = vrot.lane.b32.xlu1 %v7749_v19, %s13739_s1  ;;  %v8839_v3 = vrot.slane %v8831_v27, %v13831_v5  ;;  %v2324_v2 = vshll.u32 %v16997_v23, 16  ;;  %v11615_v25 = vsel %vm11601_vm4, %v11564_v56, %v10336_v18 }
 0x219   :  { %v8515_v30 = vrot.slane %v8505_v59, %v13831_v5  ;;  %v8522_v6 = vrot.slane %v8506_v61, %v13831_v5  ;;  %v8529_v43 = vrot.slane %v8507_v47, %v13831_v5  ;;  %v11666_v60 = vsel %vm11652_vm5, %v11615_v25, %v10914_v55  ;;  %v5992_v25 = vpop.permute.xlu0 %5991 }
 0x21a   :  { %v8832_v21 = vcombine.low %v8823_v57, %v8830_v58  ;;  %v17020_v11 = vsel %vm14115_vm14, %v2319_v63, %v2324_v2  ;;  %v11717_v37 = vsel %vm11703_vm6, %v11666_v60, %v11284_v0  ;;  %v13269_v16 = vcombine.high %v16631_v8, %v16640_v46  ;;  %v20624_v58 = vld [vmem:[#allocation20_spill] sm:$0xff]  ;;  %v6004_v0 = vpop.permute.xlu1 %6003  ;;  %v20626_v2 = vld [vmem:[#allocation29_spill] sm:$0xff] }
 0x21b   :  { %v4442_v39 = vcombine.low %v16660_v20, %v16667_v26  ;;  %7985 = vrot.lane.b32.xlu0 %v7567_v41, %s13739_s1  ;;  %v8508_v48 = vcombine.low %v16842_v35, %v17020_v11  ;;  %v8537_v38 = vcombine.low %v8515_v30, %v8522_v6  ;;  %v13333_v45 = vcombine.low %v11717_v37, %v11717_v37  ;;  %v20628_v60 = vld [vmem:[#allocation33_spill] sm:$0xff] }
 0x21c   :  { %v8846_v51 = vrot.slane %v8832_v21, %v13831_v5  ;;  %v13334_v18 = vcombine.high %v11717_v37, %v11717_v37  ;;  %v17032_v52 = vrot.slane %v13269_v16, %v13831_v5  ;;  %v9593_v8 = vcombine.low %v16706_v40, %v16640_v46  ;;  %v20617_v40 = vld [vmem:[#allocation44_spill] sm:$0xff]  ;;  %v13012_v21 = vld.sshfl [vmem:[#allocation3 + $0xb4] sm:$0x33 pattern:$0x75316420]  ;;  %v20629_v37 = vld [vmem:[#allocation31_spill] sm:$0xff] }
 0x21d   :  { %v17035_v9 = vrot.slane %v4442_v39, %v13831_v5  ;;  %v8536_v26 = vrot.slane %v8508_v48, %v13831_v5  ;;  %v8545_v49 = vrot.slane %v8537_v38, %v13831_v5  ;;  %11939 = vst.msk [vmem:[#allocation2 + $0x30] sm:$0xf] %vm11926_vm7, %v13333_v45  ;;  %v4119_v35 = vcombine.low %v16774_v44, %v16997_v23  ;;  %v20619_v44 = vld [vmem:[#allocation43_spill] sm:$0xff] }
 0x21e   :  { %20613 = vst [vmem:[#allocation68_spill] sm:$0xff] %v17032_v52  ;;  %v8847_v20 = vcombine.low %v8839_v3, %v8846_v51  ;;  %11940 = vst.msk [vmem:[#allocation2 + $0x34] sm:$0xf] %vm11926_vm7, %v13334_v18  ;;  %v9600_v24 = vrot.slane %v9593_v8, %v13831_v5  ;;  %v13306_v4 = vcombine.high %v16554_v54, %v16663_v31  ;;  %v20625_v3 = vld [vmem:[#allocation30_spill] sm:$0xff] }
 0x21f   :  { %20614 = vst [vmem:[#allocation69_spill] sm:$0xff] %v17035_v9  ;;  %v4214_v46 = vcombine.low %v20616_v7, %v20615_v53  ;;  %v4215_v12 = vcombine.low %v20618_v34, %v20617_v40  ;;  %v8538_v63 = vcombine.low %v8529_v43, %v8536_v26  ;;  %v17054_v15 = vrot.slane %v4119_v35, %v13831_v5  ;;  %v13013_v39 = vld.sshfl [vmem:[#allocation3 + $0xb8] sm:$0x33 pattern:$0x75316420] }
 0x220   :  { %9247 = vrot.lane.b32.xlu1 %v8847_v20, %s13743_s16  ;;  %v4216_v62 = vcombine.low %v20620_v28, %v20619_v44  ;;  %v4217_v56 = vcombine.low %v20622_v29, %v20621_v14  ;;  %v9601_v54 = vcombine.low %v9600_v24, %v17032_v52  ;;  %v9458_v31 = vrot.slane %v13306_v4, %v13831_v5  ;;  %v13223_v28 = vld.sshfl [vmem:[#allocation3 + $0x70] sm:$0x33 pattern:$0x75316420] }
 0x221   :  { %v4224_v10 = vrot.slane %v4214_v46, %v13831_v5  ;;  %v17064_v57 = vrot.slane %v4215_v12, %v13831_v5  ;;  %v8552_v19 = vrot.slane %v8538_v63, %v13831_v5  ;;  %v4149_v27 = vcombine.low %v16724_v33, %v17054_v15 }
 0x222   :  { %v4238_v59 = vrot.slane %v4216_v62, %v13831_v5  ;;  %v4245_v55 = vrot.slane %v4217_v56, %v13831_v5  ;;  %v9608_v41 = vrot.slane %v9601_v54, %v13831_v5  ;;  %v9459_v61 = vcombine.low %v20624_v58, %v9458_v31  ;;  %v7254_v56 = vpop.permute.xlu1 %7253  ;;  %v7242_v54 = vpop.permute.xlu0 %7241 }
 0x223   :  { %20623 = vst [vmem:[#allocation19_spill] sm:$0xff] %v17064_v57  ;;  %v4246_v47 = vcombine.low %v4224_v10, %v17064_v57  ;;  %v3952_v30 = vcombine.low %v20626_v2, %v20625_v3  ;;  %v8553_v6 = vcombine.low %v8545_v49, %v8552_v19  ;;  %v17077_v43 = vrot.slane %v4149_v27, %v13831_v5 }
 0x224   :  { %v4247_v33 = vcombine.low %v4238_v59, %v4245_v55  ;;  %v3953_v16 = vcombine.low %v20629_v37, %v20628_v60  ;;  %v9609_v51 = vcombine.low %v17035_v9, %v9608_v41  ;;  %v9466_v48 = vrot.slane %v9459_v61, %v13831_v5 }
 0x225   :  { %20627 = vst [vmem:[#allocation18_spill] sm:$0xff] %v17077_v43  ;;  %v4254_v38 = vrot.slane %v4246_v47, %v13831_v5  ;;  %v3960_v45 = vrot.slane %v3952_v30, %v13831_v5  ;;  %9235 = vrot.lane.b32.xlu0 %v8553_v6, %s13743_s16  ;;  %v1165_v20 = vcombine.high %v13012_v21, %v13012_v21  ;;  %v13592_v49 = vld [vmem:[#allocation2 + $0x30] sm:$0xff]   ;;  %v2718_v37 = vshrl.u32 %v16960_v50, 16 }
 0x226   :  { %v17087_v18 = vrot.slane %v4247_v33, %v13831_v5  ;;  %v3967_v8 = vrot.slane %v3953_v16, %v13831_v5  ;;  %v17091_v26 = vrot.slane %v13012_v21, %v13831_v5  ;;  %9809 = vrot.lane.b32.xlu1 %v9609_v51, %s13738_s3  ;;  %v9467_v35 = vcombine.low %v9466_v48, %v17077_v43 }
 0x227   :  { %v1188_v24 = vcombine.high %v13013_v39, %v13013_v39  ;;  %v17096_v4 = vrot.slane %v13013_v39, %v13831_v5  ;;  %v836_v46 = vcombine.high %v16970_v32, %v16970_v32  ;;  %v17102_v63 = vrot.slane %v1165_v20, %v13831_v5  ;;  %13484 = vmatmul.mubr.msk.bf16.gmra.mrb[24].mxu0 %vm12168_vm10, %v13592_v49 }
 0x228   :  { %20630 = vst [vmem:[#allocation22_spill] sm:$0xff] %v17087_v18  ;;  %v4262_v40 = vcombine.low %v4254_v38, %v17087_v18  ;;  %v3968_v12 = vcombine.low %v3960_v45, %v3967_v8  ;;  %v17106_v44 = vcombine.high %v17091_v26, %v17091_v26  ;;  %v17121_v29 = vcombine.high %v16997_v23, %v16997_v23 }
 0x229   :  { %v17110_v62 = vrot.slane %v1188_v24, %v13831_v5  ;;  %v17114_v14 = vcombine.high %v17096_v4, %v17096_v4  ;;  %v17117_v32 = vrot.slane %v836_v46, %v13831_v5  ;;  %13487 = vmatprep.mubr.msk.bf16.mxu0 %vm13746_vm9, %v20529_v13  ;;  %9797 = vrot.lane.b32.xlu0 %v9467_v35, %s13738_s3  ;;  %v2723_v16 = vshll.u32 %v17091_v26, 16  ;;  %v20644_v13 = vld [vmem:[#allocation71_spill] sm:$0xff] }
 0x22a   :  { %v11363_v31 = vsel %vm11321_vm15, %v4262_v40, %v6004_v0  ;;  %v11345_v10 = vsel %vm11321_vm15, %v3968_v12, %v5992_v25  ;;  %v4459_v19 = vcombine.low %v17091_v26, %v17102_v63  ;;  %v4460_v27 = vcombine.low %v17106_v44, %v17096_v4 }
 0x22b   :  { %v4461_v59 = vcombine.low %v17110_v62, %v17114_v14  ;;  %v3160_v55 = vcombine.high %v13223_v28, %v13223_v28  ;;  %v17135_v41 = vrot.slane %v13223_v28, %v13831_v5  ;;  %v4165_v61 = vcombine.low %v17117_v32, %v17121_v29 }
 0x22c   :  { %v17140_v47 = vrot.slane %v4459_v19, %v13831_v5  ;;  %v17143_v0 = vrot.slane %v4460_v27, %v13831_v5  ;;  %v17146_v3 = vsel %vm11397_vm0, %v11363_v31, %v7254_v56  ;;  %v17149_v2 = vsel %vm11397_vm0, %v11345_v10, %v7242_v54 }
 0x22d   :  { %v17152_v30 = vrot.slane %v4461_v59, %v13831_v5  ;;  %v17155_v25 = vrot.slane %v3160_v55, %v13831_v5  ;;  %v17158_v21 = vrot.slane %v4165_v61, %v13831_v5  ;;  %v17162_v6 = vcombine.high %v17110_v62, %v17110_v62 }
 0x22e   :  { %20631 = vst [vmem:[#allocation27_spill] sm:$0xff] %v17140_v47  ;;  %20632 = vst [vmem:[#allocation26_spill] sm:$0xff] %v17143_v0  ;;  %v10139_v33 = vcombine.low %v17032_v52, %v17140_v47  ;;  %v17168_v60 = vcombine.high %v17102_v63, %v17102_v63  ;;  %v17183_v8 = vsel %vm14115_vm14, %v2718_v37, %v2723_v16  ;;  %v2726_v20 = vshrl.u32 %v17091_v26, 16  ;;  %v20647_v47 = vld [vmem:[#allocation28_spill] sm:$0xff] }
 0x22f   :  { %20633 = vst [vmem:[#allocation84_spill] sm:$0xff] %v17158_v21  ;;  %v10140_v39 = vcombine.low %v17143_v0, %v17152_v30  ;;  %v13307_v51 = vcombine.high %v17135_v41, %v17155_v25  ;;  %v9997_v48 = vcombine.low %v17135_v41, %v17155_v25  ;;  %v10005_v38 = vcombine.low %v17054_v15, %v17158_v21 }
 0x230   :  { %v10147_v45 = vrot.slane %v10139_v33, %v13831_v5  ;;  %v2731_v49 = vshll.u32 %v17102_v63, 16  ;;  %v2734_v12 = vshrl.u32 %v17102_v63, 16  ;;  %v2739_v28 = vshll.u32 %v17106_v44, 16 }
 0x231   :  { %v10154_v35 = vrot.slane %v10140_v39, %v13831_v5  ;;  %v17189_v24 = vrot.slane %v13307_v51, %v13831_v5  ;;  %v10004_v46 = vrot.slane %v9997_v48, %v13831_v5  ;;  %v10013_v40 = vrot.slane %v10005_v38, %v13831_v5 }
 0x232   :  { %v17195_v15 = vsel %vm14115_vm14, %v2726_v20, %v2731_v49  ;;  %v2742_v56 = vshrl.u32 %v17106_v44, 16  ;;  %v2747_v10 = vshll.u32 %v17168_v60, 16  ;;  %v2751_v19 = vshrl.u32 %v17096_v4, 16  ;;  %v7992_v20 = vpop.permute.xlu1 %7991 }
 0x233   :  { %20634 = vst [vmem:[#allocation85_spill] sm:$0xff] %v17189_v24  ;;  %v10155_v54 = vcombine.low %v10147_v45, %v10154_v35  ;;  %v10006_v31 = vcombine.low %v10004_v46, %v17189_v24  ;;  %v17205_v27 = vsel %vm14115_vm14, %v2734_v12, %v2739_v28  ;;  %v2756_v59 = vshll.u32 %v17110_v62, 16  ;;  %v7980_v12 = vpop.permute.xlu0 %7979  ;;  %v20645_v24 = vld [vmem:[#allocation23_spill] sm:$0xff] }
 0x234   :  { %v2759_v55 = vshrl.u32 %v17110_v62, 16  ;;  %v2764_v61 = vshll.u32 %v17114_v14, 16  ;;  %v17214_v37 = vsel %vm14115_vm14, %v2742_v56, %v2747_v10  ;;  %v2767_v16 = vshrl.u32 %v17114_v14, 16 }
 0x235   :  { %10355 = vrot.lane.b32.xlu1 %v10155_v54, %s13740_s13  ;;  %v10020_v33 = vrot.slane %v10006_v31, %v13831_v5  ;;  %v2772_v39 = vshll.u32 %v17162_v6, 16  ;;  %v17220_v51 = vsel %vm14115_vm14, %v2751_v19, %v2756_v59  ;;  %v5613_v38 = vcombine.low %v16985_v42, %v17183_v8  ;;  %v17248_v56 = vld.sshfl [vmem:[#allocation3 + $0x74] sm:$0x33 pattern:$0x75316420] }
 0x236   :  { %v17224_v48 = vsel %vm14115_vm14, %v2759_v55, %v2764_v61  ;;  %v5659_v45 = vcombine.low %v17195_v15, %v17205_v27  ;;  %v5660_v35 = vcombine.low %v17214_v37, %v17220_v51  ;;  %v17238_v46 = vcombine.high %v17117_v32, %v17117_v32 }
 0x237   :  { %v10021_v49 = vcombine.low %v10013_v40, %v10020_v33  ;;  %v17232_v14 = vsel %vm14115_vm14, %v2767_v16, %v2772_v39  ;;  %v17241_v28 = vrot.slane %v5613_v38, %v13831_v5  ;;  %v2327_v54 = vshrl.u32 %v16997_v23, 16  ;;  %v9230_v58 = vpop.permute.xlu0 %9229 }
 0x238   :  { %v5661_v42 = vcombine.low %v17224_v48, %v17232_v14  ;;  %v17246_v40 = vrot.slane %v5659_v45, %v13831_v5  ;;  %v17253_v31 = vrot.slane %v5660_v35, %v13831_v5  ;;  %v2332_v10 = vshll.u32 %v17117_v32, 16 }
 0x239   :  { %10343 = vrot.lane.b32.xlu0 %v10021_v49, %s13740_s13  ;;  %v2335_v19 = vshrl.u32 %v17117_v32, 16  ;;  %v2340_v59 = vshll.u32 %v17121_v29, 16  ;;  %v2343_v33 = vshrl.u32 %v17121_v29, 16  ;;  %v2348_v16 = vshll.u32 %v17238_v46, 16 }
 0x23a   :  { %20635 = vst [vmem:[#allocation86_spill] sm:$0xff] %v17246_v40  ;;  %20636 = vst [vmem:[#allocation32_spill] sm:$0xff] %v17253_v31  ;;  %v17259_v55 = vrot.slane %v5661_v42, %v13831_v5  ;;  %v10701_v61 = vcombine.low %v17241_v28, %v17246_v40  ;;  %v17267_v39 = vsel %vm14115_vm14, %v2327_v54, %v2332_v10  ;;  %v9242_v10 = vpop.permute.xlu1 %9241  ;;  %v3258_v43 = vshrl.u32 %v17155_v25, 16 }
 0x23b   :  { %v17271_v38 = vsel %vm14115_vm14, %v2335_v19, %v2340_v59  ;;  %v3175_v45 = vcombine.high %v17135_v41, %v17135_v41  ;;  %v3176_v49 = vcombine.high %v17155_v25, %v17155_v25  ;;  %v17282_v0 = vsel %vm14115_vm14, %v2343_v33, %v2348_v16 }
 0x23c   :  { %20637 = vst [vmem:[#allocation44_spill] sm:$0xff] %v17259_v55  ;;  %v10702_v35 = vcombine.low %v17253_v31, %v17259_v55  ;;  %v10709_v42 = vrot.slane %v10701_v61, %v13831_v5  ;;  %v17286_v54 = vrot.slane %v17248_v56, %v13831_v5  ;;  %v3250_v19 = vshrl.u32 %v17135_v41, 16  ;;  %v20643_v31 = vld [vmem:[#allocation65_spill] sm:$0xff] }
 0x23d   :  { %v3255_v59 = vshll.u32 %v17155_v25, 16  ;;  %v3263_v9 = vshll.u32 %v3175_v45, 16  ;;  %v3266_v61 = vshrl.u32 %v3175_v45, 16  ;;  %v3271_v18 = vshll.u32 %v3176_v49, 16 }
 0x23e   :  { %v10716_v52 = vrot.slane %v10702_v35, %v13831_v5  ;;  %v3274_v57 = vshrl.u32 %v3176_v49, 16  ;;  %v3279_v53 = vshll.u32 %v17286_v54, 16  ;;  %v5319_v34 = vcombine.low %v17020_v11, %v17267_v39 }
 0x23f   :  { %v17294_v33 = vsel %vm14115_vm14, %v3250_v19, %v3255_v59  ;;  %v17298_v16 = vsel %vm14115_vm14, %v3258_v43, %v3263_v9  ;;  %v17305_v35 = vsel %vm14115_vm14, %v3266_v61, %v3271_v18  ;;  %v5365_v55 = vcombine.low %v17271_v38, %v17282_v0 }
 0x240   :  { %v10717_v7 = vcombine.low %v10709_v42, %v10716_v52  ;;  %v10543_v19 = vcombine.low %v17294_v33, %v17298_v16  ;;  %v17313_v9 = vsel %vm14115_vm14, %v3274_v57, %v3279_v53  ;;  %v5347_v43 = vrot.slane %v5319_v34, %v13831_v5  ;;  %v9804_v34 = vpop.permute.xlu1 %9803 }
 0x241   :  { %v11476_v11 = vsel %vm11448_vm1, %v17146_v3, %v7992_v20  ;;  %v11464_v52 = vsel %vm11448_vm1, %v17149_v2, %v7980_v12  ;;  %v17322_v18 = vrot.slane %v5365_v55, %v13831_v5  ;;  %v10544_v42 = vcombine.low %v17305_v35, %v17313_v9  ;;  %v9792_v20 = vpop.permute.xlu0 %9791 }
 0x242   :  { %10933 = vrot.lane.b32.xlu1 %v10717_v7, %s13744_s17  ;;  %v10551_v59 = vrot.slane %v10543_v19, %v13831_v5  ;;  %v6863_v53 = vcombine.low %v16960_v50, %v17091_v26  ;;  %v6909_v57 = vcombine.low %v17102_v63, %v17106_v44  ;;  %v6910_v3 = vcombine.low %v17168_v60, %v17110_v62 }
 0x243   :  { %20638 = vst [vmem:[#allocation43_spill] sm:$0xff] %v17322_v18  ;;  %v13293_v7 = vcombine.high %v17096_v4, %v17110_v62  ;;  %v6569_v2 = vcombine.low %v16997_v23, %v17117_v32  ;;  %v10558_v12 = vrot.slane %v10544_v42, %v13831_v5  ;;  %v10559_v55 = vcombine.low %v5347_v43, %v17322_v18 }
 0x244   :  { %v6891_v50 = vrot.slane %v6863_v53, %v13831_v5  ;;  %v13286_v61 = vcombine.high %v16997_v23, %v17117_v32  ;;  %v17343_v44 = vrot.slane %v6909_v57, %v13831_v5  ;;  %v17346_v60 = vrot.slane %v6910_v3, %v13831_v5 }
 0x245   :  { %v17349_v19 = vrot.slane %v13293_v7, %v13831_v5  ;;  %v17352_v40 = vrot.slane %v6569_v2, %v13831_v5  ;;  %v10560_v42 = vcombine.low %v10551_v59, %v10558_v12  ;;  %v10567_v18 = vrot.slane %v10559_v55, %v13831_v5 }
 0x246   :  { %20639 = vst [vmem:[#allocation45_spill] sm:$0xff] %v17343_v44  ;;  %20640 = vst [vmem:[#allocation48_spill] sm:$0xff] %v17346_v60  ;;  %v17356_v53 = vrot.slane %v13286_v61, %v13831_v5  ;;  %v7569_v23 = vcombine.low %v17155_v25, %v3175_v45  ;;  %v7758_v32 = vcombine.low %v6891_v50, %v17343_v44  ;;  %v10350_v61 = vpop.permute.xlu1 %10349 }
 0x247   :  { %v11151_v57 = vcombine.low %v17346_v60, %v17349_v19  ;;  %v7570_v3 = vcombine.low %v3176_v49, %v17286_v54  ;;  %v11527_v7 = vsel %vm11499_vm2, %v11476_v11, %v9242_v10  ;;  %v10574_v2 = vrot.slane %v10560_v42, %v13831_v5  ;;  %v20642_v49 = vld [vmem:[#allocation77_spill] sm:$0xff]  ;;  %v10338_v11 = vpop.permute.xlu0 %10337 }
 0x248   :  { %20641 = vst [vmem:[#allocation47_spill] sm:$0xff] %v17356_v53  ;;  %v7584_v59 = vrot.slane %v7569_v23, %v13831_v5  ;;  %v11049_v12 = vcombine.low %v17352_v40, %v17356_v53  ;;  %v11515_v55 = vsel %vm11499_vm2, %v11464_v52, %v9230_v58  ;;  %v17370_v45 = vrot.slane %v7758_v32, %v13831_v5  ;;  %v20646_v58 = vld [vmem:[#allocation24_spill] sm:$0xff] }
 0x249   :  { %v11158_v44 = vrot.slane %v11151_v57, %v13831_v5  ;;  %v7591_v60 = vrot.slane %v7570_v3, %v13831_v5  ;;  %v5642_v10 = vcombine.low %v20643_v31, %v20642_v49  ;;  %v10575_v42 = vcombine.low %v10567_v18, %v10574_v2 }
 0x24a   :  { %v11056_v23 = vrot.slane %v11049_v12, %v13831_v5  ;;  %v5643_v53 = vcombine.low %v20644_v13, %v17241_v28  ;;  %v5348_v52 = vcombine.low %v20646_v58, %v20645_v24  ;;  %v5349_v3 = vcombine.low %v20647_v47, %v5347_v43  ;;  %v17405_v58 = vld.sshfl [vmem:[#allocation3 + $0xbc] sm:$0x33 pattern:$0x75316420] }
 0x24b   :  { %v11159_v32 = vcombine.low %v17370_v45, %v11158_v44  ;;  %v7593_v21 = vcombine.low %v7584_v59, %v7591_v60  ;;  %v5650_v57 = vrot.slane %v5642_v10, %v13831_v5  ;;  %10921 = vrot.lane.b32.xlu0 %v10575_v42, %s13744_s17  ;;  %v11578_v2 = vsel %vm11550_vm3, %v11527_v7, %v9804_v34  ;;  %v20648_v44 = vld [vmem:[#allocation88_spill] sm:$0xff]  ;;  %v20649_v60 = vld [vmem:[#allocation87_spill] sm:$0xff]  ;;  %v10928_v7 = vpop.permute.xlu1 %10927  ;;  %v10916_v42 = vpop.permute.xlu0 %10915 }
 0x24c   :  { %v5657_v31 = vrot.slane %v5643_v53, %v13831_v5  ;;  %v5356_v18 = vrot.slane %v5348_v52, %v13831_v5  ;;  %v11566_v13 = vsel %vm11550_vm3, %v11515_v55, %v9792_v20  ;;  %v5363_v28 = vrot.slane %v5349_v3, %v13831_v5  ;;  %v20650_v53 = vld [vmem:[#allocation89_spill] sm:$0xff] }
 0x24d   :  { %11303 = vrot.lane.b32.xlu1 %v11159_v32, %s13742_s15  ;;  %v17391_v24 = vrot.slane %v7593_v21, %v13831_v5  ;;  %v6892_v47 = vcombine.low %v20649_v60, %v20648_v44  ;;  %v6893_v43 = vcombine.low %v16879_v1, %v6891_v50  ;;  %v6598_v12 = vcombine.low %v20650_v53, %v16898_v17 }
 0x24e   :  { %v5658_v59 = vcombine.low %v5650_v57, %v5657_v31  ;;  %v6599_v34 = vcombine.low %v16909_v22, %v17352_v40  ;;  %v11629_v20 = vsel %vm11601_vm4, %v11578_v2, %v10350_v61  ;;  %v5364_v55 = vcombine.low %v5356_v18, %v5363_v28 }
 0x24f   :  { %v11057_v21 = vcombine.low %v11056_v23, %v17391_v24  ;;  %v6900_v49 = vrot.slane %v6892_v47, %v13831_v5  ;;  %v6907_v10 = vrot.slane %v6893_v43, %v13831_v5  ;;  %v6606_v1 = vrot.slane %v6598_v12, %v13831_v5 }
 0x250   :  { %v6613_v17 = vrot.slane %v6599_v34, %v13831_v5  ;;  %v11617_v50 = vsel %vm11601_vm4, %v11566_v13, %v10338_v11  ;;  %v7750_v22 = vcombine.low %v17096_v4, %v17110_v62  ;;  %v7568_v23 = vcombine.low %v17121_v29, %v17135_v41 }
 0x251   :  { %11291 = vrot.lane.b32.xlu0 %v11057_v21, %s13742_s15  ;;  %6011 = vrot.lane.b32.xlu1 %v5658_v59, %s13734_s28  ;;  %v6908_v61 = vcombine.low %v6900_v49, %v6907_v10  ;;  %v11680_v52 = vsel %vm11652_vm5, %v11629_v20, %v10928_v7  ;;  %v2775_v32 = vshrl.u32 %v17162_v6, 16  ;;  %v11668_v11 = vsel %vm11652_vm5, %v11617_v50, %v10916_v42  ;;  %v11298_v59 = vpop.permute.xlu1 %11297 }
 0x252   :  { %v6614_v57 = vcombine.low %v6606_v1, %v6613_v17  ;;  %v7757_v3 = vrot.slane %v7750_v22, %v13831_v5  ;;  %v17422_v4 = vrot.slane %v17405_v58, %v13831_v5  ;;  %v7577_v62 = vrot.slane %v7568_v23, %v13831_v5 }
 0x253   :  { %v8848_v31 = vcombine.low %v17183_v8, %v17195_v15  ;;  %v8849_v29 = vcombine.low %v17205_v27, %v17214_v37  ;;  %v8850_v41 = vcombine.low %v17220_v51, %v17224_v48  ;;  %v3184_v13 = vcombine.high %v17248_v56, %v17248_v56 }
 0x254   :  { %v7759_v18 = vcombine.low %v7757_v3, %v17349_v19  ;;  %v2780_v2 = vshll.u32 %v17422_v4, 16  ;;  %v3282_v28 = vshrl.u32 %v17286_v54, 16  ;;  %v7592_v8 = vcombine.low %v17352_v40, %v7577_v62  ;;  %v20651_v3 = vld [vmem:[#allocation49_spill] sm:$0xff] }
 0x255   :  { %5999 = vrot.lane.b32.xlu0 %v5364_v55, %s13734_s28  ;;  %7261 = vrot.lane.b32.xlu1 %v6908_v61, %s13741_s14  ;;  %v8858_v15 = vrot.slane %v8848_v31, %v13831_v5  ;;  %v8865_v27 = vrot.slane %v8849_v29, %v13831_v5  ;;  %v2783_v37 = vshrl.u32 %v17422_v4, 16  ;;  %v8872_v56 = vrot.slane %v8850_v41, %v13831_v5  ;;  %v20653_v41 = vld [vmem:[#allocation27_spill] sm:$0xff] }
 0x256   :  { %v7773_v51 = vrot.slane %v7759_v18, %v13831_v5  ;;  %v17445_v48 = vsel %vm14115_vm14, %v2775_v32, %v2780_v2  ;;  %v17449_v44 = vrot.slane %v3184_v13, %v13831_v5  ;;  %v7600_v60 = vrot.slane %v7592_v8, %v13831_v5  ;;  %v20655_v2 = vld [vmem:[#allocation61_spill] sm:$0xff] }
 0x257   :  { %v8851_v40 = vcombine.low %v17232_v14, %v17445_v48  ;;  %v8880_v47 = vcombine.low %v8858_v15, %v8865_v27  ;;  %v8554_v43 = vcombine.low %v17267_v39, %v17271_v38  ;;  %v8555_v34 = vcombine.low %v17282_v0, %v17294_v33  ;;  %v11286_v38 = vpop.permute.xlu0 %11285  ;;  %v6006_v27 = vpop.permute.xlu1 %6005 }
 0x258   :  { %v7774_v53 = vcombine.low %v17370_v45, %v7773_v51  ;;  %v3287_v12 = vshll.u32 %v17449_v44, 16  ;;  %v8556_v20 = vcombine.low %v17298_v16, %v17305_v35  ;;  %v7608_v7 = vcombine.low %v7600_v60, %v17391_v24  ;;  %v20657_v51 = vld [vmem:[#allocation67_spill] sm:$0xff] }
 0x259   :  { %7249 = vrot.lane.b32.xlu0 %v6614_v57, %s13741_s14  ;;  %v8879_v14 = vrot.slane %v8851_v40, %v13831_v5  ;;  %v8888_v21 = vrot.slane %v8880_v47, %v13831_v5  ;;  %v8564_v39 = vrot.slane %v8554_v43, %v13831_v5  ;;  %v8571_v0 = vrot.slane %v8555_v34, %v13831_v5  ;;  %v20660_v47 = vld [vmem:[#allocation84_spill] sm:$0xff]  ;;  %v20661_v34 = vld [vmem:[#allocation85_spill] sm:$0xff] }
 0x25a   :  { %7999 = vrot.lane.b32.xlu1 %v7774_v53, %s13739_s1  ;;  %v17470_v45 = vsel %vm14115_vm14, %v3282_v28, %v3287_v12  ;;  %v8578_v33 = vrot.slane %v8556_v20, %v13831_v5  ;;  %v11731_v16 = vsel %vm11703_vm6, %v11680_v52, %v11298_v59  ;;  %v11719_v42 = vsel %vm11703_vm6, %v11668_v11, %v11286_v38  ;;  %v20652_v11 = vld [vmem:[#allocation46_spill] sm:$0xff]  ;;  %v13015_v53 = vld.sshfl [vmem:[#allocation3 + $0xc0] sm:$0x33 pattern:$0x75316420] }
 0x25b   :  { %v8881_v35 = vcombine.low %v8872_v56, %v8879_v14  ;;  %v8557_v24 = vcombine.low %v17313_v9, %v17470_v45  ;;  %v13347_v55 = vcombine.low %v11731_v16, %v11731_v16  ;;  %v13348_v49 = vcombine.high %v11731_v16, %v11731_v16  ;;  %v5994_v31 = vpop.permute.xlu0 %5993 }
 0x25c   :  { %v8586_v10 = vcombine.low %v8564_v39, %v8571_v0  ;;  %v4462_v1 = vcombine.low %v17162_v6, %v17422_v4  ;;  %v13311_v17 = vcombine.high %v17091_v26, %v17102_v63  ;;  %v13335_v9 = vcombine.low %v11719_v42, %v11719_v42  ;;  %v13241_v39 = vld.sshfl [vmem:[#allocation3 + $0x78] sm:$0x33 pattern:$0x75316420] }
 0x25d   :  { %7987 = vrot.lane.b32.xlu0 %v7608_v7, %s13739_s1  ;;  %v8895_v50 = vrot.slane %v8881_v35, %v13831_v5  ;;  %v8585_v22 = vrot.slane %v8557_v24, %v13831_v5  ;;  %11953 = vst.msk [vmem:[#allocation2 + $0x68] sm:$0xf] %vm11926_vm7, %v13347_v55  ;;  %11954 = vst.msk [vmem:[#allocation2 + $0x6c] sm:$0xf] %vm11926_vm7, %v13348_v49  ;;  %v13336_v61 = vcombine.high %v11719_v42, %v11719_v42  ;;  %v20662_v7 = vld [vmem:[#allocation60_spill] sm:$0xff]  ;;  %v20663_v49 = vld [vmem:[#allocation62_spill] sm:$0xff] }
 0x25e   :  { %v8594_v23 = vrot.slane %v8586_v10, %v13831_v5  ;;  %v17489_v52 = vrot.slane %v4462_v1, %v13831_v5  ;;  %v9617_v6 = vrot.slane %v13311_v17, %v13831_v5  ;;  %v9468_v26 = vcombine.low %v17238_v46, %v17155_v25  ;;  %11941 = vst.msk [vmem:[#allocation2 + $0x38] sm:$0xf] %vm11926_vm7, %v13335_v9  ;;  %v20654_v46 = vld [vmem:[#allocation63_spill] sm:$0xff] }
 0x25f   :  { %v8896_v63 = vcombine.low %v8888_v21, %v8895_v50  ;;  %v8587_v32 = vcombine.low %v8578_v33, %v8585_v22  ;;  %11942 = vst.msk [vmem:[#allocation2 + $0x3c] sm:$0xf] %vm11926_vm7, %v13336_v61  ;;  %v9470_v57 = vcombine.low %v17286_v54, %v17449_v44  ;;  %v4263_v62 = vcombine.low %v20652_v11, %v20651_v3  ;;  %v7244_v1 = vpop.permute.xlu0 %7243 }
 0x260   :  { %v4492_v29 = vcombine.low %v17152_v30, %v17489_v52  ;;  %v9618_v18 = vcombine.low %v20653_v41, %v9617_v6  ;;  %v9477_v25 = vrot.slane %v9468_v26, %v13831_v5  ;;  %v4296_v13 = vcombine.low %v20655_v2, %v20654_v46  ;;  %v20658_v30 = vld [vmem:[#allocation34_spill] sm:$0xff] }
 0x261   :  { %9249 = vrot.lane.b32.xlu1 %v8896_v63, %s13743_s16  ;;  %v8601_v28 = vrot.slane %v8587_v32, %v13831_v5  ;;  %v17509_v8 = vrot.slane %v9470_v57, %v13831_v5  ;;  %v17512_v15 = vrot.slane %v4263_v62, %v13831_v5  ;;  %v4002_v56 = vcombine.low %v20658_v30, %v20657_v51  ;;  %v7256_v63 = vpop.permute.xlu1 %7255 }
 0x262   :  { %v17517_v60 = vrot.slane %v4492_v29, %v13831_v5  ;;  %v9625_v40 = vrot.slane %v9618_v18, %v13831_v5  ;;  %v9492_v43 = vcombine.low %v20660_v47, %v9477_v25  ;;  %v4310_v59 = vrot.slane %v4296_v13, %v13831_v5 }
 0x263   :  { %20656 = vst [vmem:[#allocation30_spill] sm:$0xff] %v17512_v15  ;;  %v8602_v12 = vcombine.low %v8594_v23, %v8601_v28  ;;  %v9493_v20 = vcombine.low %v20661_v34, %v17509_v8  ;;  %v4295_v14 = vcombine.low %v17512_v15, %v20662_v7  ;;  %v4016_v21 = vrot.slane %v4002_v56, %v13831_v5  ;;  %v20684_v15 = vld [vmem:[#allocation45_spill] sm:$0xff] }
 0x264   :  { %20659 = vst [vmem:[#allocation29_spill] sm:$0xff] %v17517_v60  ;;  %v9626_v38 = vcombine.low %v9625_v40, %v17517_v60  ;;  %v9500_v0 = vrot.slane %v9492_v43, %v13831_v5  ;;  %v1212_v33 = vcombine.high %v17405_v58, %v17405_v58  ;;  %v17533_v16 = vcombine.high %v17422_v4, %v17422_v4  ;;  %v13593_v35 = vld [vmem:[#allocation2 + $0x68] sm:$0xff]  }
 0x265   :  { %9237 = vrot.lane.b32.xlu0 %v8602_v12, %s13743_s16  ;;  %v9507_v24 = vrot.slane %v9493_v20, %v13831_v5  ;;  %v4303_v55 = vrot.slane %v4295_v14, %v13831_v5  ;;  %v4017_v10 = vcombine.low %v20663_v49, %v4016_v21  ;;  %v1235_v42 = vcombine.high %v13015_v53, %v13015_v53  ;;  %v20667_v12 = vld [vmem:[#allocation79_spill] sm:$0xff]  ;;  %v17616_v14 = vpop.permute.xlu0 %7981 }
 0x266   :  { %9811 = vrot.lane.b32.xlu1 %v9626_v38, %s13738_s3  ;;  %v17541_v17 = vrot.slane %v1212_v33, %v13831_v5  ;;  %v17544_v58 = vrot.slane %v13015_v53, %v13831_v5  ;;  %v17548_v50 = vcombine.high %v17286_v54, %v17286_v54  ;;  %v3374_v22 = vcombine.high %v13241_v39, %v13241_v39  ;;  %v13594_v9 = vld [vmem:[#allocation2 + $0x38] sm:$0xff]  }
 0x267   :  { %v9508_v61 = vcombine.low %v9500_v0, %v9507_v24  ;;  %v4311_v23 = vcombine.low %v4303_v55, %v4310_v59  ;;  %v11348_v6 = vsel %vm11321_vm15, %v4017_v10, %v5994_v31  ;;  %v17552_v26 = vrot.slane %v1235_v42, %v13831_v5  ;;  %13512 = vmatmul.mubr.msk.bf16.vlgmr.msra.gmra.mrb[0].mxu1 %vm12168_vm10, %v13593_v35  ;;  %v17629_v0 = vpop.permute.xlu1 %7993 }
 0x268   :  { %v4508_v32 = vcombine.low %v17541_v17, %v17533_v16  ;;  %v17558_v57 = vrot.slane %v13241_v39, %v13831_v5  ;;  %v17561_v3 = vrot.slane %v3374_v22, %v13831_v5  ;;  %v17564_v11 = vsel %vm11397_vm0, %v11348_v6, %v7244_v1  ;;  %13488 = vmatmul.mubr.msk.bf16.gmra.mrb[28].mxu0 %vm12168_vm10, %v13594_v9 }
 0x269   :  { %9799 = vrot.lane.b32.xlu0 %v9508_v61, %s13738_s3  ;;  %v11366_v62 = vsel %vm11321_vm15, %v4311_v23, %v6006_v27  ;;  %v4509_v31 = vcombine.low %v17544_v58, %v17552_v26  ;;  %v13270_v29 = vcombine.high %v17544_v58, %v17552_v26  ;;  %v17575_v18 = vcombine.high %v17544_v58, %v17544_v58  ;;  %v17590_v27 = vld.sshfl [vmem:[#allocation3 + $0xc4] sm:$0x33 pattern:$0x75316420] }
 0x26a   :  { %v17578_v25 = vrot.slane %v4508_v32, %v13831_v5  ;;  %v17582_v46 = vcombine.high %v17558_v57, %v17558_v57  ;;  %v17586_v13 = vcombine.high %v17561_v3, %v17561_v3  ;;  %v10022_v28 = vcombine.low %v17548_v50, %v17558_v57 }
 0x26b   :  { %v20665_v51 = vmov 0.0   ;;  %v17595_v30 = vrot.slane %v4509_v31, %v13831_v5  ;;  %v17598_v56 = vrot.slane %v13270_v29, %v13831_v5  ;;  %v17601_v40 = vsel %vm11397_vm0, %v11366_v62, %v7256_v63 }
 0x26c   :  { %20664 = vst [vmem:[#allocation33_spill] sm:$0xff] %v17578_v25  ;;  %13491 = vmatprep.mubr.msk.bf16.mxu0 %vm13746_vm9, %v20665_v51  ;;  %v17605_v43 = vcombine.high %v17552_v26, %v17552_v26  ;;  %13515 = vmatprep.mubr.msk.bf16.mxu1 %vm13746_vm9, %v20665_v51  ;;  %v10156_v59 = vcombine.low %v17489_v52, %v17578_v25  ;;  %v2788_v38 = vshll.u32 %v17541_v17, 16  ;;  %v2791_v42 = vshrl.u32 %v17541_v17, 16 }
 0x26d   :  { %20666 = vst [vmem:[#allocation31_spill] sm:$0xff] %v17595_v30  ;;  %v10023_v53 = vcombine.low %v17561_v3, %v17582_v46  ;;  %v10024_v34 = vcombine.low %v17586_v13, %v20667_v12  ;;  %v10031_v20 = vrot.slane %v10022_v28, %v13831_v5  ;;  %v10157_v21 = vcombine.low %v17595_v30, %v17598_v56  ;;  %v17660_v28 = vpop.permute.xlu0 %9231 }
 0x26e   :  { %v17622_v39 = vrot.slane %v17590_v27, %v13831_v5  ;;  %v17626_v52 = vcombine.high %v17541_v17, %v17541_v17  ;;  %v10164_v33 = vrot.slane %v10156_v59, %v13831_v5  ;;  %v17640_v10 = vsel %vm14115_vm14, %v2783_v37, %v2788_v38 }
 0x26f   :  { %v10038_v35 = vrot.slane %v10023_v53, %v13831_v5  ;;  %v10045_v24 = vrot.slane %v10024_v34, %v13831_v5  ;;  %v10046_v55 = vcombine.low %v17509_v8, %v10031_v20  ;;  %v10171_v49 = vrot.slane %v10157_v21, %v13831_v5  ;;  %v17670_v21 = vpop.permute.xlu1 %9243 }
 0x270   :  { %v2796_v1 = vshll.u32 %v17533_v16, 16  ;;  %v2799_v61 = vshrl.u32 %v17533_v16, 16  ;;  %v2804_v23 = vshll.u32 %v17626_v52, 16  ;;  %v2808_v63 = vshrl.u32 %v17544_v58, 16 }
 0x271   :  { %v10047_v22 = vcombine.low %v10038_v35, %v10045_v24  ;;  %v10054_v9 = vrot.slane %v10046_v55, %v13831_v5  ;;  %v10172_v8 = vcombine.low %v10164_v33, %v10171_v49  ;;  %v2813_v37 = vshll.u32 %v17552_v26, 16 }
 0x272   :  { %v17649_v6 = vsel %vm14115_vm14, %v2791_v42, %v2796_v1  ;;  %v17656_v62 = vsel %vm14115_vm14, %v2799_v61, %v2804_v23  ;;  %v2816_v31 = vshrl.u32 %v17552_v26, 16  ;;  %v2821_v29 = vshll.u32 %v17575_v18, 16 }
 0x273   :  { %v10061_v32 = vrot.slane %v10047_v22, %v13831_v5  ;;  %10357 = vrot.lane.b32.xlu1 %v10172_v8, %s13740_s13  ;;  %v17665_v59 = vsel %vm14115_vm14, %v2808_v63, %v2813_v37  ;;  %v2824_v53 = vshrl.u32 %v17575_v18, 16  ;;  %v2829_v34 = vshll.u32 %v17605_v43, 16 }
 0x274   :  { %v2832_v20 = vshrl.u32 %v17605_v43, 16  ;;  %v17674_v33 = vsel %vm14115_vm14, %v2816_v31, %v2821_v29  ;;  %v2837_v35 = vshll.u32 %v17622_v39, 16  ;;  %v5662_v24 = vcombine.low %v17445_v48, %v17640_v10 }
 0x275   :  { %v10062_v38 = vcombine.low %v10054_v9, %v10061_v32  ;;  %v17681_v55 = vsel %vm14115_vm14, %v2824_v53, %v2829_v34  ;;  %v5708_v49 = vcombine.low %v17649_v6, %v17656_v62  ;;  %v5709_v42 = vcombine.low %v17665_v59, %v17674_v33  ;;  %v17717_v34 = vpop.permute.xlu0 %9793 }
 0x276   :  { %v17689_v1 = vcombine.high %v17449_v44, %v17449_v44  ;;  %v17694_v22 = vsel %vm14115_vm14, %v2832_v20, %v2837_v35  ;;  %v17697_v48 = vrot.slane %v5662_v24, %v13831_v5  ;;  %v3290_v9 = vshrl.u32 %v17449_v44, 16 }
 0x277   :  { %10345 = vrot.lane.b32.xlu0 %v10062_v38, %s13740_s13  ;;  %v3295_v61 = vshll.u32 %v17548_v50, 16  ;;  %v5710_v23 = vcombine.low %v17681_v55, %v17694_v22  ;;  %v17704_v8 = vrot.slane %v5708_v49, %v13831_v5  ;;  %v17707_v63 = vrot.slane %v5709_v42, %v13831_v5  ;;  %v17726_v49 = vpop.permute.xlu1 %9805 }
 0x278   :  { %v3298_v37 = vshrl.u32 %v17548_v50, 16  ;;  %v3303_v31 = vshll.u32 %v17689_v1, 16  ;;  %v3464_v29 = vshrl.u32 %v17558_v57, 16  ;;  %v3469_v53 = vshll.u32 %v17561_v3, 16 }
 0x279   :  { %20668 = vst [vmem:[#allocation77_spill] sm:$0xff] %v17704_v8  ;;  %20669 = vst [vmem:[#allocation65_spill] sm:$0xff] %v17707_v63  ;;  %v17712_v32 = vsel %vm14115_vm14, %v3290_v9, %v3295_v61  ;;  %v17720_v20 = vrot.slane %v5710_v23, %v13831_v5  ;;  %v10718_v38 = vcombine.low %v17697_v48, %v17704_v8  ;;  %v3472_v35 = vshrl.u32 %v17561_v3, 16 }
 0x27a   :  { %v3477_v24 = vshll.u32 %v17582_v46, 16  ;;  %v17730_v42 = vsel %vm14115_vm14, %v3298_v37, %v3303_v31  ;;  %v3471_v9 = vsel %vm14115_vm14, %v3464_v29, %v3469_v53  ;;  %v3480_v61 = vshrl.u32 %v17582_v46, 16  ;;  %v20671_v46 = vld [vmem:[#allocation80_spill] sm:$0xff] }
 0x27b   :  { %20670 = vst [vmem:[#allocation71_spill] sm:$0xff] %v17720_v20  ;;  %v3485_v23 = vshll.u32 %v17586_v13, 16  ;;  %v10719_v30 = vcombine.low %v17707_v63, %v17720_v20  ;;  %v10726_v47 = vrot.slane %v10718_v38, %v13831_v5  ;;  %v3488_v41 = vshrl.u32 %v17586_v13, 16 }
 0x27c   :  { %v3479_v60 = vsel %vm14115_vm14, %v3472_v35, %v3477_v24  ;;  %v3493_v31 = vshll.u32 %v20667_v12, 16  ;;  %v3496_v29 = vshrl.u32 %v20667_v12, 16  ;;  %v3501_v53 = vshll.u32 %v20671_v46, 16 }
 0x27d   :  { %v3487_v37 = vsel %vm14115_vm14, %v3480_v61, %v3485_v23  ;;  %v10733_v8 = vrot.slane %v10719_v30, %v13831_v5  ;;  %v10576_v20 = vcombine.low %v17470_v45, %v17712_v32  ;;  %v10577_v38 = vcombine.low %v17730_v42, %v3471_v9  ;;  %v17761_v61 = vpop.permute.xlu0 %10339 }
 0x27e   :  { %v10578_v63 = vcombine.low %v3479_v60, %v3487_v37  ;;  %v3495_v13 = vsel %vm14115_vm14, %v3488_v41, %v3493_v31  ;;  %v3503_v35 = vsel %vm14115_vm14, %v3496_v29, %v3501_v53  ;;  %v11478_v24 = vsel %vm11448_vm1, %v17601_v40, %v17629_v0  ;;  %v17765_v41 = vpop.permute.xlu1 %10351 }
 0x27f   :  { %v11466_v30 = vsel %vm11448_vm1, %v17564_v11, %v17616_v14  ;;  %v10734_v45 = vcombine.low %v10726_v47, %v10733_v8  ;;  %v10579_v23 = vcombine.low %v3495_v13, %v3503_v35  ;;  %v10586_v60 = vrot.slane %v10576_v20, %v13831_v5 }
 0x280   :  { %v10593_v9 = vrot.slane %v10577_v38, %v13831_v5  ;;  %v10600_v37 = vrot.slane %v10578_v63, %v13831_v5  ;;  %v6912_v31 = vcombine.low %v17422_v4, %v17541_v17  ;;  %v13294_v40 = vcombine.high %v17422_v4, %v17541_v17 }
 0x281   :  { %v6959_v11 = vcombine.low %v17552_v26, %v17575_v18  ;;  %10935 = vrot.lane.b32.xlu1 %v10734_v45, %s13744_s17  ;;  %v10607_v47 = vrot.slane %v10579_v23, %v13831_v5  ;;  %v6960_v0 = vcombine.low %v17605_v43, %v17622_v39  ;;  %v7609_v8 = vcombine.low %v17449_v44, %v17548_v50  ;;  %v17805_v35 = vpop.permute.xlu0 %10917 }
 0x282   :  { %v10608_v14 = vcombine.low %v10586_v60, %v10593_v9  ;;  %v17781_v63 = vrot.slane %v6912_v31, %v13831_v5  ;;  %v17784_v20 = vrot.slane %v13294_v40, %v13831_v5  ;;  %v11058_v17 = vcombine.low %v17689_v1, %v17561_v3 }
 0x283   :  { %v17787_v4 = vrot.slane %v6959_v11, %v13831_v5  ;;  %v10609_v18 = vcombine.low %v10600_v37, %v10607_v47  ;;  %v17793_v43 = vrot.slane %v6960_v0, %v13831_v5  ;;  %v17796_v50 = vrot.slane %v7609_v8, %v13831_v5  ;;  %v12999_v37 = vld.sshfl [vmem:[#allocation3 + $0x80] sm:$0x33 pattern:$0x75316420] }
 0x284   :  { %20672 = vst [vmem:[#allocation23_spill] sm:$0xff] %v17784_v20  ;;  %v10616_v29 = vrot.slane %v10608_v14, %v13831_v5  ;;  %v11160_v53 = vcombine.low %v17781_v63, %v17784_v20  ;;  %v13317_v38 = vcombine.high %v17558_v57, %v17561_v3  ;;  %v11060_v13 = vcombine.low %v20667_v12, %v20671_v46  ;;  %v17814_v57 = vpop.permute.xlu1 %10929  ;;  %v20675_v0 = vld [vmem:[#allocation32_spill] sm:$0xff] }
 0x285   :  { %20673 = vst [vmem:[#allocation24_spill] sm:$0xff] %v17787_v4  ;;  %20674 = vst [vmem:[#allocation28_spill] sm:$0xff] %v17793_v43  ;;  %v11067_v1 = vrot.slane %v11058_v17, %v13831_v5  ;;  %v10623_v45 = vrot.slane %v10609_v18, %v13831_v5  ;;  %v7784_v23 = vcombine.low %v17787_v4, %v17793_v43 }
 0x286   :  { %v11529_v60 = vsel %vm11499_vm2, %v11478_v24, %v17670_v21  ;;  %v11517_v9 = vsel %vm11499_vm2, %v11466_v30, %v17660_v28  ;;  %v11167_v3 = vrot.slane %v11160_v53, %v13831_v5  ;;  %v11074_v31 = vrot.slane %v13317_v38, %v13831_v5  ;;  %v20676_v21 = vld [vmem:[#allocation86_spill] sm:$0xff]  ;;  %v20677_v28 = vld [vmem:[#allocation44_spill] sm:$0xff] }
 0x287   :  { %v11081_v40 = vrot.slane %v11060_v13, %v13831_v5  ;;  %v11082_v11 = vcombine.low %v17796_v50, %v11067_v1  ;;  %v10624_v47 = vcombine.low %v10616_v29, %v10623_v45  ;;  %v17821_v14 = vrot.slane %v7784_v23, %v13831_v5  ;;  %v20679_v1 = vld [vmem:[#allocation36_spill] sm:$0xff] }
 0x288   :  { %v5691_v24 = vcombine.low %v20676_v21, %v20675_v0  ;;  %v5692_v30 = vcombine.low %v20677_v28, %v17697_v48  ;;  %v859_v18 = vcombine.high %v12999_v37, %v12999_v37  ;;  %v17829_v53 = vrot.slane %v12999_v37, %v13831_v5 }
 0x289   :  { %v11083_v8 = vcombine.low %v11074_v31, %v11081_v40  ;;  %v11090_v17 = vrot.slane %v11082_v11, %v13831_v5  ;;  %10923 = vrot.lane.b32.xlu0 %v10624_v47, %s13744_s17  ;;  %v11168_v29 = vcombine.low %v11167_v3, %v17821_v14  ;;  %v2381_v45 = vshll.u32 %v20679_v1, 16  ;;  %v17843_v40 = vpop.permute.xlu0 %11287  ;;  %v20681_v47 = vld [vmem:[#allocation38_spill] sm:$0xff] }
 0x28a   :  { %20678 = vst [vmem:[#allocation88_spill] sm:$0xff] %v17829_v53  ;;  %v5699_v38 = vrot.slane %v5691_v24, %v13831_v5  ;;  %v5706_v13 = vrot.slane %v5692_v30, %v13831_v5  ;;  %v17838_v48 = vrot.slane %v859_v18, %v13831_v5  ;;  %v874_v31 = vcombine.high %v17829_v53, %v17829_v53  ;;  %v17849_v24 = vpop.permute.xlu1 %11299 }
 0x28b   :  { %v11097_v23 = vrot.slane %v11083_v8, %v13831_v5  ;;  %v2352_v37 = vshrl.u32 %v17829_v53, 16  ;;  %11305 = vrot.lane.b32.xlu1 %v11168_v29, %s13742_s15  ;;  %v2384_v11 = vshrl.u32 %v20679_v1, 16  ;;  %v2389_v0 = vshll.u32 %v20681_v47, 16 }
 0x28c   :  { %20680 = vst [vmem:[#allocation87_spill] sm:$0xff] %v17838_v48  ;;  %v5707_v3 = vcombine.low %v5699_v38, %v5706_v13  ;;  %v2392_v21 = vshrl.u32 %v20681_v47, 16  ;;  %v875_v30 = vcombine.high %v17838_v48, %v17838_v48  ;;  %v2357_v8 = vshll.u32 %v17838_v48, 16  ;;  %v20682_v38 = vld [vmem:[#allocation39_spill] sm:$0xff] }
 0x28d   :  { %v11098_v28 = vcombine.low %v11090_v17, %v11097_v23  ;;  %v2360_v18 = vshrl.u32 %v17838_v48, 16  ;;  %v2365_v53 = vshll.u32 %v874_v31, 16  ;;  %v2368_v43 = vshrl.u32 %v874_v31, 16 }
 0x28e   :  { %v2391_v29 = vsel %vm14115_vm14, %v2384_v11, %v2389_v0  ;;  %v2397_v13 = vshll.u32 %v20682_v38, 16  ;;  %v2359_v20 = vsel %vm14115_vm14, %v2352_v37, %v2357_v8  ;;  %v2373_v17 = vshll.u32 %v875_v30, 16  ;;  %v17876_v8 = vpop.permute.xlu0 %5995 }
 0x28f   :  { %11293 = vrot.lane.b32.xlu0 %v11098_v28, %s13742_s15  ;;  %v2376_v23 = vshrl.u32 %v875_v30, 16  ;;  %v11580_v4 = vsel %vm11550_vm3, %v11529_v60, %v17726_v49  ;;  %6013 = vrot.lane.b32.xlu1 %v5707_v3, %s13734_s28  ;;  %v2367_v12 = vsel %vm14115_vm14, %v2360_v18, %v2365_v53  ;;  %v11568_v0 = vsel %vm11550_vm3, %v11517_v9, %v17717_v34  ;;  %v20683_v28 = vld [vmem:[#allocation48_spill] sm:$0xff]  ;;  %v17882_v9 = vpop.permute.xlu1 %6007 }
 0x290   :  { %v2399_v11 = vsel %vm14115_vm14, %v2392_v21, %v2397_v13  ;;  %v6941_v51 = vcombine.low %v20684_v15, %v20683_v28  ;;  %v2375_v37 = vsel %vm14115_vm14, %v2368_v43, %v2373_v17  ;;  %v5366_v60 = vcombine.low %v2359_v20, %v2367_v12  ;;  %v20686_v28 = vld [vmem:[#allocation47_spill] sm:$0xff] }
 0x291   :  { %v2383_v49 = vsel %vm14115_vm14, %v2376_v23, %v2381_v45  ;;  %v5368_v3 = vcombine.low %v2391_v29, %v2399_v11  ;;  %v6942_v21 = vcombine.low %v17349_v19, %v17781_v63  ;;  %v6616_v34 = vcombine.low %v17838_v48, %v874_v31  ;;  %v20685_v31 = vld [vmem:[#allocation43_spill] sm:$0xff] }
 0x292   :  { %v5367_v53 = vcombine.low %v2375_v37, %v2383_v49  ;;  %v6949_v18 = vrot.slane %v6941_v51, %v13831_v5  ;;  %v5382_v15 = vrot.slane %v5366_v60, %v13831_v5  ;;  %v6617_v45 = vcombine.low %v875_v30, %v20679_v1 }
 0x293   :  { %v5396_v43 = vrot.slane %v5368_v3, %v13831_v5  ;;  %v6618_v12 = vcombine.low %v20681_v47, %v20682_v38  ;;  %v6956_v29 = vrot.slane %v6942_v21, %v13831_v5  ;;  %v6632_v19 = vrot.slane %v6616_v34, %v13831_v5  ;;  %v20689_v21 = vld [vmem:[#allocation57_spill] sm:$0xff]  ;;  %v20690_v34 = vld [vmem:[#allocation56_spill] sm:$0xff] }
 0x294   :  { %v5389_v20 = vrot.slane %v5367_v53, %v13831_v5  ;;  %v11631_v51 = vsel %vm11601_vm4, %v11580_v4, %v17765_v41  ;;  %v5397_v13 = vcombine.low %v20685_v31, %v5382_v15  ;;  %v6639_v17 = vrot.slane %v6617_v45, %v13831_v5  ;;  %v20687_v41 = vld [vmem:[#allocation41_spill] sm:$0xff]  ;;  %v20688_v4 = vld [vmem:[#allocation40_spill] sm:$0xff]  ;;  %v17907_v45 = vpop.permute.xlu0 %7245 }
 0x295   :  { %v6646_v23 = vrot.slane %v6618_v12, %v13831_v5  ;;  %v11619_v30 = vsel %vm11601_vm4, %v11568_v0, %v17761_v61  ;;  %v6957_v38 = vcombine.low %v6949_v18, %v6956_v29  ;;  %v6647_v37 = vcombine.low %v20686_v28, %v6632_v19 }
 0x296   :  { %v5398_v11 = vcombine.low %v5389_v20, %v5396_v43  ;;  %v7775_v49 = vcombine.low %v17533_v16, %v17544_v58  ;;  %v5405_v60 = vrot.slane %v5397_v13, %v13831_v5  ;;  %v7610_v53 = vcombine.low %v20688_v4, %v20687_v41  ;;  %v17915_v58 = vpop.permute.xlu1 %7257  ;;  %v20694_v41 = vld [vmem:[#allocation52_spill] sm:$0xff]  ;;  %v20695_v4 = vld [vmem:[#allocation53_spill] sm:$0xff] }
 0x297   :  { %v6648_v3 = vcombine.low %v6639_v17, %v6646_v23  ;;  %v7626_v15 = vcombine.low %v20690_v34, %v20689_v21  ;;  %7263 = vrot.lane.b32.xlu1 %v6957_v38, %s13741_s14  ;;  %v6655_v0 = vrot.slane %v6647_v37, %v13831_v5  ;;  %v11682_v16 = vsel %vm11652_vm5, %v11631_v51, %v17814_v57  ;;  %v20697_v34 = vld [vmem:[#allocation54_spill] sm:$0xff] }
 0x298   :  { %v5412_v61 = vrot.slane %v5398_v11, %v13831_v5  ;;  %v7782_v18 = vrot.slane %v7775_v49, %v13831_v5  ;;  %v7624_v12 = vrot.slane %v7610_v53, %v13831_v5  ;;  %v11670_v29 = vsel %vm11652_vm5, %v11619_v30, %v17805_v35  ;;  %v17947_v37 = vpop.permute.xlu0 %7983 }
 0x299   :  { %v6662_v43 = vrot.slane %v6648_v3, %v13831_v5  ;;  %v7640_v20 = vrot.slane %v7626_v15, %v13831_v5  ;;  %v1259_v13 = vcombine.high %v17590_v27, %v17590_v27  ;;  %v2840_v17 = vshrl.u32 %v17622_v39, 16  ;;  %v20698_v15 = vld [vmem:[#allocation55_spill] sm:$0xff] }
 0x29a   :  { %v5413_v19 = vcombine.low %v5405_v60, %v5412_v61  ;;  %v7783_v31 = vcombine.low %v17781_v63, %v7782_v18  ;;  %v7625_v51 = vcombine.low %v17796_v50, %v7624_v12  ;;  %v8897_v23 = vcombine.low %v17640_v10, %v17649_v6 }
 0x29b   :  { %v6663_v57 = vcombine.low %v6655_v0, %v6662_v43  ;;  %v8898_v11 = vcombine.low %v17656_v62, %v17665_v59  ;;  %v17934_v63 = vrot.slane %v1259_v13, %v13831_v5  ;;  %v8899_v27 = vcombine.low %v17674_v33, %v17681_v55  ;;  %v20691_v62 = vld [vmem:[#allocation50_spill] sm:$0xff]  ;;  %v20692_v59 = vld [vmem:[#allocation51_spill] sm:$0xff] }
 0x29c   :  { %6001 = vrot.lane.b32.xlu0 %v5413_v19, %s13734_s28  ;;  %v7791_v35 = vrot.slane %v7783_v31, %v13831_v5  ;;  %v8603_v30 = vcombine.low %v17712_v32, %v17730_v42  ;;  %v7633_v50 = vrot.slane %v7625_v51, %v13831_v5  ;;  %v8907_v10 = vrot.slane %v8897_v23, %v13831_v5  ;;  %v17953_v42 = vpop.permute.xlu1 %7995 }
 0x29d   :  { %v8914_v6 = vrot.slane %v8898_v11, %v13831_v5  ;;  %v20693_v38 = vcombine.low %v20691_v62, %v20692_v59  ;;  %v2845_v33 = vshll.u32 %v17934_v63, 16  ;;  %v8921_v55 = vrot.slane %v8899_v27, %v13831_v5 }
 0x29e   :  { %v7799_v49 = vcombine.low %v7791_v35, %v17821_v14  ;;  %v8613_v32 = vrot.slane %v8603_v30, %v13831_v5  ;;  %v7641_v60 = vcombine.low %v7633_v50, %v7640_v20  ;;  %v20696_v53 = vcombine.low %v20694_v41, %v20695_v4  ;;  %v17983_v35 = vpop.permute.xlu0 %9233  ;;  %v20700_v30 = vld [vmem:[#allocation72_spill] sm:$0xff]  ;;  %v20701_v50 = vld [vmem:[#allocation66_spill] sm:$0xff] }
 0x29f   :  { %v8620_v28 = vrot.slane %v20693_v38, %v13831_v5  ;;  %v8929_v3 = vcombine.low %v8907_v10, %v8914_v6  ;;  %v20699_v61 = vcombine.low %v20697_v34, %v20698_v15  ;;  %v17967_v0 = vsel %vm14115_vm14, %v2840_v17, %v2845_v33  ;;  %v13017_v6 = vld.sshfl [vmem:[#allocation3 + $0xc8] sm:$0x33 pattern:$0x75316420]  ;;  %v20706_v15 = vld [vmem:[#allocation16_spill] sm:$0xff] }
 0x2a0   :  { %v8627_v21 = vrot.slane %v20696_v53, %v13831_v5  ;;  %7251 = vrot.lane.b32.xlu0 %v6663_v57, %s13741_s14  ;;  %8001 = vrot.lane.b32.xlu1 %v7799_v49, %s13739_s1  ;;  %v11733_v43 = vsel %vm11703_vm6, %v11682_v16, %v17849_v24  ;;  %v2848_v12 = vshrl.u32 %v17934_v63, 16  ;;  %v8900_v20 = vcombine.low %v17694_v22, %v17967_v0  ;;  %v17996_v62 = vpop.permute.xlu1 %9245  ;;  %v20703_v49 = vld [vmem:[#allocation70_spill] sm:$0xff] }
 0x2a1   :  { %v8634_v14 = vrot.slane %v20699_v61, %v13831_v5  ;;  %v8635_v18 = vcombine.low %v8613_v32, %v8620_v28  ;;  %v8937_v19 = vrot.slane %v8929_v3, %v13831_v5  ;;  %v13349_v13 = vcombine.low %v11733_v43, %v11733_v43  ;;  %v20702_v28 = vld [vmem:[#allocation17_spill] sm:$0xff] }
 0x2a2   :  { %v13350_v51 = vcombine.high %v11733_v43, %v11733_v43  ;;  %v11721_v17 = vsel %vm11703_vm6, %v11670_v29, %v17843_v40  ;;  %v4511_v23 = vcombine.low %v17622_v39, %v17934_v63  ;;  %v8928_v24 = vrot.slane %v8900_v20, %v13831_v5  ;;  %v13018_v3 = vld.sshfl [vmem:[#allocation3 + $0xcc] sm:$0x33 pattern:$0x75316420] }
 0x2a3   :  { %v8636_v31 = vcombine.low %v8627_v21, %v8634_v14  ;;  %v8643_v57 = vrot.slane %v8635_v18, %v13831_v5  ;;  %11955 = vst.msk [vmem:[#allocation2 + $0x70] sm:$0xf] %vm11926_vm7, %v13349_v13  ;;  %v13337_v22 = vcombine.low %v11721_v17, %v11721_v17  ;;  %v13338_v11 = vcombine.high %v11721_v17, %v11721_v17  ;;  %v20705_v21 = vld [vmem:[#allocation19_spill] sm:$0xff]  ;;  %v18031_v13 = vpop.permute.xlu0 %9795 }
 0x2a4   :  { %7989 = vrot.lane.b32.xlu0 %v7641_v60, %s13739_s1  ;;  %11956 = vst.msk [vmem:[#allocation2 + $0x74] sm:$0xf] %vm11926_vm7, %v13350_v51  ;;  %v17988_v27 = vrot.slane %v4511_v23, %v13831_v5  ;;  %v9627_v40 = vcombine.low %v17626_v52, %v17552_v26  ;;  %v13308_v29 = vcombine.high %v17286_v54, %v17449_v44  ;;  %v20707_v18 = vld [vmem:[#allocation35_spill] sm:$0xff] }
 0x2a5   :  { %v8650_v16 = vrot.slane %v8636_v31, %v13831_v5  ;;  %v4345_v10 = vcombine.low %v20701_v50, %v20700_v30  ;;  %v8930_v59 = vcombine.low %v8921_v55, %v8928_v24  ;;  %11943 = vst.msk [vmem:[#allocation2 + $0x40] sm:$0xf] %vm11926_vm7, %v13337_v22  ;;  %11944 = vst.msk [vmem:[#allocation2 + $0x44] sm:$0xf] %vm11926_vm7, %v13338_v11 }
 0x2a6   :  { %v4051_v33 = vcombine.low %v20703_v49, %v20702_v28  ;;  %v18004_v26 = vcombine.high %v17622_v39, %v17622_v39  ;;  %v4541_v54 = vcombine.low %v17598_v56, %v17988_v27  ;;  %v9634_v44 = vrot.slane %v9627_v40, %v13831_v5 }
 0x2a7   :  { %v8651_v38 = vcombine.low %v8643_v57, %v8650_v16  ;;  %v9516_v52 = vrot.slane %v13308_v29, %v13831_v5  ;;  %v4359_v55 = vrot.slane %v4345_v10, %v13831_v5  ;;  %v8944_v32 = vrot.slane %v8930_v59, %v13831_v5  ;;  %v20708_v29 = vld [vmem:[#allocation22_spill] sm:$0xff] }
 0x2a8   :  { %v4065_v60 = vrot.slane %v4051_v33, %v13831_v5  ;;  %v1282_v41 = vcombine.high %v13017_v6, %v13017_v6  ;;  %v18014_v4 = vrot.slane %v13017_v6, %v13831_v5  ;;  %v18018_v53 = vrot.slane %v4541_v54, %v13831_v5 }
 0x2a9   :  { %9239 = vrot.lane.b32.xlu0 %v8651_v38, %s13743_s16  ;;  %v9635_v56 = vcombine.low %v17578_v25, %v9634_v44  ;;  %v9517_v34 = vcombine.low %v9516_v52, %v20705_v21  ;;  %v4360_v61 = vcombine.low %v20706_v15, %v4359_v55  ;;  %v8945_v14 = vcombine.low %v8937_v19, %v8944_v32  ;;  %v18037_v19 = vpop.permute.xlu1 %9807  ;;  %v20710_v38 = vld [vmem:[#allocation81_spill] sm:$0xff]  ;;  %v20713_v15 = vld [vmem:[#allocation30_spill] sm:$0xff] }
 0x2aa   :  { %20704 = vst [vmem:[#allocation89_spill] sm:$0xff] %v18018_v53  ;;  %v4066_v43 = vcombine.low %v20707_v18, %v4065_v60  ;;  %v18025_v20 = vrot.slane %v1282_v41, %v13831_v5  ;;  %v18029_v31 = vcombine.high %v18014_v4, %v18014_v4  ;;  %v1306_v23 = vcombine.high %v13018_v3, %v13018_v3 }
 0x2ab   :  { %v9642_v57 = vrot.slane %v9635_v56, %v13831_v5  ;;  %v9524_v51 = vrot.slane %v9517_v34, %v13831_v5  ;;  %v11369_v17 = vsel %vm11321_vm15, %v4360_v61, %v17882_v9  ;;  %9251 = vrot.lane.b32.xlu1 %v8945_v14, %s13743_s16  ;;  %v18045_v22 = vrot.slane %v13018_v3, %v13831_v5  ;;  %v13595_v40 = vld [vmem:[#allocation2 + $0x70] sm:$0xff]  }
 0x2ac   :  { %v11351_v24 = vsel %vm11321_vm15, %v4066_v43, %v17876_v8  ;;  %v1298_v16 = vcombine.high %v18025_v20, %v18025_v20  ;;  %v4557_v11 = vcombine.low %v18004_v26, %v18014_v4  ;;  %v18052_v50 = vrot.slane %v1306_v23, %v13831_v5  ;;  %v13596_v10 = vld [vmem:[#allocation2 + $0x40] sm:$0xff]   ;;  %13516 = vmatmul.mubr.msk.bf16.gmra.mrb[4].mxu1 %vm12168_vm10, %v13595_v40 }
 0x2ad   :  { %v9643_v9 = vcombine.low %v9642_v57, %v18018_v53  ;;  %v9525_v30 = vcombine.low %v9524_v51, %v20708_v29  ;;  %v4558_v8 = vcombine.low %v18025_v20, %v18029_v31  ;;  %v10063_v28 = vcombine.low %v20671_v46, %v20710_v38  ;;  %13492 = vmatmul.mubr.msk.bf16.gmra.mrb[32].mxu0 %vm12168_vm10, %v13596_v10  ;;  %v18092_v56 = vpop.permute.xlu1 %10353 }
 0x2ae   :  { %v4559_v6 = vcombine.low %v1298_v16, %v18045_v22  ;;  %v18058_v59 = vrot.slane %v4557_v11, %v13831_v5  ;;  %v10072_v49 = vcombine.low %v20662_v7, %v20655_v2  ;;  %v11429_v54 = vsel %vm11397_vm0, %v11369_v17, %v17915_v58  ;;  %v18085_v58 = vpop.permute.xlu0 %10341 }
 0x2af   :  { %9801 = vrot.lane.b32.xlu0 %v9525_v30, %s13738_s3  ;;  %v18067_v33 = vrot.slane %v4558_v8, %v13831_v5  ;;  %v11417_v44 = vsel %vm11397_vm0, %v11351_v24, %v17907_v45  ;;  %v18075_v52 = vcombine.high %v17934_v63, %v17934_v63  ;;  %9813 = vrot.lane.b32.xlu1 %v9643_v9, %s13738_s3  ;;  %v2853_v45 = vshll.u32 %v18004_v26, 16 }
 0x2b0   :  { %20709 = vst [vmem:[#allocation49_spill] sm:$0xff] %v18058_v59  ;;  %v18079_v2 = vrot.slane %v4559_v6, %v13831_v5  ;;  %v10173_v7 = vcombine.low %v17988_v27, %v18058_v59  ;;  %v10070_v55 = vrot.slane %v10063_v28, %v13831_v5  ;;  %v10086_v32 = vrot.slane %v10072_v49, %v13831_v5 }
 0x2b1   :  { %20711 = vst [vmem:[#allocation46_spill] sm:$0xff] %v18067_v33  ;;  %v2856_v60 = vshrl.u32 %v18004_v26, 16  ;;  %v2861_v3 = vshll.u32 %v18075_v52, 16  ;;  %v2865_v41 = vshrl.u32 %v18014_v4, 16  ;;  %v20712_v21 = vmov 0.0  }
 0x2b2   :  { %13519 = vmatprep.mubr.msk.bf16.mxu1 %vm13746_vm9, %v20712_v21  ;;  %v10174_v27 = vcombine.low %v18067_v33, %v18079_v2  ;;  %v10181_v34 = vrot.slane %v10173_v7, %v13831_v5  ;;  %v10071_v61 = vcombine.low %v10070_v55, %v20713_v15  ;;  %v2870_v14 = vshll.u32 %v18025_v20, 16  ;;  %13495 = vmatprep.mubr.msk.bf16.mxu0 %vm13746_vm9, %v20712_v21  ;;  %v18129_v38 = vpop.permute.xlu0 %10919  ;;  %v18143_v7 = vpop.permute.xlu1 %10931 }
 0x2b3   :  { %v18107_v18 = vsel %vm14115_vm14, %v2848_v12, %v2853_v45  ;;  %v18111_v43 = vsel %vm14115_vm14, %v2856_v60, %v2861_v3  ;;  %v2873_v57 = vshrl.u32 %v18025_v20, 16  ;;  %v2878_v51 = vshll.u32 %v18029_v31, 16  ;;  %v20714_v45 = vld [vmem:[#allocation42_spill] sm:$0xff] }
 0x2b4   :  { %v10188_v17 = vrot.slane %v10174_v27, %v13831_v5  ;;  %v10079_v23 = vrot.slane %v10071_v61, %v13831_v5  ;;  %v18119_v24 = vsel %vm14115_vm14, %v2865_v41, %v2870_v14  ;;  %v2881_v11 = vshrl.u32 %v18029_v31, 16  ;;  %v20715_v60 = vld [vmem:[#allocation82_spill] sm:$0xff]  ;;  %v18158_v27 = vpop.f32.mrb[0].mxu0  ;;  %v20718_v14 = vld [vmem:[#allocation83_spill] sm:$0xff] }
 0x2b5   :  { %v18124_v12 = vsel %vm14115_vm14, %v2873_v57, %v2878_v51  ;;  %v2886_v40 = vshll.u32 %v1298_v16, 16  ;;  %v2889_v9 = vshrl.u32 %v1298_v16, 16  ;;  %v2894_v29 = vshll.u32 %v18045_v22, 16  ;;  %20717 = vst [vmem:[#allocation63_spill] sm:$0xff] %v18158_v27  ;;  %v20719_v57 = vld [vmem:[#allocation37_spill] sm:$0xff] }
 0x2b6   :  { %v10189_v30 = vcombine.low %v10181_v34, %v10188_v17  ;;  %v10087_v8 = vcombine.low %v10079_v23, %v10086_v32  ;;  %v2897_v10 = vshrl.u32 %v18045_v22, 16  ;;  %v2902_v6 = vshll.u32 %v18052_v50, 16  ;;  %v13461_v23 = vpop.f32.mrb[1].mxu0 }
 0x2b7   :  { %v18133_v28 = vsel %vm14115_vm14, %v2881_v11, %v2886_v40  ;;  %v18137_v31 = vsel %vm14115_vm14, %v2889_v9, %v2894_v29  ;;  %v5711_v16 = vcombine.low %v17967_v0, %v18107_v18  ;;  %v5757_v49 = vcombine.low %v18111_v43, %v18119_v24  ;;  %v20724_v23 = vld [vmem:[#allocation71_spill] sm:$0xff] }
 0x2b8   :  { %10359 = vrot.lane.b32.xlu1 %v10189_v30, %s13740_s13  ;;  %10347 = vrot.lane.b32.xlu0 %v10087_v8, %s13740_s13  ;;  %v18149_v55 = vsel %vm14115_vm14, %v2897_v10, %v2902_v6  ;;  %v5758_v32 = vcombine.low %v18124_v12, %v18133_v28  ;;  %v20716_v0 = vcombine.low %v20714_v45, %v20715_v60  ;;  %v2905_v41 = vshrl.u32 %v18052_v50, 16  ;;  %v18205_v60 = vpop.permute.xlu1 %11301 }
 0x2b9   :  { %v5739_v34 = vrot.slane %v5711_v16, %v13831_v5  ;;  %v5759_v15 = vcombine.low %v18137_v31, %v18149_v55  ;;  %v18164_v61 = vrot.slane %v5757_v49, %v13831_v5  ;;  %v20720_v51 = vcombine.low %v20718_v14, %v20719_v57 }
 0x2ba   :  { %v10641_v3 = vrot.slane %v20716_v0, %v13831_v5  ;;  %v18171_v11 = vrot.slane %v5758_v32, %v13831_v5  ;;  %v11480_v40 = vsel %vm11448_vm1, %v11429_v54, %v17953_v42  ;;  %v11468_v9 = vsel %vm11448_vm1, %v11417_v44, %v17947_v37  ;;  %v18194_v44 = vpop.permute.xlu0 %11289 }
 0x2bb   :  { %v10648_v17 = vrot.slane %v20720_v51, %v13831_v5  ;;  %v6961_v29 = vcombine.low %v17934_v63, %v18004_v26  ;;  %v18180_v30 = vrot.slane %v5759_v15, %v13831_v5  ;;  %v10735_v8 = vcombine.low %v5739_v34, %v18164_v61  ;;  %v20721_v26 = vld [vmem:[#allocation79_spill] sm:$0xff]  ;;  %v20722_v51 = vld [vmem:[#allocation65_spill] sm:$0xff] }
 0x2bc   :  { %v7007_v6 = vcombine.low %v18075_v52, %v18025_v20  ;;  %v13295_v42 = vcombine.high %v18014_v4, %v18025_v20  ;;  %v7009_v37 = vcombine.low %v18045_v22, %v18052_v50  ;;  %v13318_v54 = vcombine.high %v20721_v26, %v20671_v46 }
 0x2bd   :  { %v10649_v10 = vcombine.low %v10641_v3, %v10648_v17  ;;  %v18186_v16 = vrot.slane %v6961_v29, %v13831_v5  ;;  %v10736_v49 = vcombine.low %v18171_v11, %v18180_v30  ;;  %v10743_v32 = vrot.slane %v10735_v8, %v13831_v5  ;;  %v20725_v8 = vld [vmem:[#allocation58_spill] sm:$0xff] }
 0x2be   :  { %v18201_v52 = vrot.slane %v7007_v6, %v13831_v5  ;;  %v11531_v45 = vsel %vm11499_vm2, %v11480_v40, %v17996_v62  ;;  %v18208_v0 = vrot.slane %v13295_v42, %v13831_v5  ;;  %v18211_v46 = vrot.slane %v7009_v37, %v13831_v5  ;;  %v20723_v62 = vld [vmem:[#allocation77_spill] sm:$0xff]  ;;  %v20726_v6 = vld [vmem:[#allocation24_spill] sm:$0xff]  ;;  %v20727_v42 = vld [vmem:[#allocation23_spill] sm:$0xff] }
 0x2bf   :  { %10925 = vrot.lane.b32.xlu0 %v10649_v10, %s13744_s17  ;;  %v11106_v3 = vrot.slane %v13318_v54, %v13831_v5  ;;  %v11519_v15 = vsel %vm11499_vm2, %v11468_v9, %v17983_v35  ;;  %v10750_v14 = vrot.slane %v10736_v49, %v13831_v5  ;;  %v5740_v17 = vcombine.low %v20723_v62, %v20722_v51  ;;  %v20728_v35 = vld [vmem:[#allocation28_spill] sm:$0xff] }
 0x2c0   :  { %v11169_v57 = vcombine.low %v18186_v16, %v18201_v52  ;;  %v5741_v40 = vcombine.low %v20724_v23, %v5739_v34  ;;  %v7809_v29 = vcombine.low %v18208_v0, %v18211_v46  ;;  %v6990_v37 = vcombine.low %v20727_v42, %v20726_v6  ;;  %v18240_v6 = vpop.f32.mrb[2].mxu0  ;;  %v20730_v42 = vld [vmem:[#allocation59_spill] sm:$0xff] }
 0x2c1   :  { %v11107_v10 = vcombine.low %v11106_v3, %v20725_v8  ;;  %v6991_v9 = vcombine.low %v20728_v35, %v18186_v16  ;;  %v10751_v26 = vcombine.low %v10743_v32, %v10750_v14  ;;  %v5748_v49 = vrot.slane %v5740_v17, %v13831_v5  ;;  %v18238_v8 = vpop.permute.xlu0 %5997  ;;  %20729 = vst [vmem:[#allocation61_spill] sm:$0xff] %v18240_v6 }
 0x2c2   :  { %v11176_v54 = vrot.slane %v11169_v57, %v13831_v5  ;;  %v5755_v51 = vrot.slane %v5741_v40, %v13831_v5  ;;  %v18233_v34 = vrot.slane %v7809_v29, %v13831_v5  ;;  %v6998_v3 = vrot.slane %v6990_v37, %v13831_v5  ;;  %v18249_v40 = vpop.permute.xlu1 %6009  ;;  %v13462_v29 = vpop.f32.mrb[3].mxu0 }
 0x2c3   :  { %v11114_v62 = vrot.slane %v11107_v10, %v13831_v5  ;;  %v7005_v23 = vrot.slane %v6991_v9, %v13831_v5  ;;  %10937 = vrot.lane.b32.xlu1 %v10751_v26, %s13744_s17  ;;  %v11582_v14 = vsel %vm11550_vm3, %v11531_v45, %v18037_v19  ;;  %v11570_v57 = vsel %vm11550_vm3, %v11519_v15, %v18031_v13  ;;  %v13019_v45 = vld.sshfl [vmem:[#allocation3 + $0xd0] sm:$0x33 pattern:$0x75316420] }
 0x2c4   :  { %v5756_v32 = vcombine.low %v5748_v49, %v5755_v51  ;;  %v7800_v17 = vcombine.low %v18014_v4, %v18025_v20  ;;  %v11177_v10 = vcombine.low %v11176_v54, %v18233_v34  ;;  %v18255_v9 = vcombine.high %v18045_v22, %v18045_v22  ;;  %v18277_v49 = vpop.f32.mrb[4].mxu0 }
 0x2c5   :  { %v11115_v37 = vcombine.low %v11114_v62, %v20730_v42  ;;  %v7006_v35 = vcombine.low %v6998_v3, %v7005_v23  ;;  %v8946_v13 = vcombine.low %v18107_v18, %v18111_v43  ;;  %v8947_v4 = vcombine.low %v18119_v24, %v18124_v12  ;;  %20731 = vst [vmem:[#allocation67_spill] sm:$0xff] %v18277_v49  ;;  %v18288_v62 = vpop.permute.xlu0 %7247  ;;  %v13465_v3 = vpop.f32.mrb[5].mxu0 }
 0x2c6   :  { %v7807_v19 = vrot.slane %v7800_v17, %v13831_v5  ;;  %v8948_v20 = vcombine.low %v18133_v28, %v18137_v31  ;;  %v2910_v15 = vshll.u32 %v18255_v9, 16  ;;  %v11633_v26 = vsel %vm11601_vm4, %v11582_v14, %v18092_v56  ;;  %v13020_v31 = vld.sshfl [vmem:[#allocation3 + $0xd4] sm:$0x33 pattern:$0x75316420] }
 0x2c7   :  { %11295 = vrot.lane.b32.xlu0 %v11115_v37, %s13742_s15  ;;  %v11621_v54 = vsel %vm11601_vm4, %v11570_v57, %v18085_v58  ;;  %v4560_v18 = vcombine.low %v18052_v50, %v18255_v9  ;;  %11307 = vrot.lane.b32.xlu1 %v11177_v10, %s13742_s15  ;;  %v8956_v24 = vrot.slane %v8946_v13, %v13831_v5 }
 0x2c8   :  { %v7808_v43 = vcombine.low %v18186_v16, %v7807_v19  ;;  %v8963_v12 = vrot.slane %v8947_v4, %v13831_v5  ;;  %v8970_v28 = vrot.slane %v8948_v20, %v13831_v5  ;;  %v18283_v58 = vsel %vm14115_vm14, %v2905_v41, %v2910_v15  ;;  %v18296_v41 = vpop.permute.xlu1 %7259 }
 0x2c9   :  { %v4588_v56 = vrot.slane %v4560_v18, %v13831_v5  ;;  %v13312_v16 = vcombine.high %v17622_v39, %v17934_v63  ;;  %v1329_v51 = vcombine.high %v13019_v45, %v13019_v45  ;;  %v8949_v14 = vcombine.low %v18149_v55, %v18283_v58 }
 0x2ca   :  { %v7816_v23 = vrot.slane %v7808_v43, %v13831_v5  ;;  %v8978_v57 = vcombine.low %v8956_v24, %v8963_v12  ;;  %v18294_v17 = vrot.slane %v13019_v45, %v13831_v5  ;;  %v1353_v10 = vcombine.high %v13020_v31, %v13020_v31  ;;  %v18339_v12 = vpop.permute.xlu0 %7985 }
 0x2cb   :  { %6015 = vrot.lane.b32.xlu0 %v5756_v32, %s13734_s28  ;;  %v4590_v29 = vcombine.low %v18079_v2, %v4588_v56  ;;  %v9651_v39 = vrot.slane %v13312_v16, %v13831_v5  ;;  %v18302_v63 = vrot.slane %v1329_v51, %v13831_v5  ;;  %7265 = vrot.lane.b32.xlu1 %v7006_v35, %s13741_s14 }
 0x2cc   :  { %v7824_v55 = vcombine.low %v7816_v23, %v18233_v34  ;;  %v8977_v42 = vrot.slane %v8949_v14, %v13831_v5  ;;  %v8986_v37 = vrot.slane %v8978_v57, %v13831_v5  ;;  %v18309_v19 = vrot.slane %v13020_v31, %v13831_v5  ;;  %v18353_v31 = vpop.f32.mrb[6].mxu0 }
 0x2cd   :  { %v18312_v32 = vrot.slane %v4590_v29, %v13831_v5  ;;  %v9652_v2 = vcombine.low %v9651_v39, %v18067_v33  ;;  %v18316_v13 = vrot.slane %v1353_v10, %v13831_v5  ;;  %v4606_v35 = vcombine.low %v18294_v17, %v18302_v63  ;;  %20735 = vst [vmem:[#allocation62_spill] sm:$0xff] %v18353_v31  ;;  %v13466_v14 = vpop.f32.mrb[7].mxu0 }
 0x2ce   :  { %v8979_v4 = vcombine.low %v8970_v28, %v8977_v42  ;;  %v13271_v34 = vcombine.high %v18294_v17, %v18302_v63  ;;  %v18324_v20 = vsel %vm11652_vm5, %v11633_v26, %v18143_v7  ;;  %v18328_v45 = vsel %vm11652_vm5, %v11621_v54, %v18129_v38  ;;  %v18351_v28 = vpop.permute.xlu1 %7997 }
 0x2cf   :  { %20732 = vst [vmem:[#allocation34_spill] sm:$0xff] %v18312_v32  ;;  %8003 = vrot.lane.b32.xlu0 %v7824_v55, %s13739_s1  ;;  %v9659_v15 = vrot.slane %v9652_v2, %v13831_v5  ;;  %v4608_v18 = vcombine.low %v18309_v19, %v18316_v13  ;;  %v18335_v43 = vrot.slane %v4606_v35, %v13831_v5  ;;  %v2913_v29 = vshrl.u32 %v18255_v9, 16 }
 0x2d0   :  { %v1344_v24 = vcombine.high %v18294_v17, %v18294_v17  ;;  %v8993_v7 = vrot.slane %v8979_v4, %v13831_v5  ;;  %v18343_v38 = vrot.slane %v13271_v34, %v13831_v5  ;;  %v1345_v26 = vcombine.high %v18302_v63, %v18302_v63 }
 0x2d1   :  { %20733 = vst [vmem:[#allocation85_spill] sm:$0xff] %v18335_v43  ;;  %v18349_v54 = vcombine.high %v18309_v19, %v18309_v19  ;;  %v9660_v16 = vcombine.low %v9659_v15, %v18312_v32  ;;  %v18357_v51 = vrot.slane %v4608_v18, %v13831_v5  ;;  %v10190_v3 = vcombine.low %v4588_v56, %v18335_v43 }
 0x2d2   :  { %20734 = vst [vmem:[#allocation60_spill] sm:$0xff] %v18343_v38  ;;  %v18362_v23 = vcombine.high %v18052_v50, %v18052_v50  ;;  %v8994_v57 = vcombine.low %v8986_v37, %v8993_v7  ;;  %v2922_v39 = vshrl.u32 %v18294_v17, 16  ;;  %v2927_v10 = vshll.u32 %v18302_v63, 16 }
 0x2d3   :  { %20736 = vst [vmem:[#allocation80_spill] sm:$0xff] %v18357_v51  ;;  %9815 = vrot.lane.b32.xlu0 %v9660_v16, %s13738_s3  ;;  %v10191_v55 = vcombine.low %v18343_v38, %v18357_v51  ;;  %v10198_v42 = vrot.slane %v10190_v3, %v13831_v5  ;;  %v2930_v2 = vshrl.u32 %v18302_v63, 16  ;;  %v2935_v35 = vshll.u32 %v1344_v24, 16  ;;  %v18384_v3 = vpop.permute.xlu0 %9235 }
 0x2d4   :  { %v2918_v56 = vshll.u32 %v18362_v23, 16  ;;  %9253 = vrot.lane.b32.xlu1 %v8994_v57, %s13743_s16  ;;  %v18376_v37 = vsel %vm14115_vm14, %v2922_v39, %v2927_v10  ;;  %v2938_v4 = vshrl.u32 %v1344_v24, 16  ;;  %v2943_v34 = vshll.u32 %v1345_v26, 16 }
 0x2d5   :  { %v10205_v15 = vrot.slane %v10191_v55, %v13831_v5  ;;  %v2946_v7 = vshrl.u32 %v1345_v26, 16  ;;  %v2951_v16 = vshll.u32 %v18309_v19, 16  ;;  %v18388_v14 = vsel %vm14115_vm14, %v2930_v2, %v2935_v35  ;;  %v18396_v55 = vpop.permute.xlu1 %9247 }
 0x2d6   :  { %v18381_v18 = vsel %vm14115_vm14, %v2913_v29, %v2918_v56  ;;  %v18392_v57 = vsel %vm14115_vm14, %v2938_v4, %v2943_v34  ;;  %v2954_v39 = vshrl.u32 %v18309_v19, 16  ;;  %v2959_v10 = vshll.u32 %v18316_v13, 16 }
 0x2d7   :  { %v10206_v29 = vcombine.low %v10198_v42, %v10205_v15  ;;  %v18400_v56 = vsel %vm14115_vm14, %v2946_v7, %v2951_v16  ;;  %v2962_v43 = vshrl.u32 %v18316_v13, 16  ;;  %v2967_v2 = vshll.u32 %v18349_v54, 16 }
 0x2d8   :  { %v18406_v35 = vsel %vm14115_vm14, %v2954_v39, %v2959_v10  ;;  %v5760_v4 = vcombine.low %v18283_v58, %v18381_v18  ;;  %v5806_v34 = vcombine.low %v18376_v37, %v18388_v14  ;;  %v5807_v42 = vcombine.low %v18392_v57, %v18400_v56 }
 0x2d9   :  { %10361 = vrot.lane.b32.xlu1 %v10206_v29, %s13740_s13  ;;  %v18417_v15 = vsel %vm14115_vm14, %v2962_v43, %v2967_v2  ;;  %v13296_v7 = vcombine.high %v18045_v22, %v18052_v50  ;;  %v7056_v16 = vcombine.low %v18302_v63, %v1344_v24  ;;  %v7057_v39 = vcombine.low %v1345_v26, %v18309_v19  ;;  %v18441_v26 = vpop.permute.xlu0 %9797 }
 0x2da   :  { %v5788_v58 = vrot.slane %v5760_v4, %v13831_v5  ;;  %v5808_v10 = vcombine.low %v18406_v35, %v18417_v15  ;;  %v18427_v32 = vrot.slane %v5806_v34, %v13831_v5  ;;  %v18430_v29 = vrot.slane %v5807_v42, %v13831_v5 }
 0x2db   :  { %v7038_v43 = vrot.slane %v13296_v7, %v13831_v5  ;;  %v7058_v22 = vcombine.low %v18316_v13, %v18349_v54  ;;  %v18436_v50 = vrot.slane %v7056_v16, %v13831_v5  ;;  %v18439_v24 = vrot.slane %v7057_v39, %v13831_v5  ;;  %v18453_v7 = vpop.permute.xlu1 %9809 }
 0x2dc   :  { %v18444_v2 = vrot.slane %v5808_v10, %v13831_v5  ;;  %v10752_v4 = vcombine.low %v5788_v58, %v18427_v32  ;;  %v11735_v34 = vsel %vm11703_vm6, %v18324_v20, %v18205_v60  ;;  %v11723_v42 = vsel %vm11703_vm6, %v18328_v45, %v18194_v44 }
 0x2dd   :  { %v18456_v16 = vrot.slane %v7058_v22, %v13831_v5  ;;  %v11178_v39 = vcombine.low %v7038_v43, %v18436_v50  ;;  %v13351_v53 = vcombine.low %v11735_v34, %v11735_v34  ;;  %v13352_v10 = vcombine.high %v11735_v34, %v11735_v34 }
 0x2de   :  { %v10753_v59 = vcombine.low %v18430_v29, %v18444_v2  ;;  %v10760_v33 = vrot.slane %v10752_v4, %v13831_v5  ;;  %v13339_v25 = vcombine.low %v11723_v42, %v11723_v42  ;;  %v13340_v60 = vcombine.high %v11723_v42, %v11723_v42 }
 0x2df   :  { %v7834_v20 = vcombine.low %v18439_v24, %v18456_v16  ;;  %v11185_v44 = vrot.slane %v11178_v39, %v13831_v5  ;;  %11957 = vst.msk [vmem:[#allocation2 + $0x78] sm:$0xf] %vm11926_vm7, %v13351_v53  ;;  %11958 = vst.msk [vmem:[#allocation2 + $0x7c] sm:$0xf] %vm11926_vm7, %v13352_v10  ;;  %v5789_v45 = vcombine.low %v18164_v61, %v18171_v11  ;;  %v20737_v39 = vld [vmem:[#allocation74_spill] sm:$0xff]  ;;  %v20738_v53 = vld [vmem:[#allocation76_spill] sm:$0xff] }
 0x2e0   :  { %v5790_v22 = vcombine.low %v18180_v30, %v5788_v58  ;;  %v10767_v34 = vrot.slane %v10753_v59, %v13831_v5  ;;  %11945 = vst.msk [vmem:[#allocation2 + $0x48] sm:$0xf] %vm11926_vm7, %v13339_v25  ;;  %11946 = vst.msk [vmem:[#allocation2 + $0x4c] sm:$0xf] %vm11926_vm7, %v13340_v60  ;;  %v7039_v4 = vcombine.low %v18201_v52, %v18208_v0  ;;  %v20739_v59 = vld [vmem:[#allocation75_spill] sm:$0xff]  ;;  %v20740_v30 = vld [vmem:[#allocation64_spill] sm:$0xff]  ;;  %v18485_v58 = vpop.permute.xlu0 %10343 }
 0x2e1   :  { %v7040_v42 = vcombine.low %v18211_v46, %v7038_v43  ;;  %v4394_v1 = vcombine.low %v20738_v53, %v20737_v39  ;;  %v18479_v10 = vrot.slane %v7834_v20, %v13831_v5  ;;  %v5797_v61 = vrot.slane %v5789_v45, %v13831_v5  ;;  %v18490_v43 = vpop.permute.xlu1 %10355  ;;  %v18496_v53 = vpop.f32.mrb[8].mxu0 }
 0x2e2   :  { %v5804_v11 = vrot.slane %v5790_v22, %v13831_v5  ;;  %v4100_v25 = vcombine.low %v20740_v30, %v20739_v59  ;;  %v10768_v60 = vcombine.low %v10760_v33, %v10767_v34  ;;  %v7047_v52 = vrot.slane %v7039_v4, %v13831_v5  ;;  %20741 = vst [vmem:[#allocation32_spill] sm:$0xff] %v18496_v53  ;;  %v20742_v34 = vld [vmem:[#allocation73_spill] sm:$0xff]  ;;  %v13021_v30 = vld.sshfl [vmem:[#allocation3 + $0xd8] sm:$0x33 pattern:$0x75316420] }
 0x2e3   :  { %v7054_v0 = vrot.slane %v7040_v42, %v13831_v5  ;;  %v4408_v46 = vrot.slane %v4394_v1, %v13831_v5  ;;  %v11186_v20 = vcombine.low %v11185_v44, %v18479_v10  ;;  %v7825_v22 = vcombine.low %v18255_v9, %v18294_v17  ;;  %v13469_v44 = vpop.f32.mrb[9].mxu0 }
 0x2e4   :  { %v5805_v39 = vcombine.low %v5797_v61, %v5804_v11  ;;  %v4114_v45 = vrot.slane %v4100_v25, %v13831_v5  ;;  %10939 = vrot.lane.b32.xlu0 %v10768_v60, %s13744_s17  ;;  %v18502_v1 = vcombine.high %v18316_v13, %v18316_v13  ;;  %v2970_v42 = vshrl.u32 %v18349_v54, 16  ;;  %v20743_v61 = vld [vmem:[#allocation78_spill] sm:$0xff]  ;;  %v13022_v25 = vld.sshfl [vmem:[#allocation3 + $0xdc] sm:$0x33 pattern:$0x75316420] }
 0x2e5   :  { %v7055_v33 = vcombine.low %v7047_v52, %v7054_v0  ;;  %v4409_v4 = vcombine.low %v20742_v34, %v4408_v46  ;;  %11309 = vrot.lane.b32.xlu1 %v11186_v20, %s13742_s15  ;;  %v7832_v9 = vrot.slane %v7825_v22, %v13831_v5  ;;  %v8995_v17 = vcombine.low %v18381_v18, %v18376_v37  ;;  %v18526_v22 = vpop.f32.mrb[10].mxu0 }
 0x2e6   :  { %v4115_v11 = vcombine.low %v20743_v61, %v4114_v45  ;;  %v8996_v59 = vcombine.low %v18388_v14, %v18392_v57  ;;  %v2975_v52 = vshll.u32 %v18502_v1, 16  ;;  %v8997_v0 = vcombine.low %v18400_v56, %v18406_v35  ;;  %v13597_v20 = vld [vmem:[#allocation2 + $0x78] sm:$0xff]   ;;  %20744 = vst [vmem:[#allocation86_spill] sm:$0xff] %v18526_v22  ;;  %v18538_v35 = vpop.permute.xlu1 %10933  ;;  %v13470_v34 = vpop.f32.mrb[11].mxu0 }
 0x2e7   :  { %v11372_v60 = vsel %vm11321_vm15, %v4409_v4, %v18249_v40  ;;  %v9661_v46 = vcombine.low %v18362_v23, %v18302_v63  ;;  %v7833_v18 = vcombine.low %v7832_v9, %v18436_v50  ;;  %v9005_v14 = vrot.slane %v8995_v17, %v13831_v5  ;;  %v13598_v45 = vld [vmem:[#allocation2 + $0x48] sm:$0xff]   ;;  %v18524_v40 = vpop.permute.xlu0 %10921  ;;  %13520 = vmatmul.mubr.msk.bf16.gmra.mrb[8].mxu1 %vm12168_vm10, %v13597_v20 }
 0x2e8   :  { %v11354_v37 = vsel %vm11321_vm15, %v4115_v11, %v18238_v8  ;;  %v9012_v57 = vrot.slane %v8996_v59, %v13831_v5  ;;  %6017 = vrot.lane.b32.xlu0 %v5805_v39, %s13734_s28  ;;  %v18531_v63 = vsel %vm14115_vm14, %v2970_v42, %v2975_v52  ;;  %v9019_v23 = vrot.slane %v8997_v0, %v13831_v5 }
 0x2e9   :  { %v11431_v8 = vsel %vm11397_vm0, %v11372_v60, %v18296_v41  ;;  %v11419_v56 = vsel %vm11397_vm0, %v11354_v37, %v18288_v62  ;;  %7267 = vrot.lane.b32.xlu1 %v7055_v33, %s13741_s14  ;;  %v7841_v4 = vrot.slane %v7833_v18, %v13831_v5  ;;  %v8998_v39 = vcombine.low %v18417_v15, %v18531_v63 }
 0x2ea   :  { %v9027_v42 = vcombine.low %v9005_v14, %v9012_v57  ;;  %v13313_v44 = vcombine.high %v18309_v19, %v18316_v13  ;;  %v9669_v61 = vrot.slane %v9661_v46, %v13831_v5  ;;  %v1376_v41 = vcombine.high %v13021_v30, %v13021_v30  ;;  %13496 = vmatmul.mubr.msk.bf16.gmra.mrb[36].mxu0 %vm12168_vm10, %v13598_v45  ;;  %v18584_v14 = vpop.permute.xlu1 %11303 }
 0x2eb   :  { %v18548_v11 = vrot.slane %v13021_v30, %v13831_v5  ;;  %v1400_v62 = vcombine.high %v13022_v25, %v13022_v25  ;;  %v7849_v33 = vcombine.low %v7841_v4, %v18479_v10  ;;  %v9026_v9 = vrot.slane %v8998_v39, %v13831_v5  ;;  %13499 = vmatprep.mubr.msk.bf16.mxu0 %vm13746_vm9, %v20712_v21  ;;  %v18574_v46 = vpop.permute.xlu0 %11291 }
 0x2ec   :  { %v9035_v17 = vrot.slane %v9027_v42, %v13831_v5  ;;  %v9676_v15 = vrot.slane %v13313_v44, %v13831_v5  ;;  %v9677_v19 = vcombine.low %v9669_v61, %v18343_v38  ;;  %v18558_v13 = vrot.slane %v1376_v41, %v13831_v5  ;;  %13523 = vmatprep.mubr.msk.bf16.mxu1 %vm13746_vm9, %v20712_v21 }
 0x2ed   :  { %v1391_v59 = vcombine.high %v18548_v11, %v18548_v11  ;;  %v18563_v30 = vrot.slane %v13022_v25, %v13831_v5  ;;  %8005 = vrot.lane.b32.xlu0 %v7849_v33, %s13739_s1  ;;  %v9028_v10 = vcombine.low %v9019_v23, %v9026_v9  ;;  %v18570_v52 = vrot.slane %v1400_v62, %v13831_v5 }
 0x2ee   :  { %v9678_v60 = vcombine.low %v18357_v51, %v9676_v15  ;;  %v4609_v0 = vcombine.low %v18349_v54, %v18548_v11  ;;  %v9685_v20 = vrot.slane %v9677_v19, %v13831_v5  ;;  %v1392_v25 = vcombine.high %v18558_v13, %v18558_v13 }
 0x2ef   :  { %v18581_v37 = vcombine.high %v18563_v30, %v18563_v30  ;;  %v4655_v18 = vcombine.low %v18558_v13, %v1391_v59  ;;  %v9042_v54 = vrot.slane %v9028_v10, %v13831_v5  ;;  %v11482_v23 = vsel %vm11448_vm1, %v11431_v8, %v18351_v28  ;;  %v18622_v19 = vpop.permute.xlu0 %5999 }
 0x2f0   :  { %v9692_v57 = vrot.slane %v9678_v60, %v13831_v5  ;;  %v18591_v45 = vrot.slane %v4609_v0, %v13831_v5  ;;  %v4656_v34 = vcombine.low %v1392_v25, %v18563_v30  ;;  %v18603_v42 = vsel %vm11448_vm1, %v11419_v56, %v18339_v12 }
 0x2f1   :  { %v4657_v4 = vcombine.low %v18570_v52, %v18581_v37  ;;  %v18599_v39 = vrot.slane %v4655_v18, %v13831_v5  ;;  %v9043_v44 = vcombine.low %v9035_v17, %v9042_v54  ;;  %v18607_v41 = vcombine.high %v18570_v52, %v18570_v52  ;;  %v18631_v18 = vpop.permute.xlu1 %6011 }
 0x2f2   :  { %20745 = vst [vmem:[#allocation44_spill] sm:$0xff] %v18591_v45  ;;  %v9693_v61 = vcombine.low %v9685_v20, %v9692_v57  ;;  %v2979_v28 = vshrl.u32 %v18548_v11, 16  ;;  %v18611_v8 = vrot.slane %v4656_v34, %v13831_v5  ;;  %v2984_v12 = vshll.u32 %v18558_v13, 16 }
 0x2f3   :  { %v18614_v62 = vrot.slane %v4657_v4, %v13831_v5  ;;  %v10207_v33 = vcombine.low %v18591_v45, %v18599_v39  ;;  %9255 = vrot.lane.b32.xlu1 %v9043_v44, %s13743_s16  ;;  %v2987_v56 = vshrl.u32 %v18558_v13, 16  ;;  %v2992_v9 = vshll.u32 %v1391_v59, 16 }
 0x2f4   :  { %9817 = vrot.lane.b32.xlu0 %v9693_v61, %s13738_s3  ;;  %v2995_v17 = vshrl.u32 %v1391_v59, 16  ;;  %v3000_v15 = vshll.u32 %v1392_v25, 16  ;;  %v18629_v0 = vsel %vm14115_vm14, %v2979_v28, %v2984_v12  ;;  %v3003_v20 = vshrl.u32 %v1392_v25, 16 }
 0x2f5   :  { %20746 = vst [vmem:[#allocation39_spill] sm:$0xff] %v18614_v62  ;;  %v10208_v10 = vcombine.low %v18611_v8, %v18614_v62  ;;  %v10215_v60 = vrot.slane %v10207_v33, %v13831_v5  ;;  %v18635_v54 = vsel %vm14115_vm14, %v2987_v56, %v2992_v9  ;;  %v3008_v57 = vshll.u32 %v18563_v30, 16  ;;  %v18655_v9 = vpop.f32.mrb[12].mxu0 }
 0x2f6   :  { %v18639_v59 = vsel %vm14115_vm14, %v2995_v17, %v3000_v15  ;;  %v3011_v34 = vshrl.u32 %v18563_v30, 16  ;;  %v3016_v44 = vshll.u32 %v18570_v52, 16  ;;  %v3019_v25 = vshrl.u32 %v18570_v52, 16  ;;  %20747 = vst [vmem:[#allocation48_spill] sm:$0xff] %v18655_v9 }
 0x2f7   :  { %v10222_v4 = vrot.slane %v10208_v10, %v13831_v5  ;;  %v3024_v61 = vshll.u32 %v18581_v37, 16  ;;  %v18649_v28 = vsel %vm14115_vm14, %v3003_v20, %v3008_v57  ;;  %v3027_v33 = vshrl.u32 %v18581_v37, 16  ;;  %v13473_v57 = vpop.f32.mrb[13].mxu0 }
 0x2f8   :  { %v3032_v12 = vshll.u32 %v18607_v41, 16  ;;  %v5809_v56 = vcombine.low %v18531_v63, %v18629_v0  ;;  %v18659_v15 = vsel %vm14115_vm14, %v3011_v34, %v3016_v44  ;;  %v5855_v20 = vcombine.low %v18635_v54, %v18639_v59  ;;  %v18678_v44 = vpop.f32.mrb[14].mxu0 }
 0x2f9   :  { %v10223_v17 = vcombine.low %v10215_v60, %v10222_v4  ;;  %v18663_v10 = vsel %vm14115_vm14, %v3019_v25, %v3024_v61  ;;  %v5856_v60 = vcombine.low %v18649_v28, %v18659_v15  ;;  %v7059_v34 = vcombine.low %v18502_v1, %v18558_v13  ;;  %v18676_v4 = vpop.permute.xlu0 %7249  ;;  %20748 = vst [vmem:[#allocation45_spill] sm:$0xff] %v18678_v44  ;;  %v13474_v1 = vpop.f32.mrb[15].mxu0 }
 0x2fa   :  { %v18669_v51 = vsel %vm14115_vm14, %v3027_v33, %v3032_v12  ;;  %v5837_v63 = vrot.slane %v5809_v56, %v13831_v5  ;;  %v18684_v61 = vrot.slane %v5855_v20, %v13831_v5  ;;  %v13297_v33 = vcombine.high %v18548_v11, %v18558_v13  ;;  %v18690_v56 = vpop.permute.xlu1 %7261  ;;  %v18700_v38 = vpop.f32.mrb[16].mxu0 }
 0x2fb   :  { %10363 = vrot.lane.b32.xlu1 %v10223_v17, %s13740_s13  ;;  %v5857_v25 = vcombine.low %v18663_v10, %v18669_v51  ;;  %v7106_v12 = vcombine.low %v18563_v30, %v18570_v52  ;;  %v18693_v57 = vrot.slane %v5856_v60, %v13831_v5  ;;  %v7087_v17 = vrot.slane %v7059_v34, %v13831_v5  ;;  %v13477_v34 = vpop.f32.mrb[17].mxu0 }
 0x2fc   :  { %v13298_v45 = vcombine.high %v18563_v30, %v18570_v52  ;;  %v11533_v20 = vsel %vm11499_vm2, %v11482_v23, %v18396_v55  ;;  %20749 = vst [vmem:[#allocation43_spill] sm:$0xff] %v18700_v38  ;;  %v10769_v9 = vcombine.low %v5837_v63, %v18684_v61  ;;  %v18707_v1 = vrot.slane %v13297_v33, %v13831_v5  ;;  %v18721_v23 = vpop.f32.mrb[18].mxu0 }
 0x2fd   :  { %v18703_v44 = vrot.slane %v5857_v25, %v13831_v5  ;;  %v18710_v60 = vrot.slane %v7106_v12, %v13831_v5  ;;  %v11521_v55 = vsel %vm11499_vm2, %v18603_v42, %v18384_v3  ;;  %v5838_v30 = vcombine.low %v18427_v32, %v18430_v29  ;;  %20750 = vst [vmem:[#allocation47_spill] sm:$0xff] %v18721_v23  ;;  %v13478_v34 = vpop.f32.mrb[19].mxu0  ;;  %v13023_v42 = vld.sshfl [vmem:[#allocation3 + $0xe0] sm:$0x33 pattern:$0x75316420] }
 0x2fe   :  { %v18713_v47 = vrot.slane %v13298_v45, %v13831_v5  ;;  %v5839_v52 = vcombine.low %v18444_v2, %v5837_v63  ;;  %v10777_v33 = vrot.slane %v10769_v9, %v13831_v5  ;;  %v11187_v12 = vcombine.low %v7087_v17, %v18707_v1  ;;  %v18734_v63 = vpop.permute.xlu0 %7987 }
 0x2ff   :  { %v10770_v25 = vcombine.low %v18693_v57, %v18703_v44  ;;  %v7088_v45 = vcombine.low %v18436_v50, %v18439_v24  ;;  %v5846_v32 = vrot.slane %v5838_v30, %v13831_v5  ;;  %v7089_v2 = vcombine.low %v18456_v16, %v7087_v17  ;;  %v18741_v24 = vpop.permute.xlu1 %7999 }
 0x300   :  { %v11188_v3 = vcombine.low %v18710_v60, %v18713_v47  ;;  %v5853_v29 = vrot.slane %v5839_v52, %v13831_v5  ;;  %v11195_v23 = vrot.slane %v11187_v12, %v13831_v5  ;;  %v11584_v50 = vsel %vm11550_vm3, %v11533_v20, %v18453_v7 }
 0x301   :  { %v10784_v9 = vrot.slane %v10770_v25, %v13831_v5  ;;  %v7096_v38 = vrot.slane %v7088_v45, %v13831_v5  ;;  %v7103_v52 = vrot.slane %v7089_v2, %v13831_v5  ;;  %v11572_v16 = vsel %vm11550_vm3, %v11521_v55, %v18441_v26 }
 0x302   :  { %v11202_v30 = vrot.slane %v11188_v3, %v13831_v5  ;;  %v5854_v34 = vcombine.low %v5846_v32, %v5853_v29  ;;  %v1423_v48 = vcombine.high %v13023_v42, %v13023_v42  ;;  %v18748_v25 = vrot.slane %v13023_v42, %v13831_v5  ;;  %v13025_v42 = vld.sshfl [vmem:[#allocation3 + $0xe8] sm:$0x33 pattern:$0x75316420] }
 0x303   :  { %v10785_v17 = vcombine.low %v10777_v33, %v10784_v9  ;;  %v7850_v12 = vcombine.low %v18548_v11, %v18558_v13  ;;  %v7104_v7 = vcombine.low %v7096_v38, %v7103_v52  ;;  %v9044_v20 = vcombine.low %v18629_v0, %v18635_v54  ;;  %v13024_v54 = vld.sshfl [vmem:[#allocation3 + $0xe4] sm:$0x33 pattern:$0x75316420]  ;;  %v18792_v52 = vpop.f32.mrb[20].mxu0 }
 0x304   :  { %v11203_v45 = vcombine.low %v11195_v23, %v11202_v30  ;;  %v9045_v3 = vcombine.low %v18639_v59, %v18649_v28  ;;  %v18758_v26 = vrot.slane %v1423_v48, %v13831_v5  ;;  %v7851_v55 = vcombine.low %v18581_v37, %v18748_v25  ;;  %v18771_v59 = vpop.permute.xlu0 %9237  ;;  %20751 = vst [vmem:[#allocation41_spill] sm:$0xff] %v18792_v52 }
 0x305   :  { %10941 = vrot.lane.b32.xlu0 %v10785_v17, %s13744_s17  ;;  %v7858_v33 = vrot.slane %v7850_v12, %v13831_v5  ;;  %v3036_v11 = vshrl.u32 %v18748_v25, 16  ;;  %v9046_v38 = vcombine.low %v18659_v15, %v18663_v10  ;;  %v9054_v13 = vrot.slane %v9044_v20, %v13831_v5  ;;  %v18778_v15 = vpop.permute.xlu1 %9249 }
 0x306   :  { %11311 = vrot.lane.b32.xlu1 %v11203_v45, %s13742_s15  ;;  %v9061_v0 = vrot.slane %v9045_v3, %v13831_v5  ;;  %v11635_v48 = vsel %vm11601_vm4, %v11584_v50, %v18490_v43  ;;  %v7865_v37 = vrot.slane %v7851_v55, %v13831_v5  ;;  %v3041_v23 = vshll.u32 %v18758_v26, 16 }
 0x307   :  { %v7866_v28 = vcombine.low %v7858_v33, %v18707_v1  ;;  %v11623_v32 = vsel %vm11601_vm4, %v11572_v16, %v18485_v58  ;;  %v9068_v10 = vrot.slane %v9046_v38, %v13831_v5  ;;  %v4687_v43 = vcombine.low %v18599_v39, %v18611_v8  ;;  %v13481_v16 = vpop.f32.mrb[21].mxu0 }
 0x308   :  { %v9076_v29 = vcombine.low %v9054_v13, %v9061_v0  ;;  %v9694_v2 = vcombine.low %v18607_v41, %v18758_v26  ;;  %v7867_v9 = vcombine.low %v18710_v60, %v7865_v37  ;;  %v18790_v58 = vsel %vm14115_vm14, %v3036_v11, %v3041_v23  ;;  %v18809_v20 = vpop.f32.mrb[22].mxu0  ;;  %v18818_v11 = vpop.permute.xlu0 %9799 }
 0x309   :  { %6019 = vrot.lane.b32.xlu0 %v5854_v34, %s13734_s28  ;;  %v7874_v50 = vrot.slane %v7866_v28, %v13831_v5  ;;  %v1447_v30 = vcombine.high %v13024_v54, %v13024_v54  ;;  %v9047_v39 = vcombine.low %v18669_v51, %v18790_v58  ;;  %v18799_v8 = vrot.slane %v4687_v43, %v13831_v5  ;;  %v13482_v38 = vpop.f32.mrb[23].mxu0  ;;  %v18829_v28 = vpop.permute.xlu1 %9811 }
 0x30a   :  { %7269 = vrot.lane.b32.xlu1 %v7104_v7, %s13741_s14  ;;  %v9084_v41 = vrot.slane %v9076_v29, %v13831_v5  ;;  %v9701_v34 = vrot.slane %v9694_v2, %v13831_v5  ;;  %v7881_v17 = vrot.slane %v7867_v9, %v13831_v5  ;;  %v18804_v12 = vrot.slane %v13024_v54, %v13831_v5 }
 0x30b   :  { %20752 = vst [vmem:[#allocation40_spill] sm:$0xff] %v18799_v8  ;;  %v18807_v45 = vrot.slane %v1447_v30, %v13831_v5  ;;  %v1470_v7 = vcombine.high %v13025_v42, %v13025_v42  ;;  %20753 = vst [vmem:[#allocation57_spill] sm:$0xff] %v18809_v20  ;;  %v9075_v51 = vrot.slane %v9047_v39, %v13831_v5 }
 0x30c   :  { %v9702_v3 = vcombine.low %v18614_v62, %v9701_v34  ;;  %v18814_v55 = vrot.slane %v13025_v42, %v13831_v5  ;;  %v4658_v33 = vcombine.low %v18748_v25, %v18758_v26  ;;  %v7882_v13 = vcombine.low %v7874_v50, %v7881_v17 }
 0x30d   :  { %v18822_v0 = vcombine.high %v18804_v12, %v18804_v12  ;;  %v18825_v54 = vrot.slane %v1470_v7, %v13831_v5  ;;  %v13272_v37 = vcombine.high %v18748_v25, %v18758_v26  ;;  %v9077_v23 = vcombine.low %v9068_v10, %v9075_v51 }
 0x30e   :  { %v9709_v29 = vrot.slane %v9702_v3, %v13831_v5  ;;  %v18833_v43 = vrot.slane %v4658_v33, %v13831_v5  ;;  %v4705_v2 = vcombine.low %v18804_v12, %v18807_v45  ;;  %8007 = vrot.lane.b32.xlu0 %v7882_v13, %s13739_s1  ;;  %v18845_v50 = vsel %vm11652_vm5, %v11635_v48, %v18538_v35  ;;  %v18868_v33 = vpop.permute.xlu0 %10345 }
 0x30f   :  { %v4706_v42 = vcombine.low %v18822_v0, %v18814_v55  ;;  %v18841_v9 = vrot.slane %v13272_v37, %v13831_v5  ;;  %v18849_v10 = vsel %vm11652_vm5, %v11623_v32, %v18524_v40  ;;  %v9091_v30 = vrot.slane %v9077_v23, %v13831_v5 }
 0x310   :  { %20754 = vst [vmem:[#allocation56_spill] sm:$0xff] %v18833_v43  ;;  %v9710_v39 = vcombine.low %v18799_v8, %v9709_v29  ;;  %v18854_v34 = vrot.slane %v4705_v2, %v13831_v5  ;;  %v1438_v16 = vcombine.high %v18748_v25, %v18748_v25  ;;  %v1439_v40 = vcombine.high %v18758_v26, %v18758_v26  ;;  %v18870_v25 = vpop.f32.mrb[24].mxu0  ;;  %v18876_v29 = vpop.permute.xlu1 %10357 }
 0x311   :  { %v18859_v17 = vrot.slane %v4706_v42, %v13831_v5  ;;  %v10224_v35 = vcombine.low %v18833_v43, %v18841_v9  ;;  %v1536_v48 = vcombine.high %v18807_v45, %v18807_v45  ;;  %v9092_v32 = vcombine.low %v9084_v41, %v9091_v30  ;;  %20756 = vst [vmem:[#allocation51_spill] sm:$0xff] %v18870_v25  ;;  %v13485_v41 = vpop.f32.mrb[25].mxu0 }
 0x312   :  { %v3044_v7 = vshrl.u32 %v18758_v26, 16  ;;  %v3049_v51 = vshll.u32 %v1438_v16, 16  ;;  %v3052_v3 = vshrl.u32 %v1438_v16, 16  ;;  %9819 = vrot.lane.b32.xlu0 %v9710_v39, %s13738_s3  ;;  %v3057_v37 = vshll.u32 %v1439_v40, 16 }
 0x313   :  { %20755 = vst [vmem:[#allocation50_spill] sm:$0xff] %v18859_v17  ;;  %v10225_v38 = vcombine.low %v18854_v34, %v18859_v17  ;;  %v10232_v13 = vrot.slane %v10224_v35, %v13831_v5  ;;  %v3060_v23 = vshrl.u32 %v1439_v40, 16  ;;  %9257 = vrot.lane.b32.xlu1 %v9092_v32, %s13743_s16  ;;  %v3065_v42 = vshll.u32 %v18804_v12, 16  ;;  %v18886_v17 = vpop.f32.mrb[26].mxu0 }
 0x314   :  { %v18881_v2 = vsel %vm14115_vm14, %v3044_v7, %v3049_v51  ;;  %v3068_v30 = vshrl.u32 %v18804_v12, 16  ;;  %v3073_v39 = vshll.u32 %v18807_v45, 16  ;;  %20757 = vst [vmem:[#allocation52_spill] sm:$0xff] %v18886_v17  ;;  %v18891_v8 = vsel %vm14115_vm14, %v3052_v3, %v3057_v37 }
 0x315   :  { %v10239_v35 = vrot.slane %v10225_v38, %v13831_v5  ;;  %v3076_v32 = vshrl.u32 %v18807_v45, 16  ;;  %v3081_v41 = vshll.u32 %v18822_v0, 16  ;;  %v18897_v7 = vsel %vm14115_vm14, %v3060_v23, %v3065_v42  ;;  %v13486_v38 = vpop.f32.mrb[27].mxu0 }
 0x316   :  { %v18901_v51 = vsel %vm14115_vm14, %v3068_v30, %v3073_v39  ;;  %v3084_v62 = vshrl.u32 %v18822_v0, 16  ;;  %v3089_v43 = vshll.u32 %v1536_v48, 16  ;;  %v3093_v37 = vshrl.u32 %v18814_v55, 16  ;;  %v18920_v39 = vpop.permute.xlu0 %10923 }
 0x317   :  { %v10240_v17 = vcombine.low %v10232_v13, %v10239_v35  ;;  %v18906_v3 = vsel %vm14115_vm14, %v3076_v32, %v3081_v41  ;;  %v3098_v25 = vshll.u32 %v18825_v54, 16  ;;  %v5858_v42 = vcombine.low %v18790_v58, %v18881_v2  ;;  %v18931_v32 = vpop.permute.xlu1 %10935 }
 0x318   :  { %v18912_v23 = vsel %vm14115_vm14, %v3084_v62, %v3089_v43  ;;  %v5904_v30 = vcombine.low %v18891_v8, %v18897_v7  ;;  %v5905_v13 = vcombine.low %v18901_v51, %v18906_v3  ;;  %v7108_v62 = vcombine.low %v18758_v26, %v1438_v16 }
 0x319   :  { %10365 = vrot.lane.b32.xlu1 %v10240_v17, %s13740_s13  ;;  %v18925_v35 = vsel %vm14115_vm14, %v3093_v37, %v3098_v25  ;;  %v7154_v43 = vcombine.low %v1439_v40, %v18804_v12  ;;  %v7155_v58 = vcombine.low %v18807_v45, %v18822_v0  ;;  %v5886_v41 = vrot.slane %v5858_v42, %v13831_v5 }
 0x31a   :  { %v5906_v38 = vcombine.low %v18912_v23, %v18925_v35  ;;  %v18937_v17 = vrot.slane %v5904_v30, %v13831_v5  ;;  %v18940_v25 = vrot.slane %v5905_v13, %v13831_v5  ;;  %v7136_v26 = vrot.slane %v7108_v62, %v13831_v5  ;;  %v18967_v53 = vpop.permute.xlu0 %11293 }
 0x31b   :  { %v7156_v16 = vcombine.low %v1536_v48, %v18825_v54  ;;  %v18945_v40 = vrot.slane %v7154_v43, %v13831_v5  ;;  %v18948_v0 = vrot.slane %v7155_v58, %v13831_v5  ;;  %v11737_v30 = vsel %vm11703_vm6, %v18845_v50, %v18584_v14  ;;  %20758 = vst [vmem:[#allocation53_spill] sm:$0xff] %v18967_v53 }
 0x31c   :  { %v18951_v37 = vrot.slane %v5906_v38, %v13831_v5  ;;  %v10786_v42 = vcombine.low %v5886_v41, %v18937_v17  ;;  %v11725_v13 = vsel %vm11703_vm6, %v18849_v10, %v18574_v46  ;;  %v13353_v43 = vcombine.low %v11737_v30, %v11737_v30 }
 0x31d   :  { %v18961_v48 = vrot.slane %v7156_v16, %v13831_v5  ;;  %v7891_v62 = vcombine.low %v7136_v26, %v18945_v40  ;;  %v13354_v58 = vcombine.high %v11737_v30, %v11737_v30  ;;  %v13341_v52 = vcombine.low %v11725_v13, %v11725_v13  ;;  %v18979_v16 = vpop.permute.xlu1 %11305 }
 0x31e   :  { %v10787_v38 = vcombine.low %v18940_v25, %v18951_v37  ;;  %v10794_v20 = vrot.slane %v10786_v42, %v13831_v5  ;;  %v13342_v22 = vcombine.high %v11725_v13, %v11725_v13  ;;  %11959 = vst.msk [vmem:[#allocation2 + $0x80] sm:$0xf] %vm11926_vm7, %v13353_v43  ;;  %v5887_v50 = vcombine.low %v18684_v61, %v18693_v57  ;;  %v20761_v43 = vld [vmem:[#allocation21_spill] sm:$0xff] }
 0x31f   :  { %v18970_v14 = vrot.slane %v7891_v62, %v13831_v5  ;;  %v11204_v46 = vcombine.low %v18948_v0, %v18961_v48  ;;  %11960 = vst.msk [vmem:[#allocation2 + $0x84] sm:$0xf] %vm11926_vm7, %v13354_v58  ;;  %v5888_v10 = vcombine.low %v18703_v44, %v5886_v41  ;;  %20759 = vst [vmem:[#allocation54_spill] sm:$0xff] %v18979_v16  ;;  %v20760_v62 = vld [vmem:[#allocation68_spill] sm:$0xff]  ;;  %v20762_v41 = vld [vmem:[#allocation25_spill] sm:$0xff] }
 0x320   :  { %v10801_v42 = vrot.slane %v10787_v38, %v13831_v5  ;;  %11947 = vst.msk [vmem:[#allocation2 + $0x50] sm:$0xf] %vm11926_vm7, %v13341_v52  ;;  %11948 = vst.msk [vmem:[#allocation2 + $0x54] sm:$0xf] %vm11926_vm7, %v13342_v22  ;;  %v7137_v30 = vcombine.low %v18707_v1, %v18710_v60  ;;  %v7138_v13 = vcombine.low %v18713_v47, %v7136_v26  ;;  %v20763_v38 = vld [vmem:[#allocation20_spill] sm:$0xff] }
 0x321   :  { %v4443_v58 = vcombine.low %v20761_v43, %v20760_v62  ;;  %v11211_v61 = vrot.slane %v11204_v46, %v13831_v5  ;;  %v5895_v44 = vrot.slane %v5887_v50, %v13831_v5  ;;  %v5902_v57 = vrot.slane %v5888_v10, %v13831_v5  ;;  %v20764_v10 = vld [vmem:[#allocation69_spill] sm:$0xff] }
 0x322   :  { %v4148_v53 = vcombine.low %v20763_v38, %v20762_v41  ;;  %v10802_v52 = vcombine.low %v10794_v20, %v10801_v42  ;;  %v7145_v22 = vrot.slane %v7137_v30, %v13831_v5  ;;  %v7152_v16 = vrot.slane %v7138_v13, %v13831_v5  ;;  %v19008_v30 = vpop.permute.xlu0 %6001  ;;  %v20765_v13 = vld [vmem:[#allocation18_spill] sm:$0xff] }
 0x323   :  { %v4457_v1 = vrot.slane %v4443_v58, %v13831_v5  ;;  %v11212_v47 = vcombine.low %v18970_v14, %v11211_v61  ;;  %v5903_v60 = vcombine.low %v5895_v44, %v5902_v57  ;;  %v7883_v46 = vcombine.low %v18814_v55, %v18825_v54  ;;  %v13026_v61 = vld.sshfl [vmem:[#allocation3 + $0xec] sm:$0x33 pattern:$0x75316420]  ;;  %v19017_v44 = vpop.permute.xlu1 %6013 }
 0x324   :  { %v4156_v26 = vrot.slane %v4148_v53, %v13831_v5  ;;  %10943 = vrot.lane.b32.xlu0 %v10802_v52, %s13744_s17  ;;  %v7153_v50 = vcombine.low %v7145_v22, %v7152_v16  ;;  %v19005_v20 = vcombine.high %v18814_v55, %v18814_v55  ;;  %v3101_v42 = vshrl.u32 %v18825_v54, 16 }
 0x325   :  { %v4458_v62 = vcombine.low %v20764_v10, %v4457_v1  ;;  %11313 = vrot.lane.b32.xlu1 %v11212_v47, %s13742_s15  ;;  %v7890_v43 = vrot.slane %v7883_v46, %v13831_v5  ;;  %v9093_v58 = vcombine.low %v18881_v2, %v18891_v8  ;;  %v9094_v16 = vcombine.low %v18897_v7, %v18901_v51  ;;  %v13225_v10 = vld.sshfl [vmem:[#allocation3 + $0xf0] sm:$0x33 pattern:$0x75316420] }
 0x326   :  { %v4164_v53 = vcombine.low %v4156_v26, %v20765_v13  ;;  %v3106_v41 = vshll.u32 %v19005_v20, 16  ;;  %v9095_v38 = vcombine.low %v18906_v3, %v18912_v23  ;;  %v4707_v52 = vcombine.low %v18825_v54, %v19005_v20  ;;  %v13599_v22 = vld [vmem:[#allocation2 + $0x80] sm:$0xff]  }
 0x327   :  { %v11375_v57 = vsel %vm11321_vm15, %v4458_v62, %v18631_v18  ;;  %v7892_v2 = vcombine.low %v18948_v0, %v7890_v43  ;;  %v9103_v7 = vrot.slane %v9093_v58, %v13831_v5  ;;  %v9110_v51 = vrot.slane %v9094_v16, %v13831_v5  ;;  %v13600_v1 = vld [vmem:[#allocation2 + $0x50] sm:$0xff]   ;;  %13524 = vmatmul.mubr.msk.bf16.gmra.mrb[12].mxu1 %vm12168_vm10, %v13599_v22 }
 0x328   :  { %v11357_v8 = vsel %vm11321_vm15, %v4164_v53, %v18622_v19  ;;  %6021 = vrot.lane.b32.xlu0 %v5903_v60, %s13734_s28  ;;  %v19034_v18 = vsel %vm14115_vm14, %v3101_v42, %v3106_v41  ;;  %v9117_v3 = vrot.slane %v9095_v38, %v13831_v5  ;;  %v11433_v23 = vsel %vm11397_vm0, %v11375_v57, %v18690_v56  ;;  %v19055_v42 = vpop.permute.xlu0 %7251 }
 0x329   :  { %v11421_v19 = vsel %vm11397_vm0, %v11357_v8, %v18676_v4  ;;  %7271 = vrot.lane.b32.xlu1 %v7153_v50, %s13741_s14  ;;  %v7906_v47 = vrot.slane %v7892_v2, %v13831_v5  ;;  %v9096_v26 = vcombine.low %v18925_v35, %v19034_v18  ;;  %v9125_v60 = vcombine.low %v9103_v7, %v9110_v51 }
 0x32a   :  { %v19046_v46 = vrot.slane %v4707_v52, %v13831_v5  ;;  %v4736_v62 = vcombine.low %v18841_v9, %v18854_v34  ;;  %v13314_v56 = vcombine.high %v18804_v12, %v18807_v45  ;;  %v1486_v4 = vcombine.high %v18825_v54, %v18825_v54  ;;  %13500 = vmatmul.mubr.msk.bf16.gmra.mrb[40].mxu0 %vm12168_vm10, %v13600_v1  ;;  %v19064_v12 = vpop.permute.xlu1 %7263 }
 0x32b   :  { %v1494_v50 = vcombine.high %v13026_v61, %v13026_v61  ;;  %v7907_v35 = vcombine.low %v18970_v14, %v7906_v47  ;;  %v9124_v13 = vrot.slane %v9096_v26, %v13831_v5  ;;  %v9133_v53 = vrot.slane %v9125_v60, %v13831_v5  ;;  %13503 = vmatprep.mubr.msk.bf16.mxu0 %vm13746_vm9, %v20712_v21 }
 0x32c   :  { %20766 = vst [vmem:[#allocation55_spill] sm:$0xff] %v19046_v46  ;;  %v19061_v43 = vrot.slane %v13026_v61, %v13831_v5  ;;  %v19067_v45 = vrot.slane %v4736_v62, %v13831_v5  ;;  %v9718_v9 = vrot.slane %v13314_v56, %v13831_v5  ;;  %v3207_v14 = vcombine.high %v13225_v10, %v13225_v10 }
 0x32d   :  { %v19071_v34 = vrot.slane %v1494_v50, %v13831_v5  ;;  %8009 = vrot.lane.b32.xlu0 %v7907_v35, %s13739_s1  ;;  %v9126_v58 = vcombine.low %v9117_v3, %v9124_v13  ;;  %v19081_v61 = vrot.slane %v13225_v10, %v13831_v5  ;;  %v19090_v52 = vsel %vm11448_vm1, %v11433_v23, %v18741_v24  ;;  %v19116_v23 = vpop.permute.xlu0 %7989 }
 0x32e   :  { %20767 = vst [vmem:[#allocation72_spill] sm:$0xff] %v19067_v45  ;;  %v19078_v16 = vcombine.high %v19061_v43, %v19061_v43  ;;  %v4753_v57 = vcombine.low %v1486_v4, %v19061_v43  ;;  %v9719_v41 = vcombine.low %v9718_v9, %v19046_v46  ;;  %v19086_v38 = vrot.slane %v3207_v14, %v13831_v5  ;;  %v19123_v10 = vpop.permute.xlu1 %8001 }
 0x32f   :  { %v19094_v22 = vsel %vm11448_vm1, %v11421_v19, %v18734_v63  ;;  %13527 = vmatprep.mubr.msk.bf16.mxu1 %vm13746_vm9, %v20712_v21  ;;  %v9140_v8 = vrot.slane %v9126_v58, %v13831_v5  ;;  %v19106_v51 = vmul.f32 %v18158_v27, %v18158_v27  ;;  %v19113_v1 = vcombine.high %v19071_v34, %v19071_v34 }
 0x330   :  { %v4754_v2 = vcombine.low %v19071_v34, %v19078_v16  ;;  %v19102_v7 = vrot.slane %v4753_v57, %v13831_v5  ;;  %v9726_v24 = vrot.slane %v9719_v41, %v13831_v5  ;;  %v10241_v63 = vcombine.low %v19081_v61, %v19086_v38 }
 0x331   :  { %v3109_v3 = vshrl.u32 %v19005_v20, 16  ;;  %v9141_v19 = vcombine.low %v9133_v53, %v9140_v8  ;;  %v3114_v60 = vshll.u32 %v1486_v4, 16  ;;  %v3117_v50 = vshrl.u32 %v1486_v4, 16 }
 0x332   :  { %v19119_v47 = vrot.slane %v4754_v2, %v13831_v5  ;;  %v10249_v26 = vcombine.low %v19046_v46, %v19102_v7  ;;  %v9727_v62 = vcombine.low %v19067_v45, %v9726_v24  ;;  %v10248_v56 = vrot.slane %v10241_v63, %v13831_v5 }
 0x333   :  { %v3122_v35 = vshll.u32 %v19061_v43, 16  ;;  %9259 = vrot.lane.b32.xlu1 %v9141_v19, %s13743_s16  ;;  %v19132_v13 = vsel %vm14115_vm14, %v3109_v3, %v3114_v60  ;;  %v3125_v53 = vshrl.u32 %v19061_v43, 16  ;;  %v3130_v9 = vshll.u32 %v19071_v34, 16  ;;  %v19161_v60 = vpop.permute.xlu0 %9239 }
 0x334   :  { %v10257_v20 = vrot.slane %v10249_v26, %v13831_v5  ;;  %9821 = vrot.lane.b32.xlu0 %v9727_v62, %s13738_s3  ;;  %v10250_v14 = vcombine.low %v19119_v47, %v10248_v56  ;;  %v3133_v58 = vshrl.u32 %v19071_v34, 16  ;;  %v3138_v57 = vshll.u32 %v19078_v16, 16  ;;  %20768 = vst [vmem:[#allocation66_spill] sm:$0xff] %v19161_v60 }
 0x335   :  { %v19140_v4 = vsel %vm14115_vm14, %v3117_v50, %v3122_v35  ;;  %v19146_v41 = vsel %vm14115_vm14, %v3125_v53, %v3130_v9  ;;  %v3141_v8 = vshrl.u32 %v19078_v16, 16  ;;  %v3146_v2 = vshll.u32 %v19113_v1, 16  ;;  %v19171_v53 = vpop.permute.xlu1 %9251 }
 0x336   :  { %v19152_v24 = vcombine.high %v19081_v61, %v19081_v61  ;;  %v10264_v63 = vrot.slane %v10250_v14, %v13831_v5  ;;  %v19157_v3 = vsel %vm14115_vm14, %v3133_v58, %v3138_v57  ;;  %v3307_v19 = vshrl.u32 %v19081_v61, 16 }
 0x337   :  { %v3312_v26 = vshll.u32 %v19086_v38, 16  ;;  %v19165_v62 = vsel %vm14115_vm14, %v3141_v8, %v3146_v2  ;;  %v3315_v56 = vshrl.u32 %v19086_v38, 16  ;;  %v5907_v35 = vcombine.low %v19034_v18, %v19132_v13 }
 0x338   :  { %v3320_v50 = vshll.u32 %v19152_v24, 16  ;;  %v10265_v9 = vcombine.low %v10257_v20, %v10264_v63  ;;  %v5953_v58 = vcombine.low %v19140_v4, %v19146_v41  ;;  %v5954_v57 = vcombine.low %v19157_v3, %v19165_v62 }
 0x339   :  { %v19175_v14 = vsel %vm14115_vm14, %v3307_v19, %v3312_v26  ;;  %v5935_v2 = vrot.slane %v5907_v35, %v13831_v5  ;;  %v13299_v18 = vcombine.high %v18814_v55, %v18825_v54  ;;  %v7203_v20 = vcombine.low %v19061_v43, %v19071_v34 }
 0x33a   :  { %v19183_v8 = vsel %vm14115_vm14, %v3315_v56, %v3320_v50  ;;  %10367 = vrot.lane.b32.xlu1 %v10265_v9, %s13740_s13  ;;  %v19192_v63 = vrot.slane %v5953_v58, %v13831_v5  ;;  %v19195_v19 = vrot.slane %v5954_v57, %v13831_v5  ;;  %v13300_v56 = vcombine.high %v19061_v43, %v19071_v34  ;;  %v19216_v34 = vpop.permute.xlu0 %9801 }
 0x33b   :  { %v10803_v26 = vcombine.low %v19175_v14, %v19183_v8  ;;  %v7185_v50 = vrot.slane %v13299_v18, %v13831_v5  ;;  %v19203_v55 = vrot.slane %v7203_v20, %v13831_v5  ;;  %v7909_v54 = vcombine.low %v19086_v38, %v19152_v24  ;;  %20769 = vst [vmem:[#allocation17_spill] sm:$0xff] %v19216_v34  ;;  %v19235_v34 = vpop.f32.mrb[0].mxu1 }
 0x33c   :  { %v12480_v35 = vadd.f32 %v18240_v6, %v18158_v27  ;;  %v10811_v58 = vcombine.low %v5935_v2, %v19192_v63  ;;  %v19212_v57 = vrot.slane %v13300_v56, %v13831_v5  ;;  %v12536_v43 = vmul.f32 %v18240_v6, %v18240_v6  ;;  %v19228_v56 = vpop.permute.xlu1 %9813 }
 0x33d   :  { %v10810_v9 = vrot.slane %v10803_v26, %v13831_v5  ;;  %v19219_v18 = vrot.slane %v7909_v54, %v13831_v5  ;;  %v7924_v20 = vcombine.low %v7185_v50, %v19203_v55  ;;  %v11535_v27 = vsel %vm11499_vm2, %v19090_v52, %v18778_v15 }
 0x33e   :  { %v11523_v26 = vsel %vm11499_vm2, %v19094_v22, %v18771_v59  ;;  %v10819_v6 = vrot.slane %v10811_v58, %v13831_v5  ;;  %v12584_v46 = vadd.f32 %v12536_v43, %v19106_v51  ;;  %v5936_v54 = vcombine.low %v18937_v17, %v18940_v25  ;;  %v19245_v22 = vpop.f32.mrb[28].mxu0  ;;  %v13513_v43 = vpop.f32.mrb[1].mxu1 }
 0x33f   :  { %v10812_v45 = vcombine.low %v19195_v19, %v10810_v9  ;;  %v19238_v60 = vrot.slane %v7924_v20, %v13831_v5  ;;  %v11213_v15 = vcombine.low %v19212_v57, %v19219_v18  ;;  %v5937_v59 = vcombine.low %v18951_v37, %v5935_v2  ;;  %v13489_v58 = vpop.f32.mrb[29].mxu0 }
 0x340   :  { %v7186_v52 = vcombine.low %v18945_v40, %v18948_v0  ;;  %v5944_v9 = vrot.slane %v5936_v54, %v13831_v5  ;;  %v7187_v17 = vcombine.low %v18961_v48, %v7185_v50  ;;  %v11586_v25 = vsel %vm11550_vm3, %v11535_v27, %v18829_v28  ;;  %v19257_v0 = vpop.f32.mrb[30].mxu0  ;;  %v19265_v50 = vpop.permute.xlu0 %10347 }
 0x341   :  { %v10826_v51 = vrot.slane %v10812_v45, %v13831_v5  ;;  %v11220_v20 = vrot.slane %v11213_v15, %v13831_v5  ;;  %v5951_v37 = vrot.slane %v5937_v59, %v13831_v5  ;;  %v11574_v40 = vsel %vm11550_vm3, %v11523_v26, %v18818_v11  ;;  %v19259_v45 = vpop.f32.mrb[2].mxu1  ;;  %v13490_v15 = vpop.f32.mrb[31].mxu0 }
 0x342   :  { %v7194_v2 = vrot.slane %v7186_v52, %v13831_v5  ;;  %v7201_v48 = vrot.slane %v7187_v17, %v13831_v5  ;;  %v12481_v27 = vadd.f32 %v12480_v35, %v18277_v49  ;;  %v12537_v28 = vmul.f32 %v18277_v49, %v18277_v49 }
 0x343   :  { %v10827_v54 = vcombine.low %v10819_v6, %v10826_v51  ;;  %v11221_v59 = vcombine.low %v19238_v60, %v11220_v20  ;;  %v5952_v52 = vcombine.low %v5944_v9, %v5951_v37  ;;  %v7908_v11 = vcombine.low %v19078_v16, %v19081_v61  ;;  %v19274_v6 = vpop.permute.xlu1 %10359  ;;  %v13514_v51 = vpop.f32.mrb[3].mxu1 }
 0x344   :  { %v19272_v26 = vcombine.high %v19086_v38, %v19086_v38  ;;  %v7202_v35 = vcombine.low %v7194_v2, %v7201_v48  ;;  %v12585_v17 = vadd.f32 %v12584_v46, %v12537_v28  ;;  %v3323_v58 = vshrl.u32 %v19152_v24, 16 }
 0x345   :  { %10945 = vrot.lane.b32.xlu0 %v10827_v54, %s13744_s17  ;;  %v9142_v43 = vcombine.low %v19132_v13, %v19140_v4  ;;  %11315 = vrot.lane.b32.xlu1 %v11221_v59, %s13742_s15  ;;  %v7916_v16 = vrot.slane %v7908_v11, %v13831_v5  ;;  %v9143_v20 = vcombine.low %v19146_v41, %v19157_v3  ;;  %v13243_v59 = vld.sshfl [vmem:[#allocation3 + $0xf8] sm:$0x33 pattern:$0x75316420] }
 0x346   :  { %v3328_v9 = vshll.u32 %v19272_v26, 16  ;;  %v9144_v37 = vcombine.low %v19165_v62, %v19175_v14  ;;  %v19289_v46 = vadd.f32 %v12481_v27, %v18353_v31  ;;  %v12538_v13 = vmul.f32 %v18353_v31, %v18353_v31  ;;  %v13226_v62 = vld.sshfl [vmem:[#allocation3 + $0xf4] sm:$0x33 pattern:$0x75316420] }
 0x347   :  { %v9152_v2 = vrot.slane %v9142_v43, %v13831_v5  ;;  %v11637_v4 = vsel %vm11601_vm4, %v11586_v25, %v18876_v29  ;;  %v7925_v24 = vcombine.low %v7916_v16, %v19219_v18  ;;  %v9159_v41 = vrot.slane %v9143_v20, %v13831_v5  ;;  %v19311_v25 = vpop.permute.xlu0 %10925 }
 0x348   :  { %v19298_v54 = vsel %vm14115_vm14, %v3323_v58, %v3328_v9  ;;  %v9166_v3 = vrot.slane %v9144_v37, %v13831_v5  ;;  %v19305_v48 = vadd.f32 %v12585_v17, %v12538_v13  ;;  %v11625_v29 = vsel %vm11601_vm4, %v11574_v40, %v18868_v33 }
 0x349   :  { %6023 = vrot.lane.b32.xlu0 %v5952_v52, %s13734_s28  ;;  %v9145_v14 = vcombine.low %v19183_v8, %v19298_v54  ;;  %v4769_v18 = vcombine.low %v19102_v7, %v19119_v47  ;;  %7273 = vrot.lane.b32.xlu1 %v7202_v35, %s13741_s14  ;;  %v7939_v27 = vrot.slane %v7925_v24, %v13831_v5  ;;  %v19319_v52 = vpop.permute.xlu1 %10937 }
 0x34a   :  { %v9174_v28 = vcombine.low %v9152_v2, %v9159_v41  ;;  %v9728_v15 = vcombine.low %v19113_v1, %v19086_v38  ;;  %v13315_v8 = vcombine.high %v19081_v61, %v19086_v38  ;;  %v3231_v47 = vcombine.high %v13226_v62, %v13226_v62 }
 0x34b   :  { %v9173_v33 = vrot.slane %v9145_v14, %v13831_v5  ;;  %v19323_v7 = vrot.slane %v4769_v18, %v13831_v5  ;;  %v19326_v40 = vrot.slane %v13226_v62, %v13831_v5  ;;  %v7940_v11 = vcombine.low %v19238_v60, %v7939_v27  ;;  %v19361_v24 = vpop.permute.xlu0 %11295 }
 0x34c   :  { %v9182_v51 = vrot.slane %v9174_v28, %v13831_v5  ;;  %v9736_v1 = vrot.slane %v9728_v15, %v13831_v5  ;;  %v9743_v61 = vrot.slane %v13315_v8, %v13831_v5  ;;  %v19333_v35 = vrot.slane %v3231_v47, %v13831_v5 }
 0x34d   :  { %v9175_v38 = vcombine.low %v9166_v3, %v9173_v33  ;;  %v19337_v17 = vcombine.high %v19326_v40, %v19326_v40  ;;  %v3421_v58 = vcombine.high %v13243_v59, %v13243_v59  ;;  %8011 = vrot.lane.b32.xlu0 %v7940_v11, %s13739_s1  ;;  %v19341_v60 = vrot.slane %v13243_v59, %v13831_v5  ;;  %v19369_v3 = vpop.permute.xlu1 %11307 }
 0x34e   :  { %v9744_v43 = vcombine.low %v9736_v1, %v9743_v61  ;;  %v19345_v16 = vsel %vm11652_vm5, %v11637_v4, %v18931_v32  ;;  %v19349_v9 = vsel %vm11652_vm5, %v11625_v29, %v18920_v39  ;;  %v9753_v2 = vcombine.low %v19326_v40, %v19333_v35 }
 0x34f   :  { %v9189_v20 = vrot.slane %v9175_v38, %v13831_v5  ;;  %v19353_v37 = vrot.slane %v3421_v58, %v13831_v5  ;;  %v19359_v13 = vcombine.high %v19333_v35, %v19333_v35  ;;  %v3436_v39 = vcombine.high %v19341_v60, %v19341_v60 }
 0x350   :  { %v9751_v32 = vrot.slane %v9744_v43, %v13831_v5  ;;  %v10266_v4 = vcombine.low %v19337_v17, %v19341_v60  ;;  %v3331_v41 = vshrl.u32 %v19272_v26, 16  ;;  %v19372_v14 = vrot.slane %v9753_v2, %v13831_v5 }
 0x351   :  { %v9190_v62 = vcombine.low %v9182_v51, %v9189_v20  ;;  %v3336_v29 = vshll.u32 %v19326_v40, 16  ;;  %v3339_v18 = vshrl.u32 %v19326_v40, 16  ;;  %v10267_v28 = vcombine.low %v19353_v37, %v3436_v39 }
 0x352   :  { %v9752_v27 = vcombine.low %v19323_v7, %v9751_v32  ;;  %v10274_v15 = vrot.slane %v10266_v4, %v13831_v5  ;;  %v3344_v8 = vshll.u32 %v19333_v35, 16  ;;  %v10282_v59 = vcombine.low %v9743_v61, %v19372_v14  ;;  %v19406_v32 = vpop.permute.xlu0 %6015 }
 0x353   :  { %9261 = vrot.lane.b32.xlu1 %v9190_v62, %s13743_s16  ;;  %v19384_v33 = vsel %vm14115_vm14, %v3331_v41, %v3336_v29  ;;  %v3347_v47 = vshrl.u32 %v19333_v35, 16  ;;  %v3352_v11 = vshll.u32 %v19337_v17, 16  ;;  %v10281_v51 = vrot.slane %v10267_v28, %v13831_v5 }
 0x354   :  { %9823 = vrot.lane.b32.xlu0 %v9752_v27, %s13738_s3  ;;  %v19392_v1 = vsel %vm14115_vm14, %v3339_v18, %v3344_v8  ;;  %v3355_v38 = vshrl.u32 %v19337_v17, 16  ;;  %v3360_v61 = vshll.u32 %v19359_v13, 16  ;;  %v10290_v58 = vrot.slane %v10282_v59, %v13831_v5  ;;  %v19414_v18 = vpop.permute.xlu1 %7265 }
 0x355   :  { %v19399_v43 = vsel %vm14115_vm14, %v3347_v47, %v3352_v11  ;;  %v19403_v20 = vcombine.high %v19353_v37, %v19353_v37  ;;  %v3521_v2 = vshrl.u32 %v19341_v60, 16  ;;  %v10283_v4 = vcombine.low %v10274_v15, %v10281_v51 }
 0x356   :  { %v19410_v41 = vsel %vm14115_vm14, %v3355_v38, %v3360_v61  ;;  %v3526_v62 = vshll.u32 %v19353_v37, 16  ;;  %v3529_v29 = vshrl.u32 %v19353_v37, 16  ;;  %v3534_v27 = vshll.u32 %v3436_v39, 16 }
 0x357   :  { %v3537_v28 = vshrl.u32 %v3436_v39, 16  ;;  %v3542_v8 = vshll.u32 %v19403_v20, 16  ;;  %v10828_v59 = vcombine.low %v19298_v54, %v19384_v33  ;;  %v10297_v47 = vrot.slane %v10283_v4, %v13831_v5 }
 0x358   :  { %v3528_v15 = vsel %vm14115_vm14, %v3521_v2, %v3526_v62  ;;  %v10829_v11 = vcombine.low %v19392_v1, %v19399_v43  ;;  %v7941_v51 = vcombine.low %v19272_v26, %v19326_v40  ;;  %v3536_v38 = vsel %vm14115_vm14, %v3529_v29, %v3534_v27 }
 0x359   :  { %v3544_v39 = vsel %vm14115_vm14, %v3537_v28, %v3542_v8  ;;  %v10830_v61 = vcombine.low %v19410_v41, %v3528_v15  ;;  %v10838_v54 = vrot.slane %v10828_v59, %v13831_v5  ;;  %v10298_v4 = vcombine.low %v10290_v58, %v10297_v47  ;;  %v19441_v28 = vpop.permute.xlu0 %8003  ;;  %v19449_v15 = vpop.permute.xlu1 %9253 }
 0x35a   :  { %v10831_v31 = vcombine.low %v3536_v38, %v3544_v39  ;;  %v10845_v2 = vrot.slane %v10829_v11, %v13831_v5  ;;  %v7942_v62 = vcombine.low %v19333_v35, %v19337_v17  ;;  %v7949_v26 = vrot.slane %v7941_v51, %v13831_v5  ;;  %v20770_v17 = vld [vmem:[#allocation54_spill] sm:$0xff] }
 0x35b   :  { %v10852_v49 = vrot.slane %v10830_v61, %v13831_v5  ;;  %v11222_v29 = vcombine.low %v19359_v13, %v19353_v37  ;;  %v13319_v27 = vcombine.high %v19341_v60, %v19353_v37  ;;  %10369 = vrot.lane.b32.xlu1 %v10298_v4, %s13740_s13  ;;  %v11739_v47 = vsel %vm11703_vm6, %v19345_v16, %v20770_v17  ;;  %v20775_v17 = vld [vmem:[#allocation86_spill] sm:$0xff] }
 0x35c   :  { %v10859_v58 = vrot.slane %v10831_v31, %v13831_v5  ;;  %v10860_v8 = vcombine.low %v10838_v54, %v10845_v2  ;;  %v7956_v59 = vrot.slane %v7942_v62, %v13831_v5  ;;  %v13355_v60 = vcombine.low %v11739_v47, %v11739_v47  ;;  %v20771_v31 = vld [vmem:[#allocation53_spill] sm:$0xff]  ;;  %v20772_v2 = vld [vmem:[#allocation32_spill] sm:$0xff] }
 0x35d   :  { %v11230_v13 = vrot.slane %v11222_v29, %v13831_v5  ;;  %v11237_v11 = vrot.slane %v13319_v27, %v13831_v5  ;;  %v13356_v37 = vcombine.high %v11739_v47, %v11739_v47  ;;  %v11727_v61 = vsel %vm11703_vm6, %v19349_v9, %v20771_v31  ;;  %v20777_v31 = vld [vmem:[#allocation88_spill] sm:$0xff] }
 0x35e   :  { %v10861_v51 = vcombine.low %v10852_v49, %v10859_v58  ;;  %v10868_v38 = vrot.slane %v10860_v8, %v13831_v5  ;;  %v7957_v39 = vcombine.low %v7949_v26, %v7956_v59  ;;  %11961 = vst.msk [vmem:[#allocation2 + $0x88] sm:$0xf] %vm11926_vm7, %v13355_v60  ;;  %v13343_v16 = vcombine.low %v11727_v61, %v11727_v61  ;;  %v20773_v58 = vld [vmem:[#allocation26_spill] sm:$0xff]  ;;  %v20774_v8 = vld [vmem:[#allocation27_spill] sm:$0xff] }
 0x35f   :  { %v11238_v54 = vcombine.low %v11230_v13, %v11237_v11  ;;  %11962 = vst.msk [vmem:[#allocation2 + $0x8c] sm:$0xf] %vm11926_vm7, %v13356_v37  ;;  %v13344_v4 = vcombine.high %v11727_v61, %v11727_v61  ;;  %v12483_v62 = vadd.f32 %v19289_v46, %v20772_v2  ;;  %v12539_v26 = vmul.f32 %v20772_v2, %v20772_v2  ;;  %v19479_v13 = vpop.permute.xlu0 %9815  ;;  %v19485_v37 = vpop.permute.xlu1 %10361 }
 0x360   :  { %v10875_v29 = vrot.slane %v10861_v51, %v13831_v5  ;;  %v19463_v49 = vrot.slane %v7957_v39, %v13831_v5  ;;  %v5969_v9 = vcombine.low %v19192_v63, %v19195_v19  ;;  %11949 = vst.msk [vmem:[#allocation2 + $0x58] sm:$0xf] %vm11926_vm7, %v13343_v16  ;;  %v7219_v46 = vcombine.low %v19203_v55, %v19212_v57  ;;  %v20776_v39 = vld [vmem:[#allocation87_spill] sm:$0xff]  ;;  %v20778_v16 = vld [vmem:[#allocation38_spill] sm:$0xff] }
 0x361   :  { %v11245_v27 = vrot.slane %v11238_v54, %v13831_v5  ;;  %11950 = vst.msk [vmem:[#allocation2 + $0x5c] sm:$0xf] %vm11926_vm7, %v13344_v4  ;;  %v4491_v59 = vcombine.low %v20774_v8, %v20773_v58  ;;  %v19477_v47 = vadd.f32 %v12483_v62, %v20775_v17  ;;  %v12587_v63 = vadd.f32 %v19305_v48, %v12539_v26  ;;  %v13244_v54 = vld.sshfl [vmem:[#allocation3 + $0xfc] sm:$0x33 pattern:$0x75316420] }
 0x362   :  { %v10876_v11 = vcombine.low %v10868_v38, %v10875_v29  ;;  %v5976_v19 = vrot.slane %v5969_v9, %v13831_v5  ;;  %v12540_v60 = vmul.f32 %v20775_v17, %v20775_v17  ;;  %v7226_v57 = vrot.slane %v7219_v46, %v13831_v5  ;;  %v20779_v4 = vld [vmem:[#allocation36_spill] sm:$0xff]  ;;  %v20780_v26 = vld [vmem:[#allocation29_spill] sm:$0xff] }
 0x363   :  { %v11246_v55 = vcombine.low %v19463_v49, %v11245_v27  ;;  %v4499_v51 = vrot.slane %v4491_v59, %v13831_v5  ;;  %v4166_v61 = vcombine.low %v20777_v31, %v20776_v39  ;;  %v13266_v38 = vcombine.high %v20777_v31, %v20776_v39 }
 0x364   :  { %10947 = vrot.lane.b32.xlu0 %v10876_v11, %s13744_s17  ;;  %v19493_v48 = vadd.f32 %v12587_v63, %v12540_v60  ;;  %v4168_v62 = vcombine.low %v20779_v4, %v20778_v16  ;;  %v9191_v29 = vcombine.low %v19384_v33, %v19392_v1  ;;  %v9192_v46 = vcombine.low %v19399_v43, %v19410_v41  ;;  %v20781_v60 = vld [vmem:[#allocation84_spill] sm:$0xff]  ;;  %v19516_v41 = vpop.permute.xlu0 %10939 }
 0x365   :  { %11317 = vrot.lane.b32.xlu1 %v11246_v55, %s13742_s15  ;;  %v4507_v9 = vcombine.low %v4499_v51, %v20780_v26  ;;  %v4182_v27 = vrot.slane %v4166_v61, %v13831_v5  ;;  %v13316_v58 = vcombine.high %v19326_v40, %v19333_v35  ;;  %v4189_v8 = vrot.slane %v13266_v38, %v13831_v5 }
 0x366   :  { %v4196_v59 = vrot.slane %v4168_v62, %v13831_v5  ;;  %v9199_v11 = vrot.slane %v9191_v29, %v13831_v5  ;;  %v3445_v63 = vcombine.high %v13244_v54, %v13244_v54  ;;  %v13601_v33 = vld [vmem:[#allocation2 + $0x88] sm:$0xff]   ;;  %v9206_v51 = vrot.slane %v9192_v46, %v13831_v5 }
 0x367   :  { %v11378_v1 = vsel %vm11321_vm15, %v4507_v9, %v19017_v44  ;;  %v4197_v55 = vcombine.low %v20781_v60, %v4182_v27  ;;  %v9768_v43 = vrot.slane %v13316_v58, %v13831_v5  ;;  %v3452_v39 = vrot.slane %v13244_v54, %v13831_v5  ;;  %v19523_v44 = vpop.permute.xlu1 %11309  ;;  %13528 = vmatmul.mubr.msk.bf16.gmra.mrb[16].mxu1 %vm12168_vm10, %v13601_v33 }
 0x368   :  { %6025 = vrot.lane.b32.xlu0 %v5976_v19, %s13734_s28  ;;  %v4198_v40 = vcombine.low %v4189_v8, %v4196_v59  ;;  %v11435_v35 = vsel %vm11397_vm0, %v11378_v1, %v19064_v12  ;;  %v3459_v31 = vrot.slane %v3445_v63, %v13831_v5  ;;  %v13602_v61 = vld [vmem:[#allocation2 + $0x58] sm:$0xff]   ;;  %v9207_v16 = vcombine.low %v9199_v11, %v9206_v51  ;;  %v19547_v63 = vpop.permute.xlu0 %6017  ;;  %s13747_s28 = smov [#allocation11]  }
 0x369   :  { %7275 = vrot.lane.b32.xlu1 %v7226_v57, %s13741_s14  ;;  %v4205_v38 = vrot.slane %v4197_v55, %v13831_v5  ;;  %v9769_v4 = vcombine.low %v19372_v14, %v9768_v43  ;;  %v11486_v19 = vsel %vm11448_vm1, %v11435_v35, %v19123_v10  ;;  %v3460_v12 = vcombine.high %v3452_v39, %v3452_v39  ;;  %s12957_s19 = sshll.u32 %s13747_s28, 4  ;;  %s12958_s19 = int_to_ptr.vmem [resolvable:$true] %s12957_s19 }
 0x36a   :  { %v4212_v62 = vrot.slane %v4198_v40, %v13831_v5  ;;  %v10299_v54 = vcombine.low %v19403_v20, %v3452_v39  ;;  %v3462_v29 = vcombine.high %v3459_v31, %v3459_v31  ;;  %v9214_v26 = vrot.slane %v9207_v16, %v13831_v5  ;;  %13504 = vmatmul.mubr.msk.bf16.gmra.mrb[44].mxu0 %vm12168_vm10, %v13602_v61  ;;  %s13701_s20 = scalar_lea.vmem %s12958_s19, 6272  ;;  %p13706_p5 = scmp.lt.s32.totalorder %s12958_s19, %s12958_s19 }
 0x36b   :  { %v9776_v57 = vrot.slane %v9769_v4, %v13831_v5  ;;  %v3545_v9 = vshrl.u32 %v19403_v20, 16  ;;  %v3550_v27 = vshll.u32 %v3452_v39, 16  ;;  %13531 = vmatprep.mubr.msk.bf16.mxu1 %vm13746_vm9, %v20712_v21  ;;  %v10300_v14 = vcombine.low %v3459_v31, %v3460_v12  ;;  %13507 = vmatprep.mubr.msk.bf16.mxu0 %vm13746_vm9, %v20712_v21  ;;  %v19552_v55 = vpop.permute.xlu1 %7267  ;;  %p13702_p4 = scmp.ne.s32.totalorder %s12958_s19, %s13701_s20  ;;  %p13707_p6 = scmp.lt.s32.totalorder %s13701_s20, %s13701_s20 }
 0x36c   :  { %v4213_v10 = vcombine.low %v4205_v38, %v4212_v62  ;;  %8013 = vrot.lane.b32.xlu0 %v19463_v49, %s13739_s1  ;;  %v10307_v46 = vrot.slane %v10299_v54, %v13831_v5  ;;  %v3553_v58 = vshrl.u32 %v3452_v39, 16  ;;  %v3558_v8 = vshll.u32 %v3459_v31, 16 }
 0x36d   :  { %9263 = vrot.lane.b32.xlu1 %v9214_v26, %s13743_s16  ;;  %v3552_v20 = vsel %vm14115_vm14, %v3545_v9, %v3550_v27  ;;  %v3561_v59 = vshrl.u32 %v3459_v31, 16  ;;  %v3566_v11 = vshll.u32 %v3460_v12, 16  ;;  %v10314_v33 = vrot.slane %v10300_v14, %v13831_v5  ;;  %v20782_v26 = vld [vmem:[#allocation66_spill] sm:$0xff]  ;;  %v20783_v9 = vld [vmem:[#allocation48_spill] sm:$0xff]  ;;  %p13708_p7 = por %p13707_p6, %p13706_p5 }
 0x36e   :  { %v11360_v49 = vsel %vm11321_vm15, %v4213_v10, %v19008_v30  ;;  %v3569_v1 = vshrl.u32 %v3460_v12, 16  ;;  %v3574_v60 = vshll.u32 %v3462_v29, 16  ;;  %v3560_v43 = vsel %vm14115_vm14, %v3553_v58, %v3558_v8 }
 0x36f   :  { %v11423_v51 = vsel %vm11397_vm0, %v11360_v49, %v19055_v42  ;;  %v3568_v40 = vsel %vm14115_vm14, %v3561_v59, %v3566_v11  ;;  %v11247_v35 = vcombine.low %v3452_v39, %v3459_v31  ;;  %v10315_v61 = vcombine.low %v10307_v46, %v10314_v33  ;;  %p13709_p8 = pnand %p13708_p7, %p13702_p4 }
 0x370   :  { %9825 = vrot.lane.b32.xlu0 %v9776_v57, %s13738_s3  ;;  %v11474_v30 = vsel %vm11448_vm1, %v11423_v51, %v19116_v23  ;;  %v3576_v38 = vsel %vm14115_vm14, %v3569_v1, %v3574_v60  ;;  %v10877_v16 = vcombine.low %v3552_v20, %v3560_v43  ;;  %v13320_v62 = vcombine.high %v3452_v39, %v3459_v31  ;;  %v19580_v31 = vpop.permute.xlu0 %8005  ;;  %v19590_v20 = vpop.permute.xlu1 %9255  ;;  %v20786_v1 = vld [vmem:[#allocation43_spill] sm:$0xff] }
 0x371   :  { %v10878_v4 = vcombine.low %v3568_v40, %v3576_v38  ;;  %v11255_v42 = vrot.slane %v11247_v35, %v13831_v5  ;;  %v11537_v12 = vsel %vm11499_vm2, %v11486_v19, %v19171_v53  ;;  %v10322_v54 = vrot.slane %v10315_v61, %v13831_v5  ;;  %v20784_v19 = vld [vmem:[#allocation45_spill] sm:$0xff]  ;;  %v20787_v61 = vld [vmem:[#allocation47_spill] sm:$0xff] }
 0x372   :  { %v10885_v29 = vrot.slane %v10877_v16, %v13831_v5  ;;  %v11525_v57 = vsel %vm11499_vm2, %v11474_v30, %v20782_v26  ;;  %v12485_v23 = vadd.f32 %v19477_v47, %v20783_v9  ;;  %v11262_v27 = vrot.slane %v13320_v62, %v13831_v5  ;;  %v20785_v47 = vld [vmem:[#allocation17_spill] sm:$0xff]  ;;  %v20788_v62 = vld [vmem:[#allocation31_spill] sm:$0xff] }
 0x373   :  { %v10892_v36 = vrot.slane %v10878_v4, %v13831_v5  ;;  %v12541_v39 = vmul.f32 %v20783_v9, %v20783_v9  ;;  %v11588_v53 = vsel %vm11550_vm3, %v11537_v12, %v19228_v56  ;;  %10371 = vrot.lane.b32.xlu1 %v10322_v54, %s13740_s13  ;;  %v12542_v14 = vmul.f32 %v20784_v19, %v20784_v19  ;;  %v20790_v12 = vld [vmem:[#allocation41_spill] sm:$0xff] }
 0x374   :  { %v12486_v10 = vadd.f32 %v12485_v23, %v20784_v19  ;;  %v11576_v46 = vsel %vm11550_vm3, %v11525_v57, %v20785_v47  ;;  %v11639_v58 = vsel %vm11601_vm4, %v11588_v53, %v19274_v6  ;;  %v11263_v59 = vcombine.low %v11255_v42, %v11262_v27  ;;  %v9818_v4 = vpop.permute.xlu0 %9817  ;;  %v20789_v42 = vld [vmem:[#allocation33_spill] sm:$0xff]  ;;  %v10364_v26 = vpop.permute.xlu1 %10363  ;;  %v20791_v57 = vld [vmem:[#allocation46_spill] sm:$0xff] }
 0x375   :  { %v10893_v8 = vcombine.low %v10885_v29, %v10892_v36  ;;  %v12589_v56 = vadd.f32 %v19493_v48, %v12541_v39  ;;  %v11627_v11 = vsel %vm11601_vm4, %v11576_v46, %v19265_v50  ;;  %v11690_v49 = vsel %vm11652_vm5, %v11639_v58, %v19319_v52  ;;  %v20792_v23 = vld [vmem:[#allocation49_spill] sm:$0xff] }
 0x376   :  { %v11678_v33 = vsel %vm11652_vm5, %v11627_v11, %v19311_v25  ;;  %v12487_v60 = vadd.f32 %v12486_v10, %v20786_v1  ;;  %v12543_v6 = vmul.f32 %v20786_v1, %v20786_v1  ;;  %v11270_v43 = vrot.slane %v11263_v59, %v13831_v5  ;;  %v20793_v53 = vld [vmem:[#allocation57_spill] sm:$0xff]  ;;  %v20795_v59 = vld [vmem:[#allocation51_spill] sm:$0xff] }
 0x377   :  { %v10900_v51 = vrot.slane %v10893_v8, %v13831_v5  ;;  %v12590_v40 = vadd.f32 %v12589_v56, %v12542_v14  ;;  %v11741_v48 = vsel %vm11703_vm6, %v11690_v49, %v19369_v3  ;;  %v11729_v52 = vsel %vm11703_vm6, %v11678_v33, %v19361_v24  ;;  %v20794_v46 = vld [vmem:[#allocation89_spill] sm:$0xff]  ;;  %v20796_v49 = vld [vmem:[#allocation34_spill] sm:$0xff] }
 0x378   :  { %v13357_v50 = vcombine.low %v11741_v48, %v11741_v48  ;;  %v13358_v35 = vcombine.high %v11741_v48, %v11741_v48  ;;  %v12488_v25 = vadd.f32 %v12487_v60, %v20787_v61  ;;  %11319 = vrot.lane.b32.xlu1 %v11270_v43, %s13742_s15  ;;  %v13345_v30 = vcombine.low %v11729_v52, %v11729_v52  ;;  %v10942_v60 = vpop.permute.xlu0 %10941  ;;  %v20800_v48 = vld [vmem:[#allocation80_spill] sm:$0xff] }
 0x379   :  { %10949 = vrot.lane.b32.xlu0 %v10900_v51, %s13744_s17  ;;  %v13346_v38 = vcombine.high %v11729_v52, %v11729_v52  ;;  %v12591_v16 = vadd.f32 %v12590_v40, %v12543_v6  ;;  %v12544_v3 = vmul.f32 %v20787_v61, %v20787_v61  ;;  %v4540_v24 = vcombine.low %v20789_v42, %v20788_v62  ;;  %v20797_v6 = vld [vmem:[#allocation60_spill] sm:$0xff]  ;;  %v20798_v51 = vld [vmem:[#allocation85_spill] sm:$0xff] }
 0x37a   :  { %11963 = vst.msk [vmem:[#allocation2 + $0x90] sm:$0xf] %vm11926_vm7, %v13357_v50  ;;  %11964 = vst.msk [vmem:[#allocation2 + $0x94] sm:$0xf] %vm11926_vm7, %v13358_v35  ;;  %v12489_v54 = vadd.f32 %v12488_v25, %v20790_v12  ;;  %v12545_v29 = vmul.f32 %v20790_v12, %v20790_v12  ;;  %v4589_v36 = vcombine.low %v20792_v23, %v20791_v57  ;;  %v20799_v40 = vld [vmem:[#allocation44_spill] sm:$0xff]  ;;  %v11312_v25 = vpop.permute.xlu1 %11311 }
 0x37b   :  { %11951 = vst.msk [vmem:[#allocation2 + $0x60] sm:$0xf] %vm11926_vm7, %v13345_v30  ;;  %11952 = vst.msk [vmem:[#allocation2 + $0x64] sm:$0xf] %vm11926_vm7, %v13346_v38  ;;  %v12592_v27 = vadd.f32 %v12591_v16, %v12544_v3  ;;  %v4548_v39 = vrot.slane %v4540_v24, %v13831_v5  ;;  %v12546_v14 = vmul.f32 %v20793_v53, %v20793_v53  ;;  %v20801_v30 = vld [vmem:[#allocation52_spill] sm:$0xff] }
 0x37c   :  { %v12490_v10 = vadd.f32 %v12489_v54, %v20793_v53  ;;  %v4597_v47 = vrot.slane %v4589_v36, %v13831_v5  ;;  %v12547_v11 = vmul.f32 %v20795_v59, %v20795_v59  ;;  %v4638_v43 = vcombine.low %v20798_v51, %v20797_v6 }
 0x37d   :  { %v4556_v58 = vcombine.low %v4548_v39, %v20794_v46  ;;  %v12593_v8 = vadd.f32 %v12592_v27, %v12545_v29  ;;  %v4639_v50 = vcombine.low %v20800_v48, %v20799_v40  ;;  %v12548_v16 = vmul.f32 %v20801_v30, %v20801_v30 }
 0x37e   :  { %v12491_v56 = vadd.f32 %v12490_v10, %v20795_v59  ;;  %v4605_v33 = vcombine.low %v4597_v47, %v20796_v49  ;;  %v12549_v24 = vmul.f32 %v19245_v22, %v19245_v22  ;;  %v4646_v36 = vrot.slane %v4638_v43, %v13831_v5 }
 0x37f   :  { %v11381_v35 = vsel %vm11321_vm15, %v4556_v58, %v19406_v32  ;;  %v12594_v52 = vadd.f32 %v12593_v8, %v12546_v14  ;;  %v4653_v27 = vrot.slane %v4639_v50, %v13831_v5  ;;  %v19668_v39 = vpop.f32.mrb[4].mxu1  ;;  %v6020_v14 = vpop.permute.xlu0 %6019 }
 0x380   :  { %v12492_v38 = vadd.f32 %v12491_v56, %v20801_v30  ;;  %v11437_v3 = vsel %vm11397_vm0, %v11381_v35, %v19414_v18  ;;  %v11384_v42 = vsel %vm11321_vm15, %v4605_v33, %v19547_v63  ;;  %v13517_v46 = vpop.f32.mrb[5].mxu1  ;;  %v7270_v8 = vpop.permute.xlu1 %7269 }
 0x381   :  { %v13604_v62 = vld [vmem:[#allocation2 + $0x90] sm:$0xff]   ;;  %v11488_v32 = vsel %vm11448_vm1, %v11437_v3, %v19441_v28  ;;  %v11439_v29 = vsel %vm11397_vm0, %v11384_v42, %v19552_v55  ;;  %v12595_v57 = vadd.f32 %v12594_v52, %v12547_v11  ;;  %v19679_v11 = vpop.f32.mrb[6].mxu1  ;;  %v19684_v49 = vpop.f32.mrb[32].mxu0  ;;  %v4654_v43 = vcombine.low %v4646_v36, %v4653_v27 }
 0x382   :  { %v13603_v54 = vld [vmem:[#allocation2 + $0x60] sm:$0xff]   ;;  %v12493_v23 = vadd.f32 %v12492_v38, %v19245_v22  ;;  %v11539_v18 = vsel %vm11499_vm2, %v11488_v32, %v19449_v15  ;;  %13532 = vmatmul.mubr.msk.bf16.gmra.mrb[20].mxu1 %vm12168_vm10, %v13604_v62  ;;  %v11490_v63 = vsel %vm11448_vm1, %v11439_v29, %v19580_v31  ;;  %v13493_v40 = vpop.f32.mrb[33].mxu0 }
 0x383   :  { %v11590_v28 = vsel %vm11550_vm3, %v11539_v18, %v19479_v13  ;;  %13508 = vmatmul.mubr.msk.bf16.gmra.mrb[48].mxu0 %vm12168_vm10, %v13603_v54  ;;  %v11541_v55 = vsel %vm11499_vm2, %v11490_v63, %v19590_v20  ;;  %13535 = vmatprep.mubr.msk.bf16.mxu1 %vm13746_vm9, %v20712_v21  ;;  %v12596_v15 = vadd.f32 %v12595_v57, %v12548_v16  ;;  %v19687_v35 = vpop.f32.mrb[34].mxu0  ;;  %v8008_v38 = vpop.permute.xlu0 %8007 }
 0x384   :  { %v11641_v31 = vsel %vm11601_vm4, %v11590_v28, %v19485_v37  ;;  %v11592_v10 = vsel %vm11550_vm3, %v11541_v55, %v9818_v4  ;;  %v12494_v47 = vadd.f32 %v12493_v23, %v19257_v0  ;;  %v12550_v13 = vmul.f32 %v19257_v0, %v19257_v0 }
 0x385   :  { %v11692_v20 = vsel %vm11652_vm5, %v11641_v31, %v19516_v41  ;;  %v11643_v58 = vsel %vm11601_vm4, %v11592_v10, %v10364_v26  ;;  %v12597_v56 = vadd.f32 %v12596_v15, %v12549_v24  ;;  %v13518_v41 = vpop.f32.mrb[7].mxu1  ;;  %v12552_v52 = vmul.f32 %v19687_v35, %v19687_v35  ;;  %v9258_v3 = vpop.permute.xlu1 %9257 }
 0x386   :  { %v11743_v37 = vsel %vm11703_vm6, %v11692_v20, %v19523_v44  ;;  %v11694_v4 = vsel %vm11652_vm5, %v11643_v58, %v10942_v60  ;;  %v12495_v44 = vadd.f32 %v12494_v47, %v19684_v49  ;;  %v12551_v60 = vmul.f32 %v19684_v49, %v19684_v49  ;;  %v20802_v47 = vld [vmem:[#allocation56_spill] sm:$0xff] }
 0x387   :  { %v13359_v33 = vcombine.low %v11743_v37, %v11743_v37  ;;  %v13360_v6 = vcombine.high %v11743_v37, %v11743_v37  ;;  %v11745_v51 = vsel %vm11703_vm6, %v11694_v4, %v11312_v25  ;;  %v12598_v50 = vadd.f32 %v12597_v56, %v12550_v13  ;;  %v13494_v25 = vpop.f32.mrb[35].mxu0  ;;  %v9820_v57 = vpop.permute.xlu0 %9819  ;;  %v20803_v13 = vld [vmem:[#allocation39_spill] sm:$0xff]  ;;  %v20804_v37 = vld [vmem:[#allocation40_spill] sm:$0xff] }
 0x388   :  { %v13361_v48 = vcombine.low %v11745_v51, %v11745_v51  ;;  %v13362_v26 = vcombine.high %v11745_v51, %v11745_v51  ;;  %v11387_v16 = vsel %vm11321_vm15, %v4654_v43, %v6020_v14  ;;  %v12496_v42 = vadd.f32 %v12495_v44, %v19687_v35 }
 0x389   :  { %11965 = vst.msk [vmem:[#allocation2 + $0x98] sm:$0xf] %vm11926_vm7, %v13359_v33  ;;  %11966 = vst.msk [vmem:[#allocation2 + $0x9c] sm:$0xf] %vm11926_vm7, %v13360_v6  ;;  %v12599_v62 = vadd.f32 %v12598_v50, %v12551_v60  ;;  %v11441_v32 = vsel %vm11397_vm0, %v11387_v16, %v7270_v8  ;;  %v4688_v46 = vcombine.low %v20803_v13, %v20802_v47 }
 0x38a   :  { %11967 = vst.msk [vmem:[#allocation2 + $0xa0] sm:$0xf] %vm11926_vm7, %v13361_v48  ;;  %11968 = vst.msk [vmem:[#allocation2 + $0xa4] sm:$0xf] %vm11926_vm7, %v13362_v26  ;;  %v11492_v54 = vsel %vm11448_vm1, %v11441_v32, %v8008_v38  ;;  %v20806_v32 = vld [vmem:[#allocation50_spill] sm:$0xff] }
 0x38b   :  { %v12600_v24 = vadd.f32 %v12599_v62, %v12552_v52  ;;  %v10366_v23 = vpop.permute.xlu1 %10365  ;;  %v11543_v18 = vsel %vm11499_vm2, %v11492_v54, %v9258_v3  ;;  %v4702_v58 = vrot.slane %v4688_v46, %v13831_v5  ;;  %v20805_v62 = vld [vmem:[#allocation55_spill] sm:$0xff] }
 0x38c   :  { %v11594_v63 = vsel %vm11550_vm3, %v11543_v18, %v9820_v57  ;;  %v4737_v54 = vcombine.low %v20806_v32, %v20805_v62 }
 0x38d   :  { %v11645_v36 = vsel %vm11601_vm4, %v11594_v63, %v10366_v23  ;;  %v4703_v4 = vcombine.low %v20804_v37, %v4702_v58  ;;  %v20807_v58 = vld [vmem:[#allocation72_spill] sm:$0xff] }
 0x390   :  { %v13605_v29 = vld [vmem:[#allocation2 + $0x98] sm:$0xff]  }
 0x391   :  { %13536 = vmatmul.mubr.msk.bf16.gmra.mrb[24].mxu1 %vm12168_vm10, %v13605_v29  ;;  %v13606_v27 = vld [vmem:[#allocation2 + $0xa0] sm:$0xff]  }
 0x392   :  { %13539 = vmatprep.mubr.msk.bf16.mxu1 %vm13746_vm9, %v20712_v21 }
 0x396   :  { %v10944_v28 = vpop.permute.xlu0 %10943 }
 0x397   :  { %v11696_v55 = vsel %vm11652_vm5, %v11645_v36, %v10944_v28  ;;  %v11314_v15 = vpop.permute.xlu1 %11313 }
 0x398   :  { %v11747_v31 = vsel %vm11703_vm6, %v11696_v55, %v11314_v15  ;;  %v4751_v55 = vrot.slane %v4737_v54, %v13831_v5 }
 0x399   :  { %v13363_v10 = vcombine.low %v11747_v31, %v11747_v31  ;;  %v13364_v14 = vcombine.high %v11747_v31, %v11747_v31  ;;  %13540 = vmatmul.mubr.msk.bf16.gmra.mrb[28].mxu1 %vm12168_vm10, %v13606_v27 }
 0x39a   :  { %13543 = vmatprep.mubr.msk.bf16.mxu1 %vm13746_vm9, %v20712_v21  ;;  %v6022_v8 = vpop.permute.xlu0 %6021 }
 0x39b   :  { %11969 = vst.msk [vmem:[#allocation2 + $0xa8] sm:$0xf] %vm11926_vm7, %v13363_v10  ;;  %11970 = vst.msk [vmem:[#allocation2 + $0xac] sm:$0xf] %vm11926_vm7, %v13364_v14  ;;  %v7272_v56 = vpop.permute.xlu1 %7271  ;;  %v11390_v6 = vsel %vm11321_vm15, %v4703_v4, %v6022_v8  ;;  %v4752_v8 = vcombine.low %v20807_v58, %v4751_v55 }
 0x39c   :  { %v11443_v43 = vsel %vm11397_vm0, %v11390_v6, %v7272_v56 }
 0x39f   :  { %v8010_v33 = vpop.permute.xlu0 %8009 }
 0x3a0   :  { %v11494_v40 = vsel %vm11448_vm1, %v11443_v43, %v8010_v33 }
 0x3a2   :  { %v13607_v20 = vld [vmem:[#allocation2 + $0xa8] sm:$0xff]  }
 0x3a3   :  { %13544 = vmatmul.mubr.msk.bf16.gmra.mrb[32].mxu1 %vm12168_vm10, %v13607_v20 }
 0x3a4   :  { %13547 = vmatprep.mubr.msk.bf16.mxu1 %vm13746_vm9, %v20712_v21 }
 0x3a5   :  { %v9260_v51 = vpop.permute.xlu1 %9259 }
 0x3a6   :  { %v9822_v41 = vpop.permute.xlu0 %9821  ;;  %v11545_v26 = vsel %vm11499_vm2, %v11494_v40, %v9260_v51 }
 0x3a7   :  { %v11596_v50 = vsel %vm11550_vm3, %v11545_v26, %v9822_v41 }
 0x3ac   :  { %v10368_v48 = vpop.permute.xlu1 %10367 }
 0x3ad   :  { %v11647_v44 = vsel %vm11601_vm4, %v11596_v50, %v10368_v48 }
 0x3b7   :  { %v10946_v60 = vpop.permute.xlu0 %10945  ;;  %v11316_v25 = vpop.permute.xlu1 %11315 }
 0x3b8   :  { %v11698_v52 = vsel %vm11652_vm5, %v11647_v44, %v10946_v60 }
 0x3b9   :  { %v11749_v38 = vsel %vm11703_vm6, %v11698_v52, %v11316_v25 }
 0x3ba   :  { %v13365_v16 = vcombine.low %v11749_v38, %v11749_v38  ;;  %v13366_v3 = vcombine.high %v11749_v38, %v11749_v38  ;;  %v19734_v29 = vpop.f32.mrb[8].mxu1 }
 0x3bb   :  { %v13521_v36 = vpop.f32.mrb[9].mxu1  ;;  %v7274_v46 = vpop.permute.xlu1 %7273 }
 0x3bc   :  { %11971 = vst.msk [vmem:[#allocation2 + $0xb0] sm:$0xf] %vm11926_vm7, %v13365_v16  ;;  %11972 = vst.msk [vmem:[#allocation2 + $0xb4] sm:$0xf] %vm11926_vm7, %v13366_v3  ;;  %v19743_v28 = vpop.f32.mrb[10].mxu1 }
 0x3bd   :  { %v19736_v57 = vpop.f32.mrb[36].mxu0  ;;  %v13522_v13 = vpop.f32.mrb[11].mxu1 }
 0x3be   :  { %v12497_v23 = vadd.f32 %v12496_v42, %v19736_v57  ;;  %v12553_v18 = vmul.f32 %v19736_v57, %v19736_v57  ;;  %v13497_v63 = vpop.f32.mrb[37].mxu0  ;;  %v6024_v42 = vpop.permute.xlu0 %6023 }
 0x3bf   :  { %v19741_v27 = vpop.f32.mrb[38].mxu0 }
 0x3c0   :  { %v12601_v31 = vadd.f32 %v12600_v24, %v12553_v18  ;;  %v12498_v10 = vadd.f32 %v12497_v23, %v19741_v27  ;;  %v12554_v14 = vmul.f32 %v19741_v27, %v19741_v27  ;;  %v13498_v47 = vpop.f32.mrb[39].mxu0  ;;  %v11393_v24 = vsel %vm11321_vm15, %v4752_v8, %v6024_v42 }
 0x3c1   :  { %v11445_v37 = vsel %vm11397_vm0, %v11393_v24, %v7274_v46 }
 0x3c2   :  { %v12602_v20 = vadd.f32 %v12601_v31, %v12554_v14  ;;  %v8012_v5 = vpop.permute.xlu0 %8011 }
 0x3c3   :  { %v13608_v15 = vld [vmem:[#allocation2 + $0xb0] sm:$0xff]   ;;  %v11496_v4 = vsel %vm11448_vm1, %v11445_v37, %v8012_v5 }
 0x3c4   :  { %13548 = vmatmul.mubr.msk.bf16.gmra.mrb[36].mxu1 %vm12168_vm10, %v13608_v15 }
 0x3c5   :  { %13551 = vmatprep.mubr.msk.bf16.mxu1 %vm13746_vm9, %v20712_v21  ;;  %v9262_v56 = vpop.permute.xlu1 %9261 }
 0x3c6   :  { %v9824_v33 = vpop.permute.xlu0 %9823  ;;  %v11547_v51 = vsel %vm11499_vm2, %v11496_v4, %v9262_v56 }
 0x3c7   :  { %v11598_v43 = vsel %vm11550_vm3, %v11547_v51, %v9824_v33 }
 0x3cd   :  { %v10370_v6 = vpop.permute.xlu1 %10369 }
 0x3ce   :  { %v11649_v40 = vsel %vm11601_vm4, %v11598_v43, %v10370_v6 }
 0x3d6   :  { %v10948_v41 = vpop.permute.xlu0 %10947 }
 0x3d7   :  { %v11700_v48 = vsel %vm11652_vm5, %v11649_v40, %v10948_v41  ;;  %v11318_v26 = vpop.permute.xlu1 %11317 }
 0x3d8   :  { %v11751_v50 = vsel %vm11703_vm6, %v11700_v48, %v11318_v26 }
 0x3d9   :  { %v13367_v44 = vcombine.low %v11751_v50, %v11751_v50  ;;  %v13368_v60 = vcombine.high %v11751_v50, %v11751_v50 }
 0x3da   :  { %v6026_v52 = vpop.permute.xlu0 %6025 }
 0x3db   :  { %11973 = vst.msk [vmem:[#allocation2 + $0xb8] sm:$0xf] %vm11926_vm7, %v13367_v44  ;;  %11974 = vst.msk [vmem:[#allocation2 + $0xbc] sm:$0xf] %vm11926_vm7, %v13368_v60  ;;  %v7276_v25 = vpop.permute.xlu1 %7275  ;;  %v11396_v16 = vsel %vm11321_vm15, %v19323_v7, %v6026_v52 }
 0x3dc   :  { %v11447_v32 = vsel %vm11397_vm0, %v11396_v16, %v7276_v25 }
 0x3de   :  { %v8014_v38 = vpop.permute.xlu0 %8013 }
 0x3df   :  { %v9264_v3 = vpop.permute.xlu1 %9263  ;;  %v11498_v54 = vsel %vm11448_vm1, %v11447_v32, %v8014_v38 }
 0x3e0   :  { %v11549_v63 = vsel %vm11499_vm2, %v11498_v54, %v9264_v3 }
 0x3e2   :  { %v13609_v62 = vld [vmem:[#allocation2 + $0xb8] sm:$0xff]   ;;  %v9826_v23 = vpop.permute.xlu0 %9825 }
 0x3e3   :  { %13552 = vmatmul.mubr.msk.bf16.gmra.mrb[40].mxu1 %vm12168_vm10, %v13609_v62  ;;  %v11600_v36 = vsel %vm11550_vm3, %v11549_v63, %v9826_v23 }
 0x3e4   :  { %13555 = vmatprep.mubr.msk.bf16.mxu1 %vm13746_vm9, %v20712_v21 }
 0x3e5   :  { %v10372_v18 = vpop.permute.xlu1 %10371 }
 0x3e6   :  { %v11651_v55 = vsel %vm11601_vm4, %v11600_v36, %v10372_v18 }
 0x3ea   :  { %v11320_v15 = vpop.permute.xlu1 %11319 }
 0x3eb   :  { %v10950_v7 = vpop.permute.xlu0 %10949 }
 0x3ec   :  { %v11702_v31 = vsel %vm11652_vm5, %v11651_v55, %v10950_v7 }
 0x3ed   :  { %v11753_v14 = vsel %vm11703_vm6, %v11702_v31, %v11320_v15 }
 0x3ee   :  { %v13369_v47 = vcombine.low %v11753_v14, %v11753_v14 }
 0x3f0   :  { %11975 = vst.msk [vmem:[#allocation2 + $0xc0] sm:$0xf] %vm11926_vm7, %v13369_v47 }
 0x3f7   :  { %v13610_v42 = vld [vmem:[#allocation2 + $0xc0] ss:$0 sps:$4 sm:$0xff]  }
 0x3f8   :  { %13556 = vmatmul.mubr.msk.bf16.gmra.mrb[44].mxu1 %vm12168_vm10, %v13610_v42  ;;  %v12561_v42 = vmul.f32 %v19235_v34, %v19235_v34 }
 0x3fa   :  { %v19777_v21 = vpop.f32.mrb[12].mxu1 }
 0x3fb   :  { %v13525_v46 = vpop.f32.mrb[13].mxu1 }
 0x3fc   :  { %v19784_v24 = vpop.f32.mrb[14].mxu1 }
 0x3fd   :  { %v19779_v13 = vpop.f32.mrb[40].mxu0  ;;  %v13526_v37 = vpop.f32.mrb[15].mxu1 }
 0x3fe   :  { %v12499_v58 = vadd.f32 %v12498_v10, %v19779_v13  ;;  %v12555_v8 = vmul.f32 %v19779_v13, %v19779_v13  ;;  %v13501_v5 = vpop.f32.mrb[41].mxu0 }
 0x3ff   :  { %v19786_v56 = vpop.f32.mrb[42].mxu0 }
 0x400   :  { %v12603_v4 = vadd.f32 %v12602_v20, %v12555_v8  ;;  %v12500_v33 = vadd.f32 %v12499_v58, %v19786_v56  ;;  %v12556_v6 = vmul.f32 %v19786_v56, %v19786_v56  ;;  %v13502_v51 = vpop.f32.mrb[43].mxu0  ;;  %v12562_v8 = vmul.f32 %v19259_v45, %v19259_v45 }
 0x401   :  { %v12564_v51 = vmul.f32 %v19679_v11, %v19679_v11 }
 0x402   :  { %v12604_v43 = vadd.f32 %v12603_v4, %v12556_v6  ;;  %v12563_v4 = vmul.f32 %v19668_v39, %v19668_v39 }
 0x43a   :  { %v19791_v40 = vpop.f32.mrb[16].mxu1 }
 0x43b   :  { %v13529_v41 = vpop.f32.mrb[17].mxu1 }
 0x43c   :  { %v19798_v44 = vpop.f32.mrb[18].mxu1 }
 0x43d   :  { %v19793_v10 = vpop.f32.mrb[44].mxu0  ;;  %v13530_v60 = vpop.f32.mrb[19].mxu1 }
 0x43e   :  { %v12501_v48 = vadd.f32 %v12500_v33, %v19793_v10  ;;  %v12557_v26 = vmul.f32 %v19793_v10, %v19793_v10  ;;  %v13505_v50 = vpop.f32.mrb[45].mxu0  ;;  %v12566_v60 = vmul.f32 %v19743_v28, %v19743_v28 }
 0x43f   :  { %v19800_v20 = vpop.f32.mrb[46].mxu0 }
 0x440   :  { %v12605_v52 = vadd.f32 %v12604_v43, %v12557_v26  ;;  %v12502_v25 = vadd.f32 %v12501_v48, %v19800_v20  ;;  %v12558_v38 = vmul.f32 %v19800_v20, %v19800_v20  ;;  %v13506_v16 = vpop.f32.mrb[47].mxu0  ;;  %v12565_v48 = vmul.f32 %v19734_v29, %v19734_v29 }
 0x442   :  { %v12606_v3 = vadd.f32 %v12605_v52, %v12558_v38 }
 0x455   :  { %v19805_v62 = vpop.f32.mrb[20].mxu1 }
 0x456   :  { %v19807_v32 = vpop.f32.mrb[48].mxu0  ;;  %v13533_v54 = vpop.f32.mrb[21].mxu1 }
 0x457   :  { %v12503_v23 = vadd.f32 %v12502_v25, %v19807_v32  ;;  %v12559_v18 = vmul.f32 %v19807_v32, %v19807_v32  ;;  %v13509_v63 = vpop.f32.mrb[49].mxu0  ;;  %v19812_v36 = vpop.f32.mrb[22].mxu1 }
 0x458   :  { %v19814_v55 = vpop.f32.mrb[50].mxu0  ;;  %v13534_v7 = vpop.f32.mrb[23].mxu1 }
 0x459   :  { %v12607_v15 = vadd.f32 %v12606_v3, %v12559_v18  ;;  %v12504_v31 = vadd.f32 %v12503_v23, %v19814_v55  ;;  %v12560_v14 = vmul.f32 %v19814_v55, %v19814_v55  ;;  %v13510_v47 = vpop.f32.mrb[51].mxu0  ;;  %v12567_v3 = vmul.f32 %v19777_v21, %v19777_v21 }
 0x45a   :  { %v12568_v7 = vmul.f32 %v19784_v24, %v19784_v24 }
 0x45b   :  { %v12505_v46 = vadd.f32 %v12504_v31, %v19235_v34  ;;  %v12608_v58 = vadd.f32 %v12607_v15, %v12560_v14  ;;  %v12569_v14 = vmul.f32 %v19791_v40, %v19791_v40 }
 0x45d   :  { %v12506_v5 = vadd.f32 %v12505_v46, %v19259_v45  ;;  %v12609_v37 = vadd.f32 %v12608_v58, %v12561_v42  ;;  %v12570_v46 = vmul.f32 %v19798_v44, %v19798_v44 }
 0x45f   :  { %v12507_v33 = vadd.f32 %v12506_v5, %v19668_v39  ;;  %v12610_v6 = vadd.f32 %v12609_v37, %v12562_v8 }
 0x461   :  { %v12508_v43 = vadd.f32 %v12507_v33, %v19679_v11  ;;  %v12611_v41 = vadd.f32 %v12610_v6, %v12563_v4  ;;  %v12571_v4 = vmul.f32 %v19805_v62, %v19805_v62 }
 0x463   :  { %v12509_v26 = vadd.f32 %v12508_v43, %v19734_v29  ;;  %v12612_v50 = vadd.f32 %v12611_v41, %v12564_v51 }
 0x464   :  { %v19837_v38 = vpop.f32.mrb[24].mxu1 }
 0x465   :  { %v12613_v52 = vadd.f32 %v12612_v50, %v12565_v48  ;;  %v12510_v25 = vadd.f32 %v12509_v26, %v19743_v28  ;;  %v13537_v16 = vpop.f32.mrb[25].mxu1  ;;  %v12572_v48 = vmul.f32 %v19812_v36, %v19812_v36 }
 0x466   :  { %v19842_v18 = vpop.f32.mrb[26].mxu1 }
 0x467   :  { %v12511_v54 = vadd.f32 %v12510_v25, %v19777_v21  ;;  %v12614_v23 = vadd.f32 %v12613_v52, %v12566_v60  ;;  %v13538_v63 = vpop.f32.mrb[27].mxu1  ;;  %v12573_v52 = vmul.f32 %v19837_v38, %v19837_v38 }
 0x469   :  { %v12512_v15 = vadd.f32 %v12511_v54, %v19784_v24  ;;  %v12615_v31 = vadd.f32 %v12614_v23, %v12567_v3  ;;  %v12574_v3 = vmul.f32 %v19842_v18, %v19842_v18 }
 0x46b   :  { %v12513_v47 = vadd.f32 %v12512_v15, %v19791_v40  ;;  %v12616_v42 = vadd.f32 %v12615_v31, %v12568_v7 }
 0x46c   :  { %v19853_v5 = vpop.f32.mrb[28].mxu1 }
 0x46d   :  { %v12514_v58 = vadd.f32 %v12513_v47, %v19798_v44  ;;  %v12617_v8 = vadd.f32 %v12616_v42, %v12569_v14  ;;  %v13541_v37 = vpop.f32.mrb[29].mxu1  ;;  %v12575_v54 = vmul.f32 %v19853_v5, %v19853_v5 }
 0x46e   :  { %v19858_v51 = vpop.f32.mrb[30].mxu1 }
 0x46f   :  { %v12515_v33 = vadd.f32 %v12514_v58, %v19805_v62  ;;  %v12618_v6 = vadd.f32 %v12617_v8, %v12570_v46  ;;  %v13542_v43 = vpop.f32.mrb[31].mxu1  ;;  %v12576_v7 = vmul.f32 %v19858_v51, %v19858_v51 }
 0x471   :  { %v12516_v41 = vadd.f32 %v12515_v33, %v19812_v36  ;;  %v12619_v26 = vadd.f32 %v12618_v6, %v12571_v4 }
 0x473   :  { %v12620_v50 = vadd.f32 %v12619_v26, %v12572_v48  ;;  %v12517_v60 = vadd.f32 %v12516_v41, %v19837_v38 }
 0x475   :  { %v12621_v25 = vadd.f32 %v12620_v50, %v12573_v52  ;;  %v12518_v16 = vadd.f32 %v12517_v60, %v19842_v18 }
 0x476   :  { %v19874_v15 = vpop.f32.mrb[32].mxu1 }
 0x477   :  { %v12622_v23 = vadd.f32 %v12621_v25, %v12574_v3  ;;  %v12519_v63 = vadd.f32 %v12518_v16, %v19853_v5  ;;  %v13545_v31 = vpop.f32.mrb[33].mxu1  ;;  %v12577_v42 = vmul.f32 %v19874_v15, %v19874_v15 }
 0x478   :  { %v19879_v46 = vpop.f32.mrb[34].mxu1 }
 0x479   :  { %v12623_v14 = vadd.f32 %v12622_v23, %v12575_v54  ;;  %v12520_v47 = vadd.f32 %v12519_v63, %v19858_v51  ;;  %v13546_v58 = vpop.f32.mrb[35].mxu1  ;;  %v12578_v4 = vmul.f32 %v19879_v46, %v19879_v46 }
 0x47b   :  { %v12624_v8 = vadd.f32 %v12623_v14, %v12576_v7  ;;  %v12521_v37 = vadd.f32 %v12520_v47, %v19874_v15 }
 0x47d   :  { %v12625_v33 = vadd.f32 %v12624_v8, %v12577_v42  ;;  %v12522_v6 = vadd.f32 %v12521_v37, %v19879_v46 }
 0x47f   :  { %v12626_v43 = vadd.f32 %v12625_v33, %v12578_v4 }
 0x497   :  { %v19885_v41 = vpop.f32.mrb[36].mxu1 }
 0x498   :  { %v12523_v48 = vadd.f32 %v12522_v6, %v19885_v41  ;;  %v12579_v26 = vmul.f32 %v19885_v41, %v19885_v41  ;;  %v13549_v50 = vpop.f32.mrb[37].mxu1 }
 0x499   :  { %v19890_v60 = vpop.f32.mrb[38].mxu1 }
 0x49a   :  { %v12627_v52 = vadd.f32 %v12626_v43, %v12579_v26  ;;  %v12524_v25 = vadd.f32 %v12523_v48, %v19890_v60  ;;  %v12580_v16 = vmul.f32 %v19890_v60, %v19890_v60  ;;  %v13550_v3 = vpop.f32.mrb[39].mxu1 }
 0x49c   :  { %v12628_v54 = vadd.f32 %v12627_v52, %v12580_v16 }
 0x4b6   :  { %v19895_v23 = vpop.f32.mrb[40].mxu1 }
 0x4b7   :  { %20808 = vst [vmem:[#allocation70_spill] sm:$0xff] %v19895_v23  ;;  %v12525_v63 = vadd.f32 %v12524_v25, %v19895_v23  ;;  %v12581_v7 = vmul.f32 %v19895_v23, %v19895_v23  ;;  %v13553_v31 = vpop.f32.mrb[41].mxu1 }
 0x4b8   :  { %v19900_v14 = vpop.f32.mrb[42].mxu1 }
 0x4b9   :  { %20809 = vst [vmem:[#allocation19_spill] sm:$0xff] %v19900_v14  ;;  %v12629_v47 = vadd.f32 %v12628_v54, %v12581_v7  ;;  %v12526_v42 = vadd.f32 %v12525_v63, %v19900_v14  ;;  %v12582_v58 = vmul.f32 %v19900_v14, %v19900_v14  ;;  %v13554_v8 = vpop.f32.mrb[43].mxu1 }
 0x4bb   :  { %v12630_v37 = vadd.f32 %v12629_v47, %v12582_v58 }
 0x4cb   :  { %v19905_v4 = vpop.f32.mrb[44].mxu1 }
 0x4cc   :  { %v12527_v33 = vadd.f32 %v12526_v42, %v19905_v4  ;;  %v12583_v6 = vmul.f32 %v19905_v4, %v19905_v4  ;;  %v13557_v43 = vpop.f32.mrb[45].mxu1 }
 0x4cd   :  { %v12477_v48 = vpop.f32.mrb[46].mxu1 }
 0x4ce   :  { %v12528_v26 = vrot.slane %v12527_v33, 4  ;;  %v12631_v50 = vadd.f32 %v12630_v37, %v12583_v6  ;;  %v13558_v52 = vpop.f32.mrb[47].mxu1  ;;  %v20811_v48 = vld [vmem:[#allocation61_spill] sm:$0xff] }
 0x4d0   :  { %v12529_v25 = vadd.f32 %v12528_v26, %v12527_v33  ;;  %v12632_v16 = vrot.slane %v12631_v50, 4  ;;  %v20810_v33 = vld [vmem:[#allocation63_spill] sm:$0xff] }
 0x4d2   :  { %v12530_v3 = vrot.slane %v12529_v25, 2  ;;  %v12633_v54 = vadd.f32 %v12632_v16, %v12631_v50  ;;  %v20812_v50 = vld [vmem:[#allocation67_spill] sm:$0xff] }
 0x4d4   :  { %v12531_v63 = vadd.f32 %v12530_v3, %v12529_v25  ;;  %v12634_v7 = vrot.slane %v12633_v54, 2  ;;  %v20813_v25 = vld [vmem:[#allocation62_spill] sm:$0xff] }
 0x4d6   :  { %v12532_v31 = vrot.slane %v12531_v63, 1  ;;  %v12635_v47 = vadd.f32 %v12634_v7, %v12633_v54 }
 0x4d8   :  { %v12533_v58 = vadd.f32 %v12532_v31, %v12531_v63  ;;  %v12636_v8 = vrot.slane %v12635_v47, 1 }
 0x4da   :  { %v19910_v14 = vmul.f32 0.0025510204, %v12533_v58  ;;  %v12637_v42 = vadd.f32 %v12636_v8, %v12635_v47 }
 0x4dc   :  { %v12638_v23 = vmul.f32 0.0025510204, %v12637_v42  ;;  %v12639_v43 = vmul.f32 %v19910_v14, %v19910_v14  ;;  %v12690_v37 = vsub.f32 %v19905_v4, %v19910_v14  ;;  %v12642_v6 = vsub.f32 %v20810_v33, %v19910_v14 }
 0x4dd   :  { %v12643_v26 = vsub.f32 %v20811_v48, %v19910_v14  ;;  %v12644_v52 = vsub.f32 %v20812_v50, %v19910_v14  ;;  %v12645_v16 = vsub.f32 %v20813_v25, %v19910_v14  ;;  %v12646_v3 = vsub.f32 %v20772_v2, %v19910_v14 }
 0x4de   :  { %v12640_v54 = vsub.f32 %v12638_v23, %v12639_v43  ;;  %v12647_v63 = vsub.f32 %v20775_v17, %v19910_v14  ;;  %v12648_v4 = vsub.f32 %v20783_v9, %v19910_v14  ;;  %v12649_v7 = vsub.f32 %v20784_v19, %v19910_v14 }
 0x4df   :  { %v12650_v31 = vsub.f32 %v20786_v1, %v19910_v14  ;;  %v12651_v47 = vsub.f32 %v20787_v61, %v19910_v14  ;;  %v12652_v58 = vsub.f32 %v20790_v12, %v19910_v14  ;;  %v12653_v2 = vsub.f32 %v20793_v53, %v19910_v14 }
 0x4e0   :  { %v12641_v23 = vmax.f32 %v12640_v54, 0.0  ;;  %v12654_v17 = vsub.f32 %v20795_v59, %v19910_v14  ;;  %v12655_v9 = vsub.f32 %v20801_v30, %v19910_v14  ;;  %v12656_v19 = vsub.f32 %v19245_v22, %v19910_v14 }
 0x4e1   :  { %v12657_v1 = vsub.f32 %v19257_v0, %v19910_v14  ;;  %v12658_v61 = vsub.f32 %v19684_v49, %v19910_v14  ;;  %v12659_v12 = vsub.f32 %v19687_v35, %v19910_v14  ;;  %v12660_v53 = vsub.f32 %v19736_v57, %v19910_v14 }
 0x4e2   :  { %v12691_v8 = vadd.f32 1e-05, %v12641_v23  ;;  %v12661_v59 = vsub.f32 %v19741_v27, %v19910_v14  ;;  %v12662_v30 = vsub.f32 %v19779_v13, %v19910_v14  ;;  %v12663_v22 = vsub.f32 %v19786_v56, %v19910_v14 }
 0x4e3   :  { %v12664_v0 = vsub.f32 %v19793_v10, %v19910_v14  ;;  %v12665_v49 = vsub.f32 %v19800_v20, %v19910_v14  ;;  %v12666_v35 = vsub.f32 %v19807_v32, %v19910_v14  ;;  %v12667_v57 = vsub.f32 %v19814_v55, %v19910_v14 }
 0x4e4   :  { %13611 = vrsqrt.f32 %v12691_v8  ;;  %v12668_v27 = vsub.f32 %v19235_v34, %v19910_v14  ;;  %v12669_v13 = vsub.f32 %v19259_v45, %v19910_v14  ;;  %v12670_v56 = vsub.f32 %v19668_v39, %v19910_v14 }
 0x4e5   :  { %v12671_v10 = vsub.f32 %v19679_v11, %v19910_v14  ;;  %v12672_v20 = vsub.f32 %v19734_v29, %v19910_v14  ;;  %v12673_v32 = vsub.f32 %v19743_v28, %v19910_v14  ;;  %v12674_v55 = vsub.f32 %v19777_v21, %v19910_v14 }
 0x4e6   :  { %v12675_v34 = vsub.f32 %v19784_v24, %v19910_v14  ;;  %v12676_v45 = vsub.f32 %v19791_v40, %v19910_v14  ;;  %v12677_v39 = vsub.f32 %v19798_v44, %v19910_v14  ;;  %v12678_v11 = vsub.f32 %v19805_v62, %v19910_v14 }
 0x4e7   :  { %v12679_v29 = vsub.f32 %v19812_v36, %v19910_v14  ;;  %v12680_v28 = vsub.f32 %v19837_v38, %v19910_v14  ;;  %v12681_v21 = vsub.f32 %v19842_v18, %v19910_v14  ;;  %v12682_v24 = vsub.f32 %v19853_v5, %v19910_v14  ;;  %v20814_v18 = vld [vmem:[#allocation70_spill] sm:$0xff]  ;;  %v20815_v5 = vld [vmem:[#allocation19_spill] sm:$0xff] }
 0x4e8   :  { %v12683_v40 = vsub.f32 %v19858_v51, %v19910_v14  ;;  %v12684_v44 = vsub.f32 %v19874_v15, %v19910_v14  ;;  %v12685_v62 = vsub.f32 %v19879_v46, %v19910_v14  ;;  %v12686_v36 = vsub.f32 %v19885_v41, %v19910_v14  ;;  %v20012_v51 = vld [vmem:[#allocation8] ss:$0 sm:$0xff]  ;;  %v20014_v46 = vld [vmem:[#allocation9] ss:$0 sm:$0xff] }
 0x4e9   :  { %v12687_v38 = vsub.f32 %v19890_v60, %v19910_v14  ;;  %v12688_v42 = vsub.f32 %v20814_v18, %v19910_v14  ;;  %v12689_v43 = vsub.f32 %v20815_v5, %v19910_v14  ;;  %20816 = vst [vmem:[#allocation16_spill] sm:$0xff] %v20012_v51  ;;  %20817 = vst [vmem:[#allocation35_spill] sm:$0xff] %v20014_v46 }
 0x4ee   :  { %v13612_v33 = vpop.eup %13611 }
 0x4ef   :  { %v12741_v48 = vmul.f32 %v13612_v33, %v12690_v37  ;;  %v12693_v15 = vmul.f32 %v13612_v33, %v12642_v6  ;;  %v12694_v50 = vmul.f32 %v13612_v33, %v12643_v26  ;;  %v12695_v25 = vmul.f32 %v13612_v33, %v12644_v52 }
 0x4f0   :  { %v12696_v54 = vmul.f32 %v13612_v33, %v12645_v16  ;;  %v12697_v41 = vmul.f32 %v13612_v33, %v12646_v3  ;;  %v12698_v23 = vmul.f32 %v13612_v33, %v12647_v63  ;;  %v12699_v8 = vmul.f32 %v13612_v33, %v12648_v4 }
 0x4f1   :  { %v12797_v60 = vmul.f32 %v20012_v51, %v12741_v48  ;;  %v12700_v18 = vmul.f32 %v13612_v33, %v12649_v7  ;;  %v12701_v5 = vmul.f32 %v13612_v33, %v12650_v31  ;;  %v12702_v14 = vmul.f32 %v13612_v33, %v12651_v47 }
 0x4f2   :  { %v12703_v37 = vmul.f32 %v13612_v33, %v12652_v58  ;;  %v12704_v6 = vmul.f32 %v13612_v33, %v12653_v2  ;;  %v12705_v26 = vmul.f32 %v13612_v33, %v12654_v17  ;;  %v12706_v52 = vmul.f32 %v13612_v33, %v12655_v9 }
 0x4f3   :  { %v12853_v16 = vadd.f32 %v20014_v46, %v12797_v60  ;;  %v12707_v3 = vmul.f32 %v13612_v33, %v12656_v19  ;;  %v12708_v63 = vmul.f32 %v13612_v33, %v12657_v1  ;;  %v12709_v4 = vmul.f32 %v13612_v33, %v12658_v61 }
 0x4f4   :  { %v12710_v48 = vmul.f32 %v13612_v33, %v12659_v12  ;;  %v12711_v51 = vmul.f32 %v13612_v33, %v12660_v53  ;;  %v12712_v7 = vmul.f32 %v13612_v33, %v12661_v59  ;;  %v12713_v31 = vmul.f32 %v13612_v33, %v12662_v30 }
 0x4f5   :  { %v12902_v47 = vmax.f32 %v12853_v16, 0.0  ;;  %v12714_v58 = vmul.f32 %v13612_v33, %v12663_v22  ;;  %v12715_v2 = vmul.f32 %v13612_v33, %v12664_v0  ;;  %v12716_v17 = vmul.f32 %v13612_v33, %v12665_v49 }
 0x4f6   :  { %v12717_v9 = vmul.f32 %v13612_v33, %v12666_v35  ;;  %v12718_v46 = vmul.f32 %v13612_v33, %v12667_v57  ;;  %v12719_v60 = vmul.f32 %v13612_v33, %v12668_v27  ;;  %v12720_v19 = vmul.f32 %v13612_v33, %v12669_v13 }
 0x4f7   :  { %12951 = vst [vmem:[#allocation11 + $0x180] sm:$0xff] %v12902_v47  ;;  %v12721_v1 = vmul.f32 %v13612_v33, %v12670_v56  ;;  %v12722_v61 = vmul.f32 %v13612_v33, %v12671_v10  ;;  %v12723_v12 = vmul.f32 %v13612_v33, %v12672_v20  ;;  %v12724_v53 = vmul.f32 %v13612_v33, %v12673_v32 }
 0x4f8   :  { %v12725_v59 = vmul.f32 %v13612_v33, %v12674_v55  ;;  %v12726_v30 = vmul.f32 %v13612_v33, %v12675_v34  ;;  %v12727_v16 = vmul.f32 %v13612_v33, %v12676_v45  ;;  %v12728_v22 = vmul.f32 %v13612_v33, %v12677_v39  ;;  %v20818_v34 = vld [vmem:[#allocation16_spill] sm:$0xff] }
 0x4f9   :  { %v12729_v0 = vmul.f32 %v13612_v33, %v12678_v11  ;;  %v12730_v49 = vmul.f32 %v13612_v33, %v12679_v29  ;;  %v12731_v35 = vmul.f32 %v13612_v33, %v12680_v28  ;;  %v12732_v57 = vmul.f32 %v13612_v33, %v12681_v21 }
 0x4fa   :  { %v12733_v27 = vmul.f32 %v13612_v33, %v12682_v24  ;;  %v12734_v13 = vmul.f32 %v13612_v33, %v12683_v40  ;;  %v12735_v47 = vmul.f32 %v13612_v33, %v12684_v44  ;;  %v12736_v56 = vmul.f32 %v13612_v33, %v12685_v62 }
 0x4fb   :  { %v12737_v10 = vmul.f32 %v13612_v33, %v12686_v36  ;;  %v12738_v20 = vmul.f32 %v13612_v33, %v12687_v38  ;;  %v12739_v32 = vmul.f32 %v13612_v33, %v12688_v42  ;;  %v12740_v55 = vmul.f32 %v13612_v33, %v12689_v43 }
 0x4fc   :  { %v12749_v45 = vmul.f32 %v20818_v34, %v12693_v15  ;;  %v12750_v39 = vmul.f32 %v20818_v34, %v12694_v50  ;;  %v12751_v11 = vmul.f32 %v20818_v34, %v12695_v25  ;;  %v12752_v29 = vmul.f32 %v20818_v34, %v12696_v54 }
 0x4fd   :  { %v12753_v28 = vmul.f32 %v20818_v34, %v12697_v41  ;;  %v12754_v21 = vmul.f32 %v20818_v34, %v12698_v23  ;;  %v12755_v24 = vmul.f32 %v20818_v34, %v12699_v8  ;;  %v12756_v40 = vmul.f32 %v20818_v34, %v12700_v18 }
 0x4fe   :  { %v12757_v44 = vmul.f32 %v20818_v34, %v12701_v5  ;;  %v12758_v62 = vmul.f32 %v20818_v34, %v12702_v14  ;;  %v12759_v36 = vmul.f32 %v20818_v34, %v12703_v37  ;;  %v12760_v38 = vmul.f32 %v20818_v34, %v12704_v6 }
 0x4ff   :  { %v12761_v42 = vmul.f32 %v20818_v34, %v12705_v26  ;;  %v12762_v43 = vmul.f32 %v20818_v34, %v12706_v52  ;;  %v12763_v33 = vmul.f32 %v20818_v34, %v12707_v3  ;;  %v12764_v15 = vmul.f32 %v20818_v34, %v12708_v63 }
 0x500   :  { %v12765_v50 = vmul.f32 %v20818_v34, %v12709_v4  ;;  %v12766_v25 = vmul.f32 %v20818_v34, %v12710_v48  ;;  %v12767_v54 = vmul.f32 %v20818_v34, %v12711_v51  ;;  %v12768_v41 = vmul.f32 %v20818_v34, %v12712_v7 }
 0x501   :  { %v12769_v23 = vmul.f32 %v20818_v34, %v12713_v31  ;;  %v12770_v8 = vmul.f32 %v20818_v34, %v12714_v58  ;;  %v12771_v18 = vmul.f32 %v20818_v34, %v12715_v2  ;;  %v12772_v5 = vmul.f32 %v20818_v34, %v12716_v17 }
 0x502   :  { %v12773_v14 = vmul.f32 %v20818_v34, %v12717_v9  ;;  %v12774_v37 = vmul.f32 %v20818_v34, %v12718_v46  ;;  %v12775_v6 = vmul.f32 %v20818_v34, %v12719_v60  ;;  %v12776_v26 = vmul.f32 %v20818_v34, %v12720_v19 }
 0x503   :  { %v12777_v51 = vmul.f32 %v20818_v34, %v12721_v1  ;;  %v12778_v52 = vmul.f32 %v20818_v34, %v12722_v61  ;;  %v12779_v3 = vmul.f32 %v20818_v34, %v12723_v12  ;;  %v12780_v63 = vmul.f32 %v20818_v34, %v12724_v53 }
 0x504   :  { %v12781_v4 = vmul.f32 %v20818_v34, %v12725_v59  ;;  %v12782_v48 = vmul.f32 %v20818_v34, %v12726_v30  ;;  %v12783_v7 = vmul.f32 %v20818_v34, %v12727_v16  ;;  %v12784_v46 = vmul.f32 %v20818_v34, %v12728_v22  ;;  %v20819_v30 = vld [vmem:[#allocation35_spill] sm:$0xff] }
 0x505   :  { %v12785_v31 = vmul.f32 %v20818_v34, %v12729_v0  ;;  %v12786_v58 = vmul.f32 %v20818_v34, %v12730_v49  ;;  %v12787_v2 = vmul.f32 %v20818_v34, %v12731_v35  ;;  %v12788_v17 = vmul.f32 %v20818_v34, %v12732_v57 }
 0x506   :  { %v12789_v9 = vmul.f32 %v20818_v34, %v12733_v27  ;;  %v12790_v60 = vmul.f32 %v20818_v34, %v12734_v13  ;;  %v12791_v19 = vmul.f32 %v20818_v34, %v12735_v47  ;;  %v12792_v1 = vmul.f32 %v20818_v34, %v12736_v56 }
 0x507   :  { %v12793_v61 = vmul.f32 %v20818_v34, %v12737_v10  ;;  %v12794_v12 = vmul.f32 %v20818_v34, %v12738_v20  ;;  %v12795_v53 = vmul.f32 %v20818_v34, %v12739_v32  ;;  %v12796_v59 = vmul.f32 %v20818_v34, %v12740_v55 }
 0x508   :  { %v12805_v16 = vadd.f32 %v20819_v30, %v12749_v45  ;;  %v12806_v22 = vadd.f32 %v20819_v30, %v12750_v39  ;;  %v12807_v0 = vadd.f32 %v20819_v30, %v12751_v11  ;;  %v12808_v49 = vadd.f32 %v20819_v30, %v12752_v29 }
 0x509   :  { %v20071_v35 = vadd.f32 %v20819_v30, %v12753_v28  ;;  %v20074_v57 = vadd.f32 %v20819_v30, %v12754_v21  ;;  %v20077_v27 = vadd.f32 %v20819_v30, %v12755_v24  ;;  %v20080_v13 = vadd.f32 %v20819_v30, %v12756_v40 }
 0x50a   :  { %v20083_v47 = vadd.f32 %v20819_v30, %v12757_v44  ;;  %v20086_v56 = vadd.f32 %v20819_v30, %v12758_v62  ;;  %v20089_v10 = vadd.f32 %v20819_v30, %v12759_v36  ;;  %v20092_v20 = vadd.f32 %v20819_v30, %v12760_v38 }
 0x50b   :  { %v20095_v32 = vadd.f32 %v20819_v30, %v12761_v42  ;;  %v20098_v55 = vadd.f32 %v20819_v30, %v12762_v43  ;;  %v20101_v34 = vadd.f32 %v20819_v30, %v12763_v33  ;;  %v20104_v45 = vadd.f32 %v20819_v30, %v12764_v15 }
 0x50c   :  { %v20107_v39 = vadd.f32 %v20819_v30, %v12765_v50  ;;  %v20110_v11 = vadd.f32 %v20819_v30, %v12766_v25  ;;  %v20113_v29 = vadd.f32 %v20819_v30, %v12767_v54  ;;  %v20116_v28 = vadd.f32 %v20819_v30, %v12768_v41 }
 0x50d   :  { %v20119_v21 = vadd.f32 %v20819_v30, %v12769_v23  ;;  %v20122_v24 = vadd.f32 %v20819_v30, %v12770_v8  ;;  %v20125_v40 = vadd.f32 %v20819_v30, %v12771_v18  ;;  %v20128_v44 = vadd.f32 %v20819_v30, %v12772_v5 }
 0x50e   :  { %v20131_v62 = vadd.f32 %v20819_v30, %v12773_v14  ;;  %v20134_v36 = vadd.f32 %v20819_v30, %v12774_v37  ;;  %v20137_v38 = vadd.f32 %v20819_v30, %v12775_v6  ;;  %v20140_v42 = vadd.f32 %v20819_v30, %v12776_v26 }
 0x50f   :  { %v20143_v43 = vadd.f32 %v20819_v30, %v12777_v51  ;;  %v20146_v33 = vadd.f32 %v20819_v30, %v12778_v52  ;;  %v20149_v15 = vadd.f32 %v20819_v30, %v12779_v3  ;;  %v20152_v50 = vadd.f32 %v20819_v30, %v12780_v63 }
 0x510   :  { %v20155_v25 = vadd.f32 %v20819_v30, %v12781_v4  ;;  %v20158_v54 = vadd.f32 %v20819_v30, %v12782_v48  ;;  %v20161_v41 = vadd.f32 %v20819_v30, %v12783_v7  ;;  %v20164_v23 = vadd.f32 %v20819_v30, %v12784_v46 }
 0x511   :  { %v20167_v8 = vadd.f32 %v20819_v30, %v12785_v31  ;;  %v20170_v18 = vadd.f32 %v20819_v30, %v12786_v58  ;;  %v20173_v5 = vadd.f32 %v20819_v30, %v12787_v2  ;;  %v20176_v14 = vadd.f32 %v20819_v30, %v12788_v17 }
 0x512   :  { %v20179_v37 = vadd.f32 %v20819_v30, %v12789_v9  ;;  %v20182_v6 = vadd.f32 %v20819_v30, %v12790_v60  ;;  %v20185_v26 = vadd.f32 %v20819_v30, %v12791_v19  ;;  %v20188_v51 = vadd.f32 %v20819_v30, %v12792_v1 }
 0x513   :  { %v20191_v52 = vadd.f32 %v20819_v30, %v12793_v61  ;;  %v20194_v3 = vadd.f32 %v20819_v30, %v12794_v12  ;;  %v20197_v63 = vadd.f32 %v20819_v30, %v12795_v53  ;;  %v20200_v4 = vadd.f32 %v20819_v30, %v12796_v59 }
 0x514   :  { %v12854_v48 = vmax.f32 %v12805_v16, 0.0  ;;  %v12855_v7 = vmax.f32 %v12806_v22, 0.0  ;;  %v12856_v46 = vmax.f32 %v12807_v0, 0.0  ;;  %v12857_v31 = vmax.f32 %v12808_v49, 0.0 }
 0x515   :  { %v12858_v58 = vmax.f32 %v20071_v35, 0.0  ;;  %v12859_v2 = vmax.f32 %v20074_v57, 0.0  ;;  %v12860_v17 = vmax.f32 %v20077_v27, 0.0  ;;  %v12861_v9 = vmax.f32 %v20080_v13, 0.0 }
 0x516   :  { %v12862_v60 = vmax.f32 %v20083_v47, 0.0  ;;  %v12863_v19 = vmax.f32 %v20086_v56, 0.0  ;;  %v12864_v1 = vmax.f32 %v20089_v10, 0.0  ;;  %v12865_v61 = vmax.f32 %v20092_v20, 0.0  ;;  %12903 = vst [vmem:[#allocation11] sm:$0xff] %v12854_v48  ;;  %12904 = vst [vmem:[#allocation11 + $0x8] sm:$0xff] %v12855_v7 }
 0x517   :  { %12905 = vst [vmem:[#allocation11 + $0x10] sm:$0xff] %v12856_v46  ;;  %12906 = vst [vmem:[#allocation11 + $0x18] sm:$0xff] %v12857_v31  ;;  %v12866_v12 = vmax.f32 %v20095_v32, 0.0  ;;  %v12867_v53 = vmax.f32 %v20098_v55, 0.0  ;;  %v12868_v59 = vmax.f32 %v20101_v34, 0.0  ;;  %v12869_v30 = vmax.f32 %v20104_v45, 0.0 }
 0x518   :  { %12907 = vst [vmem:[#allocation11 + $0x20] sm:$0xff] %v12858_v58  ;;  %12908 = vst [vmem:[#allocation11 + $0x28] sm:$0xff] %v12859_v2  ;;  %v12870_v16 = vmax.f32 %v20107_v39, 0.0  ;;  %v12871_v22 = vmax.f32 %v20110_v11, 0.0  ;;  %v12872_v0 = vmax.f32 %v20113_v29, 0.0  ;;  %v12873_v49 = vmax.f32 %v20116_v28, 0.0 }
 0x519   :  { %12909 = vst [vmem:[#allocation11 + $0x30] sm:$0xff] %v12860_v17  ;;  %12910 = vst [vmem:[#allocation11 + $0x38] sm:$0xff] %v12861_v9  ;;  %v12874_v35 = vmax.f32 %v20119_v21, 0.0  ;;  %v12875_v57 = vmax.f32 %v20122_v24, 0.0  ;;  %v12876_v27 = vmax.f32 %v20125_v40, 0.0  ;;  %v12877_v13 = vmax.f32 %v20128_v44, 0.0 }
 0x51a   :  { %12911 = vst [vmem:[#allocation11 + $0x40] sm:$0xff] %v12862_v60  ;;  %12912 = vst [vmem:[#allocation11 + $0x48] sm:$0xff] %v12863_v19  ;;  %v12878_v47 = vmax.f32 %v20131_v62, 0.0  ;;  %v12879_v56 = vmax.f32 %v20134_v36, 0.0  ;;  %v12880_v10 = vmax.f32 %v20137_v38, 0.0  ;;  %v12881_v20 = vmax.f32 %v20140_v42, 0.0 }
 0x51b   :  { %12913 = vst [vmem:[#allocation11 + $0x50] sm:$0xff] %v12864_v1  ;;  %12914 = vst [vmem:[#allocation11 + $0x58] sm:$0xff] %v12865_v61  ;;  %v12882_v32 = vmax.f32 %v20143_v43, 0.0  ;;  %v12883_v55 = vmax.f32 %v20146_v33, 0.0  ;;  %v12884_v34 = vmax.f32 %v20149_v15, 0.0  ;;  %v12885_v45 = vmax.f32 %v20152_v50, 0.0 }
 0x51c   :  { %12915 = vst [vmem:[#allocation11 + $0x60] sm:$0xff] %v12866_v12  ;;  %12916 = vst [vmem:[#allocation11 + $0x68] sm:$0xff] %v12867_v53  ;;  %v12886_v39 = vmax.f32 %v20155_v25, 0.0  ;;  %v12887_v11 = vmax.f32 %v20158_v54, 0.0  ;;  %v12888_v29 = vmax.f32 %v20161_v41, 0.0  ;;  %v12889_v28 = vmax.f32 %v20164_v23, 0.0 }
 0x51d   :  { %12917 = vst [vmem:[#allocation11 + $0x70] sm:$0xff] %v12868_v59  ;;  %12918 = vst [vmem:[#allocation11 + $0x78] sm:$0xff] %v12869_v30  ;;  %v12890_v21 = vmax.f32 %v20167_v8, 0.0  ;;  %v12891_v24 = vmax.f32 %v20170_v18, 0.0  ;;  %v12892_v40 = vmax.f32 %v20173_v5, 0.0  ;;  %v12893_v44 = vmax.f32 %v20176_v14, 0.0 }
 0x51e   :  { %12919 = vst [vmem:[#allocation11 + $0x80] sm:$0xff] %v12870_v16  ;;  %12920 = vst [vmem:[#allocation11 + $0x88] sm:$0xff] %v12871_v22  ;;  %v12894_v62 = vmax.f32 %v20179_v37, 0.0  ;;  %v12895_v36 = vmax.f32 %v20182_v6, 0.0  ;;  %v12896_v38 = vmax.f32 %v20185_v26, 0.0  ;;  %v12897_v42 = vmax.f32 %v20188_v51, 0.0 }
 0x51f   :  { %12921 = vst [vmem:[#allocation11 + $0x90] sm:$0xff] %v12872_v0  ;;  %12922 = vst [vmem:[#allocation11 + $0x98] sm:$0xff] %v12873_v49  ;;  %v12898_v43 = vmax.f32 %v20191_v52, 0.0  ;;  %v12899_v33 = vmax.f32 %v20194_v3, 0.0  ;;  %v12900_v15 = vmax.f32 %v20197_v63, 0.0  ;;  %v12901_v50 = vmax.f32 %v20200_v4, 0.0 }
 0x520   :  { %12923 = vst [vmem:[#allocation11 + $0xa0] sm:$0xff] %v12874_v35  ;;  %12924 = vst [vmem:[#allocation11 + $0xa8] sm:$0xff] %v12875_v57 }
 0x521   :  { %12925 = vst [vmem:[#allocation11 + $0xb0] sm:$0xff] %v12876_v27  ;;  %12926 = vst [vmem:[#allocation11 + $0xb8] sm:$0xff] %v12877_v13 }
 0x522   :  { %12927 = vst [vmem:[#allocation11 + $0xc0] sm:$0xff] %v12878_v47  ;;  %12928 = vst [vmem:[#allocation11 + $0xc8] sm:$0xff] %v12879_v56 }
 0x523   :  { %12929 = vst [vmem:[#allocation11 + $0xd0] sm:$0xff] %v12880_v10  ;;  %12930 = vst [vmem:[#allocation11 + $0xd8] sm:$0xff] %v12881_v20 }
 0x524   :  { %12931 = vst [vmem:[#allocation11 + $0xe0] sm:$0xff] %v12882_v32  ;;  %12932 = vst [vmem:[#allocation11 + $0xe8] sm:$0xff] %v12883_v55 }
 0x525   :  { %12933 = vst [vmem:[#allocation11 + $0xf0] sm:$0xff] %v12884_v34  ;;  %12934 = vst [vmem:[#allocation11 + $0xf8] sm:$0xff] %v12885_v45 }
 0x526   :  { %12935 = vst [vmem:[#allocation11 + $0x100] sm:$0xff] %v12886_v39  ;;  %12936 = vst [vmem:[#allocation11 + $0x108] sm:$0xff] %v12887_v11 }
 0x527   :  { %12937 = vst [vmem:[#allocation11 + $0x110] sm:$0xff] %v12888_v29  ;;  %12938 = vst [vmem:[#allocation11 + $0x118] sm:$0xff] %v12889_v28 }
 0x528   :  { %12939 = vst [vmem:[#allocation11 + $0x120] sm:$0xff] %v12890_v21  ;;  %12940 = vst [vmem:[#allocation11 + $0x128] sm:$0xff] %v12891_v24 }
 0x529   :  { %12941 = vst [vmem:[#allocation11 + $0x130] sm:$0xff] %v12892_v40  ;;  %12942 = vst [vmem:[#allocation11 + $0x138] sm:$0xff] %v12893_v44 }
 0x52a   :  { %12943 = vst [vmem:[#allocation11 + $0x140] sm:$0xff] %v12894_v62  ;;  %12944 = vst [vmem:[#allocation11 + $0x148] sm:$0xff] %v12895_v36 }
 0x52b   :  { %12945 = vst [vmem:[#allocation11 + $0x150] sm:$0xff] %v12896_v38  ;;  %12946 = vst [vmem:[#allocation11 + $0x158] sm:$0xff] %v12897_v42 }
 0x52c   :  { %12947 = vst [vmem:[#allocation11 + $0x160] sm:$0xff] %v12898_v43  ;;  %12948 = vst [vmem:[#allocation11 + $0x168] sm:$0xff] %v12899_v33 }
 0x52d   :  { %12949 = vst [vmem:[#allocation11 + $0x170] sm:$0xff] %v12900_v15  ;;  %12950 = vst [vmem:[#allocation11 + $0x178] sm:$0xff] %v12901_v50 }
 0x52e   :  { %13712 = shalt.err (!%p13709_p8)
}
 0x52f   :  { %s13713_s23 = scalar_lea.hbm %s20263_s4, 6272 }
 0x530   :  { %p13714_p9 = scmp.ne.s32.totalorder %s20263_s4, %s13713_s23  ;;  %p13717_p10 = scmp.lt.u32.totalorder %s13713_s23, %s20263_s4 }
 0x532   :  { %p13719_p11 = pnand %p13717_p10, %p13714_p9 }
 0x534   :  { %13722 = shalt.err (!%p13719_p11)
}
 0x535   :  { %s13748_s26 = smov 128  }
 0x536   :  { %12963 = dma.vmem_to_hbm [thread:$0]  %s12958_s19, 6272, %s20263_s4, [#allocation5], %s13748_s26, %s13748_s26, %s13741_s14  }
 0x537   :  { %13729 = dma.done.wait [#allocation5], 6272  }
 0x538   :  { %13730 = vsyncadd [#allocation5], 4294961024 }
 0x539   :  { %12967 = vsyncpa [#allocation4], 1 }
 0x53a   :  { %12968 = vsyncpa [#allocation7], 1 }
 0x53b   :  { %12969 = vsyncpa [#allocation10], 1 }
 0x53c   :  { %12970 = vsyncpa [#allocation5], 1 }

</bundles_post_ra>
